<compile_context>
chip_gen: v6e
topology: v6e:2x2x1
jax: 0.10.0
libtpu: 0.0.40
codegen_flags: <defaults>
</compile_context>

<pallas_src>
import jax
import jax.numpy as jnp
from jax.experimental import pallas as pl
from jax.experimental.pallas import tpu as pltpu

Z_DIM = 100
H_DIM = 1200          # logical hidden width (matches nn.Linear(., 1200))
OUT_DIM = 784         # logical output width
H_PAD = 1280          # 10 x 128 lanes (also 5 x 256 for the v6e/v7x MXU)
OUT_PAD = 896         # 7 x 128 lanes (lane-dense output stores)
TB_MAX = 256          # batch tile: fills the 256-row MXU on v6e/v7x


def _round_up(x: int, m: int) -> int:
    return ((x + m - 1) // m) * m


def _generator_kernel(x_ref, w1_ref, b1_ref, w2_ref, b2_ref, w3_ref, b3_ref,
                      out_ref):
    # x_ref: (TB, IN_PAD) bf16; weights bf16 (whole-array VMEM residents),
    # biases f32; all feature dims lane-padded.
    x = x_ref[...]
    h1 = jnp.dot(x, w1_ref[...], preferred_element_type=jnp.float32) + b1_ref[...]
    h1 = jnp.maximum(h1, 0.0).astype(jnp.bfloat16)           # ReLU, bf16 for next MXU
    h2 = jnp.dot(h1, w2_ref[...], preferred_element_type=jnp.float32) + b2_ref[...]
    h2 = jnp.maximum(h2, 0.0).astype(jnp.bfloat16)           # ReLU
    h3 = jnp.dot(h2, w3_ref[...], preferred_element_type=jnp.float32) + b3_ref[...]
    out_ref[...] = jax.nn.sigmoid(h3).astype(jnp.bfloat16)   # bf16 writeback (halved bytes)


def init_params(key, nc: int):
    """Deterministic init mimicking nn.Linear default (U[-1/sqrt(fan_in), +])."""
    def linear(key, fan_in, fan_out):
        kw, kb = jax.random.split(key)
        bound = 1.0 / jnp.sqrt(fan_in)
        w = jax.random.uniform(kw, (fan_in, fan_out), jnp.float32, -bound, bound)
        b = jax.random.uniform(kb, (1, fan_out), jnp.float32, -bound, bound)
        return w, b

    k1, k2, k3 = jax.random.split(key, 3)
    w1, b1 = linear(k1, Z_DIM + nc, H_DIM)
    w2, b2 = linear(k2, H_DIM, H_DIM)
    w3, b3 = linear(k3, H_DIM, OUT_DIM)
    return (w1, b1, w2, b2, w3, b3)


def prepare_params(params, nc: int):
    """Pad feature dims to lane multiples and cast weights to bf16 (once)."""
    w1, b1, w2, b2, w3, b3 = params
    in_dim = Z_DIM + nc
    in_pad = _round_up(in_dim, 128)

    def pad_w(w, rows, cols):
        return jnp.pad(w, ((0, rows - w.shape[0]), (0, cols - w.shape[1])))

    def pad_b(b, cols):
        return jnp.pad(b, ((0, 0), (0, cols - b.shape[1])))

    w1p = pad_w(w1, in_pad, H_PAD).astype(jnp.bfloat16)
    w2p = pad_w(w2, H_PAD, H_PAD).astype(jnp.bfloat16)
    w3p = pad_w(w3, H_PAD, OUT_PAD).astype(jnp.bfloat16)
    b1p = pad_b(b1, H_PAD)       # biases stay f32 (added to f32 accumulator)
    b2p = pad_b(b2, H_PAD)
    b3p = pad_b(b3, OUT_PAD)
    return (w1p, b1p, w2p, b2p, w3p, b3p), in_pad


def generator_forward(padded_params, in_pad: int, z, y, nc: int):
    """z: (B, 100) float32, y: (B,) int32 class labels -> (B, 784) float32."""
    w1, b1, w2, b2, w3, b3 = padded_params
    B = z.shape[0]

    # Glue: one-hot + concat (matches F.one_hot(...).float() and torch.cat dim=1).
    y_oh = jax.nn.one_hot(y, nc, dtype=jnp.float32)
    x = jnp.concatenate([z, y_oh], axis=1)                   # (B, 100+nc)

    # Batch tiling: pad batch to a multiple of 16 (bf16 packs 2 rows/sublane);
    # large batches use TB_MAX-sized tiles on a parallel grid axis.
    bp16 = _round_up(B, 16)
    if bp16 <= TB_MAX:
        tb, bp = bp16, bp16
    else:
        tb = TB_MAX
        bp = _round_up(B, tb)

    # Pad batch rows and feature lanes in a single jnp.pad, cast to bf16.
    x_pad = jnp.pad(x, ((0, bp - B), (0, in_pad - x.shape[1]))).astype(jnp.bfloat16)

    # Whole-array VMEM residents: fetched once, single-buffered (no 2x weight
    # buffers, no per-step re-DMA).
    resident = lambda: pl.BlockSpec(memory_space=pltpu.MemorySpace.VMEM)

    out_pad = pl.pallas_call(
        _generator_kernel,
        out_shape=jax.ShapeDtypeStruct((bp, OUT_PAD), jnp.bfloat16),
        grid=(bp // tb,),
        in_specs=[
            pl.BlockSpec((tb, in_pad), lambda i: (i, 0)),    # batch-tiled input
            resident(), resident(),                          # w1, b1
            resident(), resident(),                          # w2, b2
            resident(), resident(),                          # w3, b3
        ],
        out_specs=pl.BlockSpec((tb, OUT_PAD), lambda i: (i, 0)),
        compiler_params=pltpu.CompilerParams(
            dimension_semantics=("parallel",),               # split batch tiles across TCs (v7x)
            vmem_limit_bytes=48 << 20,                       # fits v7x's 64 MiB physical VMEM
        ),
    )(x_pad, w1, b1, w2, b2, w3, b3)

    # Drop padded batch rows / output lanes; give the caller f32 like the module.
    return out_pad[:B, :OUT_DIM].astype(jnp.float32)


if __name__ == "__main__":
    nc = 10
    B = 2
    key = jax.random.PRNGKey(0)
    kp, kz, ky = jax.random.split(key, 3)

    params = init_params(kp, nc)
    padded_params, in_pad = prepare_params(params, nc)

    z = jax.random.normal(kz, (B, Z_DIM), jnp.float32)
    y = jax.random.randint(ky, (B,), 0, nc, jnp.int32)

    out = generator_forward(padded_params, in_pad, z, y, nc)
    out = jax.block_until_ready(out)
    assert out.shape == (B, OUT_DIM)

    # Pure-JAX reference following the same bf16-weight / f32-accumulate /
    # bf16-output path as the kernel.
    w1, b1, w2, b2, w3, b3 = params
    x_ref = jnp.concatenate([z, jax.nn.one_hot(y, nc, dtype=jnp.float32)], axis=1)
    x_bf = x_ref.astype(jnp.bfloat16)
    h = jnp.dot(x_bf, w1.astype(jnp.bfloat16),
                preferred_element_type=jnp.float32) + b1
    h = jnp.maximum(h, 0.0).astype(jnp.bfloat16)
    h = jnp.dot(h, w2.astype(jnp.bfloat16),
                preferred_element_type=jnp.float32) + b2
    h = jnp.maximum(h, 0.0).astype(jnp.bfloat16)
    ref = jax.nn.sigmoid(jnp.dot(h, w3.astype(jnp.bfloat16),
                                 preferred_element_type=jnp.float32) + b3)
    ref = ref.astype(jnp.bfloat16).astype(jnp.float32)
    assert jnp.allclose(out, ref, rtol=1e-2, atol=1e-2), "mismatch vs reference"

    print("KERNEL_OK")
</pallas_src>

<mosaic_0001>
module attributes {stable_mosaic.version = 11 : i64} {
  func.func @_generator_kernel(%arg0: i32, %arg1: memref<16x128xbf16, #tpu.memory_space<vmem>>, %arg2: memref<128x1280xbf16, #tpu.memory_space<vmem>>, %arg3: memref<1x1280xf32, #tpu.memory_space<vmem>>, %arg4: memref<1280x1280xbf16, #tpu.memory_space<vmem>>, %arg5: memref<1x1280xf32, #tpu.memory_space<vmem>>, %arg6: memref<1280x896xbf16, #tpu.memory_space<vmem>>, %arg7: memref<1x896xf32, #tpu.memory_space<vmem>>, %arg8: memref<16x896xbf16, #tpu.memory_space<vmem>>) attributes {dimension_semantics = [#tpu.dimension_semantics<parallel>], iteration_bounds = array<i64: 1>, scalar_prefetch = 0 : i64, scratch_operands = 0 : i64, tpu.core_type = #tpu.core_type<tc>, window_params = [{transform_indices = @transform_0, window_bounds = array<i64: 16, 128>}, {pipeline_mode = #tpu.pipeline_mode<synchronous>, transform_indices = @transform_1, window_bounds = array<i64: 128, 1280>}, {pipeline_mode = #tpu.pipeline_mode<synchronous>, transform_indices = @transform_2, window_bounds = array<i64: 1, 1280>}, {pipeline_mode = #tpu.pipeline_mode<synchronous>, transform_indices = @transform_3, window_bounds = array<i64: 1280, 1280>}, {pipeline_mode = #tpu.pipeline_mode<synchronous>, transform_indices = @transform_4, window_bounds = array<i64: 1, 1280>}, {pipeline_mode = #tpu.pipeline_mode<synchronous>, transform_indices = @transform_5, window_bounds = array<i64: 1280, 896>}, {pipeline_mode = #tpu.pipeline_mode<synchronous>, transform_indices = @transform_6, window_bounds = array<i64: 1, 896>}, {transform_indices = @transform_7, window_bounds = array<i64: 16, 896>}]} {
    %c0 = arith.constant 0 : index
    %c0_0 = arith.constant 0 : index
    %0 = vector.load %arg1[%c0, %c0_0] : memref<16x128xbf16, #tpu.memory_space<vmem>>, vector<16x128xbf16>
    %c0_1 = arith.constant 0 : index
    %c0_2 = arith.constant 0 : index
    %1 = vector.load %arg2[%c0_1, %c0_2] : memref<128x1280xbf16, #tpu.memory_space<vmem>>, vector<128x1280xbf16>
    %cst = arith.constant dense<0.000000e+00> : vector<16x1280xf32>
    %2 = tpu.matmul %0, %1, %cst {dimension_numbers = #tpu.dot_dimension_numbers<[1], [0], [0], [1], [0, 0, 1, 1], [], []>} : vector<16x128xbf16>, vector<128x1280xbf16>, vector<16x1280xf32> -> vector<16x1280xf32>
    %c0_3 = arith.constant 0 : index
    %c0_4 = arith.constant 0 : index
    %3 = vector.load %arg3[%c0_3, %c0_4] : memref<1x1280xf32, #tpu.memory_space<vmem>>, vector<1x1280xf32>
    %4 = vector.broadcast %3 : vector<1x1280xf32> to vector<16x1280xf32>
    %5 = arith.addf %2, %4 : vector<16x1280xf32>
    %cst_5 = arith.constant 0.000000e+00 : f32
    %6 = vector.broadcast %cst_5 : f32 to vector<16x1280xf32>
    %7 = arith.maximumf %5, %6 : vector<16x1280xf32>
    %8 = arith.truncf %7 : vector<16x1280xf32> to vector<16x1280xbf16>
    %c0_6 = arith.constant 0 : index
    %c0_7 = arith.constant 0 : index
    %9 = vector.load %arg4[%c0_6, %c0_7] : memref<1280x1280xbf16, #tpu.memory_space<vmem>>, vector<1280x1280xbf16>
    %cst_8 = arith.constant dense<0.000000e+00> : vector<16x1280xf32>
    %10 = tpu.matmul %8, %9, %cst_8 {dimension_numbers = #tpu.dot_dimension_numbers<[1], [0], [0], [1], [0, 0, 1, 1], [], []>} : vector<16x1280xbf16>, vector<1280x1280xbf16>, vector<16x1280xf32> -> vector<16x1280xf32>
    %c0_9 = arith.constant 0 : index
    %c0_10 = arith.constant 0 : index
    %11 = vector.load %arg5[%c0_9, %c0_10] : memref<1x1280xf32, #tpu.memory_space<vmem>>, vector<1x1280xf32>
    %12 = vector.broadcast %11 : vector<1x1280xf32> to vector<16x1280xf32>
    %13 = arith.addf %10, %12 : vector<16x1280xf32>
    %cst_11 = arith.constant 0.000000e+00 : f32
    %14 = vector.broadcast %cst_11 : f32 to vector<16x1280xf32>
    %15 = arith.maximumf %13, %14 : vector<16x1280xf32>
    %16 = arith.truncf %15 : vector<16x1280xf32> to vector<16x1280xbf16>
    %c0_12 = arith.constant 0 : index
    %c0_13 = arith.constant 0 : index
    %17 = vector.load %arg6[%c0_12, %c0_13] : memref<1280x896xbf16, #tpu.memory_space<vmem>>, vector<1280x896xbf16>
    %cst_14 = arith.constant dense<0.000000e+00> : vector<16x896xf32>
    %18 = tpu.matmul %16, %17, %cst_14 {dimension_numbers = #tpu.dot_dimension_numbers<[1], [0], [0], [1], [0, 0, 1, 1], [], []>} : vector<16x1280xbf16>, vector<1280x896xbf16>, vector<16x896xf32> -> vector<16x896xf32>
    %c0_15 = arith.constant 0 : index
    %c0_16 = arith.constant 0 : index
    %19 = vector.load %arg7[%c0_15, %c0_16] : memref<1x896xf32, #tpu.memory_space<vmem>>, vector<1x896xf32>
    %20 = vector.broadcast %19 : vector<1x896xf32> to vector<16x896xf32>
    %21 = arith.addf %18, %20 : vector<16x896xf32>
    %22 = arith.negf %21 : vector<16x896xf32>
    %23 = math.exp %22 : vector<16x896xf32>
    %cst_17 = arith.constant 1.000000e+00 : f32
    %24 = vector.broadcast %cst_17 : f32 to vector<16x896xf32>
    %25 = arith.addf %24, %23 : vector<16x896xf32>
    %26 = arith.divf %24, %25 : vector<16x896xf32>
    %27 = arith.truncf %26 : vector<16x896xf32> to vector<16x896xbf16>
    %c0_18 = arith.constant 0 : index
    %c0_19 = arith.constant 0 : index
    %28 = vector.load %arg8[%c0_18, %c0_19] : memref<16x896xbf16, #tpu.memory_space<vmem>>, vector<16x896xbf16>
    tpu.vector_store %arg8[%c0_18, %c0_19], %27 {strides = array<i32>} : memref<16x896xbf16, #tpu.memory_space<vmem>>, vector<16x896xbf16>,
    return
  }
  func.func @transform_0(%arg0: i32) -> (i32, i32) {
    %c0_i32 = arith.constant 0 : i32
    %c0_i32_0 = arith.constant 0 : i32
    return %arg0, %c0_i32 : i32, i32
  }
  func.func @transform_1(%arg0: i32) -> (i32, i32) {
    %c0_i32 = arith.constant 0 : i32
    %c0_i32_0 = arith.constant 0 : i32
    %c0_i32_1 = arith.constant 0 : i32
    return %c0_i32, %c0_i32_0 : i32, i32
  }
  func.func @transform_2(%arg0: i32) -> (i32, i32) {
    %c0_i32 = arith.constant 0 : i32
    %c0_i32_0 = arith.constant 0 : i32
    %c0_i32_1 = arith.constant 0 : i32
    return %c0_i32, %c0_i32_0 : i32, i32
  }
  func.func @transform_3(%arg0: i32) -> (i32, i32) {
    %c0_i32 = arith.constant 0 : i32
    %c0_i32_0 = arith.constant 0 : i32
    %c0_i32_1 = arith.constant 0 : i32
    return %c0_i32, %c0_i32_0 : i32, i32
  }
  func.func @transform_4(%arg0: i32) -> (i32, i32) {
    %c0_i32 = arith.constant 0 : i32
    %c0_i32_0 = arith.constant 0 : i32
    %c0_i32_1 = arith.constant 0 : i32
    return %c0_i32, %c0_i32_0 : i32, i32
  }
  func.func @transform_5(%arg0: i32) -> (i32, i32) {
    %c0_i32 = arith.constant 0 : i32
    %c0_i32_0 = arith.constant 0 : i32
    %c0_i32_1 = arith.constant 0 : i32
    return %c0_i32, %c0_i32_0 : i32, i32
  }
  func.func @transform_6(%arg0: i32) -> (i32, i32) {
    %c0_i32 = arith.constant 0 : i32
    %c0_i32_0 = arith.constant 0 : i32
    %c0_i32_1 = arith.constant 0 : i32
    return %c0_i32, %c0_i32_0 : i32, i32
  }
  func.func @transform_7(%arg0: i32) -> (i32, i32) {
    %c0_i32 = arith.constant 0 : i32
    %c0_i32_0 = arith.constant 0 : i32
    return %arg0, %c0_i32 : i32, i32
  }
}

</mosaic_0001>

<bundles_post_ra>
// kernel: tpu_custom_call.1
= control target key start
LH: loop header
LB: loop body
LE: loop exit
PB: predicated region body
PF: predicated region fallthrough
CT: control target
= control target key end

     0   :  { %12 = vsyncpa [#allocation3], 0  ;;  %s15859_s0 = inlined_call_operand.hbm [shape: bf16[16,128], index: 0, kind: input, shape index: {}]   ;;  %s15860_s1 = inlined_call_operand.hbm [shape: bf16[128,1280], index: 1, kind: input, shape index: {}]   ;;  %s15861_s2 = inlined_call_operand.hbm [shape: f32[1,1280], index: 2, kind: input, shape index: {}]   ;;  %s15862_s3 = inlined_call_operand.hbm [shape: bf16[1280,1280], index: 3, kind: input, shape index: {}]   ;;  %s15863_s4 = inlined_call_operand.hbm [shape: f32[1,1280], index: 4, kind: input, shape index: {}]   ;;  %s15864_s5 = inlined_call_operand.hbm [shape: bf16[1280,896], index: 5, kind: input, shape index: {}]   ;;  %s15865_s6 = inlined_call_operand.hbm [shape: f32[1,896], index: 6, kind: input, shape index: {}]   ;;  %s15866_s7 = inlined_call_operand.hbm [shape: bf16[16,896], index: 7, kind: output, shape index: {}]  }
   0x1   :  { %13 = vsyncpa [#allocation6], 0 }
   0x2   :  { %14 = vsyncpa [#allocation9], 0 }
   0x3   :  { %15 = vsyncpa [#allocation12], 0 }
   0x4   :  { %16 = vsyncpa [#allocation4], 0  ;;  %s15373_s24 = smov [#allocation5]  }
   0x5   :  { %s34_s25 = sshll.u32 %s15373_s24, 4  ;;  %s35_s25 = int_to_ptr.vmem [resolvable:$true] %s34_s25 }
   0x6   :  { %s15211_s26 = scalar_lea.vmem %s35_s25, 10240  ;;  %p15216_p1 = scmp.lt.s32.totalorder %s35_s25, %s35_s25 }
   0x7   :  { %p15212_p0 = scmp.ne.s32.totalorder %s35_s25, %s15211_s26  ;;  %p15217_p2 = scmp.lt.s32.totalorder %s15211_s26, %s15211_s26 }
   0x9   :  { %p15218_p3 = por %p15217_p2, %p15216_p1 }
   0xb   :  { %p15219_p4 = pnand %p15218_p3, %p15212_p0 }
   0xd   :  { %15222 = shalt.err (!%p15219_p4)
}
   0xe   :  { %s15374_s27 = smov 640   ;;  %s15375_s28 = smov 40  }
   0xf   :  { %40 = dma.hbm_to_vmem [thread:$0]  %s15860_s1, 10240, %s35_s25, [#allocation6], %s15374_s27, %s15374_s27, %s15375_s28  }
  0x10   :  { %s15376_s8 = smov [#allocation8]   ;;  %s15377_s10 = smov [#allocation11]  }
  0x11   :  { %s56_s9 = sshll.u32 %s15376_s8, 4  ;;  %s78_s11 = sshll.u32 %s15377_s10, 4  ;;  %s57_s9 = int_to_ptr.vmem [resolvable:$true] %s56_s9  ;;  %s79_s11 = int_to_ptr.vmem [resolvable:$true] %s78_s11 }
  0x12   :  { %s15231_s12 = scalar_lea.vmem %s57_s9, 102400  ;;  %p15236_p6 = scmp.lt.s32.totalorder %s57_s9, %s57_s9 }
  0x13   :  { %p15232_p5 = scmp.ne.s32.totalorder %s57_s9, %s15231_s12  ;;  %p15237_p7 = scmp.lt.s32.totalorder %s15231_s12, %s15231_s12 }
  0x15   :  { %p15238_p8 = por %p15237_p7, %p15236_p6 }
  0x17   :  { %p15239_p9 = pnand %p15238_p8, %p15232_p5 }
  0x19   :  { %15242 = shalt.err (!%p15239_p9)
}
  0x1a   :  { %62 = dma.hbm_to_vmem [thread:$0]  %s15862_s3, 102400, %s57_s9, [#allocation9], %s15374_s27, %s15374_s27, %s15375_s28  }
  0x1b   :  { %s15251_s15 = scalar_lea.vmem %s79_s11, 71680  ;;  %p15256_p11 = scmp.lt.s32.totalorder %s79_s11, %s79_s11 }
  0x1c   :  { %p15252_p10 = scmp.ne.s32.totalorder %s79_s11, %s15251_s15  ;;  %p15257_p12 = scmp.lt.s32.totalorder %s15251_s15, %s15251_s15 }
  0x1e   :  { %p15258_p13 = por %p15257_p12, %p15256_p11 }
  0x20   :  { %p15259_p0 = pnand %p15258_p13, %p15252_p10 }
  0x22   :  { %15262 = shalt.err (!%p15259_p0)
}
  0x23   :  { %s15378_s1 = smov 448   ;;  %s15379_s16 = smov 28  }
  0x24   :  { %84 = dma.hbm_to_vmem [thread:$0]  %s15864_s5, 71680, %s79_s11, [#allocation12], %s15378_s1, %s15378_s1, %s15379_s16  }
  0x25   :  { %s15380_s19 = smov [#allocation2]  }
  0x26   :  { %s22_s20 = sshll.u32 %s15380_s19, 4  ;;  %s23_s20 = int_to_ptr.vmem [resolvable:$true] %s22_s20 }
  0x27   :  { %s15271_s3 = scalar_lea.vmem %s23_s20, 128  ;;  %p15276_p2 = scmp.lt.s32.totalorder %s23_s20, %s23_s20 }
  0x28   :  { %p15272_p1 = scmp.ne.s32.totalorder %s23_s20, %s15271_s3  ;;  %p15277_p3 = scmp.lt.s32.totalorder %s15271_s3, %s15271_s3 }
  0x2a   :  { %p15278_p4 = por %p15277_p3, %p15276_p2 }
  0x2c   :  { %p15279_p5 = pnand %p15278_p4, %p15272_p1 }
  0x2e   :  { %15282 = shalt.err (!%p15279_p5)
}
  0x2f   :  { %s15381_s21 = smov 64   ;;  %s15382_s22 = smov 4  }
  0x30   :  { %28 = dma.hbm_to_vmem [thread:$0]  %s15859_s0, 128, %s23_s20, [#allocation3], %s15381_s21, %s15381_s21, %s15382_s22  }
  0x31   :  { %s15383_s25 = smov [#allocation7]   ;;  %s15384_s27 = smov [#allocation10]  }
  0x32   :  { %s47_s26 = sshll.u32 %s15383_s25, 4  ;;  %s69_s5 = sshll.u32 %s15384_s27, 4  ;;  %s48_s26 = int_to_ptr.vmem [resolvable:$true] %s47_s26  ;;  %s70_s5 = int_to_ptr.vmem [resolvable:$true] %s69_s5 }
  0x33   :  { %s15291_s28 = scalar_lea.vmem %s48_s26, 160  ;;  %p15296_p7 = scmp.lt.s32.totalorder %s48_s26, %s48_s26 }
  0x34   :  { %p15292_p6 = scmp.ne.s32.totalorder %s48_s26, %s15291_s28  ;;  %p15297_p8 = scmp.lt.s32.totalorder %s15291_s28, %s15291_s28 }
  0x36   :  { %p15298_p9 = por %p15297_p8, %p15296_p7 }
  0x38   :  { %p15299_p10 = pnand %p15298_p9, %p15292_p6 }
  0x3a   :  { %15302 = shalt.err (!%p15299_p10)
}
  0x3b   :  { %50 = dma.hbm_to_vmem [thread:$0]  %s15861_s2, 160, %s48_s26, [#allocation6]  }
  0x3c   :  { %s15311_s8 = scalar_lea.vmem %s70_s5, 160  ;;  %p15316_p12 = scmp.lt.s32.totalorder %s70_s5, %s70_s5 }
  0x3d   :  { %p15312_p11 = scmp.ne.s32.totalorder %s70_s5, %s15311_s8  ;;  %p15317_p13 = scmp.lt.s32.totalorder %s15311_s8, %s15311_s8 }
  0x3f   :  { %p15318_p0 = por %p15317_p13, %p15316_p12 }
  0x41   :  { %p15319_p1 = pnand %p15318_p0, %p15312_p11 }
  0x43   :  { %15322 = shalt.err (!%p15319_p1)
}
  0x44   :  { %72 = dma.hbm_to_vmem [thread:$0]  %s15863_s4, 160, %s70_s5, [#allocation9]  }
  0x45   :  { %s15385_s10 = smov [#allocation13]  }
  0x46   :  { %s91_s11 = sshll.u32 %s15385_s10, 4  ;;  %s92_s11 = int_to_ptr.vmem [resolvable:$true] %s91_s11 }
  0x47   :  { %s15331_s12 = scalar_lea.vmem %s92_s11, 112  ;;  %s15335_s13 = scalar_lea.vmem %s92_s11, 128 }
  0x48   :  { %p15332_p2 = scmp.ne.s32.totalorder %s92_s11, %s15331_s12  ;;  %p15336_p3 = scmp.lt.s32.totalorder %s92_s11, %s92_s11 }
  0x49   :  { %p15337_p4 = scmp.lt.s32.totalorder %s15335_s13, %s15331_s12 }
  0x4b   :  { %p15338_p5 = por %p15337_p4, %p15336_p3 }
  0x4d   :  { %p15339_p6 = pnand %p15338_p5, %p15332_p2 }
  0x4f   :  { %15342 = shalt.err (!%p15339_p6)
}
  0x50   :  { %94 = dma.hbm_to_vmem [thread:$0]  %s15865_s6, 112, %s92_s11, [#allocation12]  }
  0x51   :  { %15363 = dma.done.wait [#allocation3], 128  }
  0x52   :  { %15364 = vsyncadd [#allocation3], 4294967168 }
  0x53   :  { %15365 = dma.done.wait [#allocation6], 10400  }
  0x54   :  { %15366 = vsyncadd [#allocation6], 4294956896 }
  0x55   :  { %15367 = dma.done.wait [#allocation9], 102560  }
  0x56   :  { %15368 = vsyncadd [#allocation9], 4294864736 }
  0x57   :  { %15369 = dma.done.wait [#allocation12], 71792  }
  0x58   :  { %15370 = vsyncadd [#allocation12], 4294895504  ;;  %v15386_v0 = vmov 0   ;;  %v13022_v1 = vld [vmem:[#allocation5 + $0x234] ss:$40 sps:$4 sm:$0xff]   ;;  %s15387_s4 = smov [#allocation14]  }
  0x59   :  { %691 = vmatprep.mubr.bf16.mxu0 %v15386_v0  ;;  %734 = vmatprep.mubr.bf16.mxu1 %v15386_v0  ;;  %v13024_v2 = vld [vmem:[#allocation5 + $0x23c] ss:$40 sps:$4 sm:$0xff]   ;;  %v13026_v3 = vld [vmem:[#allocation5 + $0x230] ss:$40 sps:$4 sm:$0xff]   ;;  %v13030_v6 = vld [vmem:[#allocation5 + $0x1ec] ss:$40 sps:$4 sm:$0xff]  }
  0x5a   :  { %659 = vmatprep.subr.bf16.mxu0 %v13022_v1  ;;  %v13027_v4 = vld [vmem:[#allocation5 + $0x238] ss:$40 sps:$4 sm:$0xff]   ;;  %702 = vmatprep.subr.bf16.mxu1 %v13024_v2  ;;  %v13028_v5 = vld [vmem:[#allocation5 + $0x1e4] ss:$40 sps:$4 sm:$0xff]   ;;  %v13033_v8 = vld [vmem:[#allocation5 + $0x1e8] ss:$40 sps:$4 sm:$0xff]  }
  0x5b   :  { %660 = vmatpush1.bf16.msra.mxu0 %v13026_v3  ;;  %703 = vmatpush1.bf16.msra.mxu1 %v13027_v4  ;;  %v13032_v7 = vld [vmem:[#allocation5 + $0x1e0] ss:$40 sps:$4 sm:$0xff]   ;;  %v13034_v9 = vld [vmem:[#allocation5 + $0x194] ss:$40 sps:$4 sm:$0xff]   ;;  %v13038_v11 = vld [vmem:[#allocation5 + $0x190] ss:$40 sps:$4 sm:$0xff]  }
  0x5c   :  { %661 = vmatprep.subr.bf16.mxu0 %v13028_v5  ;;  %704 = vmatprep.subr.bf16.mxu1 %v13030_v6  ;;  %v13036_v10 = vld [vmem:[#allocation5 + $0x19c] ss:$40 sps:$4 sm:$0xff]   ;;  %v13039_v12 = vld [vmem:[#allocation5 + $0x198] ss:$40 sps:$4 sm:$0xff]   ;;  %v13042_v14 = vld [vmem:[#allocation5 + $0x14c] ss:$40 sps:$4 sm:$0xff]  }
  0x5d   :  { %v13040_v13 = vld [vmem:[#allocation5 + $0x144] ss:$40 sps:$4 sm:$0xff]   ;;  %v13044_v15 = vld [vmem:[#allocation5 + $0x140] ss:$40 sps:$4 sm:$0xff]   ;;  %v13046_v17 = vld [vmem:[#allocation5 + $0xf4] ss:$40 sps:$4 sm:$0xff]  }
  0x5e   :  { %v13045_v16 = vld [vmem:[#allocation5 + $0x148] ss:$40 sps:$4 sm:$0xff]   ;;  %v13048_v18 = vld [vmem:[#allocation5 + $0xfc] ss:$40 sps:$4 sm:$0xff]   ;;  %v13051_v20 = vld [vmem:[#allocation5 + $0xf8] ss:$40 sps:$4 sm:$0xff]  }
  0x5f   :  { %662 = vmatpush1.bf16.msra.mxu0 %v13032_v7  ;;  %705 = vmatpush1.bf16.msra.mxu1 %v13033_v8  ;;  %v13050_v19 = vld [vmem:[#allocation5 + $0xf0] ss:$40 sps:$4 sm:$0xff]   ;;  %v13052_v21 = vld [vmem:[#allocation5 + $0xa4] ss:$40 sps:$4 sm:$0xff]   ;;  %v13056_v23 = vld [vmem:[#allocation5 + $0xa0] ss:$40 sps:$4 sm:$0xff]  }
  0x60   :  { %663 = vmatprep.subr.bf16.mxu0 %v13034_v9  ;;  %706 = vmatprep.subr.bf16.mxu1 %v13036_v10  ;;  %v13054_v22 = vld [vmem:[#allocation5 + $0xac] ss:$40 sps:$4 sm:$0xff]   ;;  %v13057_v24 = vld [vmem:[#allocation5 + $0xa8] ss:$40 sps:$4 sm:$0xff]   ;;  %v13060_v26 = vld [vmem:[#allocation5 + $0x5c] ss:$40 sps:$4 sm:$0xff]  }
  0x61   :  { %v13058_v25 = vld [vmem:[#allocation5 + $0x54] ss:$40 sps:$4 sm:$0xff]   ;;  %v13062_v27 = vld [vmem:[#allocation5 + $0x50] ss:$40 sps:$4 sm:$0xff]   ;;  %v13064_v29 = vld [vmem:[#allocation5 + $0x4] ss:$40 sps:$4 sm:$0xff]  }
  0x62   :  { %v13063_v28 = vld [vmem:[#allocation5 + $0x58] ss:$40 sps:$4 sm:$0xff]   ;;  %v13066_v30 = vld [vmem:[#allocation5 + $0xc] ss:$40 sps:$4 sm:$0xff]   ;;  %v13069_v32 = vld [vmem:[#allocation5 + $0x8] ss:$40 sps:$4 sm:$0xff]  }
  0x63   :  { %664 = vmatpush1.bf16.msra.mxu0 %v13038_v11  ;;  %707 = vmatpush1.bf16.msra.mxu1 %v13039_v12  ;;  %v13068_v31 = vld [vmem:[#allocation5] ss:$40 sps:$4 sm:$0xff]   ;;  %v13073_v33 = vld [vmem:[#allocation5 + $0x244] ss:$40 sps:$4 sm:$0xff]   ;;  %v15454_v35 = vld [vmem:[#allocation2] sm:$0xff]   ;;  %s11411_s6 = sshll.u32 %s15387_s4, 4  ;;  %s11412_s6 = int_to_ptr.vmem [resolvable:$true] %s11411_s6 }
  0x64   :  { %665 = vmatprep.subr.bf16.mxu0 %v13040_v13  ;;  %708 = vmatprep.subr.bf16.mxu1 %v13042_v14  ;;  %v13079_v34 = vld [vmem:[#allocation5 + $0x24c] ss:$40 sps:$4 sm:$0xff]   ;;  %v13071_v36 = vld [vmem:[#allocation5 + $0x240] ss:$40 sps:$4 sm:$0xff]   ;;  %v13085_v39 = vld [vmem:[#allocation5 + $0x1fc] ss:$40 sps:$4 sm:$0xff]   ;;  %p15348_p8 = scmp.lt.s32.totalorder %s11412_s6, %s11412_s6 }
  0x65   :  { %v13076_v37 = vld [vmem:[#allocation5 + $0x1f4] ss:$40 sps:$4 sm:$0xff]   ;;  %v13077_v38 = vld [vmem:[#allocation5 + $0x248] ss:$40 sps:$4 sm:$0xff]   ;;  %v13082_v41 = vld [vmem:[#allocation5 + $0x1a4] ss:$40 sps:$4 sm:$0xff]  }
  0x66   :  { %v13074_v40 = vld [vmem:[#allocation5 + $0x1f0] ss:$40 sps:$4 sm:$0xff]   ;;  %v13091_v43 = vld [vmem:[#allocation5 + $0x1ac] ss:$40 sps:$4 sm:$0xff]   ;;  %v13080_v44 = vld [vmem:[#allocation5 + $0x1a0] ss:$40 sps:$4 sm:$0xff]  }
  0x67   :  { %666 = vmatpush1.bf16.msra.mxu0 %v13044_v15  ;;  %709 = vmatpush1.bf16.msra.mxu1 %v13045_v16  ;;  %v13083_v42 = vld [vmem:[#allocation5 + $0x1f8] ss:$40 sps:$4 sm:$0xff]   ;;  %v13088_v45 = vld [vmem:[#allocation5 + $0x154] ss:$40 sps:$4 sm:$0xff]   ;;  %v13089_v46 = vld [vmem:[#allocation5 + $0x1a8] ss:$40 sps:$4 sm:$0xff]  }
  0x68   :  { %667 = vmatprep.subr.bf16.mxu0 %v13046_v17  ;;  %710 = vmatprep.subr.bf16.mxu1 %v13048_v18  ;;  %v13097_v47 = vld [vmem:[#allocation5 + $0x15c] ss:$40 sps:$4 sm:$0xff]   ;;  %v13086_v48 = vld [vmem:[#allocation5 + $0x150] ss:$40 sps:$4 sm:$0xff]   ;;  %v13103_v51 = vld [vmem:[#allocation5 + $0x10c] ss:$40 sps:$4 sm:$0xff]  }
  0x69   :  { %v13094_v49 = vld [vmem:[#allocation5 + $0x104] ss:$40 sps:$4 sm:$0xff]   ;;  %v13095_v50 = vld [vmem:[#allocation5 + $0x158] ss:$40 sps:$4 sm:$0xff]   ;;  %v13100_v53 = vld [vmem:[#allocation5 + $0xb4] ss:$40 sps:$4 sm:$0xff]  }
  0x6a   :  { %v13092_v52 = vld [vmem:[#allocation5 + $0x100] ss:$40 sps:$4 sm:$0xff]   ;;  %v13109_v55 = vld [vmem:[#allocation5 + $0xbc] ss:$40 sps:$4 sm:$0xff]   ;;  %v13098_v56 = vld [vmem:[#allocation5 + $0xb0] ss:$40 sps:$4 sm:$0xff]  }
  0x6b   :  { %668 = vmatpush1.bf16.msra.mxu0 %v13050_v19  ;;  %711 = vmatpush1.bf16.msra.mxu1 %v13051_v20  ;;  %v13101_v54 = vld [vmem:[#allocation5 + $0x108] ss:$40 sps:$4 sm:$0xff]   ;;  %v13106_v57 = vld [vmem:[#allocation5 + $0x64] ss:$40 sps:$4 sm:$0xff]   ;;  %v13107_v58 = vld [vmem:[#allocation5 + $0xb8] ss:$40 sps:$4 sm:$0xff]  }
  0x6c   :  { %669 = vmatprep.subr.bf16.mxu0 %v13052_v21  ;;  %712 = vmatprep.subr.bf16.mxu1 %v13054_v22  ;;  %v13115_v59 = vld [vmem:[#allocation5 + $0x6c] ss:$40 sps:$4 sm:$0xff]   ;;  %v13104_v60 = vld [vmem:[#allocation5 + $0x60] ss:$40 sps:$4 sm:$0xff]   ;;  %v13118_v63 = vld [vmem:[#allocation5 + $0x1c] ss:$40 sps:$4 sm:$0xff]  }
  0x6d   :  { %v13112_v61 = vld [vmem:[#allocation5 + $0x14] ss:$40 sps:$4 sm:$0xff]   ;;  %v13113_v62 = vld [vmem:[#allocation5 + $0x68] ss:$40 sps:$4 sm:$0xff]   ;;  %v13116_v2 = vld [vmem:[#allocation5 + $0x18] ss:$40 sps:$4 sm:$0xff]  }
  0x6e   :  { %v13110_v1 = vld [vmem:[#allocation5 + $0x10] ss:$40 sps:$4 sm:$0xff]   ;;  %v13121_v3 = vld [vmem:[#allocation5 + $0x254] ss:$40 sps:$4 sm:$0xff]   ;;  %v13124_v6 = vld [vmem:[#allocation5 + $0x204] ss:$40 sps:$4 sm:$0xff]  }
  0x6f   :  { %670 = vmatpush1.bf16.msra.mxu0 %v13056_v23  ;;  %713 = vmatpush1.bf16.msra.mxu1 %v13057_v24  ;;  %v13145_v4 = vld [vmem:[#allocation8 + $0x234] ss:$40 sps:$4 sm:$0xff]   ;;  %v13119_v5 = vld [vmem:[#allocation5 + $0x250] ss:$40 sps:$4 sm:$0xff]   ;;  %s15343_s15 = scalar_lea.vmem %s11412_s6, 896 }
  0x70   :  { %671 = vmatprep.subr.bf16.mxu0 %v13058_v25  ;;  %714 = vmatprep.subr.bf16.mxu1 %v13060_v26  ;;  %v13143_v7 = vld [vmem:[#allocation8 + $0x230] ss:$40 sps:$4 sm:$0xff]   ;;  %v13151_v8 = vld [vmem:[#allocation8 + $0x1e4] ss:$40 sps:$4 sm:$0xff]   ;;  %v13149_v11 = vld [vmem:[#allocation8 + $0x1e0] ss:$40 sps:$4 sm:$0xff]   ;;  %p15344_p7 = scmp.ne.s32.totalorder %s11412_s6, %s15343_s15  ;;  %p15349_p9 = scmp.lt.s32.totalorder %s15343_s15, %s15343_s15 }
  0x71   :  { %v13122_v9 = vld [vmem:[#allocation5 + $0x200] ss:$40 sps:$4 sm:$0xff]   ;;  %v13127_v10 = vld [vmem:[#allocation5 + $0x1b4] ss:$40 sps:$4 sm:$0xff]   ;;  %v13125_v13 = vld [vmem:[#allocation5 + $0x1b0] ss:$40 sps:$4 sm:$0xff]  }
  0x72   :  { %v13157_v12 = vld [vmem:[#allocation8 + $0x194] ss:$40 sps:$4 sm:$0xff]   ;;  %v13155_v15 = vld [vmem:[#allocation8 + $0x190] ss:$40 sps:$4 sm:$0xff]   ;;  %v13163_v16 = vld [vmem:[#allocation8 + $0x144] ss:$40 sps:$4 sm:$0xff]   ;;  %p15350_p10 = por %p15349_p9, %p15348_p8 }
  0x73   :  { %672 = vmatpush1.bf16.msra.mxu0 %v13062_v27  ;;  %715 = vmatpush1.bf16.msra.mxu1 %v13063_v28  ;;  %v13130_v14 = vld [vmem:[#allocation5 + $0x164] ss:$40 sps:$4 sm:$0xff]   ;;  %v13128_v17 = vld [vmem:[#allocation5 + $0x160] ss:$40 sps:$4 sm:$0xff]   ;;  %v13133_v18 = vld [vmem:[#allocation5 + $0x114] ss:$40 sps:$4 sm:$0xff]  }
  0x74   :  { %673 = vmatprep.subr.bf16.mxu0 %v13064_v29  ;;  %716 = vmatprep.subr.bf16.mxu1 %v13066_v30  ;;  %v13161_v19 = vld [vmem:[#allocation8 + $0x140] ss:$40 sps:$4 sm:$0xff]   ;;  %v13167_v22 = vld [vmem:[#allocation8 + $0xf0] ss:$40 sps:$4 sm:$0xff]   ;;  %v13175_v23 = vld [vmem:[#allocation8 + $0xa4] ss:$40 sps:$4 sm:$0xff]   ;;  %p15351_p11 = pnand %p15350_p10, %p15344_p7 }
  0x75   :  { %v13131_v20 = vld [vmem:[#allocation5 + $0x110] ss:$40 sps:$4 sm:$0xff]   ;;  %v13136_v21 = vld [vmem:[#allocation5 + $0xc4] ss:$40 sps:$4 sm:$0xff]   ;;  %v13134_v24 = vld [vmem:[#allocation5 + $0xc0] ss:$40 sps:$4 sm:$0xff]  }
  0x76   :  { %v13139_v25 = vld [vmem:[#allocation5 + $0x74] ss:$40 sps:$4 sm:$0xff]   ;;  %v13137_v28 = vld [vmem:[#allocation5 + $0x70] ss:$40 sps:$4 sm:$0xff]   ;;  %v13142_v29 = vld [vmem:[#allocation5 + $0x24] ss:$40 sps:$4 sm:$0xff]  }
  0x77   :  { %674 = vmatpush1.bf16.msra.mxu0 %v13068_v31  ;;  %717 = vmatpush1.bf16.msra.mxu1 %v13069_v32  ;;  %v13173_v26 = vld [vmem:[#allocation8 + $0xa0] ss:$40 sps:$4 sm:$0xff]   ;;  %v13181_v27 = vld [vmem:[#allocation8 + $0x54] ss:$40 sps:$4 sm:$0xff]   ;;  %v13179_v30 = vld [vmem:[#allocation8 + $0x50] ss:$40 sps:$4 sm:$0xff]  }
  0x78   :  { %745 = vmatprep.subr.bf16.mxu0 %v13073_v33  ;;  %788 = vmatprep.subr.bf16.mxu1 %v13079_v34  ;;  %v13187_v31 = vld [vmem:[#allocation8 + $0x4] ss:$40 sps:$4 sm:$0xff]   ;;  %v13140_v32 = vld [vmem:[#allocation5 + $0x20] ss:$40 sps:$4 sm:$0xff]  }
  0x79   :  { %v13148_v33 = vld [vmem:[#allocation8 + $0x734] ss:$40 sps:$4 sm:$0xff]   ;;  %v13185_v34 = vld [vmem:[#allocation8] ss:$40 sps:$4 sm:$0xff]  }
  0x7a   :  { %692 = vmatmul.mubr.bf16.vlgmr.msra.gmra.mxu0 %v15454_v35  ;;  %735 = vmatmul.mubr.bf16.vlgmr.msra.gmra.mxu1 %v15454_v35 }
  0x7b   :  { %746 = vmatpush1.bf16.msra.mxu0 %v13071_v36  ;;  %789 = vmatpush1.bf16.msra.mxu1 %v13077_v38  ;;  %v13193_v36 = vld [vmem:[#allocation8 + $0x4b4] ss:$40 sps:$4 sm:$0xff]   ;;  %v13154_v38 = vld [vmem:[#allocation8 + $0x6e4] ss:$40 sps:$4 sm:$0xff]  }
  0x7c   :  { %747 = vmatprep.subr.bf16.mxu0 %v13076_v37  ;;  %790 = vmatprep.subr.bf16.mxu1 %v13085_v39  ;;  %v13146_v37 = vld [vmem:[#allocation8 + $0x730] ss:$40 sps:$4 sm:$0xff]  }
  0x7d   :  { %777 = vmatprep.mubr.bf16.mxu0 %v15386_v0  ;;  %820 = vmatprep.mubr.bf16.mxu1 %v15386_v0  ;;  %v13191_v39 = vld [vmem:[#allocation8 + $0x4b0] ss:$40 sps:$4 sm:$0xff]  }
  0x7f   :  { %748 = vmatpush1.bf16.msra.mxu0 %v13074_v40  ;;  %791 = vmatpush1.bf16.msra.mxu1 %v13083_v42  ;;  %v13152_v40 = vld [vmem:[#allocation8 + $0x6e0] ss:$40 sps:$4 sm:$0xff]   ;;  %v13160_v42 = vld [vmem:[#allocation8 + $0x694] ss:$40 sps:$4 sm:$0xff]  }
  0x80   :  { %749 = vmatprep.subr.bf16.mxu0 %v13082_v41  ;;  %792 = vmatprep.subr.bf16.mxu1 %v13091_v43  ;;  %v13199_v41 = vld [vmem:[#allocation8 + $0x464] ss:$40 sps:$4 sm:$0xff]   ;;  %v13197_v43 = vld [vmem:[#allocation8 + $0x460] ss:$40 sps:$4 sm:$0xff]  }
  0x83   :  { %750 = vmatpush1.bf16.msra.mxu0 %v13080_v44  ;;  %793 = vmatpush1.bf16.msra.mxu1 %v13089_v46  ;;  %v13158_v44 = vld [vmem:[#allocation8 + $0x690] ss:$40 sps:$4 sm:$0xff]   ;;  %v13166_v46 = vld [vmem:[#allocation8 + $0x644] ss:$40 sps:$4 sm:$0xff]  }
  0x84   :  { %751 = vmatprep.subr.bf16.mxu0 %v13088_v45  ;;  %794 = vmatprep.subr.bf16.mxu1 %v13097_v47  ;;  %v13205_v45 = vld [vmem:[#allocation8 + $0x414] ss:$40 sps:$4 sm:$0xff]   ;;  %v13203_v47 = vld [vmem:[#allocation8 + $0x410] ss:$40 sps:$4 sm:$0xff]  }
  0x87   :  { %752 = vmatpush1.bf16.msra.mxu0 %v13086_v48  ;;  %795 = vmatpush1.bf16.msra.mxu1 %v13095_v50  ;;  %v13164_v48 = vld [vmem:[#allocation8 + $0x640] ss:$40 sps:$4 sm:$0xff]   ;;  %v13172_v50 = vld [vmem:[#allocation8 + $0x5f4] ss:$40 sps:$4 sm:$0xff]  }
  0x88   :  { %753 = vmatprep.subr.bf16.mxu0 %v13094_v49  ;;  %796 = vmatprep.subr.bf16.mxu1 %v13103_v51  ;;  %v13211_v49 = vld [vmem:[#allocation8 + $0x3c4] ss:$40 sps:$4 sm:$0xff]   ;;  %v13209_v51 = vld [vmem:[#allocation8 + $0x3c0] ss:$40 sps:$4 sm:$0xff]  }
  0x8b   :  { %754 = vmatpush1.bf16.msra.mxu0 %v13092_v52  ;;  %797 = vmatpush1.bf16.msra.mxu1 %v13101_v54  ;;  %v13217_v52 = vld [vmem:[#allocation8 + $0x374] ss:$40 sps:$4 sm:$0xff]   ;;  %v13215_v54 = vld [vmem:[#allocation8 + $0x370] ss:$40 sps:$4 sm:$0xff]  }
  0x8c   :  { %755 = vmatprep.subr.bf16.mxu0 %v13100_v53  ;;  %798 = vmatprep.subr.bf16.mxu1 %v13109_v55  ;;  %v13178_v53 = vld [vmem:[#allocation8 + $0x5a4] ss:$40 sps:$4 sm:$0xff]   ;;  %v13176_v55 = vld [vmem:[#allocation8 + $0x5a0] ss:$40 sps:$4 sm:$0xff]  }
  0x8f   :  { %756 = vmatpush1.bf16.msra.mxu0 %v13098_v56  ;;  %799 = vmatpush1.bf16.msra.mxu1 %v13107_v58  ;;  %v13223_v56 = vld [vmem:[#allocation8 + $0x324] ss:$40 sps:$4 sm:$0xff]   ;;  %v13221_v58 = vld [vmem:[#allocation8 + $0x320] ss:$40 sps:$4 sm:$0xff]  }
  0x90   :  { %757 = vmatprep.subr.bf16.mxu0 %v13106_v57  ;;  %800 = vmatprep.subr.bf16.mxu1 %v13115_v59  ;;  %v13184_v57 = vld [vmem:[#allocation8 + $0x554] ss:$40 sps:$4 sm:$0xff]   ;;  %v13182_v59 = vld [vmem:[#allocation8 + $0x550] ss:$40 sps:$4 sm:$0xff]  }
  0x93   :  { %758 = vmatpush1.bf16.msra.mxu0 %v13104_v60  ;;  %801 = vmatpush1.bf16.msra.mxu1 %v13113_v62  ;;  %v13229_v60 = vld [vmem:[#allocation8 + $0x2d4] ss:$40 sps:$4 sm:$0xff]   ;;  %v13227_v62 = vld [vmem:[#allocation8 + $0x2d0] ss:$40 sps:$4 sm:$0xff]  }
  0x94   :  { %759 = vmatprep.subr.bf16.mxu0 %v13112_v61  ;;  %802 = vmatprep.subr.bf16.mxu1 %v13118_v63  ;;  %v13190_v61 = vld [vmem:[#allocation8 + $0x504] ss:$40 sps:$4 sm:$0xff]   ;;  %v13188_v63 = vld [vmem:[#allocation8 + $0x500] ss:$40 sps:$4 sm:$0xff]  }
  0x97   :  { %760 = vmatpush1.bf16.msra.mxu0 %v13110_v1  ;;  %803 = vmatpush1.bf16.msra.mxu1 %v13116_v2  ;;  %v13235_v1 = vld [vmem:[#allocation8 + $0x284] ss:$40 sps:$4 sm:$0xff]   ;;  %v13196_v2 = vld [vmem:[#allocation8 + $0x9b4] ss:$40 sps:$4 sm:$0xff]  }
  0x98   :  { %831 = vmatprep.subr.bf16.mxu0 %v13121_v3  ;;  %5758 = vmatprep.subr.bf16.mxu1 %v13145_v4  ;;  %v13233_v3 = vld [vmem:[#allocation8 + $0x280] ss:$40 sps:$4 sm:$0xff]   ;;  %v13241_v4 = vld [vmem:[#allocation8 + $0xc34] ss:$40 sps:$4 sm:$0xff]  }
  0x9a   :  { %778 = vmatmul.mubr.bf16.vlgmr.msra.gmra.mxu0 %v15454_v35  ;;  %821 = vmatmul.mubr.bf16.vlgmr.msra.gmra.mxu1 %v15454_v35 }
  0x9b   :  { %832 = vmatpush1.bf16.msra.mxu0 %v13119_v5  ;;  %863 = vmatprep.mubr.bf16.mxu0 %v15386_v0  ;;  %v13169_v0 = vld [vmem:[#allocation8 + $0xf4] ss:$40 sps:$4 sm:$0xff]   ;;  %v13194_v5 = vld [vmem:[#allocation8 + $0x9b0] ss:$40 sps:$4 sm:$0xff]  }
  0x9c   :  { %833 = vmatprep.subr.bf16.mxu0 %v13124_v6  ;;  %5759 = vmatpush1.bf16.msra.mxu1 %v13143_v7  ;;  %v13202_v6 = vld [vmem:[#allocation8 + $0x964] ss:$40 sps:$4 sm:$0xff]   ;;  %v13200_v7 = vld [vmem:[#allocation8 + $0x960] ss:$40 sps:$4 sm:$0xff]  }
  0x9d   :  { %5760 = vmatprep.subr.bf16.mxu1 %v13151_v8  ;;  %v13208_v8 = vld [vmem:[#allocation8 + $0x914] ss:$40 sps:$4 sm:$0xff]  }
  0x9f   :  { %834 = vmatpush1.bf16.msra.mxu0 %v13122_v9  ;;  %v13206_v9 = vld [vmem:[#allocation8 + $0x910] ss:$40 sps:$4 sm:$0xff]  }
  0xa0   :  { %835 = vmatprep.subr.bf16.mxu0 %v13127_v10  ;;  %5761 = vmatpush1.bf16.msra.mxu1 %v13149_v11  ;;  %v13214_v10 = vld [vmem:[#allocation8 + $0x8c4] ss:$40 sps:$4 sm:$0xff]   ;;  %v13212_v11 = vld [vmem:[#allocation8 + $0x8c0] ss:$40 sps:$4 sm:$0xff]  }
  0xa1   :  { %5762 = vmatprep.subr.bf16.mxu1 %v13157_v12  ;;  %v13220_v12 = vld [vmem:[#allocation8 + $0x874] ss:$40 sps:$4 sm:$0xff]  }
  0xa3   :  { %836 = vmatpush1.bf16.msra.mxu0 %v13125_v13  ;;  %v13218_v13 = vld [vmem:[#allocation8 + $0x870] ss:$40 sps:$4 sm:$0xff]  }
  0xa4   :  { %837 = vmatprep.subr.bf16.mxu0 %v13130_v14  ;;  %5763 = vmatpush1.bf16.msra.mxu1 %v13155_v15  ;;  %v13226_v14 = vld [vmem:[#allocation8 + $0x824] ss:$40 sps:$4 sm:$0xff]   ;;  %v13224_v15 = vld [vmem:[#allocation8 + $0x820] ss:$40 sps:$4 sm:$0xff]  }
  0xa5   :  { %5764 = vmatprep.subr.bf16.mxu1 %v13163_v16  ;;  %v13232_v16 = vld [vmem:[#allocation8 + $0x7d4] ss:$40 sps:$4 sm:$0xff]  }
  0xa7   :  { %838 = vmatpush1.bf16.msra.mxu0 %v13128_v17  ;;  %v13230_v17 = vld [vmem:[#allocation8 + $0x7d0] ss:$40 sps:$4 sm:$0xff]  }
  0xa8   :  { %839 = vmatprep.subr.bf16.mxu0 %v13133_v18  ;;  %5765 = vmatpush1.bf16.msra.mxu1 %v13161_v19  ;;  %v13238_v18 = vld [vmem:[#allocation8 + $0x784] ss:$40 sps:$4 sm:$0xff]   ;;  %v13236_v19 = vld [vmem:[#allocation8 + $0x780] ss:$40 sps:$4 sm:$0xff]  }
  0xa9   :  { %5766 = vmatprep.subr.bf16.mxu1 %v13169_v0  ;;  %v13244_v0 = vld [vmem:[#allocation8 + $0x1134] ss:$40 sps:$4 sm:$0xff]  }
  0xab   :  { %840 = vmatpush1.bf16.msra.mxu0 %v13131_v20  ;;  %v203_v20 = vlaneseq }
  0xac   :  { %841 = vmatprep.subr.bf16.mxu0 %v13136_v21  ;;  %5767 = vmatpush1.bf16.msra.mxu1 %v13167_v22 }
  0xad   :  { %5768 = vmatprep.subr.bf16.mxu1 %v13175_v23  ;;  %v15464_v21 = vshrl.u32 %v203_v20, 7 }
  0xaf   :  { %842 = vmatpush1.bf16.msra.mxu0 %v13134_v24  ;;  %v15467_v22 = vsub.s32 2, %v15464_v21  ;;  %v15470_v23 = vsub.s32 3, %v15464_v21  ;;  %v15472_v24 = vld [vmem:[#allocation7] sm:$0xff] }
  0xb0   :  { %843 = vmatprep.subr.bf16.mxu0 %v13139_v25  ;;  %5769 = vmatpush1.bf16.msra.mxu1 %v13173_v26  ;;  %v15475_v25 = vsub.s32 1, %v15464_v21  ;;  %v15478_v26 = vsub.s32 0, %v15464_v21 }
  0xb1   :  { %5770 = vmatprep.subr.bf16.mxu1 %v13181_v27  ;;  %v214_v27 = vrot.slane %v15472_v24, %v15467_v22 }
  0xb3   :  { %844 = vmatpush1.bf16.msra.mxu0 %v13137_v28  ;;  %v218_v28 = vrot.slane %v15472_v24, %v15470_v23 }
  0xb4   :  { %845 = vmatprep.subr.bf16.mxu0 %v13142_v29  ;;  %5771 = vmatpush1.bf16.msra.mxu1 %v13179_v30 }
  0xb5   :  { %5772 = vmatprep.subr.bf16.mxu1 %v13187_v31  ;;  %v210_v31 = vrot.slane %v15472_v24, %v15475_v25 }
  0xb7   :  { %846 = vmatpush1.bf16.msra.mxu0 %v13140_v32  ;;  %v206_v32 = vrot.slane %v15472_v24, %v15478_v26 }
  0xb8   :  { %5801 = vmatprep.subr.bf16.mxu0 %v13148_v33  ;;  %5773 = vmatpush1.bf16.msra.mxu1 %v13185_v34 }
  0xb9   :  { %5774 = vmatprep.subr.bf16.mxu1 %v13193_v36 }
  0xba   :  { %864 = vmatmul.mubr.bf16.vlgmr.msra.gmra.mxu0 %v15454_v35  ;;  %v13170_v35 = vld [vmem:[#allocation8 + $0x5f0] ss:$40 sps:$4 sm:$0xff]  }
  0xbb   :  { %5802 = vmatpush1.bf16.msra.mxu0 %v13146_v37 }
  0xbc   :  { %5803 = vmatprep.subr.bf16.mxu0 %v13154_v38  ;;  %5775 = vmatpush2.bf16.msra.mxu1 %v13191_v39 }
  0xbd   :  { %5776 = vmatprep.subr.bf16.mxu1 %v13199_v41 }
  0xbf   :  { %5804 = vmatpush1.bf16.msra.mxu0 %v13152_v40 }
  0xc0   :  { %5805 = vmatprep.subr.bf16.mxu0 %v13160_v42  ;;  %5777 = vmatpush2.bf16.msra.mxu1 %v13197_v43 }
  0xc1   :  { %5778 = vmatprep.subr.bf16.mxu1 %v13205_v45 }
  0xc3   :  { %5806 = vmatpush1.bf16.msra.mxu0 %v13158_v44 }
  0xc4   :  { %5807 = vmatprep.subr.bf16.mxu0 %v13166_v46  ;;  %5779 = vmatpush2.bf16.msra.mxu1 %v13203_v47 }
  0xc5   :  { %5780 = vmatprep.subr.bf16.mxu1 %v13211_v49 }
  0xc7   :  { %5808 = vmatpush1.bf16.msra.mxu0 %v13164_v48 }
  0xc8   :  { %5809 = vmatprep.subr.bf16.mxu0 %v13172_v50  ;;  %5781 = vmatpush2.bf16.msra.mxu1 %v13209_v51 }
  0xc9   :  { %5782 = vmatprep.subr.bf16.mxu1 %v13217_v52 }
  0xcb   :  { %5810 = vmatpush1.bf16.msra.mxu0 %v13170_v35 }
  0xcc   :  { %5811 = vmatprep.subr.bf16.mxu0 %v13178_v53  ;;  %5783 = vmatpush2.bf16.msra.mxu1 %v13215_v54  ;;  %v13239_v54 = vld [vmem:[#allocation8 + $0xc30] ss:$40 sps:$4 sm:$0xff]  }
  0xcd   :  { %5784 = vmatprep.subr.bf16.mxu1 %v13223_v56 }
  0xcf   :  { %5812 = vmatpush1.bf16.msra.mxu0 %v13176_v55  ;;  %v13242_v55 = vld [vmem:[#allocation8 + $0x1130] ss:$40 sps:$4 sm:$0xff]  }
  0xd0   :  { %5813 = vmatprep.subr.bf16.mxu0 %v13184_v57  ;;  %5785 = vmatpush2.bf16.msra.mxu1 %v13221_v58  ;;  %v13247_v58 = vld [vmem:[#allocation8 + $0xbe4] ss:$40 sps:$4 sm:$0xff]  }
  0xd1   :  { %5786 = vmatprep.subr.bf16.mxu1 %v13229_v60 }
  0xd3   :  { %5814 = vmatpush1.bf16.msra.mxu0 %v13182_v59  ;;  %v13250_v59 = vld [vmem:[#allocation8 + $0x10e4] ss:$40 sps:$4 sm:$0xff]  }
  0xd4   :  { %5815 = vmatprep.subr.bf16.mxu0 %v13190_v61  ;;  %5787 = vmatpush2.bf16.msra.mxu1 %v13227_v62 }
  0xd5   :  { %5788 = vmatprep.subr.bf16.mxu1 %v13235_v1  ;;  %v13248_v1 = vld [vmem:[#allocation8 + $0x10e0] ss:$40 sps:$4 sm:$0xff]  }
  0xd7   :  { %5816 = vmatpush1.bf16.msra.mxu0 %v13188_v63  ;;  %v13245_v63 = vld [vmem:[#allocation8 + $0xbe0] ss:$40 sps:$4 sm:$0xff]  }
  0xd8   :  { %5817 = vmatprep.subr.bf16.mxu0 %v13196_v2  ;;  %5789 = vmatpush2.bf16.msra.mxu1 %v13233_v3  ;;  %v13253_v2 = vld [vmem:[#allocation8 + $0xb94] ss:$40 sps:$4 sm:$0xff]  }
  0xd9   :  { %5844 = vmatprep.subr.bf16.mxu1 %v13241_v4  ;;  %v13256_v3 = vld [vmem:[#allocation8 + $0x1094] ss:$40 sps:$4 sm:$0xff]   ;;  %v13251_v4 = vld [vmem:[#allocation8 + $0xb90] ss:$40 sps:$4 sm:$0xff]  }
  0xdb   :  { %5818 = vmatpush2.bf16.msra.mxu0 %v13194_v5  ;;  %v13254_v5 = vld [vmem:[#allocation8 + $0x1090] ss:$40 sps:$4 sm:$0xff]  }
  0xdc   :  { %5819 = vmatprep.subr.bf16.mxu0 %v13202_v6  ;;  %v13259_v6 = vld [vmem:[#allocation8 + $0xb44] ss:$40 sps:$4 sm:$0xff]  }
  0xdf   :  { %5820 = vmatpush2.bf16.msra.mxu0 %v13200_v7  ;;  %v13262_v7 = vld [vmem:[#allocation8 + $0x1044] ss:$40 sps:$4 sm:$0xff]  }
  0xe0   :  { %5821 = vmatprep.subr.bf16.mxu0 %v13208_v8  ;;  %v13257_v8 = vld [vmem:[#allocation8 + $0xb40] ss:$40 sps:$4 sm:$0xff]  }
  0xe3   :  { %5822 = vmatpush2.bf16.msra.mxu0 %v13206_v9  ;;  %v13260_v9 = vld [vmem:[#allocation8 + $0x1040] ss:$40 sps:$4 sm:$0xff]  }
  0xe4   :  { %5823 = vmatprep.subr.bf16.mxu0 %v13214_v10  ;;  %v13265_v10 = vld [vmem:[#allocation8 + $0xaf4] ss:$40 sps:$4 sm:$0xff]  }
  0xe7   :  { %5824 = vmatpush2.bf16.msra.mxu0 %v13212_v11  ;;  %v13268_v11 = vld [vmem:[#allocation8 + $0xff4] ss:$40 sps:$4 sm:$0xff]  }
  0xe8   :  { %5825 = vmatprep.subr.bf16.mxu0 %v13220_v12  ;;  %v13263_v12 = vld [vmem:[#allocation8 + $0xaf0] ss:$40 sps:$4 sm:$0xff]  }
  0xeb   :  { %5826 = vmatpush2.bf16.msra.mxu0 %v13218_v13  ;;  %v13266_v13 = vld [vmem:[#allocation8 + $0xff0] ss:$40 sps:$4 sm:$0xff]  }
  0xec   :  { %5827 = vmatprep.subr.bf16.mxu0 %v13226_v14  ;;  %v15501_v14 = vsub.s32 5, %v15464_v21 }
  0xef   :  { %5828 = vmatpush2.bf16.msra.mxu0 %v13224_v15  ;;  %v233_v15 = vsub.s32 7, %v15464_v21 }
  0xf0   :  { %5829 = vmatprep.subr.bf16.mxu0 %v13232_v16  ;;  %v13271_v16 = vld [vmem:[#allocation8 + $0xaa4] ss:$40 sps:$4 sm:$0xff]  }
  0xf1   :  { %v234_v20 = vrot.slane %v15472_v24, %v233_v15 }
  0xf3   :  { %5830 = vmatpush2.bf16.msra.mxu0 %v13230_v17  ;;  %v13274_v17 = vld [vmem:[#allocation8 + $0xfa4] ss:$40 sps:$4 sm:$0xff]  }
  0xf4   :  { %5831 = vmatprep.subr.bf16.mxu0 %v13238_v18  ;;  %v13269_v18 = vld [vmem:[#allocation8 + $0xaa0] ss:$40 sps:$4 sm:$0xff]  }
  0xf7   :  { %5832 = vmatpush2.bf16.msra.mxu0 %v13236_v19  ;;  %v13272_v19 = vld [vmem:[#allocation8 + $0xfa0] ss:$40 sps:$4 sm:$0xff]  }
  0xf8   :  { %5887 = vmatprep.subr.bf16.mxu0 %v13244_v0  ;;  %v226_v0 = vrot.slane %v15472_v24, %v15501_v14 }
 0x13a   :  { %v693_v29 = vpop.f32.mrf.mxu0  ;;  %v736_v30 = vpop.f32.mrf.mxu1 }
 0x13b   :  { %v737_v33 = vadd.f32 %v736_v30, %v214_v27  ;;  %v694_v43 = vadd.f32 %v693_v29, %v206_v32 }
 0x13c   :  { %v695_v34 = vpop.f32.mrf.mxu0  ;;  %v738_v36 = vpop.f32.mrf.mxu1 }
 0x13d   :  { %v739_v37 = vadd.f32 %v738_v36, %v218_v28  ;;  %v696_v40 = vadd.f32 %v695_v34, %v210_v31  ;;  %v876_v44 = vmax.f32 %v737_v33, 0.0  ;;  %v874_v56 = vmax.f32 %v694_v43, 0.0  ;;  %v13284_v43 = vld [vmem:[#allocation8 + $0xf00] ss:$40 sps:$4 sm:$0xff]  }
 0x13e   :  { %v697_v38 = vpop.f32.mrf.mxu0  ;;  %v740_v39 = vpop.f32.mrf.mxu1 }
 0x13f   :  { %v698_v41 = vadd.f32 %v697_v38, %v206_v32  ;;  %v741_v42 = vadd.f32 %v740_v39, %v214_v27  ;;  %v877_v47 = vmax.f32 %v739_v37, 0.0  ;;  %v875_v35 = vmax.f32 %v696_v40, 0.0  ;;  %v13277_v27 = vld [vmem:[#allocation8 + $0xa54] ss:$40 sps:$4 sm:$0xff]   ;;  %v13278_v32 = vld [vmem:[#allocation8 + $0xf50] ss:$40 sps:$4 sm:$0xff]  }
 0x140   :  { %v699_v45 = vpop.f32.mrf.mxu0  ;;  %v742_v46 = vpop.f32.mrf.mxu1  ;;  %v13283_v38 = vld [vmem:[#allocation8 + $0xa04] ss:$40 sps:$4 sm:$0xff]  }
 0x141   :  { %v886_v48 = vmax.f32 %v741_v42, 0.0  ;;  %v700_v49 = vadd.f32 %v699_v45, %v210_v31  ;;  %v743_v50 = vadd.f32 %v742_v46, %v218_v28  ;;  %v884_v51 = vmax.f32 %v698_v41, 0.0  ;;  %v13280_v28 = vld [vmem:[#allocation8 + $0xf54] ss:$40 sps:$4 sm:$0xff]   ;;  %v13275_v31 = vld [vmem:[#allocation8 + $0xa50] ss:$40 sps:$4 sm:$0xff]  }
 0x142   :  { %v13286_v39 = vld [vmem:[#allocation8 + $0xf04] ss:$40 sps:$4 sm:$0xff]   ;;  %v13281_v42 = vld [vmem:[#allocation8 + $0xa00] ss:$40 sps:$4 sm:$0xff]  }
 0x143   :  { %v885_v52 = vmax.f32 %v700_v49, 0.0  ;;  %v887_v53 = vmax.f32 %v743_v50, 0.0  ;;  %v15488_v57 = vpack.c.bf16 %v886_v48, %v876_v44  ;;  %v15494_v62 = vpack.c.bf16 %v884_v51, %v874_v56  ;;  %v13289_v50 = vld [vmem:[#allocation8 + $0xeb4] ss:$40 sps:$4 sm:$0xff]  }
 0x144   :  { %v13292_v51 = vld [vmem:[#allocation8 + $0x13b4] ss:$40 sps:$4 sm:$0xff]  }
 0x145   :  { %v15490_v60 = vpack.c.bf16 %v885_v52, %v875_v35  ;;  %v15492_v61 = vpack.c.bf16 %v887_v53, %v877_v47  ;;  %v13287_v35 = vld [vmem:[#allocation8 + $0xeb0] ss:$40 sps:$4 sm:$0xff]  }
 0x146   :  { %v13290_v52 = vld [vmem:[#allocation8 + $0x13b0] ss:$40 sps:$4 sm:$0xff]  }
 0x147   :  { %5790 = vmatprep.mubr.bf16.mxu1 %v15490_v60  ;;  %5833 = vmatprep.mubr.bf16.mxu0 %v15492_v61 }
 0x148   :  { %5791 = vmatmul.mubr.bf16.vlgmr.msra.gmra.mxu1 %v15494_v62  ;;  %5834 = vmatmul.mubr.bf16.vlgmr.msra.gmra.mxu0 %v15488_v57 }
 0x149   :  { %5845 = vmatpush1.bf16.msra.mxu1 %v13239_v54  ;;  %5888 = vmatpush1.bf16.msra.mxu0 %v13242_v55 }
 0x14a   :  { %5846 = vmatprep.subr.bf16.mxu1 %v13247_v58  ;;  %5889 = vmatprep.subr.bf16.mxu0 %v13250_v59  ;;  %v13295_v58 = vld [vmem:[#allocation8 + $0xe64] ss:$40 sps:$4 sm:$0xff]  }
 0x14b   :  { %v13298_v59 = vld [vmem:[#allocation8 + $0x1364] ss:$40 sps:$4 sm:$0xff]  }
 0x14d   :  { %5847 = vmatpush1.bf16.msra.mxu1 %v13245_v63  ;;  %5890 = vmatpush1.bf16.msra.mxu0 %v13248_v1  ;;  %v13293_v63 = vld [vmem:[#allocation8 + $0xe60] ss:$40 sps:$4 sm:$0xff]  }
 0x14e   :  { %5848 = vmatprep.subr.bf16.mxu1 %v13253_v2  ;;  %5891 = vmatprep.subr.bf16.mxu0 %v13256_v3  ;;  %v13296_v1 = vld [vmem:[#allocation8 + $0x1360] ss:$40 sps:$4 sm:$0xff]   ;;  %v13301_v2 = vld [vmem:[#allocation8 + $0xe14] ss:$40 sps:$4 sm:$0xff]  }
 0x14f   :  { %v13304_v3 = vld [vmem:[#allocation8 + $0x1314] ss:$40 sps:$4 sm:$0xff]  }
 0x151   :  { %5849 = vmatpush1.bf16.msra.mxu1 %v13251_v4  ;;  %5892 = vmatpush1.bf16.msra.mxu0 %v13254_v5  ;;  %v13299_v4 = vld [vmem:[#allocation8 + $0xe10] ss:$40 sps:$4 sm:$0xff]  }
 0x152   :  { %5850 = vmatprep.subr.bf16.mxu1 %v13259_v6  ;;  %5893 = vmatprep.subr.bf16.mxu0 %v13262_v7  ;;  %v13302_v5 = vld [vmem:[#allocation8 + $0x1310] ss:$40 sps:$4 sm:$0xff]   ;;  %v13307_v6 = vld [vmem:[#allocation8 + $0xdc4] ss:$40 sps:$4 sm:$0xff]  }
 0x153   :  { %v13310_v7 = vld [vmem:[#allocation8 + $0x12c4] ss:$40 sps:$4 sm:$0xff]  }
 0x155   :  { %5851 = vmatpush1.bf16.msra.mxu1 %v13257_v8  ;;  %5894 = vmatpush1.bf16.msra.mxu0 %v13260_v9  ;;  %v13305_v8 = vld [vmem:[#allocation8 + $0xdc0] ss:$40 sps:$4 sm:$0xff]  }
 0x156   :  { %5852 = vmatprep.subr.bf16.mxu1 %v13265_v10  ;;  %5895 = vmatprep.subr.bf16.mxu0 %v13268_v11  ;;  %v13308_v9 = vld [vmem:[#allocation8 + $0x12c0] ss:$40 sps:$4 sm:$0xff]   ;;  %v13313_v10 = vld [vmem:[#allocation8 + $0xd74] ss:$40 sps:$4 sm:$0xff]  }
 0x157   :  { %v13316_v11 = vld [vmem:[#allocation8 + $0x1274] ss:$40 sps:$4 sm:$0xff]  }
 0x159   :  { %5853 = vmatpush1.bf16.msra.mxu1 %v13263_v12  ;;  %5896 = vmatpush1.bf16.msra.mxu0 %v13266_v13  ;;  %v13311_v12 = vld [vmem:[#allocation8 + $0xd70] ss:$40 sps:$4 sm:$0xff]  }
 0x15a   :  { %5854 = vmatprep.subr.bf16.mxu1 %v13271_v16  ;;  %5897 = vmatprep.subr.bf16.mxu0 %v13274_v17  ;;  %v15509_v29 = vpop.f32.mrf.mxu0  ;;  %v15511_v30 = vpop.f32.mrf.mxu1  ;;  %v13314_v13 = vld [vmem:[#allocation8 + $0x1270] ss:$40 sps:$4 sm:$0xff]   ;;  %v15524_v16 = vsub.s32 6, %v15464_v21  ;;  %v15527_v17 = vsub.s32 4, %v15464_v21 }
 0x15b   :  { %v14471_v21 = vld [vmem:[#allocation11 + $0x5b4] ss:$28 sps:$4 sm:$0xff]  }
 0x15c   :  { %v781_v33 = vpop.f32.mrf.mxu0  ;;  %v824_v34 = vpop.f32.mrf.mxu1 }
 0x15d   :  { %5855 = vmatpush1.bf16.msra.mxu1 %v13269_v18  ;;  %5898 = vmatpush1.bf16.msra.mxu0 %v13272_v19  ;;  %v782_v36 = vadd.f32 %v781_v33, %v226_v0  ;;  %v825_v37 = vadd.f32 %v824_v34, %v234_v20  ;;  %v13319_v18 = vld [vmem:[#allocation8 + $0xd24] ss:$40 sps:$4 sm:$0xff]   ;;  %v13328_v33 = vld [vmem:[#allocation8 + $0x11d4] ss:$40 sps:$4 sm:$0xff]  }
 0x15e   :  { %5856 = vmatprep.subr.bf16.mxu1 %v13277_v27  ;;  %5899 = vmatprep.subr.bf16.mxu0 %v13280_v28  ;;  %v15513_v40 = vpop.f32.mrf.mxu0  ;;  %v15515_v41 = vpop.f32.mrf.mxu1  ;;  %v13322_v19 = vld [vmem:[#allocation8 + $0x1224] ss:$40 sps:$4 sm:$0xff]   ;;  %v15529_v27 = vld [vmem:[#allocation7 + $0x8] sm:$0x3]  ;;  %v230_v28 = vrot.slane %v15472_v24, %v15524_v16 }
 0x15f   :  { %v879_v46 = vmax.f32 %v782_v36, 0.0  ;;  %v881_v48 = vmax.f32 %v825_v37, 0.0  ;;  %v13323_v36 = vld [vmem:[#allocation8 + $0xcd0] ss:$40 sps:$4 sm:$0xff]  }
 0x160   :  { %v785_v44 = vpop.f32.mrf.mxu0  ;;  %v828_v45 = vpop.f32.mrf.mxu1  ;;  %v13326_v37 = vld [vmem:[#allocation8 + $0x11d0] ss:$40 sps:$4 sm:$0xff]  }
 0x161   :  { %5857 = vmatpush1.bf16.msra.mxu1 %v13275_v31  ;;  %5900 = vmatpush1.bf16.msra.mxu0 %v13278_v32  ;;  %v786_v47 = vadd.f32 %v785_v44, %v226_v0  ;;  %v829_v49 = vadd.f32 %v828_v45, %v234_v20  ;;  %v13317_v0 = vld [vmem:[#allocation8 + $0xd20] ss:$40 sps:$4 sm:$0xff]   ;;  %v222_v31 = vrot.slane %v15472_v24, %v15527_v17  ;;  %v13325_v32 = vld [vmem:[#allocation8 + $0xcd4] ss:$40 sps:$4 sm:$0xff]   ;;  %v13331_v45 = vld [vmem:[#allocation8 + $0xc84] ss:$40 sps:$4 sm:$0xff]  }
 0x162   :  { %5858 = vmatprep.subr.bf16.mxu1 %v13283_v38  ;;  %5901 = vmatprep.subr.bf16.mxu0 %v13286_v39  ;;  %v13320_v20 = vld [vmem:[#allocation8 + $0x1220] ss:$40 sps:$4 sm:$0xff]   ;;  %v242_v38 = vrot.slane %v15529_v27, %v15475_v25  ;;  %v823_v39 = vadd.f32 %v15511_v30, %v230_v28 }
 0x163   :  { %v889_v53 = vmax.f32 %v786_v47, 0.0  ;;  %v891_v54 = vmax.f32 %v829_v49, 0.0  ;;  %v780_v24 = vadd.f32 %v15509_v29, %v222_v31  ;;  %v784_v44 = vadd.f32 %v15513_v40, %v222_v31  ;;  %v13332_v49 = vld [vmem:[#allocation8 + $0x1180] ss:$40 sps:$4 sm:$0xff]   ;;  %v13337_v29 = vld [vmem:[#allocation8 + $0x1634] ss:$40 sps:$4 sm:$0xff]  }
 0x164   :  { %v13340_v40 = vld [vmem:[#allocation8 + $0x23c] ss:$40 sps:$4 sm:$0xff]   ;;  %v13362_v31 = vld [vmem:[#allocation8 + $0xf8] ss:$40 sps:$4 sm:$0xff]  }
 0x165   :  { %5859 = vmatpush1.bf16.msra.mxu1 %v13281_v42  ;;  %5902 = vmatpush1.bf16.msra.mxu0 %v13284_v43  ;;  %v15517_v55 = vpack.c.bf16 %v889_v53, %v879_v46  ;;  %v15519_v56 = vpack.c.bf16 %v891_v54, %v881_v48  ;;  %v827_v42 = vadd.f32 %v15515_v41, %v230_v28  ;;  %v13334_v46 = vld [vmem:[#allocation8 + $0x1184] ss:$40 sps:$4 sm:$0xff]   ;;  %v13329_v48 = vld [vmem:[#allocation8 + $0xc80] ss:$40 sps:$4 sm:$0xff]   ;;  %v888_v53 = vmax.f32 %v784_v44, 0.0 }
 0x166   :  { %5860 = vmatprep.subr.bf16.mxu1 %v13289_v50  ;;  %5903 = vmatprep.subr.bf16.mxu0 %v13292_v51  ;;  %v880_v51 = vmax.f32 %v823_v39, 0.0  ;;  %v13335_v54 = vld [vmem:[#allocation8 + $0x1630] ss:$40 sps:$4 sm:$0xff]   ;;  %v13376_v39 = vld [vmem:[#allocation8 + $0x5c] ss:$40 sps:$4 sm:$0xff]  }
 0x167   :  { %5876 = vmatprep.mubr.bf16.mxu1 %v15517_v55  ;;  %5919 = vmatprep.mubr.bf16.mxu0 %v15519_v56  ;;  %v890_v30 = vmax.f32 %v827_v42, 0.0  ;;  %v13359_v28 = vld [vmem:[#allocation8 + $0x14f0] ss:$40 sps:$4 sm:$0xff]   ;;  %v13382_v44 = vld [vmem:[#allocation8 + $0xc] ss:$40 sps:$4 sm:$0xff]  }
 0x168   :  { %v13371_v42 = vld [vmem:[#allocation8 + $0x1450] ss:$40 sps:$4 sm:$0xff]  }
 0x169   :  { %5861 = vmatpush2.bf16.msra.mxu1 %v13287_v35  ;;  %5904 = vmatpush2.bf16.msra.mxu0 %v13290_v52  ;;  %v878_v52 = vmax.f32 %v780_v24, 0.0  ;;  %v13379_v24 = vld [vmem:[#allocation8 + $0x1404] ss:$40 sps:$4 sm:$0xff]  }
 0x16a   :  { %5862 = vmatprep.subr.bf16.mxu1 %v13295_v58  ;;  %5905 = vmatprep.subr.bf16.mxu0 %v13298_v59  ;;  %v13338_v58 = vld [vmem:[#allocation8 + $0x238] ss:$40 sps:$4 sm:$0xff]  }
 0x16d   :  { %5863 = vmatpush2.bf16.msra.mxu1 %v13293_v63  ;;  %5906 = vmatpush2.bf16.msra.mxu0 %v13296_v1  ;;  %v15545_v1 = vpack.c.bf16 %v890_v30, %v880_v51  ;;  %v13386_v51 = vld [vmem:[#allocation8 + $0x4b8] ss:$40 sps:$4 sm:$0xff]   ;;  %v13391_v30 = vld [vmem:[#allocation8 + $0x1864] ss:$40 sps:$4 sm:$0xff]  }
 0x16e   :  { %5864 = vmatprep.subr.bf16.mxu1 %v13301_v2  ;;  %5907 = vmatprep.subr.bf16.mxu0 %v13304_v3  ;;  %v13343_v2 = vld [vmem:[#allocation8 + $0x15e4] ss:$40 sps:$4 sm:$0xff]   ;;  %v15547_v3 = vpack.c.bf16 %v888_v53, %v878_v52  ;;  %v13392_v52 = vld [vmem:[#allocation8 + $0x468] ss:$40 sps:$4 sm:$0xff]   ;;  %v13397_v53 = vld [vmem:[#allocation8 + $0x1814] ss:$40 sps:$4 sm:$0xff]  }
 0x171   :  { %5865 = vmatpush2.bf16.msra.mxu1 %v13299_v4  ;;  %5908 = vmatpush2.bf16.msra.mxu0 %v13302_v5  ;;  %v13341_v4 = vld [vmem:[#allocation8 + $0x15e0] ss:$40 sps:$4 sm:$0xff]   ;;  %v13346_v5 = vld [vmem:[#allocation8 + $0x1ec] ss:$40 sps:$4 sm:$0xff]  }
 0x172   :  { %5866 = vmatprep.subr.bf16.mxu1 %v13307_v6  ;;  %5909 = vmatprep.subr.bf16.mxu0 %v13310_v7  ;;  %v13344_v7 = vld [vmem:[#allocation8 + $0x1e8] ss:$40 sps:$4 sm:$0xff]  }
 0x175   :  { %5867 = vmatpush2.bf16.msra.mxu1 %v13305_v8  ;;  %5910 = vmatpush2.bf16.msra.mxu0 %v13308_v9  ;;  %v13349_v8 = vld [vmem:[#allocation8 + $0x1594] ss:$40 sps:$4 sm:$0xff]  }
 0x176   :  { %5868 = vmatprep.subr.bf16.mxu1 %v13313_v10  ;;  %5911 = vmatprep.subr.bf16.mxu0 %v13316_v11  ;;  %v13352_v9 = vld [vmem:[#allocation8 + $0x19c] ss:$40 sps:$4 sm:$0xff]   ;;  %v13347_v10 = vld [vmem:[#allocation8 + $0x1590] ss:$40 sps:$4 sm:$0xff]  }
 0x177   :  { %v13350_v11 = vld [vmem:[#allocation8 + $0x198] ss:$40 sps:$4 sm:$0xff]  }
 0x179   :  { %5869 = vmatpush2.bf16.msra.mxu1 %v13311_v12  ;;  %5912 = vmatpush2.bf16.msra.mxu0 %v13314_v13  ;;  %v13355_v12 = vld [vmem:[#allocation8 + $0x1544] ss:$40 sps:$4 sm:$0xff]  }
 0x17a   :  { %5870 = vmatprep.subr.bf16.mxu1 %v13319_v18  ;;  %5913 = vmatprep.subr.bf16.mxu0 %v13322_v19  ;;  %v15535_v34 = vpop.f32.mrf.mxu0  ;;  %v13358_v13 = vld [vmem:[#allocation8 + $0x14c] ss:$40 sps:$4 sm:$0xff]   ;;  %v13353_v18 = vld [vmem:[#allocation8 + $0x1540] ss:$40 sps:$4 sm:$0xff]  }
 0x17b   :  { %v13356_v19 = vld [vmem:[#allocation8 + $0x148] ss:$40 sps:$4 sm:$0xff]  }
 0x17c   :  { %v867_v43 = vpop.f32.mrf.mxu0 }
 0x17d   :  { %5871 = vmatpush2.bf16.msra.mxu1 %v13317_v0  ;;  %5914 = vmatpush2.bf16.msra.mxu0 %v13320_v20  ;;  %v868_v50 = vadd.f32 %v867_v43, %v242_v38  ;;  %v13361_v0 = vld [vmem:[#allocation8 + $0x14f4] ss:$40 sps:$4 sm:$0xff]   ;;  %v13374_v43 = vld [vmem:[#allocation8 + $0x58] ss:$40 sps:$4 sm:$0xff]  }
 0x17e   :  { %5872 = vmatprep.subr.bf16.mxu1 %v13325_v32  ;;  %5915 = vmatprep.subr.bf16.mxu0 %v13328_v33  ;;  %v15543_v47 = vpop.f32.mrf.mxu0  ;;  %v13364_v20 = vld [vmem:[#allocation8 + $0xfc] ss:$40 sps:$4 sm:$0xff]   ;;  %v13370_v33 = vld [vmem:[#allocation8 + $0xac] ss:$40 sps:$4 sm:$0xff]  }
 0x17f   :  { %v883_v59 = vmax.f32 %v868_v50, 0.0  ;;  %v13367_v32 = vld [vmem:[#allocation8 + $0x14a4] ss:$40 sps:$4 sm:$0xff]   ;;  %v13383_v50 = vld [vmem:[#allocation8 + $0x18b0] ss:$40 sps:$4 sm:$0xff]  }
 0x180   :  { %v871_v35 = vpop.f32.mrf.mxu0 }
 0x181   :  { %5873 = vmatpush2.bf16.msra.mxu1 %v13323_v36  ;;  %5916 = vmatpush2.bf16.msra.mxu0 %v13326_v37  ;;  %v872_v41 = vadd.f32 %v871_v35, %v242_v38  ;;  %v13365_v36 = vld [vmem:[#allocation8 + $0x14a0] ss:$40 sps:$4 sm:$0xff]   ;;  %v13373_v38 = vld [vmem:[#allocation8 + $0x1454] ss:$40 sps:$4 sm:$0xff]  }
 0x182   :  { %5874 = vmatprep.subr.bf16.mxu1 %v13331_v45  ;;  %5917 = vmatprep.subr.bf16.mxu0 %v13334_v46  ;;  %v13368_v37 = vld [vmem:[#allocation8 + $0xa8] ss:$40 sps:$4 sm:$0xff]   ;;  %v13394_v35 = vld [vmem:[#allocation8 + $0x46c] ss:$40 sps:$4 sm:$0xff]  }
 0x183   :  { %v893_v63 = vmax.f32 %v872_v41, 0.0  ;;  %v13377_v45 = vld [vmem:[#allocation8 + $0x1400] ss:$40 sps:$4 sm:$0xff]  }
 0x184   :  { %v13380_v46 = vld [vmem:[#allocation8 + $0x8] ss:$40 sps:$4 sm:$0xff]  }
 0x185   :  { %5875 = vmatpush2.bf16.msra.mxu1 %v13329_v48  ;;  %5918 = vmatpush2.bf16.msra.mxu0 %v13332_v49  ;;  %v15549_v6 = vpack.c.bf16 %v893_v63, %v883_v59  ;;  %v13385_v48 = vld [vmem:[#allocation8 + $0x18b4] ss:$40 sps:$4 sm:$0xff]   ;;  %v13389_v41 = vld [vmem:[#allocation8 + $0x1860] ss:$40 sps:$4 sm:$0xff]  }
 0x186   :  { %5930 = vmatprep.subr.bf16.mxu1 %v13337_v29  ;;  %5973 = vmatprep.subr.bf16.mxu0 %v13340_v40  ;;  %v13388_v49 = vld [vmem:[#allocation8 + $0x4bc] ss:$40 sps:$4 sm:$0xff]   ;;  %v13395_v40 = vld [vmem:[#allocation8 + $0x1810] ss:$40 sps:$4 sm:$0xff]   ;;  %v13406_v59 = vld [vmem:[#allocation8 + $0x3cc] ss:$40 sps:$4 sm:$0xff]  }
 0x187   :  { %v13400_v29 = vld [vmem:[#allocation8 + $0x41c] ss:$40 sps:$4 sm:$0xff]   ;;  %v13401_v63 = vld [vmem:[#allocation8 + $0x17c0] ss:$40 sps:$4 sm:$0xff]  }
 0x188   :  { %5877 = vmatmul.mubr.bf16.vlgmr.msra.gmra.mxu1 %v15547_v3  ;;  %5920 = vmatmul.mubr.bf16.vlgmr.msra.gmra.mxu0 %v15545_v1 }
 0x189   :  { %5931 = vmatpush1.bf16.msra.mxu1 %v13335_v54  ;;  %5974 = vmatpush1.bf16.msra.mxu0 %v13338_v58  ;;  %v13398_v54 = vld [vmem:[#allocation8 + $0x418] ss:$40 sps:$4 sm:$0xff]   ;;  %v13403_v58 = vld [vmem:[#allocation8 + $0x17c4] ss:$40 sps:$4 sm:$0xff]  }
 0x18a   :  { %6005 = vmatprep.mubr.bf16.mxu0 %v15490_v60  ;;  %5932 = vmatprep.subr.bf16.mxu1 %v13343_v2  ;;  %v13404_v2 = vld [vmem:[#allocation8 + $0x3c8] ss:$40 sps:$4 sm:$0xff]  }
 0x18b   :  { %5975 = vmatprep.subr.bf16.mxu0 %v13346_v5  ;;  %5962 = vmatprep.mubr.bf16.mxu1 %v15549_v6  ;;  %v13412_v5 = vld [vmem:[#allocation8 + $0x37c] ss:$40 sps:$4 sm:$0xff]  }
 0x18d   :  { %5933 = vmatpush1.bf16.msra.mxu1 %v13341_v4  ;;  %5976 = vmatpush1.bf16.msra.mxu0 %v13344_v7  ;;  %v13409_v4 = vld [vmem:[#allocation8 + $0x1774] ss:$40 sps:$4 sm:$0xff]   ;;  %v13407_v7 = vld [vmem:[#allocation8 + $0x1770] ss:$40 sps:$4 sm:$0xff]  }
 0x18e   :  { %5934 = vmatprep.subr.bf16.mxu1 %v13349_v8  ;;  %5977 = vmatprep.subr.bf16.mxu0 %v13352_v9  ;;  %v13410_v8 = vld [vmem:[#allocation8 + $0x378] ss:$40 sps:$4 sm:$0xff]   ;;  %v13415_v9 = vld [vmem:[#allocation8 + $0x1724] ss:$40 sps:$4 sm:$0xff]  }
 0x191   :  { %5935 = vmatpush1.bf16.msra.mxu1 %v13347_v10  ;;  %5978 = vmatpush1.bf16.msra.mxu0 %v13350_v11  ;;  %v13418_v10 = vld [vmem:[#allocation8 + $0x32c] ss:$40 sps:$4 sm:$0xff]   ;;  %v13413_v11 = vld [vmem:[#allocation8 + $0x1720] ss:$40 sps:$4 sm:$0xff]  }
 0x192   :  { %5936 = vmatprep.subr.bf16.mxu1 %v13355_v12  ;;  %5979 = vmatprep.subr.bf16.mxu0 %v13358_v13  ;;  %v13416_v12 = vld [vmem:[#allocation8 + $0x328] ss:$40 sps:$4 sm:$0xff]   ;;  %v238_v13 = vrot.slane %v15529_v27, %v15478_v26 }
 0x195   :  { %5937 = vmatpush1.bf16.msra.mxu1 %v13353_v18  ;;  %5980 = vmatpush1.bf16.msra.mxu0 %v13356_v19  ;;  %v13421_v18 = vld [vmem:[#allocation8 + $0x16d4] ss:$40 sps:$4 sm:$0xff]  }
 0x196   :  { %5938 = vmatprep.subr.bf16.mxu1 %v13361_v0  ;;  %5981 = vmatprep.subr.bf16.mxu0 %v13364_v20  ;;  %v13424_v19 = vld [vmem:[#allocation8 + $0x2dc] ss:$40 sps:$4 sm:$0xff]   ;;  %v13419_v0 = vld [vmem:[#allocation8 + $0x16d0] ss:$40 sps:$4 sm:$0xff]  }
 0x197   :  { %v13422_v20 = vld [vmem:[#allocation8 + $0x2d8] ss:$40 sps:$4 sm:$0xff]  }
 0x199   :  { %5939 = vmatpush1.bf16.msra.mxu1 %v13359_v28  ;;  %5982 = vmatpush1.bf16.msra.mxu0 %v13362_v31  ;;  %v866_v28 = vadd.f32 %v15535_v34, %v238_v13  ;;  %v870_v31 = vadd.f32 %v15543_v47, %v238_v13  ;;  %v13439_v34 = vld [vmem:[#allocation8 + $0x6ec] ss:$40 sps:$4 sm:$0xff]   ;;  %v13481_v13 = vld [vmem:[#allocation8 + $0x9bc] ss:$40 sps:$4 sm:$0xff]  }
 0x19a   :  { %5940 = vmatprep.subr.bf16.mxu1 %v13367_v32  ;;  %5983 = vmatprep.subr.bf16.mxu0 %v13370_v33  ;;  %v13427_v32 = vld [vmem:[#allocation8 + $0x1684] ss:$40 sps:$4 sm:$0xff]  }
 0x19b   :  { %v13430_v33 = vld [vmem:[#allocation8 + $0x28c] ss:$40 sps:$4 sm:$0xff]   ;;  %v882_v27 = vmax.f32 %v866_v28, 0.0  ;;  %v13485_v28 = vld [vmem:[#allocation8 + $0x968] ss:$40 sps:$4 sm:$0xff]  }
 0x19c   :  { %v13442_v47 = vld [vmem:[#allocation8 + $0xbec] ss:$40 sps:$4 sm:$0xff]  }
 0x19d   :  { %5941 = vmatpush1.bf16.msra.mxu1 %v13365_v36  ;;  %5984 = vmatpush1.bf16.msra.mxu0 %v13368_v37  ;;  %v13425_v36 = vld [vmem:[#allocation8 + $0x1680] ss:$40 sps:$4 sm:$0xff]  }
 0x19e   :  { %5942 = vmatprep.subr.bf16.mxu1 %v13373_v38  ;;  %5985 = vmatprep.subr.bf16.mxu0 %v13376_v39  ;;  %v13428_v37 = vld [vmem:[#allocation8 + $0x288] ss:$40 sps:$4 sm:$0xff]   ;;  %v892_v38 = vmax.f32 %v870_v31, 0.0  ;;  %v13433_v39 = vld [vmem:[#allocation8 + $0x73c] ss:$40 sps:$4 sm:$0xff]  }
 0x19f   :  { %v13490_v31 = vld [vmem:[#allocation8 + $0xe6c] ss:$40 sps:$4 sm:$0xff]  }
 0x1a1   :  { %5943 = vmatpush1.bf16.msra.mxu1 %v13371_v42  ;;  %5986 = vmatpush1.bf16.msra.mxu0 %v13374_v43  ;;  %v13436_v42 = vld [vmem:[#allocation8 + $0xc3c] ss:$40 sps:$4 sm:$0xff]   ;;  %v13431_v43 = vld [vmem:[#allocation8 + $0x738] ss:$40 sps:$4 sm:$0xff]  }
 0x1a2   :  { %5944 = vmatprep.subr.bf16.mxu1 %v13379_v24  ;;  %5987 = vmatprep.subr.bf16.mxu0 %v13382_v44  ;;  %v13434_v24 = vld [vmem:[#allocation8 + $0xc38] ss:$40 sps:$4 sm:$0xff]   ;;  %v15559_v44 = vpack.c.bf16 %v892_v38, %v882_v27  ;;  %v13499_v38 = vld [vmem:[#allocation8 + $0x8cc] ss:$40 sps:$4 sm:$0xff]  }
 0x1a3   :  { %v13494_v27 = vld [vmem:[#allocation8 + $0xe18] ss:$40 sps:$4 sm:$0xff]  }
 0x1a5   :  { %5945 = vmatpush1.bf16.msra.mxu1 %v13377_v45  ;;  %5988 = vmatpush1.bf16.msra.mxu0 %v13380_v46  ;;  %v13437_v45 = vld [vmem:[#allocation8 + $0x6e8] ss:$40 sps:$4 sm:$0xff]  }
 0x1a6   :  { %5946 = vmatprep.subr.bf16.mxu1 %v13385_v48  ;;  %5989 = vmatprep.subr.bf16.mxu0 %v13388_v49  ;;  %v13440_v46 = vld [vmem:[#allocation8 + $0xbe8] ss:$40 sps:$4 sm:$0xff]   ;;  %v13445_v48 = vld [vmem:[#allocation8 + $0x69c] ss:$40 sps:$4 sm:$0xff]  }
 0x1a7   :  { %v13448_v49 = vld [vmem:[#allocation8 + $0xb9c] ss:$40 sps:$4 sm:$0xff]  }
 0x1a9   :  { %5947 = vmatpush2.bf16.msra.mxu1 %v13383_v50  ;;  %5990 = vmatpush2.bf16.msra.mxu0 %v13386_v51  ;;  %v13443_v50 = vld [vmem:[#allocation8 + $0x698] ss:$40 sps:$4 sm:$0xff]  }
 0x1aa   :  { %5948 = vmatprep.subr.bf16.mxu1 %v13391_v30  ;;  %5991 = vmatprep.subr.bf16.mxu0 %v13394_v35  ;;  %v13446_v51 = vld [vmem:[#allocation8 + $0xb98] ss:$40 sps:$4 sm:$0xff]   ;;  %v13451_v30 = vld [vmem:[#allocation8 + $0x64c] ss:$40 sps:$4 sm:$0xff]  }
 0x1ab   :  { %v13454_v35 = vld [vmem:[#allocation8 + $0xb4c] ss:$40 sps:$4 sm:$0xff]  }
 0x1ad   :  { %5949 = vmatpush2.bf16.msra.mxu1 %v13389_v41  ;;  %5992 = vmatpush2.bf16.msra.mxu0 %v13392_v52  ;;  %v13449_v41 = vld [vmem:[#allocation8 + $0x648] ss:$40 sps:$4 sm:$0xff]  }
 0x1ae   :  { %5950 = vmatprep.subr.bf16.mxu1 %v13397_v53  ;;  %5993 = vmatprep.subr.bf16.mxu0 %v13400_v29  ;;  %v13452_v52 = vld [vmem:[#allocation8 + $0xb48] ss:$40 sps:$4 sm:$0xff]   ;;  %v13457_v53 = vld [vmem:[#allocation8 + $0x5fc] ss:$40 sps:$4 sm:$0xff]   ;;  %v13455_v29 = vld [vmem:[#allocation8 + $0x5f8] ss:$40 sps:$4 sm:$0xff]  }
 0x1b1   :  { %5951 = vmatpush2.bf16.msra.mxu1 %v13395_v40  ;;  %5994 = vmatpush2.bf16.msra.mxu0 %v13398_v54  ;;  %v13460_v40 = vld [vmem:[#allocation8 + $0xafc] ss:$40 sps:$4 sm:$0xff]   ;;  %v13458_v54 = vld [vmem:[#allocation8 + $0xaf8] ss:$40 sps:$4 sm:$0xff]  }
 0x1b2   :  { %5952 = vmatprep.subr.bf16.mxu1 %v13403_v58  ;;  %5995 = vmatprep.subr.bf16.mxu0 %v13406_v59  ;;  %v13463_v58 = vld [vmem:[#allocation8 + $0x5ac] ss:$40 sps:$4 sm:$0xff]   ;;  %v13461_v59 = vld [vmem:[#allocation8 + $0x5a8] ss:$40 sps:$4 sm:$0xff]  }
 0x1b5   :  { %5953 = vmatpush2.bf16.msra.mxu1 %v13401_v63  ;;  %5996 = vmatpush2.bf16.msra.mxu0 %v13404_v2  ;;  %v13466_v63 = vld [vmem:[#allocation8 + $0xaac] ss:$40 sps:$4 sm:$0xff]   ;;  %v13464_v2 = vld [vmem:[#allocation8 + $0xaa8] ss:$40 sps:$4 sm:$0xff]  }
 0x1b6   :  { %5954 = vmatprep.subr.bf16.mxu1 %v13409_v4  ;;  %5997 = vmatprep.subr.bf16.mxu0 %v13412_v5  ;;  %v13469_v4 = vld [vmem:[#allocation8 + $0x55c] ss:$40 sps:$4 sm:$0xff]   ;;  %v13467_v5 = vld [vmem:[#allocation8 + $0x558] ss:$40 sps:$4 sm:$0xff]  }
 0x1b9   :  { %5955 = vmatpush2.bf16.msra.mxu1 %v13407_v7  ;;  %5998 = vmatpush2.bf16.msra.mxu0 %v13410_v8  ;;  %v13472_v7 = vld [vmem:[#allocation8 + $0xa5c] ss:$40 sps:$4 sm:$0xff]   ;;  %v13470_v8 = vld [vmem:[#allocation8 + $0xa58] ss:$40 sps:$4 sm:$0xff]  }
 0x1ba   :  { %5956 = vmatprep.subr.bf16.mxu1 %v13415_v9  ;;  %5999 = vmatprep.subr.bf16.mxu0 %v13418_v10  ;;  %v13475_v9 = vld [vmem:[#allocation8 + $0x50c] ss:$40 sps:$4 sm:$0xff]   ;;  %v13473_v10 = vld [vmem:[#allocation8 + $0x508] ss:$40 sps:$4 sm:$0xff]  }
 0x1bd   :  { %5957 = vmatpush2.bf16.msra.mxu1 %v13413_v11  ;;  %6000 = vmatpush2.bf16.msra.mxu0 %v13416_v12  ;;  %v13478_v11 = vld [vmem:[#allocation8 + $0xa0c] ss:$40 sps:$4 sm:$0xff]   ;;  %v13476_v12 = vld [vmem:[#allocation8 + $0xa08] ss:$40 sps:$4 sm:$0xff]  }
 0x1be   :  { %5958 = vmatprep.subr.bf16.mxu1 %v13421_v18  ;;  %6001 = vmatprep.subr.bf16.mxu0 %v13424_v19  ;;  %v13479_v18 = vld [vmem:[#allocation8 + $0x9b8] ss:$40 sps:$4 sm:$0xff]   ;;  %v13484_v19 = vld [vmem:[#allocation8 + $0xebc] ss:$40 sps:$4 sm:$0xff]  }
 0x1c1   :  { %5959 = vmatpush2.bf16.msra.mxu1 %v13419_v0  ;;  %6002 = vmatpush2.bf16.msra.mxu0 %v13422_v20  ;;  %v13482_v0 = vld [vmem:[#allocation8 + $0xeb8] ss:$40 sps:$4 sm:$0xff]   ;;  %v13487_v20 = vld [vmem:[#allocation8 + $0x96c] ss:$40 sps:$4 sm:$0xff]  }
 0x1c2   :  { %5960 = vmatprep.subr.bf16.mxu1 %v13427_v32  ;;  %6003 = vmatprep.subr.bf16.mxu0 %v13430_v33  ;;  %v13488_v32 = vld [vmem:[#allocation8 + $0xe68] ss:$40 sps:$4 sm:$0xff]   ;;  %v13493_v33 = vld [vmem:[#allocation8 + $0x91c] ss:$40 sps:$4 sm:$0xff]  }
 0x1c5   :  { %5961 = vmatpush2.bf16.msra.mxu1 %v13425_v36  ;;  %6004 = vmatpush2.bf16.msra.mxu0 %v13428_v37  ;;  %v13491_v36 = vld [vmem:[#allocation8 + $0x918] ss:$40 sps:$4 sm:$0xff]   ;;  %v13496_v37 = vld [vmem:[#allocation8 + $0xe1c] ss:$40 sps:$4 sm:$0xff]  }
 0x1c6   :  { %6016 = vmatprep.subr.bf16.mxu1 %v13433_v39  ;;  %6059 = vmatprep.subr.bf16.mxu0 %v13436_v42  ;;  %v13497_v39 = vld [vmem:[#allocation8 + $0x8c8] ss:$40 sps:$4 sm:$0xff]   ;;  %v13502_v42 = vld [vmem:[#allocation8 + $0xdcc] ss:$40 sps:$4 sm:$0xff]  }
 0x1c8   :  { %5963 = vmatmul.mubr.bf16.vlgmr.msra.gmra.mxu1 %v15559_v44  ;;  %6006 = vmatmul.mubr.bf16.vlgmr.msra.gmra.mxu0 %v15494_v62 }
 0x1c9   :  { %6017 = vmatpush1.bf16.msra.mxu1 %v13431_v43  ;;  %6048 = vmatprep.mubr.bf16.mxu1 %v15492_v61  ;;  %v13500_v43 = vld [vmem:[#allocation8 + $0xdc8] ss:$40 sps:$4 sm:$0xff]  }
 0x1ca   :  { %6060 = vmatpush1.bf16.msra.mxu0 %v13434_v24  ;;  %6091 = vmatprep.mubr.bf16.mxu0 %v15517_v55  ;;  %v13505_v24 = vld [vmem:[#allocation8 + $0x87c] ss:$40 sps:$4 sm:$0xff]  }
 0x1cb   :  { %6018 = vmatprep.subr.bf16.mxu1 %v13439_v34  ;;  %6061 = vmatprep.subr.bf16.mxu0 %v13442_v47  ;;  %v13503_v34 = vld [vmem:[#allocation8 + $0x878] ss:$40 sps:$4 sm:$0xff]   ;;  %v13508_v47 = vld [vmem:[#allocation8 + $0xd7c] ss:$40 sps:$4 sm:$0xff]  }
 0x1cd   :  { %6019 = vmatpush1.bf16.msra.mxu1 %v13437_v45  ;;  %v13506_v45 = vld [vmem:[#allocation8 + $0xd78] ss:$40 sps:$4 sm:$0xff]  }
 0x1ce   :  { %6062 = vmatpush1.bf16.msra.mxu0 %v13440_v46  ;;  %6020 = vmatprep.subr.bf16.mxu1 %v13445_v48  ;;  %v13511_v46 = vld [vmem:[#allocation8 + $0x82c] ss:$40 sps:$4 sm:$0xff]   ;;  %v13509_v48 = vld [vmem:[#allocation8 + $0x828] ss:$40 sps:$4 sm:$0xff]  }
 0x1cf   :  { %6063 = vmatprep.subr.bf16.mxu0 %v13448_v49  ;;  %v13514_v49 = vld [vmem:[#allocation8 + $0xd2c] ss:$40 sps:$4 sm:$0xff]  }
 0x1d1   :  { %6021 = vmatpush1.bf16.msra.mxu1 %v13443_v50  ;;  %v13512_v50 = vld [vmem:[#allocation8 + $0xd28] ss:$40 sps:$4 sm:$0xff]  }
 0x1d2   :  { %6064 = vmatpush1.bf16.msra.mxu0 %v13446_v51  ;;  %6022 = vmatprep.subr.bf16.mxu1 %v13451_v30  ;;  %v13517_v51 = vld [vmem:[#allocation8 + $0x7dc] ss:$40 sps:$4 sm:$0xff]   ;;  %v13515_v30 = vld [vmem:[#allocation8 + $0x7d8] ss:$40 sps:$4 sm:$0xff]  }
 0x1d3   :  { %6065 = vmatprep.subr.bf16.mxu0 %v13454_v35  ;;  %v13520_v35 = vld [vmem:[#allocation8 + $0xcdc] ss:$40 sps:$4 sm:$0xff]  }
 0x1d5   :  { %6023 = vmatpush1.bf16.msra.mxu1 %v13449_v41  ;;  %v13518_v41 = vld [vmem:[#allocation8 + $0xcd8] ss:$40 sps:$4 sm:$0xff]  }
 0x1d6   :  { %6066 = vmatpush1.bf16.msra.mxu0 %v13452_v52  ;;  %6024 = vmatprep.subr.bf16.mxu1 %v13457_v53  ;;  %v13523_v52 = vld [vmem:[#allocation8 + $0x78c] ss:$40 sps:$4 sm:$0xff]   ;;  %v13521_v53 = vld [vmem:[#allocation8 + $0x788] ss:$40 sps:$4 sm:$0xff]  }
 0x1d7   :  { %6067 = vmatprep.subr.bf16.mxu0 %v13460_v40  ;;  %v13524_v40 = vld [vmem:[#allocation8 + $0xc88] ss:$40 sps:$4 sm:$0xff]  }
 0x1d9   :  { %6025 = vmatpush1.bf16.msra.mxu1 %v13455_v29  ;;  %v13526_v29 = vld [vmem:[#allocation8 + $0xc8c] ss:$40 sps:$4 sm:$0xff]  }
 0x1da   :  { %6068 = vmatpush1.bf16.msra.mxu0 %v13458_v54  ;;  %6026 = vmatprep.subr.bf16.mxu1 %v13463_v58  ;;  %v13529_v54 = vld [vmem:[#allocation8 + $0x113c] ss:$40 sps:$4 sm:$0xff]  }
 0x1db   :  { %6069 = vmatprep.subr.bf16.mxu0 %v13466_v63  ;;  %v13532_v58 = vld [vmem:[#allocation8 + $0x163c] ss:$40 sps:$4 sm:$0xff]   ;;  %v13527_v63 = vld [vmem:[#allocation8 + $0x1138] ss:$40 sps:$4 sm:$0xff]  }
 0x1dd   :  { %6027 = vmatpush1.bf16.msra.mxu1 %v13461_v59  ;;  %v1704_v59 = vld [vmem:[#allocation10] sm:$0xff] }
 0x1de   :  { %6070 = vmatpush1.bf16.msra.mxu0 %v13464_v2  ;;  %6028 = vmatprep.subr.bf16.mxu1 %v13469_v4  ;;  %v13530_v2 = vld [vmem:[#allocation8 + $0x1638] ss:$40 sps:$4 sm:$0xff]   ;;  %v1711_v4 = vrot.slane %v1704_v59, %v15478_v26 }
 0x1df   :  { %6071 = vmatprep.subr.bf16.mxu0 %v13472_v7  ;;  %v13533_v7 = vld [vmem:[#allocation8 + $0x10e8] ss:$40 sps:$4 sm:$0xff]   ;;  %v13578_v59 = vld [vmem:[#allocation8 + $0x18b8] ss:$40 sps:$4 sm:$0xff]  }
 0x1e1   :  { %6029 = vmatpush1.bf16.msra.mxu1 %v13467_v5  ;;  %v13535_v5 = vld [vmem:[#allocation8 + $0x10ec] ss:$40 sps:$4 sm:$0xff]  }
 0x1e2   :  { %6072 = vmatpush1.bf16.msra.mxu0 %v13470_v8  ;;  %6030 = vmatprep.subr.bf16.mxu1 %v13475_v9 }
 0x1e3   :  { %6073 = vmatprep.subr.bf16.mxu0 %v13478_v11  ;;  %v13538_v11 = vld [vmem:[#allocation8 + $0x15ec] ss:$40 sps:$4 sm:$0xff]  }
 0x1e5   :  { %6031 = vmatpush1.bf16.msra.mxu1 %v13473_v10  ;;  %v13536_v10 = vld [vmem:[#allocation8 + $0x15e8] ss:$40 sps:$4 sm:$0xff]  }
 0x1e6   :  { %6074 = vmatpush1.bf16.msra.mxu0 %v13476_v12  ;;  %6032 = vmatprep.subr.bf16.mxu1 %v13481_v13  ;;  %v13541_v13 = vld [vmem:[#allocation8 + $0x109c] ss:$40 sps:$4 sm:$0xff]  }
 0x1e7   :  { %6075 = vmatprep.subr.bf16.mxu0 %v13484_v19 }
 0x1e9   :  { %6033 = vmatpush2.bf16.msra.mxu1 %v13479_v18  ;;  %v13544_v18 = vld [vmem:[#allocation8 + $0x159c] ss:$40 sps:$4 sm:$0xff]  }
 0x1ea   :  { %6076 = vmatpush2.bf16.msra.mxu0 %v13482_v0  ;;  %6034 = vmatprep.subr.bf16.mxu1 %v13487_v20 }
 0x1eb   :  { %6077 = vmatprep.subr.bf16.mxu0 %v13490_v31 }
 0x1ed   :  { %6035 = vmatpush2.bf16.msra.mxu1 %v13485_v28 }
 0x1ee   :  { %6078 = vmatpush2.bf16.msra.mxu0 %v13488_v32  ;;  %6036 = vmatprep.subr.bf16.mxu1 %v13493_v33  ;;  %v13539_v32 = vld [vmem:[#allocation8 + $0x1098] ss:$40 sps:$4 sm:$0xff]  }
 0x1ef   :  { %6079 = vmatprep.subr.bf16.mxu0 %v13496_v37  ;;  %v13542_v33 = vld [vmem:[#allocation8 + $0x1598] ss:$40 sps:$4 sm:$0xff]   ;;  %v13547_v37 = vld [vmem:[#allocation8 + $0x104c] ss:$40 sps:$4 sm:$0xff]  }
 0x1f1   :  { %6037 = vmatpush2.bf16.msra.mxu1 %v13491_v36 }
 0x1f2   :  { %6080 = vmatpush2.bf16.msra.mxu0 %v13494_v27  ;;  %6038 = vmatprep.subr.bf16.mxu1 %v13499_v38  ;;  %v13550_v27 = vld [vmem:[#allocation8 + $0x154c] ss:$40 sps:$4 sm:$0xff]  }
 0x1f3   :  { %6081 = vmatprep.subr.bf16.mxu0 %v13502_v42  ;;  %v13548_v42 = vld [vmem:[#allocation8 + $0x1548] ss:$40 sps:$4 sm:$0xff]  }
 0x1f5   :  { %6039 = vmatpush2.bf16.msra.mxu1 %v13497_v39  ;;  %v13545_v39 = vld [vmem:[#allocation8 + $0x1048] ss:$40 sps:$4 sm:$0xff]  }
 0x1f6   :  { %6082 = vmatpush2.bf16.msra.mxu0 %v13500_v43  ;;  %6040 = vmatprep.subr.bf16.mxu1 %v13505_v24  ;;  %v13553_v43 = vld [vmem:[#allocation8 + $0xffc] ss:$40 sps:$4 sm:$0xff]  }
 0x1f7   :  { %6083 = vmatprep.subr.bf16.mxu0 %v13508_v47  ;;  %v13556_v24 = vld [vmem:[#allocation8 + $0x14fc] ss:$40 sps:$4 sm:$0xff]   ;;  %v13554_v47 = vld [vmem:[#allocation8 + $0x14f8] ss:$40 sps:$4 sm:$0xff]  }
 0x1f9   :  { %6041 = vmatpush2.bf16.msra.mxu1 %v13503_v34  ;;  %v13551_v34 = vld [vmem:[#allocation8 + $0xff8] ss:$40 sps:$4 sm:$0xff]  }
 0x1fa   :  { %6084 = vmatpush2.bf16.msra.mxu0 %v13506_v45  ;;  %6042 = vmatprep.subr.bf16.mxu1 %v13511_v46  ;;  %v13559_v45 = vld [vmem:[#allocation8 + $0xfac] ss:$40 sps:$4 sm:$0xff]   ;;  %v13557_v46 = vld [vmem:[#allocation8 + $0xfa8] ss:$40 sps:$4 sm:$0xff]  }
 0x1fb   :  { %6085 = vmatprep.subr.bf16.mxu0 %v13514_v49  ;;  %v13560_v49 = vld [vmem:[#allocation8 + $0x14a8] ss:$40 sps:$4 sm:$0xff]  }
 0x1fd   :  { %6043 = vmatpush2.bf16.msra.mxu1 %v13509_v48  ;;  %v13562_v48 = vld [vmem:[#allocation8 + $0x14ac] ss:$40 sps:$4 sm:$0xff]  }
 0x1fe   :  { %6086 = vmatpush2.bf16.msra.mxu0 %v13512_v50  ;;  %6044 = vmatprep.subr.bf16.mxu1 %v13517_v51  ;;  %v13565_v50 = vld [vmem:[#allocation8 + $0xf5c] ss:$40 sps:$4 sm:$0xff]   ;;  %v13563_v51 = vld [vmem:[#allocation8 + $0xf58] ss:$40 sps:$4 sm:$0xff]  }
 0x1ff   :  { %6087 = vmatprep.subr.bf16.mxu0 %v13520_v35  ;;  %v13566_v35 = vld [vmem:[#allocation8 + $0x1458] ss:$40 sps:$4 sm:$0xff]  }
 0x201   :  { %6045 = vmatpush2.bf16.msra.mxu1 %v13515_v30  ;;  %v13568_v30 = vld [vmem:[#allocation8 + $0x145c] ss:$40 sps:$4 sm:$0xff]  }
 0x202   :  { %6088 = vmatpush2.bf16.msra.mxu0 %v13518_v41  ;;  %6046 = vmatprep.subr.bf16.mxu1 %v13523_v52  ;;  %v13571_v41 = vld [vmem:[#allocation8 + $0xf0c] ss:$40 sps:$4 sm:$0xff]   ;;  %v13569_v52 = vld [vmem:[#allocation8 + $0xf08] ss:$40 sps:$4 sm:$0xff]  }
 0x203   :  { %6089 = vmatprep.subr.bf16.mxu0 %v13526_v29  ;;  %v13572_v29 = vld [vmem:[#allocation8 + $0x1408] ss:$40 sps:$4 sm:$0xff]  }
 0x205   :  { %6047 = vmatpush2.bf16.msra.mxu1 %v13521_v53  ;;  %v13574_v53 = vld [vmem:[#allocation8 + $0x140c] ss:$40 sps:$4 sm:$0xff]  }
 0x206   :  { %6090 = vmatpush2.bf16.msra.mxu0 %v13524_v40  ;;  %6102 = vmatprep.subr.bf16.mxu1 %v13529_v54  ;;  %v13577_v40 = vld [vmem:[#allocation8 + $0x13bc] ss:$40 sps:$4 sm:$0xff]   ;;  %v13575_v54 = vld [vmem:[#allocation8 + $0x13b8] ss:$40 sps:$4 sm:$0xff]  }
 0x207   :  { %6145 = vmatprep.subr.bf16.mxu0 %v13532_v58  ;;  %v13580_v58 = vld [vmem:[#allocation8 + $0x18bc] ss:$40 sps:$4 sm:$0xff]  }
 0x208   :  { %6049 = vmatmul.mubr.bf16.vlgmr.msra.gmra.mxu1 %v15488_v57  ;;  %v5792_v8 = vpop.f32.mrf.mxu1  ;;  %v5835_v9 = vpop.f32.mrf.mxu0 }
 0x209   :  { %6092 = vmatmul.mubr.bf16.vlgmr.msra.gmra.mxu0 %v15547_v3  ;;  %v5793_v12 = vadd.f32 %v5792_v8, %v1711_v4  ;;  %6103 = vmatpush1.bf16.msra.mxu1 %v13527_v63  ;;  %v13583_v63 = vld [vmem:[#allocation8 + $0x136c] ss:$40 sps:$4 sm:$0xff]   ;;  %v13587_v8 = vld [vmem:[#allocation8 + $0x1318] ss:$40 sps:$4 sm:$0xff]  }
 0x20a   :  { %6134 = vmatprep.mubr.bf16.mxu1 %v15519_v56  ;;  %6146 = vmatpush1.bf16.msra.mxu0 %v13530_v2  ;;  %v15569_v19 = vpop.f32.mrf.mxu1  ;;  %v15571_v0 = vpop.f32.mrf.mxu0  ;;  %v13581_v2 = vld [vmem:[#allocation8 + $0x1368] ss:$40 sps:$4 sm:$0xff]  }
 0x20b   :  { %6177 = vmatprep.mubr.bf16.mxu0 %v15549_v6  ;;  %v15574_v20 = vadd.f32 %v5835_v9, %v5793_v12  ;;  %6104 = vmatprep.subr.bf16.mxu1 %v13535_v5  ;;  %v13584_v5 = vld [vmem:[#allocation8 + $0x1868] ss:$40 sps:$4 sm:$0xff]   ;;  %v13592_v9 = vld [vmem:[#allocation8 + $0x181c] ss:$40 sps:$4 sm:$0xff]  }
 0x20c   :  { %6147 = vmatprep.subr.bf16.mxu0 %v13538_v11  ;;  %v5796_v28 = vpop.f32.mrf.mxu1  ;;  %v5839_v31 = vpop.f32.mrf.mxu0  ;;  %v13595_v11 = vld [vmem:[#allocation8 + $0x12cc] ss:$40 sps:$4 sm:$0xff]   ;;  %v13593_v12 = vld [vmem:[#allocation8 + $0x12c8] ss:$40 sps:$4 sm:$0xff]  }
 0x20d   :  { %v5797_v36 = vadd.f32 %v5796_v28, %v1711_v4  ;;  %6105 = vmatpush1.bf16.msra.mxu1 %v13533_v7  ;;  %v13586_v4 = vld [vmem:[#allocation8 + $0x186c] ss:$40 sps:$4 sm:$0xff]   ;;  %v13589_v7 = vld [vmem:[#allocation8 + $0x131c] ss:$40 sps:$4 sm:$0xff]  }
 0x20e   :  { %6148 = vmatpush1.bf16.msra.mxu0 %v13536_v10  ;;  %6106 = vmatprep.subr.bf16.mxu1 %v13541_v13  ;;  %v13590_v10 = vld [vmem:[#allocation8 + $0x1818] ss:$40 sps:$4 sm:$0xff]   ;;  %v13598_v13 = vld [vmem:[#allocation8 + $0x17cc] ss:$40 sps:$4 sm:$0xff]   ;;  %v13601_v28 = vld [vmem:[#allocation8 + $0x127c] ss:$40 sps:$4 sm:$0xff]  }
 0x20f   :  { %v15576_v38 = vadd.f32 %v5839_v31, %v5797_v36  ;;  %6149 = vmatprep.subr.bf16.mxu0 %v13544_v18  ;;  %v13596_v18 = vld [vmem:[#allocation8 + $0x17c8] ss:$40 sps:$4 sm:$0xff]   ;;  %v13599_v31 = vld [vmem:[#allocation8 + $0x1278] ss:$40 sps:$4 sm:$0xff]   ;;  %v13607_v36 = vld [vmem:[#allocation8 + $0x122c] ss:$40 sps:$4 sm:$0xff]  }
 0x211   :  { %6107 = vmatpush1.bf16.msra.mxu1 %v13539_v32  ;;  %v13604_v32 = vld [vmem:[#allocation8 + $0x177c] ss:$40 sps:$4 sm:$0xff]  }
 0x212   :  { %6150 = vmatpush1.bf16.msra.mxu0 %v13542_v33  ;;  %6108 = vmatprep.subr.bf16.mxu1 %v13547_v37  ;;  %v13602_v33 = vld [vmem:[#allocation8 + $0x1778] ss:$40 sps:$4 sm:$0xff]   ;;  %v13605_v37 = vld [vmem:[#allocation8 + $0x1228] ss:$40 sps:$4 sm:$0xff]  }
 0x213   :  { %6151 = vmatprep.subr.bf16.mxu0 %v13550_v27  ;;  %v13610_v27 = vld [vmem:[#allocation8 + $0x172c] ss:$40 sps:$4 sm:$0xff]  }
 0x215   :  { %6109 = vmatpush1.bf16.msra.mxu1 %v13545_v39  ;;  %v13608_v39 = vld [vmem:[#allocation8 + $0x1728] ss:$40 sps:$4 sm:$0xff]  }
 0x216   :  { %6152 = vmatpush1.bf16.msra.mxu0 %v13548_v42  ;;  %6110 = vmatprep.subr.bf16.mxu1 %v13553_v43  ;;  %v13613_v42 = vld [vmem:[#allocation8 + $0x11dc] ss:$40 sps:$4 sm:$0xff]   ;;  %v13611_v43 = vld [vmem:[#allocation8 + $0x11d8] ss:$40 sps:$4 sm:$0xff]  }
 0x217   :  { %6153 = vmatprep.subr.bf16.mxu0 %v13556_v24  ;;  %v13616_v24 = vld [vmem:[#allocation8 + $0x16dc] ss:$40 sps:$4 sm:$0xff]  }
 0x219   :  { %6111 = vmatpush1.bf16.msra.mxu1 %v13551_v34  ;;  %v13614_v34 = vld [vmem:[#allocation8 + $0x16d8] ss:$40 sps:$4 sm:$0xff]  }
 0x21a   :  { %6154 = vmatpush1.bf16.msra.mxu0 %v13554_v47  ;;  %6112 = vmatprep.subr.bf16.mxu1 %v13559_v45  ;;  %v13619_v47 = vld [vmem:[#allocation8 + $0x118c] ss:$40 sps:$4 sm:$0xff]   ;;  %v13617_v45 = vld [vmem:[#allocation8 + $0x1188] ss:$40 sps:$4 sm:$0xff]  }
 0x21b   :  { %6155 = vmatprep.subr.bf16.mxu0 %v13562_v48  ;;  %v13620_v48 = vld [vmem:[#allocation8 + $0x1688] ss:$40 sps:$4 sm:$0xff]  }
 0x21d   :  { %6113 = vmatpush1.bf16.msra.mxu1 %v13557_v46  ;;  %v13622_v46 = vld [vmem:[#allocation8 + $0x168c] ss:$40 sps:$4 sm:$0xff]  }
 0x21e   :  { %6156 = vmatpush1.bf16.msra.mxu0 %v13560_v49  ;;  %6114 = vmatprep.subr.bf16.mxu1 %v13565_v50  ;;  %v13625_v49 = vld [vmem:[#allocation8 + $0x244] ss:$40 sps:$4 sm:$0xff]  }
 0x21f   :  { %6157 = vmatprep.subr.bf16.mxu0 %v13568_v30  ;;  %v13628_v50 = vld [vmem:[#allocation8 + $0x744] ss:$40 sps:$4 sm:$0xff]   ;;  %v13626_v30 = vld [vmem:[#allocation8 + $0x740] ss:$40 sps:$4 sm:$0xff]  }
 0x221   :  { %6115 = vmatpush1.bf16.msra.mxu1 %v13563_v51  ;;  %v13623_v51 = vld [vmem:[#allocation8 + $0x240] ss:$40 sps:$4 sm:$0xff]  }
 0x222   :  { %6158 = vmatpush1.bf16.msra.mxu0 %v13566_v35  ;;  %6116 = vmatprep.subr.bf16.mxu1 %v13571_v41  ;;  %v13631_v35 = vld [vmem:[#allocation8 + $0x1f4] ss:$40 sps:$4 sm:$0xff]   ;;  %v15578_v41 = vpop.f32.mrf.mxu1 }
 0x223   :  { %6159 = vmatprep.subr.bf16.mxu0 %v13574_v53  ;;  %v13634_v53 = vld [vmem:[#allocation8 + $0x6f4] ss:$40 sps:$4 sm:$0xff]  }
 0x225   :  { %6117 = vmatpush1.bf16.msra.mxu1 %v13569_v52  ;;  %v15580_v52 = vpop.f32.mrf.mxu0 }
 0x226   :  { %6160 = vmatpush1.bf16.msra.mxu0 %v13572_v29  ;;  %6118 = vmatprep.subr.bf16.mxu1 %v13577_v40 }
 0x227   :  { %6161 = vmatprep.subr.bf16.mxu0 %v13580_v58  ;;  %v13632_v58 = vld [vmem:[#allocation8 + $0x6f0] ss:$40 sps:$4 sm:$0xff]  }
 0x229   :  { %6119 = vmatpush2.bf16.msra.mxu1 %v13575_v54  ;;  %v13629_v54 = vld [vmem:[#allocation8 + $0x1f0] ss:$40 sps:$4 sm:$0xff]  }
 0x22a   :  { %6162 = vmatpush2.bf16.msra.mxu0 %v13578_v59  ;;  %6120 = vmatprep.subr.bf16.mxu1 %v13583_v63  ;;  %v13637_v63 = vld [vmem:[#allocation8 + $0x1a4] ss:$40 sps:$4 sm:$0xff]  }
 0x22b   :  { %6163 = vmatprep.subr.bf16.mxu0 %v13586_v4 }
 0x22d   :  { %6121 = vmatpush2.bf16.msra.mxu1 %v13581_v2  ;;  %v13640_v2 = vld [vmem:[#allocation8 + $0x6a4] ss:$40 sps:$4 sm:$0xff]  }
 0x22e   :  { %6164 = vmatpush2.bf16.msra.mxu0 %v13584_v5  ;;  %6122 = vmatprep.subr.bf16.mxu1 %v13589_v7 }
 0x22f   :  { %6165 = vmatprep.subr.bf16.mxu0 %v13592_v9  ;;  %v13635_v9 = vld [vmem:[#allocation8 + $0x1a0] ss:$40 sps:$4 sm:$0xff]  }
 0x231   :  { %6123 = vmatpush2.bf16.msra.mxu1 %v13587_v8 }
 0x232   :  { %6166 = vmatpush2.bf16.msra.mxu0 %v13590_v10  ;;  %6124 = vmatprep.subr.bf16.mxu1 %v13595_v11  ;;  %v13638_v10 = vld [vmem:[#allocation8 + $0x6a0] ss:$40 sps:$4 sm:$0xff]  }
 0x233   :  { %6167 = vmatprep.subr.bf16.mxu0 %v13598_v13  ;;  %v13646_v13 = vld [vmem:[#allocation8 + $0x654] ss:$40 sps:$4 sm:$0xff]  }
 0x235   :  { %6125 = vmatpush2.bf16.msra.mxu1 %v13593_v12  ;;  %v13643_v12 = vld [vmem:[#allocation8 + $0x154] ss:$40 sps:$4 sm:$0xff]  }
 0x236   :  { %6168 = vmatpush2.bf16.msra.mxu0 %v13596_v18  ;;  %6126 = vmatprep.subr.bf16.mxu1 %v13601_v28  ;;  %v13641_v28 = vld [vmem:[#allocation8 + $0x150] ss:$40 sps:$4 sm:$0xff]  }
 0x237   :  { %6169 = vmatprep.subr.bf16.mxu0 %v13604_v32  ;;  %v13649_v32 = vld [vmem:[#allocation8 + $0x104] ss:$40 sps:$4 sm:$0xff]  }
 0x239   :  { %6127 = vmatpush2.bf16.msra.mxu1 %v13599_v31  ;;  %v13644_v31 = vld [vmem:[#allocation8 + $0x650] ss:$40 sps:$4 sm:$0xff]  }
 0x23a   :  { %6170 = vmatpush2.bf16.msra.mxu0 %v13602_v33  ;;  %6128 = vmatprep.subr.bf16.mxu1 %v13607_v36  ;;  %v13647_v33 = vld [vmem:[#allocation8 + $0x100] ss:$40 sps:$4 sm:$0xff]   ;;  %v13652_v36 = vld [vmem:[#allocation8 + $0x604] ss:$40 sps:$4 sm:$0xff]  }
 0x23b   :  { %6171 = vmatprep.subr.bf16.mxu0 %v13610_v27  ;;  %v13653_v27 = vld [vmem:[#allocation8 + $0xb0] ss:$40 sps:$4 sm:$0xff]  }
 0x23d   :  { %6129 = vmatpush2.bf16.msra.mxu1 %v13605_v37  ;;  %v13655_v37 = vld [vmem:[#allocation8 + $0xb4] ss:$40 sps:$4 sm:$0xff]  }
 0x23e   :  { %6172 = vmatpush2.bf16.msra.mxu0 %v13608_v39  ;;  %6130 = vmatprep.subr.bf16.mxu1 %v13613_v42  ;;  %v13658_v39 = vld [vmem:[#allocation8 + $0x5b4] ss:$40 sps:$4 sm:$0xff]   ;;  %v13656_v42 = vld [vmem:[#allocation8 + $0x5b0] ss:$40 sps:$4 sm:$0xff]  }
 0x23f   :  { %6173 = vmatprep.subr.bf16.mxu0 %v13616_v24  ;;  %v13659_v24 = vld [vmem:[#allocation8 + $0x60] ss:$40 sps:$4 sm:$0xff]  }
 0x241   :  { %6131 = vmatpush2.bf16.msra.mxu1 %v13611_v43  ;;  %v13661_v43 = vld [vmem:[#allocation8 + $0x64] ss:$40 sps:$4 sm:$0xff]  }
 0x242   :  { %6174 = vmatpush2.bf16.msra.mxu0 %v13614_v34  ;;  %6132 = vmatprep.subr.bf16.mxu1 %v13619_v47  ;;  %v13664_v34 = vld [vmem:[#allocation8 + $0x564] ss:$40 sps:$4 sm:$0xff]   ;;  %v13662_v47 = vld [vmem:[#allocation8 + $0x560] ss:$40 sps:$4 sm:$0xff]  }
 0x243   :  { %6175 = vmatprep.subr.bf16.mxu0 %v13622_v46  ;;  %v13665_v46 = vld [vmem:[#allocation8 + $0x10] ss:$40 sps:$4 sm:$0xff]  }
 0x245   :  { %6133 = vmatpush2.bf16.msra.mxu1 %v13617_v45  ;;  %v13667_v45 = vld [vmem:[#allocation8 + $0x14] ss:$40 sps:$4 sm:$0xff]  }
 0x246   :  { %6176 = vmatpush2.bf16.msra.mxu0 %v13620_v48  ;;  %6188 = vmatprep.subr.bf16.mxu1 %v13625_v49  ;;  %v13670_v48 = vld [vmem:[#allocation8 + $0x514] ss:$40 sps:$4 sm:$0xff]   ;;  %v13668_v49 = vld [vmem:[#allocation8 + $0x510] ss:$40 sps:$4 sm:$0xff]  }
 0x247   :  { %6231 = vmatprep.subr.bf16.mxu0 %v13628_v50  ;;  %v13673_v50 = vld [vmem:[#allocation8 + $0x4c4] ss:$40 sps:$4 sm:$0xff]  }
 0x248   :  { %v5878_v29 = vpop.f32.mrf.mxu1  ;;  %6135 = vmatmul.mubr.bf16.vlgmr.msra.gmra.mxu1 %v15545_v1  ;;  %v5921_v40 = vpop.f32.mrf.mxu0 }
 0x249   :  { %v5879_v59 = vadd.f32 %v5878_v29, %v15574_v20  ;;  %6178 = vmatmul.mubr.bf16.vlgmr.msra.gmra.mxu0 %v15559_v44  ;;  %6189 = vmatpush1.bf16.msra.mxu1 %v13623_v51  ;;  %v13671_v51 = vld [vmem:[#allocation8 + $0x4c0] ss:$40 sps:$4 sm:$0xff]   ;;  %v13677_v29 = vld [vmem:[#allocation8 + $0x470] ss:$40 sps:$4 sm:$0xff]  }
 0x24a   :  { %6220 = vmatprep.mubr.bf16.mxu1 %v15490_v60  ;;  %6232 = vmatpush1.bf16.msra.mxu0 %v13626_v30  ;;  %v15586_v4 = vpop.f32.mrf.mxu1  ;;  %v15588_v5 = vpop.f32.mrf.mxu0  ;;  %v13676_v30 = vld [vmem:[#allocation8 + $0x9c4] ss:$40 sps:$4 sm:$0xff]  }
 0x24b   :  { %6263 = vmatprep.mubr.bf16.mxu0 %v15492_v61  ;;  %v15591_v7 = vadd.f32 %v5921_v40, %v5879_v59  ;;  %6190 = vmatprep.subr.bf16.mxu1 %v13631_v35  ;;  %v13674_v35 = vld [vmem:[#allocation8 + $0x9c0] ss:$40 sps:$4 sm:$0xff]   ;;  %v13682_v40 = vld [vmem:[#allocation8 + $0x974] ss:$40 sps:$4 sm:$0xff]  }
 0x24c   :  { %v5882_v8 = vpop.f32.mrf.mxu1  ;;  %6233 = vmatprep.subr.bf16.mxu0 %v13634_v53  ;;  %v5925_v20 = vpop.f32.mrf.mxu0  ;;  %v13679_v53 = vld [vmem:[#allocation8 + $0x474] ss:$40 sps:$4 sm:$0xff]   ;;  %v13683_v59 = vld [vmem:[#allocation8 + $0x420] ss:$40 sps:$4 sm:$0xff]  }
 0x24d   :  { %v5883_v11 = vadd.f32 %v5882_v8, %v15576_v38  ;;  %6191 = vmatpush1.bf16.msra.mxu1 %v13629_v54  ;;  %v13650_v38 = vld [vmem:[#allocation8 + $0x600] ss:$40 sps:$4 sm:$0xff]   ;;  %v13680_v54 = vld [vmem:[#allocation8 + $0x970] ss:$40 sps:$4 sm:$0xff]   ;;  %v13691_v8 = vld [vmem:[#allocation8 + $0x3d4] ss:$40 sps:$4 sm:$0xff]  }
 0x24e   :  { %6234 = vmatpush1.bf16.msra.mxu0 %v13632_v58  ;;  %6192 = vmatprep.subr.bf16.mxu1 %v13637_v63  ;;  %v13685_v58 = vld [vmem:[#allocation8 + $0x424] ss:$40 sps:$4 sm:$0xff]  }
 0x24f   :  { %v15594_v18 = vadd.f32 %v5925_v20, %v5883_v11  ;;  %6235 = vmatprep.subr.bf16.mxu0 %v13640_v2  ;;  %v13688_v63 = vld [vmem:[#allocation8 + $0x924] ss:$40 sps:$4 sm:$0xff]   ;;  %v13686_v2 = vld [vmem:[#allocation8 + $0x920] ss:$40 sps:$4 sm:$0xff]   ;;  %v13689_v20 = vld [vmem:[#allocation8 + $0x3d0] ss:$40 sps:$4 sm:$0xff]  }
 0x250   :  { %v13697_v11 = vld [vmem:[#allocation8 + $0x384] ss:$40 sps:$4 sm:$0xff]  }
 0x251   :  { %6193 = vmatpush1.bf16.msra.mxu1 %v13635_v9  ;;  %v13694_v9 = vld [vmem:[#allocation8 + $0x8d4] ss:$40 sps:$4 sm:$0xff]  }
 0x252   :  { %6236 = vmatpush1.bf16.msra.mxu0 %v13638_v10  ;;  %6194 = vmatprep.subr.bf16.mxu1 %v13643_v12  ;;  %v13692_v10 = vld [vmem:[#allocation8 + $0x8d0] ss:$40 sps:$4 sm:$0xff]   ;;  %v13695_v12 = vld [vmem:[#allocation8 + $0x380] ss:$40 sps:$4 sm:$0xff]  }
 0x253   :  { %6237 = vmatprep.subr.bf16.mxu0 %v13646_v13  ;;  %v13700_v13 = vld [vmem:[#allocation8 + $0x884] ss:$40 sps:$4 sm:$0xff]  }
 0x255   :  { %6195 = vmatpush1.bf16.msra.mxu1 %v13641_v28  ;;  %v13698_v28 = vld [vmem:[#allocation8 + $0x880] ss:$40 sps:$4 sm:$0xff]  }
 0x256   :  { %6238 = vmatpush1.bf16.msra.mxu0 %v13644_v31  ;;  %6196 = vmatprep.subr.bf16.mxu1 %v13649_v32  ;;  %v13703_v31 = vld [vmem:[#allocation8 + $0x334] ss:$40 sps:$4 sm:$0xff]   ;;  %v13701_v32 = vld [vmem:[#allocation8 + $0x330] ss:$40 sps:$4 sm:$0xff]  }
 0x257   :  { %6239 = vmatprep.subr.bf16.mxu0 %v13652_v36  ;;  %v13704_v36 = vld [vmem:[#allocation8 + $0x830] ss:$40 sps:$4 sm:$0xff]  }
 0x259   :  { %6197 = vmatpush1.bf16.msra.mxu1 %v13647_v33  ;;  %v13706_v33 = vld [vmem:[#allocation8 + $0x834] ss:$40 sps:$4 sm:$0xff]  }
 0x25a   :  { %6240 = vmatpush1.bf16.msra.mxu0 %v13650_v38  ;;  %6198 = vmatprep.subr.bf16.mxu1 %v13655_v37  ;;  %v13709_v38 = vld [vmem:[#allocation8 + $0x2e4] ss:$40 sps:$4 sm:$0xff]   ;;  %v13707_v37 = vld [vmem:[#allocation8 + $0x2e0] ss:$40 sps:$4 sm:$0xff]  }
 0x25b   :  { %6241 = vmatprep.subr.bf16.mxu0 %v13658_v39  ;;  %v13710_v39 = vld [vmem:[#allocation8 + $0x7e0] ss:$40 sps:$4 sm:$0xff]  }
 0x25d   :  { %6199 = vmatpush1.bf16.msra.mxu1 %v13653_v27  ;;  %v13712_v27 = vld [vmem:[#allocation8 + $0x7e4] ss:$40 sps:$4 sm:$0xff]  }
 0x25e   :  { %6242 = vmatpush1.bf16.msra.mxu0 %v13656_v42  ;;  %6200 = vmatprep.subr.bf16.mxu1 %v13661_v43  ;;  %v13715_v42 = vld [vmem:[#allocation8 + $0x294] ss:$40 sps:$4 sm:$0xff]   ;;  %v13713_v43 = vld [vmem:[#allocation8 + $0x290] ss:$40 sps:$4 sm:$0xff]  }
 0x25f   :  { %6243 = vmatprep.subr.bf16.mxu0 %v13664_v34  ;;  %v13716_v34 = vld [vmem:[#allocation8 + $0x790] ss:$40 sps:$4 sm:$0xff]  }
 0x261   :  { %6201 = vmatpush1.bf16.msra.mxu1 %v13659_v24  ;;  %v13718_v24 = vld [vmem:[#allocation8 + $0x794] ss:$40 sps:$4 sm:$0xff]  }
 0x262   :  { %6244 = vmatpush1.bf16.msra.mxu0 %v13662_v47  ;;  %6202 = vmatprep.subr.bf16.mxu1 %v13667_v45  ;;  %v13721_v47 = vld [vmem:[#allocation8 + $0xc44] ss:$40 sps:$4 sm:$0xff]  }
 0x263   :  { %6245 = vmatprep.subr.bf16.mxu0 %v13670_v48  ;;  %v13724_v45 = vld [vmem:[#allocation8 + $0x1144] ss:$40 sps:$4 sm:$0xff]   ;;  %v13722_v48 = vld [vmem:[#allocation8 + $0x1140] ss:$40 sps:$4 sm:$0xff]  }
 0x265   :  { %6203 = vmatpush1.bf16.msra.mxu1 %v13665_v46  ;;  %v13719_v46 = vld [vmem:[#allocation8 + $0xc40] ss:$40 sps:$4 sm:$0xff]  }
 0x266   :  { %6246 = vmatpush1.bf16.msra.mxu0 %v13668_v49  ;;  %6204 = vmatprep.subr.bf16.mxu1 %v13673_v50  ;;  %v13727_v49 = vld [vmem:[#allocation8 + $0xbf4] ss:$40 sps:$4 sm:$0xff]   ;;  %v15596_v50 = vpop.f32.mrf.mxu1 }
 0x267   :  { %6247 = vmatprep.subr.bf16.mxu0 %v13676_v30 }
 0x269   :  { %6205 = vmatpush2.bf16.msra.mxu1 %v13671_v51  ;;  %v13730_v51 = vld [vmem:[#allocation8 + $0x10f4] ss:$40 sps:$4 sm:$0xff]  }
 0x26a   :  { %6248 = vmatpush2.bf16.msra.mxu0 %v13674_v35  ;;  %6206 = vmatprep.subr.bf16.mxu1 %v13679_v53  ;;  %v13725_v35 = vld [vmem:[#allocation8 + $0xbf0] ss:$40 sps:$4 sm:$0xff]  }
 0x26b   :  { %6249 = vmatprep.subr.bf16.mxu0 %v13682_v40  ;;  %v13728_v53 = vld [vmem:[#allocation8 + $0x10f0] ss:$40 sps:$4 sm:$0xff]   ;;  %v13733_v40 = vld [vmem:[#allocation8 + $0xba4] ss:$40 sps:$4 sm:$0xff]  }
 0x26d   :  { %6207 = vmatpush2.bf16.msra.mxu1 %v13677_v29 }
 0x26e   :  { %6250 = vmatpush2.bf16.msra.mxu0 %v13680_v54  ;;  %6208 = vmatprep.subr.bf16.mxu1 %v13685_v58  ;;  %v13736_v54 = vld [vmem:[#allocation8 + $0x10a4] ss:$40 sps:$4 sm:$0xff]  }
 0x26f   :  { %6251 = vmatprep.subr.bf16.mxu0 %v13688_v63  ;;  %v13731_v63 = vld [vmem:[#allocation8 + $0xba0] ss:$40 sps:$4 sm:$0xff]  }
 0x271   :  { %6209 = vmatpush2.bf16.msra.mxu1 %v13683_v59 }
 0x272   :  { %6252 = vmatpush2.bf16.msra.mxu0 %v13686_v2  ;;  %6210 = vmatprep.subr.bf16.mxu1 %v13691_v8  ;;  %v13734_v2 = vld [vmem:[#allocation8 + $0x10a0] ss:$40 sps:$4 sm:$0xff]  }
 0x273   :  { %6253 = vmatprep.subr.bf16.mxu0 %v13694_v9 }
 0x275   :  { %6211 = vmatpush2.bf16.msra.mxu1 %v13689_v20  ;;  %v13742_v20 = vld [vmem:[#allocation8 + $0x1054] ss:$40 sps:$4 sm:$0xff]  }
 0x276   :  { %6254 = vmatpush2.bf16.msra.mxu0 %v13692_v10  ;;  %6212 = vmatprep.subr.bf16.mxu1 %v13697_v11  ;;  %v13737_v11 = vld [vmem:[#allocation8 + $0xb50] ss:$40 sps:$4 sm:$0xff]  }
 0x277   :  { %6255 = vmatprep.subr.bf16.mxu0 %v13700_v13 }
 0x279   :  { %6213 = vmatpush2.bf16.msra.mxu1 %v13695_v12  ;;  %v13740_v12 = vld [vmem:[#allocation8 + $0x1050] ss:$40 sps:$4 sm:$0xff]  }
 0x27a   :  { %6256 = vmatpush2.bf16.msra.mxu0 %v13698_v28  ;;  %6214 = vmatprep.subr.bf16.mxu1 %v13703_v31  ;;  %v13745_v28 = vld [vmem:[#allocation8 + $0xb04] ss:$40 sps:$4 sm:$0xff]  }
 0x27b   :  { %6257 = vmatprep.subr.bf16.mxu0 %v13706_v33  ;;  %v13748_v31 = vld [vmem:[#allocation8 + $0x1004] ss:$40 sps:$4 sm:$0xff]   ;;  %v13751_v33 = vld [vmem:[#allocation8 + $0xab4] ss:$40 sps:$4 sm:$0xff]  }
 0x27d   :  { %6215 = vmatpush2.bf16.msra.mxu1 %v13701_v32  ;;  %v13746_v32 = vld [vmem:[#allocation8 + $0x1000] ss:$40 sps:$4 sm:$0xff]  }
 0x27e   :  { %6258 = vmatpush2.bf16.msra.mxu0 %v13704_v36  ;;  %6216 = vmatprep.subr.bf16.mxu1 %v13709_v38  ;;  %v13749_v36 = vld [vmem:[#allocation8 + $0xab0] ss:$40 sps:$4 sm:$0xff]   ;;  %v13754_v38 = vld [vmem:[#allocation8 + $0xfb4] ss:$40 sps:$4 sm:$0xff]  }
 0x27f   :  { %6259 = vmatprep.subr.bf16.mxu0 %v13712_v27  ;;  %v13757_v27 = vld [vmem:[#allocation8 + $0xa64] ss:$40 sps:$4 sm:$0xff]  }
 0x281   :  { %6217 = vmatpush2.bf16.msra.mxu1 %v13707_v37  ;;  %v13752_v37 = vld [vmem:[#allocation8 + $0xfb0] ss:$40 sps:$4 sm:$0xff]  }
 0x282   :  { %6260 = vmatpush2.bf16.msra.mxu0 %v13710_v39  ;;  %6218 = vmatprep.subr.bf16.mxu1 %v13715_v42  ;;  %v13755_v39 = vld [vmem:[#allocation8 + $0xa60] ss:$40 sps:$4 sm:$0xff]   ;;  %v13760_v42 = vld [vmem:[#allocation8 + $0xf64] ss:$40 sps:$4 sm:$0xff]  }
 0x283   :  { %6261 = vmatprep.subr.bf16.mxu0 %v13718_v24  ;;  %v13763_v24 = vld [vmem:[#allocation8 + $0xa14] ss:$40 sps:$4 sm:$0xff]  }
 0x285   :  { %6219 = vmatpush2.bf16.msra.mxu1 %v13713_v43  ;;  %v13758_v43 = vld [vmem:[#allocation8 + $0xf60] ss:$40 sps:$4 sm:$0xff]  }
 0x286   :  { %6262 = vmatpush2.bf16.msra.mxu0 %v13716_v34  ;;  %6274 = vmatprep.subr.bf16.mxu1 %v13721_v47  ;;  %v13761_v34 = vld [vmem:[#allocation8 + $0xa10] ss:$40 sps:$4 sm:$0xff]   ;;  %v13766_v47 = vld [vmem:[#allocation8 + $0xf14] ss:$40 sps:$4 sm:$0xff]  }
 0x287   :  { %6317 = vmatprep.subr.bf16.mxu0 %v13724_v45  ;;  %v13764_v45 = vld [vmem:[#allocation8 + $0xf10] ss:$40 sps:$4 sm:$0xff]  }
 0x288   :  { %v5964_v30 = vpop.f32.mrf.mxu1  ;;  %6221 = vmatmul.mubr.bf16.vlgmr.msra.gmra.mxu1 %v15494_v62 }
 0x289   :  { %v5965_v29 = vadd.f32 %v5964_v30, %v15591_v7  ;;  %6264 = vmatmul.mubr.bf16.vlgmr.msra.gmra.mxu0 %v15488_v57  ;;  %6275 = vmatpush1.bf16.msra.mxu1 %v13719_v46  ;;  %v13739_v7 = vld [vmem:[#allocation8 + $0xb54] ss:$40 sps:$4 sm:$0xff]   ;;  %v13769_v46 = vld [vmem:[#allocation8 + $0xec4] ss:$40 sps:$4 sm:$0xff]  }
 0x28a   :  { %6306 = vmatprep.mubr.bf16.mxu1 %v15517_v55  ;;  %6318 = vmatpush1.bf16.msra.mxu0 %v13722_v48  ;;  %v15602_v58 = vpop.f32.mrf.mxu1  ;;  %v13767_v48 = vld [vmem:[#allocation8 + $0xec0] ss:$40 sps:$4 sm:$0xff]   ;;  %v13775_v30 = vld [vmem:[#allocation8 + $0xe74] ss:$40 sps:$4 sm:$0xff]  }
 0x28b   :  { %6349 = vmatprep.mubr.bf16.mxu0 %v15519_v56  ;;  %6276 = vmatprep.subr.bf16.mxu1 %v13727_v49  ;;  %v6833_v9 = vmax.f32 %v5965_v29, 0.0  ;;  %v13772_v49 = vld [vmem:[#allocation8 + $0x13c4] ss:$40 sps:$4 sm:$0xff]   ;;  %v13776_v29 = vld [vmem:[#allocation8 + $0x1370] ss:$40 sps:$4 sm:$0xff]  }
 0x28c   :  { %v5968_v59 = vpop.f32.mrf.mxu1  ;;  %6319 = vmatprep.subr.bf16.mxu0 %v13730_v51  ;;  %v13770_v51 = vld [vmem:[#allocation8 + $0x13c0] ss:$40 sps:$4 sm:$0xff]  }
 0x28d   :  { %v5969_v8 = vadd.f32 %v5968_v59, %v15594_v18  ;;  %6277 = vmatpush1.bf16.msra.mxu1 %v13725_v35  ;;  %v13743_v18 = vld [vmem:[#allocation8 + $0xb00] ss:$40 sps:$4 sm:$0xff]   ;;  %v13773_v35 = vld [vmem:[#allocation8 + $0xe70] ss:$40 sps:$4 sm:$0xff]   ;;  %v13784_v59 = vld [vmem:[#allocation8 + $0x1324] ss:$40 sps:$4 sm:$0xff]  }
 0x28e   :  { %6320 = vmatpush1.bf16.msra.mxu0 %v13728_v53  ;;  %6278 = vmatprep.subr.bf16.mxu1 %v13733_v40  ;;  %v13778_v53 = vld [vmem:[#allocation8 + $0x1374] ss:$40 sps:$4 sm:$0xff]   ;;  %v13781_v40 = vld [vmem:[#allocation8 + $0xe24] ss:$40 sps:$4 sm:$0xff]  }
 0x28f   :  { %v6843_v10 = vmax.f32 %v5969_v8, 0.0  ;;  %6321 = vmatprep.subr.bf16.mxu0 %v13736_v54  ;;  %v13779_v54 = vld [vmem:[#allocation8 + $0xe20] ss:$40 sps:$4 sm:$0xff]   ;;  %v13785_v8 = vld [vmem:[#allocation8 + $0xdd0] ss:$40 sps:$4 sm:$0xff]  }
 0x291   :  { %v15606_v13 = vpack.c.bf16 %v6843_v10, %v6833_v9  ;;  %6279 = vmatpush1.bf16.msra.mxu1 %v13731_v63  ;;  %v13782_v63 = vld [vmem:[#allocation8 + $0x1320] ss:$40 sps:$4 sm:$0xff]   ;;  %v13793_v9 = vld [vmem:[#allocation8 + $0xd84] ss:$40 sps:$4 sm:$0xff]  }
 0x292   :  { %6322 = vmatpush1.bf16.msra.mxu0 %v13734_v2  ;;  %6280 = vmatprep.subr.bf16.mxu1 %v13739_v7  ;;  %v13787_v2 = vld [vmem:[#allocation8 + $0xdd4] ss:$40 sps:$4 sm:$0xff]   ;;  %v13791_v10 = vld [vmem:[#allocation8 + $0xd80] ss:$40 sps:$4 sm:$0xff]  }
 0x293   :  { %6323 = vmatprep.subr.bf16.mxu0 %v13742_v20  ;;  %v13790_v7 = vld [vmem:[#allocation8 + $0x12d4] ss:$40 sps:$4 sm:$0xff]   ;;  %v13788_v20 = vld [vmem:[#allocation8 + $0x12d0] ss:$40 sps:$4 sm:$0xff]  }
 0x295   :  { %6281 = vmatpush1.bf16.msra.mxu1 %v13737_v11  ;;  %v13796_v11 = vld [vmem:[#allocation8 + $0x1284] ss:$40 sps:$4 sm:$0xff]  }
 0x296   :  { %6324 = vmatpush1.bf16.msra.mxu0 %v13740_v12  ;;  %6282 = vmatprep.subr.bf16.mxu1 %v13745_v28  ;;  %v13794_v12 = vld [vmem:[#allocation8 + $0x1280] ss:$40 sps:$4 sm:$0xff]   ;;  %v13799_v28 = vld [vmem:[#allocation8 + $0xd34] ss:$40 sps:$4 sm:$0xff]  }
 0x297   :  { %6325 = vmatprep.subr.bf16.mxu0 %v13748_v31  ;;  %v13797_v31 = vld [vmem:[#allocation8 + $0xd30] ss:$40 sps:$4 sm:$0xff]  }
 0x299   :  { %6283 = vmatpush1.bf16.msra.mxu1 %v13743_v18  ;;  %v13802_v18 = vld [vmem:[#allocation8 + $0x1234] ss:$40 sps:$4 sm:$0xff]  }
 0x29a   :  { %6326 = vmatpush1.bf16.msra.mxu0 %v13746_v32  ;;  %6284 = vmatprep.subr.bf16.mxu1 %v13751_v33  ;;  %v15608_v32 = vpop.f32.mrf.mxu0  ;;  %v13800_v33 = vld [vmem:[#allocation8 + $0x1230] ss:$40 sps:$4 sm:$0xff]  }
 0x29b   :  { %6327 = vmatprep.subr.bf16.mxu0 %v13754_v38 }
 0x29c   :  { %v6007_v38 = vpop.f32.mrf.mxu0 }
 0x29d   :  { %6285 = vmatpush1.bf16.msra.mxu1 %v13749_v36  ;;  %v13805_v36 = vld [vmem:[#allocation8 + $0xce4] ss:$40 sps:$4 sm:$0xff]  }
 0x29e   :  { %6328 = vmatpush1.bf16.msra.mxu0 %v13752_v37  ;;  %6286 = vmatprep.subr.bf16.mxu1 %v13757_v27  ;;  %v13803_v37 = vld [vmem:[#allocation8 + $0xce0] ss:$40 sps:$4 sm:$0xff]   ;;  %v13808_v27 = vld [vmem:[#allocation8 + $0x11e4] ss:$40 sps:$4 sm:$0xff]  }
 0x29f   :  { %6329 = vmatprep.subr.bf16.mxu0 %v13760_v42  ;;  %v13811_v42 = vld [vmem:[#allocation8 + $0xc94] ss:$40 sps:$4 sm:$0xff]  }
 0x2a1   :  { %6287 = vmatpush1.bf16.msra.mxu1 %v13755_v39  ;;  %v13806_v39 = vld [vmem:[#allocation8 + $0x11e0] ss:$40 sps:$4 sm:$0xff]  }
 0x2a2   :  { %6330 = vmatpush1.bf16.msra.mxu0 %v13758_v43  ;;  %6288 = vmatprep.subr.bf16.mxu1 %v13763_v24  ;;  %v15610_v43 = vpop.f32.mrf.mxu0  ;;  %v13809_v24 = vld [vmem:[#allocation8 + $0xc90] ss:$40 sps:$4 sm:$0xff]  }
 0x2a3   :  { %6331 = vmatprep.subr.bf16.mxu0 %v13766_v47  ;;  %v13812_v47 = vld [vmem:[#allocation8 + $0x1190] ss:$40 sps:$4 sm:$0xff]  }
 0x2a5   :  { %6289 = vmatpush1.bf16.msra.mxu1 %v13761_v34  ;;  %v13814_v34 = vld [vmem:[#allocation8 + $0x1194] ss:$40 sps:$4 sm:$0xff]  }
 0x2a6   :  { %6332 = vmatpush1.bf16.msra.mxu0 %v13764_v45  ;;  %6290 = vmatprep.subr.bf16.mxu1 %v13769_v46  ;;  %v13817_v45 = vld [vmem:[#allocation8 + $0x1644] ss:$40 sps:$4 sm:$0xff]  }
 0x2a7   :  { %6333 = vmatprep.subr.bf16.mxu0 %v13772_v49  ;;  %v13820_v46 = vld [vmem:[#allocation8 + $0x24c] ss:$40 sps:$4 sm:$0xff]  }
 0x2a9   :  { %6291 = vmatpush2.bf16.msra.mxu1 %v13767_v48  ;;  %v15199_v48 = vld [vmem:[#allocation10] sm:$0xff] }
 0x2aa   :  { %6334 = vmatpush2.bf16.msra.mxu0 %v13770_v51  ;;  %6292 = vmatprep.subr.bf16.mxu1 %v13775_v30  ;;  %v1719_v49 = vrot.slane %v15199_v48, %v15467_v22  ;;  %v6011_v51 = vpop.f32.mrf.mxu0  ;;  %v13815_v30 = vld [vmem:[#allocation8 + $0x1640] ss:$40 sps:$4 sm:$0xff]  }
 0x2ab   :  { %6335 = vmatprep.subr.bf16.mxu0 %v13778_v53  ;;  %v13823_v53 = vld [vmem:[#allocation8 + $0x15f4] ss:$40 sps:$4 sm:$0xff]   ;;  %v13842_v48 = vld [vmem:[#allocation8 + $0x108] ss:$40 sps:$4 sm:$0xff]  }
 0x2ad   :  { %6293 = vmatpush2.bf16.msra.mxu1 %v13773_v35  ;;  %v13818_v35 = vld [vmem:[#allocation8 + $0x248] ss:$40 sps:$4 sm:$0xff]  }
 0x2ae   :  { %6336 = vmatpush2.bf16.msra.mxu0 %v13776_v29  ;;  %6294 = vmatprep.subr.bf16.mxu1 %v13781_v40  ;;  %v15613_v29 = vpop.f32.mrf.mxu1  ;;  %v13826_v40 = vld [vmem:[#allocation8 + $0x1fc] ss:$40 sps:$4 sm:$0xff]  }
 0x2af   :  { %6337 = vmatprep.subr.bf16.mxu0 %v13784_v59  ;;  %v15615_v59 = vpop.f32.mrf.mxu0 }
 0x2b1   :  { %6295 = vmatpush2.bf16.msra.mxu1 %v13779_v54  ;;  %v6008_v54 = vadd.f32 %v6007_v38, %v1719_v49 }
 0x2b2   :  { %6338 = vmatpush2.bf16.msra.mxu0 %v13782_v63  ;;  %6296 = vmatprep.subr.bf16.mxu1 %v13787_v2  ;;  %v13821_v2 = vld [vmem:[#allocation8 + $0x15f0] ss:$40 sps:$4 sm:$0xff]  }
 0x2b3   :  { %6339 = vmatprep.subr.bf16.mxu0 %v13790_v7 }
 0x2b5   :  { %6297 = vmatpush2.bf16.msra.mxu1 %v13785_v8  ;;  %v13824_v8 = vld [vmem:[#allocation8 + $0x1f8] ss:$40 sps:$4 sm:$0xff]  }
 0x2b6   :  { %6340 = vmatpush2.bf16.msra.mxu0 %v13788_v20  ;;  %6298 = vmatprep.subr.bf16.mxu1 %v13793_v9  ;;  %v13829_v9 = vld [vmem:[#allocation8 + $0x15a4] ss:$40 sps:$4 sm:$0xff]  }
 0x2b7   :  { %6341 = vmatprep.subr.bf16.mxu0 %v13796_v11 }
 0x2b9   :  { %6299 = vmatpush2.bf16.msra.mxu1 %v13791_v10  ;;  %v13832_v10 = vld [vmem:[#allocation8 + $0x1ac] ss:$40 sps:$4 sm:$0xff]  }
 0x2ba   :  { %6342 = vmatpush2.bf16.msra.mxu0 %v13794_v12  ;;  %6300 = vmatprep.subr.bf16.mxu1 %v13799_v28  ;;  %v6012_v12 = vadd.f32 %v6011_v51, %v1719_v49  ;;  %v13847_v49 = vld [vmem:[#allocation8 + $0x14b4] ss:$40 sps:$4 sm:$0xff]   ;;  %v13845_v51 = vld [vmem:[#allocation8 + $0x14b0] ss:$40 sps:$4 sm:$0xff]  }
 0x2bb   :  { %6343 = vmatprep.subr.bf16.mxu0 %v13802_v18 }
 0x2bd   :  { %6301 = vmatpush2.bf16.msra.mxu1 %v13797_v31 }
 0x2be   :  { %6344 = vmatpush2.bf16.msra.mxu0 %v13800_v33  ;;  %6302 = vmatprep.subr.bf16.mxu1 %v13805_v36  ;;  %v13827_v33 = vld [vmem:[#allocation8 + $0x15a0] ss:$40 sps:$4 sm:$0xff]  }
 0x2bf   :  { %6345 = vmatprep.subr.bf16.mxu0 %v13808_v27  ;;  %v13830_v36 = vld [vmem:[#allocation8 + $0x1a8] ss:$40 sps:$4 sm:$0xff]   ;;  %v13838_v27 = vld [vmem:[#allocation8 + $0x15c] ss:$40 sps:$4 sm:$0xff]  }
 0x2c1   :  { %6303 = vmatpush2.bf16.msra.mxu1 %v13803_v37  ;;  %v13835_v37 = vld [vmem:[#allocation8 + $0x1554] ss:$40 sps:$4 sm:$0xff]  }
 0x2c2   :  { %6346 = vmatpush2.bf16.msra.mxu0 %v13806_v39  ;;  %6304 = vmatprep.subr.bf16.mxu1 %v13811_v42 }
 0x2c3   :  { %6347 = vmatprep.subr.bf16.mxu0 %v13814_v34  ;;  %v13836_v34 = vld [vmem:[#allocation8 + $0x158] ss:$40 sps:$4 sm:$0xff]  }
 0x2c5   :  { %6305 = vmatpush2.bf16.msra.mxu1 %v13809_v24  ;;  %v13833_v24 = vld [vmem:[#allocation8 + $0x1550] ss:$40 sps:$4 sm:$0xff]  }
 0x2c6   :  { %6348 = vmatpush2.bf16.msra.mxu0 %v13812_v47  ;;  %6360 = vmatprep.subr.bf16.mxu1 %v13817_v45  ;;  %v13841_v47 = vld [vmem:[#allocation8 + $0x1504] ss:$40 sps:$4 sm:$0xff]   ;;  %v13839_v45 = vld [vmem:[#allocation8 + $0x1500] ss:$40 sps:$4 sm:$0xff]  }
 0x2c7   :  { %6403 = vmatprep.subr.bf16.mxu0 %v13820_v46  ;;  %v13844_v46 = vld [vmem:[#allocation8 + $0x10c] ss:$40 sps:$4 sm:$0xff]  }
 0x2c8   :  { %v6050_v63 = vpop.f32.mrf.mxu1  ;;  %6307 = vmatmul.mubr.bf16.vlgmr.msra.gmra.mxu1 %v15547_v3 }
 0x2c9   :  { %v6051_v7 = vadd.f32 %v6050_v63, %v6008_v54  ;;  %v6093_v20 = vpop.f32.mrf.mxu0  ;;  %6350 = vmatmul.mubr.bf16.vlgmr.msra.gmra.mxu0 %v15545_v1  ;;  %6361 = vmatpush1.bf16.msra.mxu1 %v13815_v30  ;;  %v13850_v30 = vld [vmem:[#allocation8 + $0xbc] ss:$40 sps:$4 sm:$0xff]   ;;  %v13856_v54 = vld [vmem:[#allocation8 + $0x6c] ss:$40 sps:$4 sm:$0xff]   ;;  %v13854_v63 = vld [vmem:[#allocation8 + $0x68] ss:$40 sps:$4 sm:$0xff]  }
 0x2ca   :  { %6392 = vmatprep.mubr.bf16.mxu1 %v15549_v6  ;;  %6404 = vmatpush1.bf16.msra.mxu0 %v13818_v35  ;;  %v15620_v11 = vpop.f32.mrf.mxu1  ;;  %v13848_v35 = vld [vmem:[#allocation8 + $0xb8] ss:$40 sps:$4 sm:$0xff]  }
 0x2cb   :  { %v15622_v28 = vadd.f32 %v6093_v20, %v6051_v7  ;;  %6435 = vmatprep.mubr.bf16.mxu0 %v15490_v60  ;;  %v15625_v31 = vpop.f32.mrf.mxu0  ;;  %6362 = vmatprep.subr.bf16.mxu1 %v13823_v53  ;;  %v13853_v53 = vld [vmem:[#allocation8 + $0x1464] ss:$40 sps:$4 sm:$0xff]   ;;  %v13860_v20 = vld [vmem:[#allocation8 + $0x18] ss:$40 sps:$4 sm:$0xff]  }
 0x2cc   :  { %v6054_v18 = vpop.f32.mrf.mxu1  ;;  %6405 = vmatprep.subr.bf16.mxu0 %v13826_v40  ;;  %v13851_v40 = vld [vmem:[#allocation8 + $0x1460] ss:$40 sps:$4 sm:$0xff]   ;;  %v13862_v7 = vld [vmem:[#allocation8 + $0x1c] ss:$40 sps:$4 sm:$0xff]  }
 0x2cd   :  { %v6055_v38 = vadd.f32 %v6054_v18, %v6012_v12  ;;  %6363 = vmatpush1.bf16.msra.mxu1 %v13821_v2  ;;  %v6097_v39 = vpop.f32.mrf.mxu0  ;;  %v13859_v2 = vld [vmem:[#allocation8 + $0x1414] ss:$40 sps:$4 sm:$0xff]   ;;  %v13866_v18 = vld [vmem:[#allocation8 + $0x4c8] ss:$40 sps:$4 sm:$0xff]  }
 0x2ce   :  { %6406 = vmatpush1.bf16.msra.mxu0 %v13824_v8  ;;  %6364 = vmatprep.subr.bf16.mxu1 %v13829_v9  ;;  %v13857_v8 = vld [vmem:[#allocation8 + $0x1410] ss:$40 sps:$4 sm:$0xff]   ;;  %v13865_v9 = vld [vmem:[#allocation8 + $0x18c4] ss:$40 sps:$4 sm:$0xff]  }
 0x2cf   :  { %v15627_v42 = vadd.f32 %v6097_v39, %v6055_v38  ;;  %6407 = vmatprep.subr.bf16.mxu0 %v13832_v10  ;;  %v13863_v10 = vld [vmem:[#allocation8 + $0x18c0] ss:$40 sps:$4 sm:$0xff]   ;;  %v13868_v12 = vld [vmem:[#allocation8 + $0x4cc] ss:$40 sps:$4 sm:$0xff]   ;;  %v13874_v38 = vld [vmem:[#allocation8 + $0x47c] ss:$40 sps:$4 sm:$0xff]  }
 0x2d0   :  { %v13875_v39 = vld [vmem:[#allocation8 + $0x1820] ss:$40 sps:$4 sm:$0xff]  }
 0x2d1   :  { %6365 = vmatpush1.bf16.msra.mxu1 %v13827_v33  ;;  %v13871_v33 = vld [vmem:[#allocation8 + $0x1874] ss:$40 sps:$4 sm:$0xff]  }
 0x2d2   :  { %6408 = vmatpush1.bf16.msra.mxu0 %v13830_v36  ;;  %6366 = vmatprep.subr.bf16.mxu1 %v13835_v37  ;;  %v13869_v36 = vld [vmem:[#allocation8 + $0x1870] ss:$40 sps:$4 sm:$0xff]  }
 0x2d3   :  { %6409 = vmatprep.subr.bf16.mxu0 %v13838_v27  ;;  %v13872_v37 = vld [vmem:[#allocation8 + $0x478] ss:$40 sps:$4 sm:$0xff]   ;;  %v13877_v27 = vld [vmem:[#allocation8 + $0x1824] ss:$40 sps:$4 sm:$0xff]  }
 0x2d5   :  { %6367 = vmatpush1.bf16.msra.mxu1 %v13833_v24  ;;  %v13880_v24 = vld [vmem:[#allocation8 + $0x42c] ss:$40 sps:$4 sm:$0xff]  }
 0x2d6   :  { %6410 = vmatpush1.bf16.msra.mxu0 %v13836_v34  ;;  %6368 = vmatprep.subr.bf16.mxu1 %v13841_v47  ;;  %v13878_v34 = vld [vmem:[#allocation8 + $0x428] ss:$40 sps:$4 sm:$0xff]   ;;  %v13883_v47 = vld [vmem:[#allocation8 + $0x17d4] ss:$40 sps:$4 sm:$0xff]  }
 0x2d7   :  { %6411 = vmatprep.subr.bf16.mxu0 %v13844_v46  ;;  %v13886_v46 = vld [vmem:[#allocation8 + $0x3dc] ss:$40 sps:$4 sm:$0xff]  }
 0x2d9   :  { %6369 = vmatpush1.bf16.msra.mxu1 %v13839_v45  ;;  %v13881_v45 = vld [vmem:[#allocation8 + $0x17d0] ss:$40 sps:$4 sm:$0xff]  }
 0x2da   :  { %6412 = vmatpush1.bf16.msra.mxu0 %v13842_v48  ;;  %6370 = vmatprep.subr.bf16.mxu1 %v13847_v49  ;;  %v13884_v48 = vld [vmem:[#allocation8 + $0x3d8] ss:$40 sps:$4 sm:$0xff]   ;;  %v13889_v49 = vld [vmem:[#allocation8 + $0x1784] ss:$40 sps:$4 sm:$0xff]  }
 0x2db   :  { %6413 = vmatprep.subr.bf16.mxu0 %v13850_v30  ;;  %v13892_v30 = vld [vmem:[#allocation8 + $0x38c] ss:$40 sps:$4 sm:$0xff]  }
 0x2dd   :  { %6371 = vmatpush1.bf16.msra.mxu1 %v13845_v51  ;;  %v13887_v51 = vld [vmem:[#allocation8 + $0x1780] ss:$40 sps:$4 sm:$0xff]  }
 0x2de   :  { %6414 = vmatpush1.bf16.msra.mxu0 %v13848_v35  ;;  %6372 = vmatprep.subr.bf16.mxu1 %v13853_v53  ;;  %v13890_v35 = vld [vmem:[#allocation8 + $0x388] ss:$40 sps:$4 sm:$0xff]   ;;  %v13895_v53 = vld [vmem:[#allocation8 + $0x1734] ss:$40 sps:$4 sm:$0xff]  }
 0x2df   :  { %6415 = vmatprep.subr.bf16.mxu0 %v13856_v54  ;;  %v13898_v54 = vld [vmem:[#allocation8 + $0x33c] ss:$40 sps:$4 sm:$0xff]  }
 0x2e1   :  { %6373 = vmatpush1.bf16.msra.mxu1 %v13851_v40  ;;  %v13893_v40 = vld [vmem:[#allocation8 + $0x1730] ss:$40 sps:$4 sm:$0xff]  }
 0x2e2   :  { %6416 = vmatpush1.bf16.msra.mxu0 %v13854_v63  ;;  %6374 = vmatprep.subr.bf16.mxu1 %v13859_v2  ;;  %v13896_v63 = vld [vmem:[#allocation8 + $0x338] ss:$40 sps:$4 sm:$0xff]   ;;  %v13901_v2 = vld [vmem:[#allocation8 + $0x16e4] ss:$40 sps:$4 sm:$0xff]  }
 0x2e3   :  { %6417 = vmatprep.subr.bf16.mxu0 %v13862_v7  ;;  %v13904_v7 = vld [vmem:[#allocation8 + $0x2ec] ss:$40 sps:$4 sm:$0xff]  }
 0x2e5   :  { %6375 = vmatpush1.bf16.msra.mxu1 %v13857_v8  ;;  %v13899_v8 = vld [vmem:[#allocation8 + $0x16e0] ss:$40 sps:$4 sm:$0xff]  }
 0x2e6   :  { %6418 = vmatpush1.bf16.msra.mxu0 %v13860_v20  ;;  %6376 = vmatprep.subr.bf16.mxu1 %v13865_v9  ;;  %v13902_v20 = vld [vmem:[#allocation8 + $0x2e8] ss:$40 sps:$4 sm:$0xff]   ;;  %v13907_v9 = vld [vmem:[#allocation8 + $0x1694] ss:$40 sps:$4 sm:$0xff]  }
 0x2e7   :  { %6419 = vmatprep.subr.bf16.mxu0 %v13868_v12  ;;  %v13910_v12 = vld [vmem:[#allocation8 + $0x29c] ss:$40 sps:$4 sm:$0xff]  }
 0x2e9   :  { %6377 = vmatpush2.bf16.msra.mxu1 %v13863_v10  ;;  %v13905_v10 = vld [vmem:[#allocation8 + $0x1690] ss:$40 sps:$4 sm:$0xff]  }
 0x2ea   :  { %6420 = vmatpush2.bf16.msra.mxu0 %v13866_v18  ;;  %6378 = vmatprep.subr.bf16.mxu1 %v13871_v33  ;;  %v13908_v18 = vld [vmem:[#allocation8 + $0x298] ss:$40 sps:$4 sm:$0xff]   ;;  %v13913_v33 = vld [vmem:[#allocation8 + $0x74c] ss:$40 sps:$4 sm:$0xff]  }
 0x2eb   :  { %6421 = vmatprep.subr.bf16.mxu0 %v13874_v38  ;;  %v13911_v38 = vld [vmem:[#allocation8 + $0x748] ss:$40 sps:$4 sm:$0xff]  }
 0x2ed   :  { %6379 = vmatpush2.bf16.msra.mxu1 %v13869_v36  ;;  %v13916_v36 = vld [vmem:[#allocation8 + $0xc4c] ss:$40 sps:$4 sm:$0xff]  }
 0x2ee   :  { %6422 = vmatpush2.bf16.msra.mxu0 %v13872_v37  ;;  %6380 = vmatprep.subr.bf16.mxu1 %v13877_v27  ;;  %v13914_v37 = vld [vmem:[#allocation8 + $0xc48] ss:$40 sps:$4 sm:$0xff]   ;;  %v13919_v27 = vld [vmem:[#allocation8 + $0x6fc] ss:$40 sps:$4 sm:$0xff]  }
 0x2ef   :  { %6423 = vmatprep.subr.bf16.mxu0 %v13880_v24  ;;  %v13922_v24 = vld [vmem:[#allocation8 + $0xbfc] ss:$40 sps:$4 sm:$0xff]  }
 0x2f1   :  { %6381 = vmatpush2.bf16.msra.mxu1 %v13875_v39  ;;  %v15629_v39 = vpop.f32.mrf.mxu1 }
 0x2f2   :  { %6424 = vmatpush2.bf16.msra.mxu0 %v13878_v34  ;;  %6382 = vmatprep.subr.bf16.mxu1 %v13883_v47  ;;  %v15631_v34 = vpop.f32.mrf.mxu0 }
 0x2f3   :  { %6425 = vmatprep.subr.bf16.mxu0 %v13886_v46  ;;  %v13920_v46 = vld [vmem:[#allocation8 + $0xbf8] ss:$40 sps:$4 sm:$0xff]  }
 0x2f5   :  { %6383 = vmatpush2.bf16.msra.mxu1 %v13881_v45  ;;  %v13917_v45 = vld [vmem:[#allocation8 + $0x6f8] ss:$40 sps:$4 sm:$0xff]  }
 0x2f6   :  { %6426 = vmatpush2.bf16.msra.mxu0 %v13884_v48  ;;  %6384 = vmatprep.subr.bf16.mxu1 %v13889_v49 }
 0x2f7   :  { %6427 = vmatprep.subr.bf16.mxu0 %v13892_v30  ;;  %v13928_v30 = vld [vmem:[#allocation8 + $0xbac] ss:$40 sps:$4 sm:$0xff]  }
 0x2f9   :  { %6385 = vmatpush2.bf16.msra.mxu1 %v13887_v51  ;;  %v13925_v51 = vld [vmem:[#allocation8 + $0x6ac] ss:$40 sps:$4 sm:$0xff]  }
 0x2fa   :  { %6428 = vmatpush2.bf16.msra.mxu0 %v13890_v35  ;;  %6386 = vmatprep.subr.bf16.mxu1 %v13895_v53 }
 0x2fb   :  { %6429 = vmatprep.subr.bf16.mxu0 %v13898_v54 }
 0x2fd   :  { %6387 = vmatpush2.bf16.msra.mxu1 %v13893_v40 }
 0x2fe   :  { %6430 = vmatpush2.bf16.msra.mxu0 %v13896_v63  ;;  %6388 = vmatprep.subr.bf16.mxu1 %v13901_v2  ;;  %v13926_v63 = vld [vmem:[#allocation8 + $0xba8] ss:$40 sps:$4 sm:$0xff]  }
 0x2ff   :  { %6431 = vmatprep.subr.bf16.mxu0 %v13904_v7  ;;  %v13934_v7 = vld [vmem:[#allocation8 + $0xb5c] ss:$40 sps:$4 sm:$0xff]  }
 0x301   :  { %6389 = vmatpush2.bf16.msra.mxu1 %v13899_v8  ;;  %v13931_v8 = vld [vmem:[#allocation8 + $0x65c] ss:$40 sps:$4 sm:$0xff]  }
 0x302   :  { %6432 = vmatpush2.bf16.msra.mxu0 %v13902_v20  ;;  %6390 = vmatprep.subr.bf16.mxu1 %v13907_v9 }
 0x303   :  { %6433 = vmatprep.subr.bf16.mxu0 %v13910_v12 }
 0x305   :  { %6391 = vmatpush2.bf16.msra.mxu1 %v13905_v10 }
 0x306   :  { %6434 = vmatpush2.bf16.msra.mxu0 %v13908_v18  ;;  %6446 = vmatprep.subr.bf16.mxu1 %v13913_v33  ;;  %v13929_v18 = vld [vmem:[#allocation8 + $0x658] ss:$40 sps:$4 sm:$0xff]  }
 0x307   :  { %6489 = vmatprep.subr.bf16.mxu0 %v13916_v36  ;;  %v13932_v33 = vld [vmem:[#allocation8 + $0xb58] ss:$40 sps:$4 sm:$0xff]   ;;  %v13937_v36 = vld [vmem:[#allocation8 + $0x60c] ss:$40 sps:$4 sm:$0xff]  }
 0x308   :  { %v6136_v47 = vpop.f32.mrf.mxu1  ;;  %6393 = vmatmul.mubr.bf16.vlgmr.msra.gmra.mxu1 %v15559_v44 }
 0x309   :  { %v6137_v48 = vadd.f32 %v6136_v47, %v15622_v28  ;;  %v6179_v49 = vpop.f32.mrf.mxu0  ;;  %6436 = vmatmul.mubr.bf16.vlgmr.msra.gmra.mxu0 %v15494_v62  ;;  %6447 = vmatpush1.bf16.msra.mxu1 %v13911_v38  ;;  %v13923_v28 = vld [vmem:[#allocation8 + $0x6a8] ss:$40 sps:$4 sm:$0xff]   ;;  %v13941_v47 = vld [vmem:[#allocation8 + $0x5b8] ss:$40 sps:$4 sm:$0xff]  }
 0x30a   :  { %6478 = vmatprep.mubr.bf16.mxu1 %v15492_v61  ;;  %6490 = vmatpush1.bf16.msra.mxu0 %v13914_v37  ;;  %v15637_v35 = vpop.f32.mrf.mxu1  ;;  %v13940_v37 = vld [vmem:[#allocation8 + $0xb0c] ss:$40 sps:$4 sm:$0xff]  }
 0x30b   :  { %v6180_v53 = vadd.f32 %v6179_v49, %v6137_v48  ;;  %6521 = vmatprep.mubr.bf16.mxu0 %v15517_v55  ;;  %v15640_v40 = vpop.f32.mrf.mxu0  ;;  %6448 = vmatprep.subr.bf16.mxu1 %v13919_v27  ;;  %v13938_v27 = vld [vmem:[#allocation8 + $0xb08] ss:$40 sps:$4 sm:$0xff]   ;;  %v13949_v48 = vld [vmem:[#allocation8 + $0x56c] ss:$40 sps:$4 sm:$0xff]  }
 0x30c   :  { %v6140_v54 = vpop.f32.mrf.mxu1  ;;  %6491 = vmatprep.subr.bf16.mxu0 %v13922_v24  ;;  %v13943_v24 = vld [vmem:[#allocation8 + $0x5bc] ss:$40 sps:$4 sm:$0xff]   ;;  %v13947_v49 = vld [vmem:[#allocation8 + $0x568] ss:$40 sps:$4 sm:$0xff]  }
 0x30d   :  { %v6141_v2 = vadd.f32 %v6140_v54, %v15627_v42  ;;  %6449 = vmatpush1.bf16.msra.mxu1 %v13917_v45  ;;  %v6183_v20 = vpop.f32.mrf.mxu0  ;;  %v6835_v10 = vmax.f32 %v6180_v53, 0.0  ;;  %v13935_v42 = vld [vmem:[#allocation8 + $0x608] ss:$40 sps:$4 sm:$0xff]   ;;  %v13946_v45 = vld [vmem:[#allocation8 + $0xabc] ss:$40 sps:$4 sm:$0xff]  }
 0x30e   :  { %6492 = vmatpush1.bf16.msra.mxu0 %v13920_v46  ;;  %6450 = vmatprep.subr.bf16.mxu1 %v13925_v51  ;;  %v13944_v46 = vld [vmem:[#allocation8 + $0xab8] ss:$40 sps:$4 sm:$0xff]   ;;  %v13952_v51 = vld [vmem:[#allocation8 + $0xa6c] ss:$40 sps:$4 sm:$0xff]   ;;  %v13955_v53 = vld [vmem:[#allocation8 + $0x51c] ss:$40 sps:$4 sm:$0xff]  }
 0x30f   :  { %v6184_v9 = vadd.f32 %v6183_v20, %v6141_v2  ;;  %6493 = vmatprep.subr.bf16.mxu0 %v13928_v30  ;;  %v13950_v30 = vld [vmem:[#allocation8 + $0xa68] ss:$40 sps:$4 sm:$0xff]   ;;  %v13953_v54 = vld [vmem:[#allocation8 + $0x518] ss:$40 sps:$4 sm:$0xff]   ;;  %v13961_v2 = vld [vmem:[#allocation8 + $0x9cc] ss:$40 sps:$4 sm:$0xff]  }
 0x310   :  { %v13962_v20 = vld [vmem:[#allocation8 + $0xec8] ss:$40 sps:$4 sm:$0xff]  }
 0x311   :  { %v6845_v12 = vmax.f32 %v6184_v9, 0.0  ;;  %6451 = vmatpush1.bf16.msra.mxu1 %v13923_v28  ;;  %v13958_v28 = vld [vmem:[#allocation8 + $0xa1c] ss:$40 sps:$4 sm:$0xff]  }
 0x312   :  { %6494 = vmatpush1.bf16.msra.mxu0 %v13926_v63  ;;  %6452 = vmatprep.subr.bf16.mxu1 %v13931_v8  ;;  %v13956_v63 = vld [vmem:[#allocation8 + $0xa18] ss:$40 sps:$4 sm:$0xff]   ;;  %v13959_v8 = vld [vmem:[#allocation8 + $0x9c8] ss:$40 sps:$4 sm:$0xff]   ;;  %v13967_v9 = vld [vmem:[#allocation8 + $0x97c] ss:$40 sps:$4 sm:$0xff]  }
 0x313   :  { %v15643_v38 = vpack.c.bf16 %v6845_v12, %v6835_v10  ;;  %6495 = vmatprep.subr.bf16.mxu0 %v13934_v7  ;;  %v13964_v7 = vld [vmem:[#allocation8 + $0xecc] ss:$40 sps:$4 sm:$0xff]   ;;  %v13965_v10 = vld [vmem:[#allocation8 + $0x978] ss:$40 sps:$4 sm:$0xff]   ;;  %v13970_v12 = vld [vmem:[#allocation8 + $0xe7c] ss:$40 sps:$4 sm:$0xff]  }
 0x315   :  { %6453 = vmatpush1.bf16.msra.mxu1 %v13929_v18  ;;  %v13968_v18 = vld [vmem:[#allocation8 + $0xe78] ss:$40 sps:$4 sm:$0xff]  }
 0x316   :  { %6496 = vmatpush1.bf16.msra.mxu0 %v13932_v33  ;;  %6454 = vmatprep.subr.bf16.mxu1 %v13937_v36  ;;  %v13973_v33 = vld [vmem:[#allocation8 + $0x92c] ss:$40 sps:$4 sm:$0xff]   ;;  %v13971_v36 = vld [vmem:[#allocation8 + $0x928] ss:$40 sps:$4 sm:$0xff]  }
 0x317   :  { %6497 = vmatprep.subr.bf16.mxu0 %v13940_v37  ;;  %v13974_v37 = vld [vmem:[#allocation8 + $0xe28] ss:$40 sps:$4 sm:$0xff]  }
 0x319   :  { %6455 = vmatpush1.bf16.msra.mxu1 %v13935_v42  ;;  %v13976_v42 = vld [vmem:[#allocation8 + $0xe2c] ss:$40 sps:$4 sm:$0xff]  }
 0x31a   :  { %6498 = vmatpush1.bf16.msra.mxu0 %v13938_v27  ;;  %6456 = vmatprep.subr.bf16.mxu1 %v13943_v24  ;;  %v13979_v27 = vld [vmem:[#allocation8 + $0x8dc] ss:$40 sps:$4 sm:$0xff]   ;;  %v13977_v24 = vld [vmem:[#allocation8 + $0x8d8] ss:$40 sps:$4 sm:$0xff]  }
 0x31b   :  { %6499 = vmatprep.subr.bf16.mxu0 %v13946_v45  ;;  %v13980_v45 = vld [vmem:[#allocation8 + $0xdd8] ss:$40 sps:$4 sm:$0xff]  }
 0x31d   :  { %6457 = vmatpush1.bf16.msra.mxu1 %v13941_v47  ;;  %v13982_v47 = vld [vmem:[#allocation8 + $0xddc] ss:$40 sps:$4 sm:$0xff]  }
 0x31e   :  { %6500 = vmatpush1.bf16.msra.mxu0 %v13944_v46  ;;  %6458 = vmatprep.subr.bf16.mxu1 %v13949_v48  ;;  %v13985_v46 = vld [vmem:[#allocation8 + $0x88c] ss:$40 sps:$4 sm:$0xff]   ;;  %v13983_v48 = vld [vmem:[#allocation8 + $0x888] ss:$40 sps:$4 sm:$0xff]  }
 0x31f   :  { %6501 = vmatprep.subr.bf16.mxu0 %v13952_v51  ;;  %v13986_v51 = vld [vmem:[#allocation8 + $0xd88] ss:$40 sps:$4 sm:$0xff]  }
 0x321   :  { %6459 = vmatpush1.bf16.msra.mxu1 %v13947_v49  ;;  %v13988_v49 = vld [vmem:[#allocation8 + $0xd8c] ss:$40 sps:$4 sm:$0xff]  }
 0x322   :  { %6502 = vmatpush1.bf16.msra.mxu0 %v13950_v30  ;;  %6460 = vmatprep.subr.bf16.mxu1 %v13955_v53  ;;  %v13991_v30 = vld [vmem:[#allocation8 + $0x83c] ss:$40 sps:$4 sm:$0xff]   ;;  %v13989_v53 = vld [vmem:[#allocation8 + $0x838] ss:$40 sps:$4 sm:$0xff]  }
 0x323   :  { %6503 = vmatprep.subr.bf16.mxu0 %v13958_v28  ;;  %v13992_v28 = vld [vmem:[#allocation8 + $0xd38] ss:$40 sps:$4 sm:$0xff]  }
 0x325   :  { %6461 = vmatpush1.bf16.msra.mxu1 %v13953_v54  ;;  %v13994_v54 = vld [vmem:[#allocation8 + $0xd3c] ss:$40 sps:$4 sm:$0xff]  }
 0x326   :  { %6504 = vmatpush1.bf16.msra.mxu0 %v13956_v63  ;;  %6462 = vmatprep.subr.bf16.mxu1 %v13961_v2  ;;  %v13997_v63 = vld [vmem:[#allocation8 + $0x7ec] ss:$40 sps:$4 sm:$0xff]   ;;  %v13995_v2 = vld [vmem:[#allocation8 + $0x7e8] ss:$40 sps:$4 sm:$0xff]  }
 0x327   :  { %6505 = vmatprep.subr.bf16.mxu0 %v13964_v7  ;;  %v13998_v7 = vld [vmem:[#allocation8 + $0xce8] ss:$40 sps:$4 sm:$0xff]  }
 0x329   :  { %6463 = vmatpush2.bf16.msra.mxu1 %v13959_v8  ;;  %v14000_v8 = vld [vmem:[#allocation8 + $0xcec] ss:$40 sps:$4 sm:$0xff]  }
 0x32a   :  { %6506 = vmatpush2.bf16.msra.mxu0 %v13962_v20  ;;  %6464 = vmatprep.subr.bf16.mxu1 %v13967_v9  ;;  %v14003_v20 = vld [vmem:[#allocation8 + $0x79c] ss:$40 sps:$4 sm:$0xff]   ;;  %v14001_v9 = vld [vmem:[#allocation8 + $0x798] ss:$40 sps:$4 sm:$0xff]  }
 0x32b   :  { %6507 = vmatprep.subr.bf16.mxu0 %v13970_v12  ;;  %v14004_v12 = vld [vmem:[#allocation8 + $0xc98] ss:$40 sps:$4 sm:$0xff]  }
 0x32d   :  { %6465 = vmatpush2.bf16.msra.mxu1 %v13965_v10  ;;  %v14006_v10 = vld [vmem:[#allocation8 + $0xc9c] ss:$40 sps:$4 sm:$0xff]  }
 0x32e   :  { %6508 = vmatpush2.bf16.msra.mxu0 %v13968_v18  ;;  %6466 = vmatprep.subr.bf16.mxu1 %v13973_v33  ;;  %v14009_v18 = vld [vmem:[#allocation8 + $0x114c] ss:$40 sps:$4 sm:$0xff]  }
 0x32f   :  { %6509 = vmatprep.subr.bf16.mxu0 %v13976_v42  ;;  %v14012_v33 = vld [vmem:[#allocation8 + $0x164c] ss:$40 sps:$4 sm:$0xff]   ;;  %v14010_v42 = vld [vmem:[#allocation8 + $0x1648] ss:$40 sps:$4 sm:$0xff]  }
 0x331   :  { %6467 = vmatpush2.bf16.msra.mxu1 %v13971_v36  ;;  %v14007_v36 = vld [vmem:[#allocation8 + $0x1148] ss:$40 sps:$4 sm:$0xff]  }
 0x332   :  { %6510 = vmatpush2.bf16.msra.mxu0 %v13974_v37  ;;  %6468 = vmatprep.subr.bf16.mxu1 %v13979_v27  ;;  %v15645_v37 = vld [vmem:[#allocation10] sm:$0xff] }
 0x333   :  { %6511 = vmatprep.subr.bf16.mxu0 %v13982_v47  ;;  %v1727_v27 = vrot.slane %v15645_v37, %v15527_v17  ;;  %v15649_v47 = vpop.f32.mrf.mxu1 }
 0x335   :  { %6469 = vmatpush2.bf16.msra.mxu1 %v13977_v24  ;;  %v14015_v24 = vld [vmem:[#allocation8 + $0x10fc] ss:$40 sps:$4 sm:$0xff]  }
 0x336   :  { %6512 = vmatpush2.bf16.msra.mxu0 %v13980_v45  ;;  %6470 = vmatprep.subr.bf16.mxu1 %v13985_v46  ;;  %v14018_v45 = vld [vmem:[#allocation8 + $0x15fc] ss:$40 sps:$4 sm:$0xff]   ;;  %v15651_v46 = vpop.f32.mrf.mxu0 }
 0x337   :  { %6513 = vmatprep.subr.bf16.mxu0 %v13988_v49  ;;  %v14013_v49 = vld [vmem:[#allocation8 + $0x10f8] ss:$40 sps:$4 sm:$0xff]  }
 0x339   :  { %6471 = vmatpush2.bf16.msra.mxu1 %v13983_v48 }
 0x33a   :  { %6514 = vmatpush2.bf16.msra.mxu0 %v13986_v51  ;;  %6472 = vmatprep.subr.bf16.mxu1 %v13991_v30  ;;  %v14016_v51 = vld [vmem:[#allocation8 + $0x15f8] ss:$40 sps:$4 sm:$0xff]  }
 0x33b   :  { %6515 = vmatprep.subr.bf16.mxu0 %v13994_v54  ;;  %v14021_v54 = vld [vmem:[#allocation8 + $0x10ac] ss:$40 sps:$4 sm:$0xff]  }
 0x33d   :  { %6473 = vmatpush2.bf16.msra.mxu1 %v13989_v53 }
 0x33e   :  { %6516 = vmatpush2.bf16.msra.mxu0 %v13992_v28  ;;  %6474 = vmatprep.subr.bf16.mxu1 %v13997_v63  ;;  %v14024_v28 = vld [vmem:[#allocation8 + $0x15ac] ss:$40 sps:$4 sm:$0xff]  }
 0x33f   :  { %6517 = vmatprep.subr.bf16.mxu0 %v14000_v8 }
 0x341   :  { %6475 = vmatpush2.bf16.msra.mxu1 %v13995_v2 }
 0x342   :  { %6518 = vmatpush2.bf16.msra.mxu0 %v13998_v7  ;;  %6476 = vmatprep.subr.bf16.mxu1 %v14003_v20  ;;  %v14019_v20 = vld [vmem:[#allocation8 + $0x10a8] ss:$40 sps:$4 sm:$0xff]  }
 0x343   :  { %6519 = vmatprep.subr.bf16.mxu0 %v14006_v10 }
 0x345   :  { %6477 = vmatpush2.bf16.msra.mxu1 %v14001_v9  ;;  %v14022_v9 = vld [vmem:[#allocation8 + $0x15a8] ss:$40 sps:$4 sm:$0xff]  }
 0x346   :  { %6520 = vmatpush2.bf16.msra.mxu0 %v14004_v12  ;;  %6532 = vmatprep.subr.bf16.mxu1 %v14009_v18  ;;  %v14027_v12 = vld [vmem:[#allocation8 + $0x105c] ss:$40 sps:$4 sm:$0xff]  }
 0x347   :  { %6575 = vmatprep.subr.bf16.mxu0 %v14012_v33  ;;  %v14030_v18 = vld [vmem:[#allocation8 + $0x155c] ss:$40 sps:$4 sm:$0xff]  }
 0x348   :  { %v6222_v48 = vpop.f32.mrf.mxu1  ;;  %6479 = vmatmul.mubr.bf16.vlgmr.msra.gmra.mxu1 %v15488_v57 }
 0x349   :  { %v6223_v30 = vadd.f32 %v6222_v48, %v1727_v27  ;;  %v6265_v53 = vpop.f32.mrf.mxu0  ;;  %6522 = vmatmul.mubr.bf16.vlgmr.msra.gmra.mxu0 %v15547_v3  ;;  %6533 = vmatpush1.bf16.msra.mxu1 %v14007_v36  ;;  %v14028_v48 = vld [vmem:[#allocation8 + $0x1558] ss:$40 sps:$4 sm:$0xff]  }
 0x34a   :  { %6564 = vmatprep.mubr.bf16.mxu1 %v15519_v56  ;;  %6576 = vmatpush1.bf16.msra.mxu0 %v14010_v42  ;;  %v15656_v63 = vpop.f32.mrf.mxu1  ;;  %v14025_v42 = vld [vmem:[#allocation8 + $0x1058] ss:$40 sps:$4 sm:$0xff]  }
 0x34b   :  { %v15658_v2 = vadd.f32 %v6265_v53, %v6223_v30  ;;  %6607 = vmatprep.mubr.bf16.mxu0 %v15549_v6  ;;  %v15661_v8 = vpop.f32.mrf.mxu0  ;;  %6534 = vmatprep.subr.bf16.mxu1 %v14015_v24  ;;  %v14033_v30 = vld [vmem:[#allocation8 + $0x100c] ss:$40 sps:$4 sm:$0xff]   ;;  %v14042_v53 = vld [vmem:[#allocation8 + $0x14bc] ss:$40 sps:$4 sm:$0xff]  }
 0x34c   :  { %v6226_v7 = vpop.f32.mrf.mxu1  ;;  %6577 = vmatprep.subr.bf16.mxu0 %v14018_v45  ;;  %v14036_v24 = vld [vmem:[#allocation8 + $0x150c] ss:$40 sps:$4 sm:$0xff]   ;;  %v14031_v45 = vld [vmem:[#allocation8 + $0x1008] ss:$40 sps:$4 sm:$0xff]  }
 0x34d   :  { %v6227_v10 = vadd.f32 %v6226_v7, %v1727_v27  ;;  %6535 = vmatpush1.bf16.msra.mxu1 %v14013_v49  ;;  %v6269_v33 = vpop.f32.mrf.mxu0  ;;  %v14034_v27 = vld [vmem:[#allocation8 + $0x1508] ss:$40 sps:$4 sm:$0xff]   ;;  %v14039_v49 = vld [vmem:[#allocation8 + $0xfbc] ss:$40 sps:$4 sm:$0xff]  }
 0x34e   :  { %6578 = vmatpush1.bf16.msra.mxu0 %v14016_v51  ;;  %6536 = vmatprep.subr.bf16.mxu1 %v14021_v54  ;;  %v14037_v51 = vld [vmem:[#allocation8 + $0xfb8] ss:$40 sps:$4 sm:$0xff]   ;;  %v14043_v7 = vld [vmem:[#allocation8 + $0xf68] ss:$40 sps:$4 sm:$0xff]  }
 0x34f   :  { %v15663_v36 = vadd.f32 %v6269_v33, %v6227_v10  ;;  %6579 = vmatprep.subr.bf16.mxu0 %v14024_v28  ;;  %v14040_v54 = vld [vmem:[#allocation8 + $0x14b8] ss:$40 sps:$4 sm:$0xff]   ;;  %v14045_v28 = vld [vmem:[#allocation8 + $0xf6c] ss:$40 sps:$4 sm:$0xff]   ;;  %v14051_v10 = vld [vmem:[#allocation8 + $0xf1c] ss:$40 sps:$4 sm:$0xff]  }
 0x350   :  { %v14052_v33 = vld [vmem:[#allocation8 + $0x1418] ss:$40 sps:$4 sm:$0xff]  }
 0x351   :  { %6537 = vmatpush1.bf16.msra.mxu1 %v14019_v20  ;;  %v14048_v20 = vld [vmem:[#allocation8 + $0x146c] ss:$40 sps:$4 sm:$0xff]  }
 0x352   :  { %6580 = vmatpush1.bf16.msra.mxu0 %v14022_v9  ;;  %6538 = vmatprep.subr.bf16.mxu1 %v14027_v12  ;;  %v14046_v9 = vld [vmem:[#allocation8 + $0x1468] ss:$40 sps:$4 sm:$0xff]   ;;  %v14049_v12 = vld [vmem:[#allocation8 + $0xf18] ss:$40 sps:$4 sm:$0xff]  }
 0x353   :  { %6581 = vmatprep.subr.bf16.mxu0 %v14030_v18  ;;  %v14054_v18 = vld [vmem:[#allocation8 + $0x141c] ss:$40 sps:$4 sm:$0xff]  }
 0x355   :  { %6539 = vmatpush1.bf16.msra.mxu1 %v14025_v42  ;;  %v14057_v42 = vld [vmem:[#allocation8 + $0x13cc] ss:$40 sps:$4 sm:$0xff]  }
 0x356   :  { %6582 = vmatpush1.bf16.msra.mxu0 %v14028_v48  ;;  %6540 = vmatprep.subr.bf16.mxu1 %v14033_v30  ;;  %v14060_v48 = vld [vmem:[#allocation8 + $0x18cc] ss:$40 sps:$4 sm:$0xff]   ;;  %v14055_v30 = vld [vmem:[#allocation8 + $0x13c8] ss:$40 sps:$4 sm:$0xff]  }
 0x357   :  { %6583 = vmatprep.subr.bf16.mxu0 %v14036_v24  ;;  %v14058_v24 = vld [vmem:[#allocation8 + $0x18c8] ss:$40 sps:$4 sm:$0xff]  }
 0x359   :  { %6541 = vmatpush1.bf16.msra.mxu1 %v14031_v45  ;;  %v14063_v45 = vld [vmem:[#allocation8 + $0x137c] ss:$40 sps:$4 sm:$0xff]  }
 0x35a   :  { %6584 = vmatpush1.bf16.msra.mxu0 %v14034_v27  ;;  %6542 = vmatprep.subr.bf16.mxu1 %v14039_v49  ;;  %v14066_v27 = vld [vmem:[#allocation8 + $0x187c] ss:$40 sps:$4 sm:$0xff]   ;;  %v14061_v49 = vld [vmem:[#allocation8 + $0x1378] ss:$40 sps:$4 sm:$0xff]  }
 0x35b   :  { %6585 = vmatprep.subr.bf16.mxu0 %v14042_v53  ;;  %v14069_v53 = vld [vmem:[#allocation8 + $0x132c] ss:$40 sps:$4 sm:$0xff]  }
 0x35d   :  { %6543 = vmatpush1.bf16.msra.mxu1 %v14037_v51  ;;  %v14064_v51 = vld [vmem:[#allocation8 + $0x1878] ss:$40 sps:$4 sm:$0xff]  }
 0x35e   :  { %6586 = vmatpush1.bf16.msra.mxu0 %v14040_v54  ;;  %6544 = vmatprep.subr.bf16.mxu1 %v14045_v28  ;;  %v14072_v54 = vld [vmem:[#allocation8 + $0x182c] ss:$40 sps:$4 sm:$0xff]   ;;  %v14067_v28 = vld [vmem:[#allocation8 + $0x1328] ss:$40 sps:$4 sm:$0xff]  }
 0x35f   :  { %6587 = vmatprep.subr.bf16.mxu0 %v14048_v20  ;;  %v14075_v20 = vld [vmem:[#allocation8 + $0x12dc] ss:$40 sps:$4 sm:$0xff]  }
 0x361   :  { %6545 = vmatpush1.bf16.msra.mxu1 %v14043_v7  ;;  %v14070_v7 = vld [vmem:[#allocation8 + $0x1828] ss:$40 sps:$4 sm:$0xff]  }
 0x362   :  { %6588 = vmatpush1.bf16.msra.mxu0 %v14046_v9  ;;  %6546 = vmatprep.subr.bf16.mxu1 %v14051_v10  ;;  %v14078_v9 = vld [vmem:[#allocation8 + $0x17dc] ss:$40 sps:$4 sm:$0xff]   ;;  %v14073_v10 = vld [vmem:[#allocation8 + $0x12d8] ss:$40 sps:$4 sm:$0xff]  }
 0x363   :  { %6589 = vmatprep.subr.bf16.mxu0 %v14054_v18  ;;  %v14081_v18 = vld [vmem:[#allocation8 + $0x128c] ss:$40 sps:$4 sm:$0xff]  }
 0x365   :  { %6547 = vmatpush1.bf16.msra.mxu1 %v14049_v12  ;;  %v14076_v12 = vld [vmem:[#allocation8 + $0x17d8] ss:$40 sps:$4 sm:$0xff]  }
 0x366   :  { %6590 = vmatpush1.bf16.msra.mxu0 %v14052_v33  ;;  %6548 = vmatprep.subr.bf16.mxu1 %v14057_v42  ;;  %v14084_v33 = vld [vmem:[#allocation8 + $0x178c] ss:$40 sps:$4 sm:$0xff]   ;;  %v14079_v42 = vld [vmem:[#allocation8 + $0x1288] ss:$40 sps:$4 sm:$0xff]  }
 0x367   :  { %6591 = vmatprep.subr.bf16.mxu0 %v14060_v48  ;;  %v14082_v48 = vld [vmem:[#allocation8 + $0x1788] ss:$40 sps:$4 sm:$0xff]  }
 0x369   :  { %6549 = vmatpush2.bf16.msra.mxu1 %v14055_v30  ;;  %v14087_v30 = vld [vmem:[#allocation8 + $0x123c] ss:$40 sps:$4 sm:$0xff]  }
 0x36a   :  { %6592 = vmatpush2.bf16.msra.mxu0 %v14058_v24  ;;  %6550 = vmatprep.subr.bf16.mxu1 %v14063_v45  ;;  %v14090_v24 = vld [vmem:[#allocation8 + $0x173c] ss:$40 sps:$4 sm:$0xff]   ;;  %v14085_v45 = vld [vmem:[#allocation8 + $0x1238] ss:$40 sps:$4 sm:$0xff]  }
 0x36b   :  { %6593 = vmatprep.subr.bf16.mxu0 %v14066_v27  ;;  %v14088_v27 = vld [vmem:[#allocation8 + $0x1738] ss:$40 sps:$4 sm:$0xff]  }
 0x36d   :  { %6551 = vmatpush2.bf16.msra.mxu1 %v14061_v49  ;;  %v14093_v49 = vld [vmem:[#allocation8 + $0x11ec] ss:$40 sps:$4 sm:$0xff]  }
 0x36e   :  { %6594 = vmatpush2.bf16.msra.mxu0 %v14064_v51  ;;  %6552 = vmatprep.subr.bf16.mxu1 %v14069_v53  ;;  %v14096_v51 = vld [vmem:[#allocation8 + $0x16ec] ss:$40 sps:$4 sm:$0xff]   ;;  %v14091_v53 = vld [vmem:[#allocation8 + $0x11e8] ss:$40 sps:$4 sm:$0xff]  }
 0x36f   :  { %6595 = vmatprep.subr.bf16.mxu0 %v14072_v54  ;;  %v14094_v54 = vld [vmem:[#allocation8 + $0x16e8] ss:$40 sps:$4 sm:$0xff]  }
 0x371   :  { %6553 = vmatpush2.bf16.msra.mxu1 %v14067_v28  ;;  %v14099_v28 = vld [vmem:[#allocation8 + $0x119c] ss:$40 sps:$4 sm:$0xff]  }
 0x372   :  { %6596 = vmatpush2.bf16.msra.mxu0 %v14070_v7  ;;  %6554 = vmatprep.subr.bf16.mxu1 %v14075_v20  ;;  %v14102_v7 = vld [vmem:[#allocation8 + $0x169c] ss:$40 sps:$4 sm:$0xff]   ;;  %v14097_v20 = vld [vmem:[#allocation8 + $0x1198] ss:$40 sps:$4 sm:$0xff]  }
 0x373   :  { %6597 = vmatprep.subr.bf16.mxu0 %v14078_v9  ;;  %v14100_v9 = vld [vmem:[#allocation8 + $0x1698] ss:$40 sps:$4 sm:$0xff]  }
 0x375   :  { %6555 = vmatpush2.bf16.msra.mxu1 %v14073_v10  ;;  %v14105_v10 = vld [vmem:[#allocation8 + $0x254] ss:$40 sps:$4 sm:$0xff]  }
 0x376   :  { %6598 = vmatpush2.bf16.msra.mxu0 %v14076_v12  ;;  %6556 = vmatprep.subr.bf16.mxu1 %v14081_v18  ;;  %v14108_v12 = vld [vmem:[#allocation8 + $0x754] ss:$40 sps:$4 sm:$0xff]   ;;  %v14103_v18 = vld [vmem:[#allocation8 + $0x250] ss:$40 sps:$4 sm:$0xff]  }
 0x377   :  { %6599 = vmatprep.subr.bf16.mxu0 %v14084_v33  ;;  %v15665_v33 = vpop.f32.mrf.mxu1 }
 0x379   :  { %6557 = vmatpush2.bf16.msra.mxu1 %v14079_v42  ;;  %v14106_v42 = vld [vmem:[#allocation8 + $0x750] ss:$40 sps:$4 sm:$0xff]  }
 0x37a   :  { %6600 = vmatpush2.bf16.msra.mxu0 %v14082_v48  ;;  %6558 = vmatprep.subr.bf16.mxu1 %v14087_v30  ;;  %v15667_v48 = vpop.f32.mrf.mxu0  ;;  %v14111_v30 = vld [vmem:[#allocation8 + $0x204] ss:$40 sps:$4 sm:$0xff]  }
 0x37b   :  { %6601 = vmatprep.subr.bf16.mxu0 %v14090_v24 }
 0x37d   :  { %6559 = vmatpush2.bf16.msra.mxu1 %v14085_v45  ;;  %v14114_v45 = vld [vmem:[#allocation8 + $0x704] ss:$40 sps:$4 sm:$0xff]  }
 0x37e   :  { %6602 = vmatpush2.bf16.msra.mxu0 %v14088_v27  ;;  %6560 = vmatprep.subr.bf16.mxu1 %v14093_v49 }
 0x37f   :  { %6603 = vmatprep.subr.bf16.mxu0 %v14096_v51  ;;  %v14109_v51 = vld [vmem:[#allocation8 + $0x200] ss:$40 sps:$4 sm:$0xff]  }
 0x381   :  { %6561 = vmatpush2.bf16.msra.mxu1 %v14091_v53 }
 0x382   :  { %6604 = vmatpush2.bf16.msra.mxu0 %v14094_v54  ;;  %6562 = vmatprep.subr.bf16.mxu1 %v14099_v28  ;;  %v14112_v54 = vld [vmem:[#allocation8 + $0x700] ss:$40 sps:$4 sm:$0xff]   ;;  %v14117_v28 = vld [vmem:[#allocation8 + $0x1b4] ss:$40 sps:$4 sm:$0xff]  }
 0x383   :  { %6605 = vmatprep.subr.bf16.mxu0 %v14102_v7 }
 0x385   :  { %6563 = vmatpush2.bf16.msra.mxu1 %v14097_v20 }
 0x386   :  { %6606 = vmatpush2.bf16.msra.mxu0 %v14100_v9  ;;  %6618 = vmatprep.subr.bf16.mxu1 %v14105_v10 }
 0x387   :  { %6661 = vmatprep.subr.bf16.mxu0 %v14108_v12  ;;  %v14115_v12 = vld [vmem:[#allocation8 + $0x1b0] ss:$40 sps:$4 sm:$0xff]  }
 0x388   :  { %v6308_v24 = vpop.f32.mrf.mxu1  ;;  %6565 = vmatmul.mubr.bf16.vlgmr.msra.gmra.mxu1 %v15545_v1 }
 0x389   :  { %v6309_v27 = vadd.f32 %v6308_v24, %v15658_v2  ;;  %v6351_v49 = vpop.f32.mrf.mxu0  ;;  %6608 = vmatmul.mubr.bf16.vlgmr.msra.gmra.mxu0 %v15559_v44  ;;  %6619 = vmatpush1.bf16.msra.mxu1 %v14103_v18  ;;  %v14120_v2 = vld [vmem:[#allocation8 + $0x6b4] ss:$40 sps:$4 sm:$0xff]   ;;  %v14118_v18 = vld [vmem:[#allocation8 + $0x6b0] ss:$40 sps:$4 sm:$0xff]  }
 0x38a   :  { %6650 = vmatprep.mubr.bf16.mxu1 %v15490_v60  ;;  %6662 = vmatpush1.bf16.msra.mxu0 %v14106_v42  ;;  %v15673_v53 = vpop.f32.mrf.mxu1  ;;  %v14123_v42 = vld [vmem:[#allocation8 + $0x164] ss:$40 sps:$4 sm:$0xff]  }
 0x38b   :  { %v15675_v7 = vadd.f32 %v6351_v49, %v6309_v27  ;;  %6693 = vmatprep.mubr.bf16.mxu0 %v15492_v61  ;;  %v15678_v20 = vpop.f32.mrf.mxu0  ;;  %6620 = vmatprep.subr.bf16.mxu1 %v14111_v30  ;;  %v14126_v27 = vld [vmem:[#allocation8 + $0x664] ss:$40 sps:$4 sm:$0xff]   ;;  %v14121_v61 = vld [vmem:[#allocation8 + $0x160] ss:$40 sps:$4 sm:$0xff]   ;;  %v14129_v49 = vld [vmem:[#allocation8 + $0x114] ss:$40 sps:$4 sm:$0xff]  }
 0x38c   :  { %v6312_v9 = vpop.f32.mrf.mxu1  ;;  %6663 = vmatprep.subr.bf16.mxu0 %v14114_v45  ;;  %v14124_v30 = vld [vmem:[#allocation8 + $0x660] ss:$40 sps:$4 sm:$0xff]   ;;  %v14132_v45 = vld [vmem:[#allocation8 + $0x614] ss:$40 sps:$4 sm:$0xff]  }
 0x38d   :  { %v6313_v10 = vadd.f32 %v6312_v9, %v15663_v36  ;;  %6621 = vmatpush1.bf16.msra.mxu1 %v14109_v51  ;;  %v6355_v60 = vpop.f32.mrf.mxu0  ;;  %v14127_v36 = vld [vmem:[#allocation8 + $0x110] ss:$40 sps:$4 sm:$0xff]   ;;  %v14133_v9 = vld [vmem:[#allocation8 + $0xc0] ss:$40 sps:$4 sm:$0xff]  }
 0x38e   :  { %6664 = vmatpush1.bf16.msra.mxu0 %v14112_v54  ;;  %6622 = vmatprep.subr.bf16.mxu1 %v14117_v28  ;;  %v14130_v51 = vld [vmem:[#allocation8 + $0x610] ss:$40 sps:$4 sm:$0xff]   ;;  %v14135_v54 = vld [vmem:[#allocation8 + $0xc4] ss:$40 sps:$4 sm:$0xff]  }
 0x38f   :  { %v15681_v24 = vadd.f32 %v6355_v60, %v6313_v10  ;;  %6665 = vmatprep.subr.bf16.mxu0 %v14120_v2  ;;  %v14138_v28 = vld [vmem:[#allocation8 + $0x5c4] ss:$40 sps:$4 sm:$0xff]   ;;  %v14136_v2 = vld [vmem:[#allocation8 + $0x5c0] ss:$40 sps:$4 sm:$0xff]   ;;  %v14141_v10 = vld [vmem:[#allocation8 + $0x74] ss:$40 sps:$4 sm:$0xff]  }
 0x390   :  { %v14139_v60 = vld [vmem:[#allocation8 + $0x70] ss:$40 sps:$4 sm:$0xff]  }
 0x391   :  { %6623 = vmatpush1.bf16.msra.mxu1 %v14115_v12  ;;  %v14144_v12 = vld [vmem:[#allocation8 + $0x574] ss:$40 sps:$4 sm:$0xff]  }
 0x392   :  { %6666 = vmatpush1.bf16.msra.mxu0 %v14118_v18  ;;  %6624 = vmatprep.subr.bf16.mxu1 %v14123_v42  ;;  %v14142_v18 = vld [vmem:[#allocation8 + $0x570] ss:$40 sps:$4 sm:$0xff]   ;;  %v14147_v42 = vld [vmem:[#allocation8 + $0x24] ss:$40 sps:$4 sm:$0xff]  }
 0x393   :  { %6667 = vmatprep.subr.bf16.mxu0 %v14126_v27  ;;  %v14150_v27 = vld [vmem:[#allocation8 + $0x524] ss:$40 sps:$4 sm:$0xff]  }
 0x395   :  { %6625 = vmatpush1.bf16.msra.mxu1 %v14121_v61  ;;  %v14145_v61 = vld [vmem:[#allocation8 + $0x20] ss:$40 sps:$4 sm:$0xff]  }
 0x396   :  { %6668 = vmatpush1.bf16.msra.mxu0 %v14124_v30  ;;  %6626 = vmatprep.subr.bf16.mxu1 %v14129_v49  ;;  %v14148_v30 = vld [vmem:[#allocation8 + $0x520] ss:$40 sps:$4 sm:$0xff]   ;;  %v14153_v49 = vld [vmem:[#allocation8 + $0x4d4] ss:$40 sps:$4 sm:$0xff]  }
 0x397   :  { %6669 = vmatprep.subr.bf16.mxu0 %v14132_v45  ;;  %v14156_v45 = vld [vmem:[#allocation8 + $0x9d4] ss:$40 sps:$4 sm:$0xff]  }
 0x399   :  { %6627 = vmatpush1.bf16.msra.mxu1 %v14127_v36  ;;  %v14151_v36 = vld [vmem:[#allocation8 + $0x4d0] ss:$40 sps:$4 sm:$0xff]  }
 0x39a   :  { %6670 = vmatpush1.bf16.msra.mxu0 %v14130_v51  ;;  %6628 = vmatprep.subr.bf16.mxu1 %v14135_v54  ;;  %v14154_v51 = vld [vmem:[#allocation8 + $0x9d0] ss:$40 sps:$4 sm:$0xff]   ;;  %v14159_v54 = vld [vmem:[#allocation8 + $0x484] ss:$40 sps:$4 sm:$0xff]  }
 0x39b   :  { %6671 = vmatprep.subr.bf16.mxu0 %v14138_v28  ;;  %v14162_v28 = vld [vmem:[#allocation8 + $0x984] ss:$40 sps:$4 sm:$0xff]  }
 0x39d   :  { %6629 = vmatpush1.bf16.msra.mxu1 %v14133_v9  ;;  %v14157_v9 = vld [vmem:[#allocation8 + $0x480] ss:$40 sps:$4 sm:$0xff]  }
 0x39e   :  { %6672 = vmatpush1.bf16.msra.mxu0 %v14136_v2  ;;  %6630 = vmatprep.subr.bf16.mxu1 %v14141_v10  ;;  %v14160_v2 = vld [vmem:[#allocation8 + $0x980] ss:$40 sps:$4 sm:$0xff]   ;;  %v14165_v10 = vld [vmem:[#allocation8 + $0x434] ss:$40 sps:$4 sm:$0xff]  }
 0x39f   :  { %6673 = vmatprep.subr.bf16.mxu0 %v14144_v12  ;;  %v14168_v12 = vld [vmem:[#allocation8 + $0x934] ss:$40 sps:$4 sm:$0xff]  }
 0x3a1   :  { %6631 = vmatpush1.bf16.msra.mxu1 %v14139_v60  ;;  %v14163_v60 = vld [vmem:[#allocation8 + $0x430] ss:$40 sps:$4 sm:$0xff]  }
 0x3a2   :  { %6674 = vmatpush1.bf16.msra.mxu0 %v14142_v18  ;;  %6632 = vmatprep.subr.bf16.mxu1 %v14147_v42  ;;  %v14166_v18 = vld [vmem:[#allocation8 + $0x930] ss:$40 sps:$4 sm:$0xff]   ;;  %v14171_v42 = vld [vmem:[#allocation8 + $0x3e4] ss:$40 sps:$4 sm:$0xff]  }
 0x3a3   :  { %6675 = vmatprep.subr.bf16.mxu0 %v14150_v27  ;;  %v14174_v27 = vld [vmem:[#allocation8 + $0x8e4] ss:$40 sps:$4 sm:$0xff]  }
 0x3a5   :  { %6633 = vmatpush1.bf16.msra.mxu1 %v14145_v61  ;;  %v14169_v61 = vld [vmem:[#allocation8 + $0x3e0] ss:$40 sps:$4 sm:$0xff]  }
 0x3a6   :  { %6676 = vmatpush1.bf16.msra.mxu0 %v14148_v30  ;;  %6634 = vmatprep.subr.bf16.mxu1 %v14153_v49  ;;  %v14172_v30 = vld [vmem:[#allocation8 + $0x8e0] ss:$40 sps:$4 sm:$0xff]   ;;  %v14177_v49 = vld [vmem:[#allocation8 + $0x394] ss:$40 sps:$4 sm:$0xff]  }
 0x3a7   :  { %6677 = vmatprep.subr.bf16.mxu0 %v14156_v45  ;;  %v14180_v45 = vld [vmem:[#allocation8 + $0x894] ss:$40 sps:$4 sm:$0xff]  }
 0x3a9   :  { %6635 = vmatpush2.bf16.msra.mxu1 %v14151_v36  ;;  %v14175_v36 = vld [vmem:[#allocation8 + $0x390] ss:$40 sps:$4 sm:$0xff]  }
 0x3aa   :  { %6678 = vmatpush2.bf16.msra.mxu0 %v14154_v51  ;;  %6636 = vmatprep.subr.bf16.mxu1 %v14159_v54  ;;  %v14178_v51 = vld [vmem:[#allocation8 + $0x890] ss:$40 sps:$4 sm:$0xff]   ;;  %v14183_v54 = vld [vmem:[#allocation8 + $0x344] ss:$40 sps:$4 sm:$0xff]  }
 0x3ab   :  { %6679 = vmatprep.subr.bf16.mxu0 %v14162_v28  ;;  %v14186_v28 = vld [vmem:[#allocation8 + $0x844] ss:$40 sps:$4 sm:$0xff]  }
 0x3ad   :  { %6637 = vmatpush2.bf16.msra.mxu1 %v14157_v9  ;;  %v14181_v9 = vld [vmem:[#allocation8 + $0x340] ss:$40 sps:$4 sm:$0xff]  }
 0x3ae   :  { %6680 = vmatpush2.bf16.msra.mxu0 %v14160_v2  ;;  %6638 = vmatprep.subr.bf16.mxu1 %v14165_v10  ;;  %v14184_v2 = vld [vmem:[#allocation8 + $0x840] ss:$40 sps:$4 sm:$0xff]   ;;  %v14189_v10 = vld [vmem:[#allocation8 + $0x2f4] ss:$40 sps:$4 sm:$0xff]  }
 0x3af   :  { %6681 = vmatprep.subr.bf16.mxu0 %v14168_v12  ;;  %v14192_v12 = vld [vmem:[#allocation8 + $0x7f4] ss:$40 sps:$4 sm:$0xff]  }
 0x3b1   :  { %6639 = vmatpush2.bf16.msra.mxu1 %v14163_v60  ;;  %v14187_v60 = vld [vmem:[#allocation8 + $0x2f0] ss:$40 sps:$4 sm:$0xff]  }
 0x3b2   :  { %6682 = vmatpush2.bf16.msra.mxu0 %v14166_v18  ;;  %6640 = vmatprep.subr.bf16.mxu1 %v14171_v42  ;;  %v14190_v18 = vld [vmem:[#allocation8 + $0x7f0] ss:$40 sps:$4 sm:$0xff]   ;;  %v14195_v42 = vld [vmem:[#allocation8 + $0x2a4] ss:$40 sps:$4 sm:$0xff]  }
 0x3b3   :  { %6683 = vmatprep.subr.bf16.mxu0 %v14174_v27  ;;  %v14198_v27 = vld [vmem:[#allocation8 + $0x7a4] ss:$40 sps:$4 sm:$0xff]  }
 0x3b5   :  { %6641 = vmatpush2.bf16.msra.mxu1 %v14169_v61  ;;  %v14193_v61 = vld [vmem:[#allocation8 + $0x2a0] ss:$40 sps:$4 sm:$0xff]  }
 0x3b6   :  { %6684 = vmatpush2.bf16.msra.mxu0 %v14172_v30  ;;  %6642 = vmatprep.subr.bf16.mxu1 %v14177_v49  ;;  %v14196_v30 = vld [vmem:[#allocation8 + $0x7a0] ss:$40 sps:$4 sm:$0xff]   ;;  %v14201_v49 = vld [vmem:[#allocation8 + $0xc54] ss:$40 sps:$4 sm:$0xff]  }
 0x3b7   :  { %6685 = vmatprep.subr.bf16.mxu0 %v14180_v45  ;;  %v14204_v45 = vld [vmem:[#allocation8 + $0x1154] ss:$40 sps:$4 sm:$0xff]  }
 0x3b9   :  { %6643 = vmatpush2.bf16.msra.mxu1 %v14175_v36  ;;  %v14199_v36 = vld [vmem:[#allocation8 + $0xc50] ss:$40 sps:$4 sm:$0xff]  }
 0x3ba   :  { %6686 = vmatpush2.bf16.msra.mxu0 %v14178_v51  ;;  %6644 = vmatprep.subr.bf16.mxu1 %v14183_v54  ;;  %v15683_v51 = vpop.f32.mrf.mxu1  ;;  %v14202_v54 = vld [vmem:[#allocation8 + $0x1150] ss:$40 sps:$4 sm:$0xff]  }
 0x3bb   :  { %6687 = vmatprep.subr.bf16.mxu0 %v14186_v28  ;;  %v14207_v28 = vld [vmem:[#allocation8 + $0xc04] ss:$40 sps:$4 sm:$0xff]  }
 0x3bd   :  { %6645 = vmatpush2.bf16.msra.mxu1 %v14181_v9 }
 0x3be   :  { %6688 = vmatpush2.bf16.msra.mxu0 %v14184_v2  ;;  %6646 = vmatprep.subr.bf16.mxu1 %v14189_v10  ;;  %v14210_v2 = vld [vmem:[#allocation8 + $0x1104] ss:$40 sps:$4 sm:$0xff]  }
 0x3bf   :  { %6689 = vmatprep.subr.bf16.mxu0 %v14192_v12  ;;  %v14205_v12 = vld [vmem:[#allocation8 + $0xc00] ss:$40 sps:$4 sm:$0xff]  }
 0x3c1   :  { %6647 = vmatpush2.bf16.msra.mxu1 %v14187_v60 }
 0x3c2   :  { %6690 = vmatpush2.bf16.msra.mxu0 %v14190_v18  ;;  %6648 = vmatprep.subr.bf16.mxu1 %v14195_v42  ;;  %v14208_v18 = vld [vmem:[#allocation8 + $0x1100] ss:$40 sps:$4 sm:$0xff]   ;;  %v14213_v42 = vld [vmem:[#allocation8 + $0xbb4] ss:$40 sps:$4 sm:$0xff]  }
 0x3c3   :  { %6691 = vmatprep.subr.bf16.mxu0 %v14198_v27  ;;  %v14216_v27 = vld [vmem:[#allocation8 + $0x10b4] ss:$40 sps:$4 sm:$0xff]  }
 0x3c5   :  { %6649 = vmatpush2.bf16.msra.mxu1 %v14193_v61 }
 0x3c6   :  { %6692 = vmatpush2.bf16.msra.mxu0 %v14196_v30  ;;  %6704 = vmatprep.subr.bf16.mxu1 %v14201_v49  ;;  %v14219_v30 = vld [vmem:[#allocation8 + $0xb64] ss:$40 sps:$4 sm:$0xff]  }
 0x3c7   :  { %6747 = vmatprep.subr.bf16.mxu0 %v14204_v45  ;;  %v14222_v45 = vld [vmem:[#allocation8 + $0x1064] ss:$40 sps:$4 sm:$0xff]  }
 0x3c8   :  { %v6394_v9 = vpop.f32.mrf.mxu1  ;;  %6651 = vmatmul.mubr.bf16.vlgmr.msra.gmra.mxu1 %v15494_v62 }
 0x3c9   :  { %v6395_v10 = vadd.f32 %v6394_v9, %v15675_v7  ;;  %6694 = vmatmul.mubr.bf16.vlgmr.msra.gmra.mxu0 %v15488_v57  ;;  %6705 = vmatpush1.bf16.msra.mxu1 %v14199_v36  ;;  %v14211_v7 = vld [vmem:[#allocation8 + $0xbb0] ss:$40 sps:$4 sm:$0xff]  }
 0x3ca   :  { %6736 = vmatprep.mubr.bf16.mxu1 %v15517_v55  ;;  %6748 = vmatpush1.bf16.msra.mxu0 %v14202_v54  ;;  %v15689_v60 = vpop.f32.mrf.mxu1  ;;  %v14214_v57 = vld [vmem:[#allocation8 + $0x10b0] ss:$40 sps:$4 sm:$0xff]   ;;  %v14220_v54 = vld [vmem:[#allocation8 + $0x1060] ss:$40 sps:$4 sm:$0xff]  }
 0x3cb   :  { %6779 = vmatprep.mubr.bf16.mxu0 %v15519_v56  ;;  %6706 = vmatprep.subr.bf16.mxu1 %v14207_v28  ;;  %v6837_v55 = vmax.f32 %v6395_v10, 0.0  ;;  %v14217_v56 = vld [vmem:[#allocation8 + $0xb60] ss:$40 sps:$4 sm:$0xff]   ;;  %v14225_v28 = vld [vmem:[#allocation8 + $0xb14] ss:$40 sps:$4 sm:$0xff]  }
 0x3cc   :  { %v6398_v61 = vpop.f32.mrf.mxu1  ;;  %6749 = vmatprep.subr.bf16.mxu0 %v14210_v2  ;;  %v14223_v9 = vld [vmem:[#allocation8 + $0xb10] ss:$40 sps:$4 sm:$0xff]   ;;  %v14234_v10 = vld [vmem:[#allocation8 + $0xfc4] ss:$40 sps:$4 sm:$0xff]  }
 0x3cd   :  { %v6399_v62 = vadd.f32 %v6398_v61, %v15681_v24  ;;  %6707 = vmatpush1.bf16.msra.mxu1 %v14205_v12  ;;  %v14228_v24 = vld [vmem:[#allocation8 + $0x1014] ss:$40 sps:$4 sm:$0xff]   ;;  %v14226_v2 = vld [vmem:[#allocation8 + $0x1010] ss:$40 sps:$4 sm:$0xff]   ;;  %v14231_v12 = vld [vmem:[#allocation8 + $0xac4] ss:$40 sps:$4 sm:$0xff]  }
 0x3ce   :  { %6750 = vmatpush1.bf16.msra.mxu0 %v14208_v18  ;;  %6708 = vmatprep.subr.bf16.mxu1 %v14213_v42  ;;  %v14229_v18 = vld [vmem:[#allocation8 + $0xac0] ss:$40 sps:$4 sm:$0xff]   ;;  %v14240_v61 = vld [vmem:[#allocation8 + $0xf74] ss:$40 sps:$4 sm:$0xff]  }
 0x3cf   :  { %v6847_v49 = vmax.f32 %v6399_v62, 0.0  ;;  %6751 = vmatprep.subr.bf16.mxu0 %v14216_v27  ;;  %v14232_v42 = vld [vmem:[#allocation8 + $0xfc0] ss:$40 sps:$4 sm:$0xff]   ;;  %v14237_v27 = vld [vmem:[#allocation8 + $0xa74] ss:$40 sps:$4 sm:$0xff]  }
 0x3d0   :  { %v14235_v62 = vld [vmem:[#allocation8 + $0xa70] ss:$40 sps:$4 sm:$0xff]  }
 0x3d1   :  { %v15693_v36 = vpack.c.bf16 %v6847_v49, %v6837_v55  ;;  %6709 = vmatpush1.bf16.msra.mxu1 %v14211_v7  ;;  %v14238_v7 = vld [vmem:[#allocation8 + $0xf70] ss:$40 sps:$4 sm:$0xff]   ;;  %v14241_v55 = vld [vmem:[#allocation8 + $0xa20] ss:$40 sps:$4 sm:$0xff]  }
 0x3d2   :  { %6752 = vmatpush1.bf16.msra.mxu0 %v14214_v57  ;;  %6710 = vmatprep.subr.bf16.mxu1 %v14219_v30  ;;  %v14243_v57 = vld [vmem:[#allocation8 + $0xa24] ss:$40 sps:$4 sm:$0xff]   ;;  %v14244_v49 = vld [vmem:[#allocation8 + $0xf20] ss:$40 sps:$4 sm:$0xff]  }
 0x3d3   :  { %6753 = vmatprep.subr.bf16.mxu0 %v14222_v45  ;;  %v14246_v30 = vld [vmem:[#allocation8 + $0xf24] ss:$40 sps:$4 sm:$0xff]   ;;  %v14249_v45 = vld [vmem:[#allocation8 + $0xed4] ss:$40 sps:$4 sm:$0xff]  }
 0x3d5   :  { %6711 = vmatpush1.bf16.msra.mxu1 %v14217_v56  ;;  %v14252_v56 = vld [vmem:[#allocation8 + $0x13d4] ss:$40 sps:$4 sm:$0xff]  }
 0x3d6   :  { %6754 = vmatpush1.bf16.msra.mxu0 %v14220_v54  ;;  %6712 = vmatprep.subr.bf16.mxu1 %v14225_v28  ;;  %v14247_v54 = vld [vmem:[#allocation8 + $0xed0] ss:$40 sps:$4 sm:$0xff]  }
 0x3d7   :  { %6755 = vmatprep.subr.bf16.mxu0 %v14228_v24  ;;  %v14250_v28 = vld [vmem:[#allocation8 + $0x13d0] ss:$40 sps:$4 sm:$0xff]   ;;  %v14255_v24 = vld [vmem:[#allocation8 + $0xe84] ss:$40 sps:$4 sm:$0xff]  }
 0x3d9   :  { %6713 = vmatpush1.bf16.msra.mxu1 %v14223_v9  ;;  %v14258_v9 = vld [vmem:[#allocation8 + $0x1384] ss:$40 sps:$4 sm:$0xff]  }
 0x3da   :  { %6756 = vmatpush1.bf16.msra.mxu0 %v14226_v2  ;;  %6714 = vmatprep.subr.bf16.mxu1 %v14231_v12  ;;  %v14253_v2 = vld [vmem:[#allocation8 + $0xe80] ss:$40 sps:$4 sm:$0xff]  }
 0x3db   :  { %6757 = vmatprep.subr.bf16.mxu0 %v14234_v10  ;;  %v14256_v12 = vld [vmem:[#allocation8 + $0x1380] ss:$40 sps:$4 sm:$0xff]   ;;  %v14261_v10 = vld [vmem:[#allocation8 + $0xe34] ss:$40 sps:$4 sm:$0xff]  }
 0x3dd   :  { %6715 = vmatpush1.bf16.msra.mxu1 %v14229_v18  ;;  %v14264_v18 = vld [vmem:[#allocation8 + $0x1334] ss:$40 sps:$4 sm:$0xff]  }
 0x3de   :  { %6758 = vmatpush1.bf16.msra.mxu0 %v14232_v42  ;;  %6716 = vmatprep.subr.bf16.mxu1 %v14237_v27  ;;  %v14259_v42 = vld [vmem:[#allocation8 + $0xe30] ss:$40 sps:$4 sm:$0xff]  }
 0x3df   :  { %6759 = vmatprep.subr.bf16.mxu0 %v14240_v61  ;;  %v14262_v27 = vld [vmem:[#allocation8 + $0x1330] ss:$40 sps:$4 sm:$0xff]   ;;  %v14267_v61 = vld [vmem:[#allocation8 + $0xde4] ss:$40 sps:$4 sm:$0xff]  }
 0x3e1   :  { %6717 = vmatpush1.bf16.msra.mxu1 %v14235_v62  ;;  %v14270_v62 = vld [vmem:[#allocation8 + $0x12e4] ss:$40 sps:$4 sm:$0xff]  }
 0x3e2   :  { %6760 = vmatpush1.bf16.msra.mxu0 %v14238_v7  ;;  %6718 = vmatprep.subr.bf16.mxu1 %v14243_v57  ;;  %v14265_v7 = vld [vmem:[#allocation8 + $0xde0] ss:$40 sps:$4 sm:$0xff]  }
 0x3e3   :  { %6761 = vmatprep.subr.bf16.mxu0 %v14246_v30  ;;  %v14268_v57 = vld [vmem:[#allocation8 + $0x12e0] ss:$40 sps:$4 sm:$0xff]   ;;  %v14273_v30 = vld [vmem:[#allocation8 + $0xd94] ss:$40 sps:$4 sm:$0xff]  }
 0x3e5   :  { %6719 = vmatpush1.bf16.msra.mxu1 %v14241_v55  ;;  %v1715_v55 = vrot.slane %v15645_v37, %v15475_v25 }
 0x3e6   :  { %6762 = vmatpush1.bf16.msra.mxu0 %v14244_v49  ;;  %6720 = vmatprep.subr.bf16.mxu1 %v14249_v45  ;;  %v14276_v49 = vld [vmem:[#allocation8 + $0x1294] ss:$40 sps:$4 sm:$0xff]  }
 0x3e7   :  { %6763 = vmatprep.subr.bf16.mxu0 %v14252_v56  ;;  %v5799_v45 = vadd.f32 %v15578_v41, %v1715_v55  ;;  %v14271_v56 = vld [vmem:[#allocation8 + $0xd90] ss:$40 sps:$4 sm:$0xff]   ;;  %v14285_v41 = vld [vmem:[#allocation8 + $0xcf4] ss:$40 sps:$4 sm:$0xff]  }
 0x3e9   :  { %6721 = vmatpush2.bf16.msra.mxu1 %v14247_v54  ;;  %v14274_v54 = vld [vmem:[#allocation8 + $0x1290] ss:$40 sps:$4 sm:$0xff]  }
 0x3ea   :  { %6764 = vmatpush2.bf16.msra.mxu0 %v14250_v28  ;;  %6722 = vmatprep.subr.bf16.mxu1 %v14255_v24  ;;  %v14279_v28 = vld [vmem:[#allocation8 + $0xd44] ss:$40 sps:$4 sm:$0xff]   ;;  %v5795_v24 = vadd.f32 %v15569_v19, %v1715_v55 }
 0x3eb   :  { %6765 = vmatprep.subr.bf16.mxu0 %v14258_v9  ;;  %v14282_v9 = vld [vmem:[#allocation8 + $0x1244] ss:$40 sps:$4 sm:$0xff]  }
 0x3ed   :  { %6723 = vmatpush2.bf16.msra.mxu1 %v14253_v2  ;;  %v5842_v2 = vadd.f32 %v15580_v52, %v5799_v45  ;;  %v14286_v52 = vld [vmem:[#allocation8 + $0x11f0] ss:$40 sps:$4 sm:$0xff]   ;;  %v14289_v45 = vld [vmem:[#allocation8 + $0xca0] ss:$40 sps:$4 sm:$0xff]  }
 0x3ee   :  { %6766 = vmatpush2.bf16.msra.mxu0 %v14256_v12  ;;  %6724 = vmatprep.subr.bf16.mxu1 %v14261_v10  ;;  %v15700_v12 = vpop.f32.mrf.mxu0  ;;  %v14277_v10 = vld [vmem:[#allocation8 + $0xd40] ss:$40 sps:$4 sm:$0xff]  }
 0x3ef   :  { %6767 = vmatprep.subr.bf16.mxu0 %v14264_v18  ;;  %v14280_v18 = vld [vmem:[#allocation8 + $0x1240] ss:$40 sps:$4 sm:$0xff]  }
 0x3f1   :  { %6725 = vmatpush2.bf16.msra.mxu1 %v14259_v42  ;;  %v5838_v42 = vadd.f32 %v15571_v0, %v5795_v24  ;;  %v14300_v24 = vld [vmem:[#allocation11 + $0x18c] ss:$28 sps:$4 sm:$0xff]  }
 0x3f2   :  { %6768 = vmatpush2.bf16.msra.mxu0 %v14262_v27  ;;  %6726 = vmatprep.subr.bf16.mxu1 %v14267_v61  ;;  %v5885_v27 = vadd.f32 %v15596_v50, %v5842_v2  ;;  %v6437_v61 = vpop.f32.mrf.mxu0  ;;  %v14295_v2 = vld [vmem:[#allocation8 + $0x1650] ss:$40 sps:$4 sm:$0xff]  }
 0x3f3   :  { %6769 = vmatprep.subr.bf16.mxu0 %v14270_v62  ;;  %v14288_v62 = vld [vmem:[#allocation8 + $0x11f4] ss:$40 sps:$4 sm:$0xff]   ;;  %v5881_v19 = vadd.f32 %v15586_v4, %v5838_v42  ;;  %v14292_v4 = vld [vmem:[#allocation8 + $0x11a0] ss:$40 sps:$4 sm:$0xff]  }
 0x3f4   :  { %v15706_v55 = vpop.f32.mrf.mxu0 }
 0x3f5   :  { %6727 = vmatpush2.bf16.msra.mxu1 %v14265_v7  ;;  %v14283_v7 = vld [vmem:[#allocation8 + $0xcf0] ss:$40 sps:$4 sm:$0xff]   ;;  %v5924_v0 = vadd.f32 %v15588_v5, %v5881_v19  ;;  %v15713_v5 = vpop.f32.mrf.mxu1 }
 0x3f6   :  { %6770 = vmatpush2.bf16.msra.mxu0 %v14268_v57  ;;  %6728 = vmatprep.subr.bf16.mxu1 %v14273_v30  ;;  %v14291_v57 = vld [vmem:[#allocation8 + $0xca4] ss:$40 sps:$4 sm:$0xff]   ;;  %v5928_v30 = vadd.f32 %v15608_v32, %v5885_v27  ;;  %v6441_v32 = vpop.f32.mrf.mxu0 }
 0x3f7   :  { %6771 = vmatprep.subr.bf16.mxu0 %v14276_v49  ;;  %v14294_v49 = vld [vmem:[#allocation8 + $0x11a4] ss:$40 sps:$4 sm:$0xff]  }
 0x3f8   :  { %v5971_v50 = vadd.f32 %v15613_v29, %v5928_v30  ;;  %v14298_v29 = vld [vmem:[#allocation11 + $0x188] ss:$28 sps:$4 sm:$0xff]  }
 0x3f9   :  { %6729 = vmatpush2.bf16.msra.mxu1 %v14271_v56  ;;  %v14297_v56 = vld [vmem:[#allocation8 + $0x1654] ss:$40 sps:$4 sm:$0xff]  }
 0x3fa   :  { %6772 = vmatpush2.bf16.msra.mxu0 %v14274_v54  ;;  %6730 = vmatprep.subr.bf16.mxu1 %v14279_v28  ;;  %v5967_v54 = vadd.f32 %v15602_v58, %v5924_v0  ;;  %v1735_v28 = vrot.slane %v15645_v37, %v15524_v16  ;;  %v14303_v58 = vld [vmem:[#allocation8 + $0x1604] ss:$40 sps:$4 sm:$0xff]   ;;  %v14306_v37 = vld [vmem:[#allocation11 + $0x154] ss:$28 sps:$4 sm:$0xff]  }
 0x3fb   :  { %6773 = vmatprep.subr.bf16.mxu0 %v14282_v9  ;;  %v6844_v9 = vmax.f32 %v5971_v50, 0.0  ;;  %v14312_v0 = vld [vmem:[#allocation11 + $0x11c] ss:$28 sps:$4 sm:$0xff]  }
 0x3fc   :  { %v6442_v30 = vadd.f32 %v6441_v32, %v1735_v28  ;;  %v14313_v32 = vld [vmem:[#allocation8 + $0x1560] ss:$40 sps:$4 sm:$0xff]  }
 0x3fd   :  { %6731 = vmatpush2.bf16.msra.mxu1 %v14277_v10  ;;  %v6834_v10 = vmax.f32 %v5967_v54, 0.0 }
 0x3fe   :  { %6774 = vmatpush2.bf16.msra.mxu0 %v14280_v18  ;;  %6732 = vmatprep.subr.bf16.mxu1 %v14285_v41  ;;  %v6438_v18 = vadd.f32 %v6437_v61, %v1735_v28  ;;  %v15715_v41 = vpop.f32.mrf.mxu0  ;;  %v14318_v28 = vld [vmem:[#allocation11 + $0xe4] ss:$28 sps:$4 sm:$0xff]  }
 0x3ff   :  { %6775 = vmatprep.subr.bf16.mxu0 %v14288_v62  ;;  %v15718_v27 = vpack.c.bf16 %v6844_v9, %v6834_v10  ;;  %v14321_v9 = vld [vmem:[#allocation8 + $0x1514] ss:$40 sps:$4 sm:$0xff]  }
 0x400   :  { %v14322_v10 = vld [vmem:[#allocation11 + $0xa8] ss:$28 sps:$4 sm:$0xff]  }
 0x401   :  { %6733 = vmatpush2.bf16.msra.mxu1 %v14283_v7  ;;  %v14301_v7 = vld [vmem:[#allocation8 + $0x1600] ss:$40 sps:$4 sm:$0xff]  }
 0x402   :  { %6776 = vmatpush2.bf16.msra.mxu0 %v14286_v52  ;;  %6734 = vmatprep.subr.bf16.mxu1 %v14291_v57  ;;  %v14304_v52 = vld [vmem:[#allocation11 + $0x150] ss:$28 sps:$4 sm:$0xff]  }
 0x403   :  { %6777 = vmatprep.subr.bf16.mxu0 %v14294_v49  ;;  %v14309_v57 = vld [vmem:[#allocation8 + $0x15b4] ss:$40 sps:$4 sm:$0xff]  }
 0x405   :  { %6735 = vmatpush2.bf16.msra.mxu1 %v14289_v45  ;;  %v14307_v45 = vld [vmem:[#allocation8 + $0x15b0] ss:$40 sps:$4 sm:$0xff]  }
 0x406   :  { %6778 = vmatpush2.bf16.msra.mxu0 %v14292_v4  ;;  %6790 = vmatprep.subr.bf16.mxu1 %v14297_v56  ;;  %v14310_v4 = vld [vmem:[#allocation11 + $0x118] ss:$28 sps:$4 sm:$0xff]  }
 0x407   :  { %10420 = vmatprep.subr.bf16.mxu0 %v14300_v24  ;;  %v14315_v56 = vld [vmem:[#allocation8 + $0x1564] ss:$40 sps:$4 sm:$0xff]  }
 0x408   :  { %v6480_v42 = vpop.f32.mrf.mxu1  ;;  %6737 = vmatmul.mubr.bf16.vlgmr.msra.gmra.mxu1 %v15547_v3  ;;  %v14316_v24 = vld [vmem:[#allocation11 + $0xe0] ss:$28 sps:$4 sm:$0xff]  }
 0x409   :  { %v6481_v62 = vadd.f32 %v6480_v42, %v6438_v18  ;;  %v6523_v19 = vpop.f32.mrf.mxu0  ;;  %6780 = vmatmul.mubr.bf16.vlgmr.msra.gmra.mxu0 %v15545_v1  ;;  %6791 = vmatpush1.bf16.msra.mxu1 %v14295_v2  ;;  %v14324_v2 = vld [vmem:[#allocation11 + $0xac] ss:$28 sps:$4 sm:$0xff]   ;;  %v14327_v18 = vld [vmem:[#allocation8 + $0x14c4] ss:$40 sps:$4 sm:$0xff]   ;;  %v14325_v42 = vld [vmem:[#allocation8 + $0x14c0] ss:$40 sps:$4 sm:$0xff]  }
 0x40a   :  { %6822 = vmatprep.mubr.bf16.mxu1 %v15549_v6  ;;  %10421 = vmatpush1.bf16.msra.mxu0 %v14298_v29  ;;  %v15722_v61 = vpop.f32.mrf.mxu1  ;;  %v14319_v29 = vld [vmem:[#allocation8 + $0x1510] ss:$40 sps:$4 sm:$0xff]  }
 0x40b   :  { %v15724_v49 = vadd.f32 %v6523_v19, %v6481_v62  ;;  %10452 = vmatprep.mubr.bf16.mxu0 %v15718_v27  ;;  %v15727_v3 = vpop.f32.mrf.mxu0  ;;  %6792 = vmatprep.subr.bf16.mxu1 %v14303_v58  ;;  %v14330_v58 = vld [vmem:[#allocation11 + $0x74] ss:$28 sps:$4 sm:$0xff]   ;;  %v14336_v19 = vld [vmem:[#allocation11 + $0x3c] ss:$28 sps:$4 sm:$0xff]  }
 0x40c   :  { %v6484_v50 = vpop.f32.mrf.mxu1  ;;  %10422 = vmatprep.subr.bf16.mxu0 %v14306_v37  ;;  %v14328_v37 = vld [vmem:[#allocation11 + $0x70] ss:$28 sps:$4 sm:$0xff]  }
 0x40d   :  { %v6485_v1 = vadd.f32 %v6484_v50, %v6442_v30  ;;  %6793 = vmatpush1.bf16.msra.mxu1 %v14301_v7  ;;  %v6527_v6 = vpop.f32.mrf.mxu0  ;;  %v14333_v62 = vld [vmem:[#allocation8 + $0x1474] ss:$40 sps:$4 sm:$0xff]   ;;  %v14331_v7 = vld [vmem:[#allocation8 + $0x1470] ss:$40 sps:$4 sm:$0xff]   ;;  %v14340_v50 = vld [vmem:[#allocation11] ss:$28 sps:$4 sm:$0xff]  }
 0x40e   :  { %10423 = vmatpush1.bf16.msra.mxu0 %v14304_v52  ;;  %6794 = vmatprep.subr.bf16.mxu1 %v14309_v57  ;;  %v14334_v52 = vld [vmem:[#allocation11 + $0x38] ss:$28 sps:$4 sm:$0xff]   ;;  %v14342_v30 = vld [vmem:[#allocation11 + $0x4] ss:$28 sps:$4 sm:$0xff]  }
 0x40f   :  { %v15729_v54 = vadd.f32 %v6527_v6, %v6485_v1  ;;  %10424 = vmatprep.subr.bf16.mxu0 %v14312_v0  ;;  %v14339_v57 = vld [vmem:[#allocation8 + $0x1424] ss:$40 sps:$4 sm:$0xff]   ;;  %v14337_v0 = vld [vmem:[#allocation8 + $0x1420] ss:$40 sps:$4 sm:$0xff]   ;;  %v14345_v1 = vld [vmem:[#allocation8 + $0x18d4] ss:$40 sps:$4 sm:$0xff]  }
 0x410   :  { %v14343_v6 = vld [vmem:[#allocation8 + $0x18d0] ss:$40 sps:$4 sm:$0xff]  }
 0x411   :  { %6795 = vmatpush1.bf16.msra.mxu1 %v14307_v45  ;;  %v14348_v45 = vld [vmem:[#allocation11 + $0x34c] ss:$28 sps:$4 sm:$0xff]  }
 0x412   :  { %10425 = vmatpush1.bf16.msra.mxu0 %v14310_v4  ;;  %6796 = vmatprep.subr.bf16.mxu1 %v14315_v56  ;;  %v14346_v4 = vld [vmem:[#allocation11 + $0x348] ss:$28 sps:$4 sm:$0xff]  }
 0x413   :  { %10426 = vmatprep.subr.bf16.mxu0 %v14318_v28  ;;  %v14351_v56 = vld [vmem:[#allocation8 + $0x1884] ss:$40 sps:$4 sm:$0xff]   ;;  %v14354_v28 = vld [vmem:[#allocation11 + $0x314] ss:$28 sps:$4 sm:$0xff]  }
 0x415   :  { %6797 = vmatpush1.bf16.msra.mxu1 %v14313_v32  ;;  %v14349_v32 = vld [vmem:[#allocation8 + $0x1880] ss:$40 sps:$4 sm:$0xff]  }
 0x416   :  { %10427 = vmatpush1.bf16.msra.mxu0 %v14316_v24  ;;  %6798 = vmatprep.subr.bf16.mxu1 %v14321_v9  ;;  %v14352_v24 = vld [vmem:[#allocation11 + $0x310] ss:$28 sps:$4 sm:$0xff]  }
 0x417   :  { %10428 = vmatprep.subr.bf16.mxu0 %v14324_v2  ;;  %v14357_v9 = vld [vmem:[#allocation8 + $0x1834] ss:$40 sps:$4 sm:$0xff]   ;;  %v14360_v2 = vld [vmem:[#allocation11 + $0x2dc] ss:$28 sps:$4 sm:$0xff]  }
 0x419   :  { %6799 = vmatpush1.bf16.msra.mxu1 %v14319_v29  ;;  %v14355_v29 = vld [vmem:[#allocation8 + $0x1830] ss:$40 sps:$4 sm:$0xff]  }
 0x41a   :  { %10429 = vmatpush1.bf16.msra.mxu0 %v14322_v10  ;;  %6800 = vmatprep.subr.bf16.mxu1 %v14327_v18  ;;  %v14358_v10 = vld [vmem:[#allocation11 + $0x2d8] ss:$28 sps:$4 sm:$0xff]  }
 0x41b   :  { %10430 = vmatprep.subr.bf16.mxu0 %v14330_v58  ;;  %v14363_v18 = vld [vmem:[#allocation8 + $0x17e4] ss:$40 sps:$4 sm:$0xff]  }
 0x41c   :  { %v14366_v58 = vld [vmem:[#allocation11 + $0x2a4] ss:$28 sps:$4 sm:$0xff]  }
 0x41d   :  { %6801 = vmatpush1.bf16.msra.mxu1 %v14325_v42  ;;  %v14361_v42 = vld [vmem:[#allocation8 + $0x17e0] ss:$40 sps:$4 sm:$0xff]  }
 0x41e   :  { %10431 = vmatpush1.bf16.msra.mxu0 %v14328_v37  ;;  %6802 = vmatprep.subr.bf16.mxu1 %v14333_v62  ;;  %v15731_v37 = vld [vmem:[#allocation10] sm:$0xff] }
 0x41f   :  { %10432 = vmatprep.subr.bf16.mxu0 %v14336_v19  ;;  %v1723_v62 = vrot.slane %v15731_v37, %v15470_v23  ;;  %v14364_v19 = vld [vmem:[#allocation11 + $0x2a0] ss:$28 sps:$4 sm:$0xff]  }
 0x421   :  { %6803 = vmatpush1.bf16.msra.mxu1 %v14331_v7  ;;  %v14369_v7 = vld [vmem:[#allocation8 + $0x1794] ss:$40 sps:$4 sm:$0xff]  }
 0x422   :  { %10433 = vmatpush1.bf16.msra.mxu0 %v14334_v52  ;;  %6804 = vmatprep.subr.bf16.mxu1 %v14339_v57  ;;  %v1731_v52 = vrot.slane %v15731_v37, %v15501_v14  ;;  %v14372_v57 = vld [vmem:[#allocation11 + $0x26c] ss:$28 sps:$4 sm:$0xff]  }
 0x423   :  { %10434 = vmatprep.subr.bf16.mxu0 %v14342_v30  ;;  %v6014_v30 = vadd.f32 %v15615_v59, %v1723_v62 }
 0x425   :  { %6805 = vmatpush1.bf16.msra.mxu1 %v14337_v0  ;;  %v6229_v0 = vadd.f32 %v15665_v33, %v1731_v52  ;;  %v14373_v33 = vld [vmem:[#allocation8 + $0x1740] ss:$40 sps:$4 sm:$0xff]  }
 0x426   :  { %10435 = vmatpush1.bf16.msra.mxu0 %v14340_v50  ;;  %6806 = vmatprep.subr.bf16.mxu1 %v14345_v1  ;;  %v14367_v50 = vld [vmem:[#allocation8 + $0x1790] ss:$40 sps:$4 sm:$0xff]   ;;  %v6010_v1 = vadd.f32 %v15610_v43, %v1723_v62 }
 0x427   :  { %10436 = vmatprep.subr.bf16.mxu0 %v14348_v45  ;;  %v6057_v45 = vadd.f32 %v15629_v39, %v6014_v30  ;;  %v6272_v59 = vadd.f32 %v15667_v48, %v6229_v0  ;;  %v14376_v43 = vld [vmem:[#allocation11 + $0x230] ss:$28 sps:$4 sm:$0xff]  }
 0x428   :  { %v14381_v39 = vld [vmem:[#allocation8 + $0x16f4] ss:$40 sps:$4 sm:$0xff]  }
 0x429   :  { %6807 = vmatpush2.bf16.msra.mxu1 %v14343_v6  ;;  %v14370_v6 = vld [vmem:[#allocation11 + $0x268] ss:$28 sps:$4 sm:$0xff]  }
 0x42a   :  { %10437 = vmatpush2.bf16.msra.mxu0 %v14346_v4  ;;  %6808 = vmatprep.subr.bf16.mxu1 %v14351_v56  ;;  %v14375_v4 = vld [vmem:[#allocation8 + $0x1744] ss:$40 sps:$4 sm:$0xff]   ;;  %v6225_v56 = vadd.f32 %v15656_v63, %v1731_v52 }
 0x42b   :  { %10438 = vmatprep.subr.bf16.mxu0 %v14354_v28  ;;  %v14378_v28 = vld [vmem:[#allocation11 + $0x234] ss:$28 sps:$4 sm:$0xff]   ;;  %v14384_v63 = vld [vmem:[#allocation11 + $0x1fc] ss:$28 sps:$4 sm:$0xff]  }
 0x42d   :  { %6809 = vmatpush2.bf16.msra.mxu1 %v14349_v32  ;;  %v6053_v32 = vadd.f32 %v15620_v11, %v6010_v1 }
 0x42e   :  { %10439 = vmatpush2.bf16.msra.mxu0 %v14352_v24  ;;  %6810 = vmatprep.subr.bf16.mxu1 %v14357_v9  ;;  %v6100_v24 = vadd.f32 %v15631_v34, %v6057_v45  ;;  %v6268_v9 = vadd.f32 %v15661_v8, %v6225_v56  ;;  %v14402_v45 = vld [vmem:[#allocation11 + $0x854] ss:$28 sps:$4 sm:$0xff]  }
 0x42f   :  { %10440 = vmatprep.subr.bf16.mxu0 %v14360_v2  ;;  %v6315_v2 = vadd.f32 %v15683_v51, %v6272_v59  ;;  %v14390_v51 = vld [vmem:[#allocation11 + $0x1c4] ss:$28 sps:$4 sm:$0xff]   ;;  %v14400_v59 = vld [vmem:[#allocation11 + $0x850] ss:$28 sps:$4 sm:$0xff]  }
 0x430   :  { %v6143_v11 = vadd.f32 %v15649_v47, %v6100_v24  ;;  %v6311_v48 = vadd.f32 %v15673_v53, %v6268_v9  ;;  %v14385_v53 = vld [vmem:[#allocation8 + $0x16a0] ss:$40 sps:$4 sm:$0xff]  }
 0x431   :  { %6811 = vmatpush2.bf16.msra.mxu1 %v14355_v29  ;;  %v6096_v29 = vadd.f32 %v15625_v31, %v6053_v32  ;;  %v6358_v8 = vadd.f32 %v15700_v12, %v6315_v2  ;;  %v14396_v12 = vld [vmem:[#allocation11 + $0x88c] ss:$28 sps:$4 sm:$0xff]   ;;  %v14403_v9 = vld [vmem:[#allocation11 + $0x498] ss:$28 sps:$4 sm:$0xff]  }
 0x432   :  { %10441 = vmatpush2.bf16.msra.mxu0 %v14358_v10  ;;  %6812 = vmatprep.subr.bf16.mxu1 %v14363_v18  ;;  %v14379_v10 = vld [vmem:[#allocation8 + $0x16f0] ss:$40 sps:$4 sm:$0xff]   ;;  %v14382_v18 = vld [vmem:[#allocation11 + $0x1f8] ss:$28 sps:$4 sm:$0xff]   ;;  %v6354_v31 = vadd.f32 %v15678_v20, %v6311_v48  ;;  %v15757_v20 = vpop.f32.mrf.mxu1 }
 0x433   :  { %10442 = vmatprep.subr.bf16.mxu0 %v14366_v58  ;;  %v6139_v34 = vadd.f32 %v15637_v35, %v6096_v29  ;;  %v14387_v58 = vld [vmem:[#allocation8 + $0x16a4] ss:$40 sps:$4 sm:$0xff]   ;;  %v6401_v47 = vadd.f32 %v15713_v5, %v6358_v8  ;;  %v14417_v8 = vld [vmem:[#allocation11 + $0x42c] ss:$28 sps:$4 sm:$0xff]  }
 0x434   :  { %v14388_v35 = vld [vmem:[#allocation11 + $0x1c0] ss:$28 sps:$4 sm:$0xff]   ;;  %v14394_v5 = vld [vmem:[#allocation11 + $0x888] ss:$28 sps:$4 sm:$0xff]  }
 0x435   :  { %6813 = vmatpush2.bf16.msra.mxu1 %v14361_v42  ;;  %v6186_v42 = vadd.f32 %v15651_v46, %v6143_v11  ;;  %v6182_v62 = vadd.f32 %v15640_v40, %v6139_v34  ;;  %v14391_v46 = vld [vmem:[#allocation11 + $0x508] ss:$28 sps:$4 sm:$0xff]   ;;  %v15759_v40 = vpop.f32.mrf.mxu0 }
 0x436   :  { %10443 = vmatpush2.bf16.msra.mxu0 %v14364_v19  ;;  %6814 = vmatprep.subr.bf16.mxu1 %v14369_v7  ;;  %v14393_v19 = vld [vmem:[#allocation11 + $0x50c] ss:$28 sps:$4 sm:$0xff]   ;;  %v6397_v7 = vadd.f32 %v15689_v60, %v6354_v31  ;;  %v14411_v29 = vld [vmem:[#allocation11 + $0x464] ss:$28 sps:$4 sm:$0xff]  }
 0x437   :  { %10444 = vmatprep.subr.bf16.mxu0 %v14372_v57  ;;  %v6846_v52 = vmax.f32 %v6186_v42, 0.0  ;;  %v6848_v57 = vmax.f32 %v6401_v47, 0.0  ;;  %v6836_v30 = vmax.f32 %v6182_v62, 0.0  ;;  %v14414_v48 = vld [vmem:[#allocation11 + $0x7e4] ss:$28 sps:$4 sm:$0xff]  }
 0x438   :  { %v6838_v0 = vmax.f32 %v6397_v7, 0.0  ;;  %v14415_v42 = vld [vmem:[#allocation11 + $0x428] ss:$28 sps:$4 sm:$0xff]   ;;  %v14423_v47 = vld [vmem:[#allocation11 + $0x3f4] ss:$28 sps:$4 sm:$0xff]  }
 0x439   :  { %6815 = vmatpush2.bf16.msra.mxu1 %v14367_v50  ;;  %v14399_v50 = vld [vmem:[#allocation11 + $0x4d4] ss:$28 sps:$4 sm:$0xff]   ;;  %v15761_v1 = vpack.c.bf16 %v6846_v52, %v6836_v30  ;;  %v14418_v31 = vld [vmem:[#allocation11 + $0x7a8] ss:$28 sps:$4 sm:$0xff]   ;;  %v14432_v7 = vld [vmem:[#allocation11 + $0x73c] ss:$28 sps:$4 sm:$0xff]  }
 0x43a   :  { %10445 = vmatpush2.bf16.msra.mxu0 %v14370_v6  ;;  %6816 = vmatprep.subr.bf16.mxu1 %v14375_v4  ;;  %v15764_v6 = vpack.c.bf16 %v6848_v57, %v6838_v0  ;;  %v14421_v62 = vld [vmem:[#allocation11 + $0x3f0] ss:$28 sps:$4 sm:$0xff]   ;;  %v14430_v52 = vld [vmem:[#allocation11 + $0x738] ss:$28 sps:$4 sm:$0xff]   ;;  %v14435_v57 = vld [vmem:[#allocation11 + $0x384] ss:$28 sps:$4 sm:$0xff]  }
 0x43b   :  { %10446 = vmatprep.subr.bf16.mxu0 %v14378_v28  ;;  %v14397_v28 = vld [vmem:[#allocation11 + $0x4d0] ss:$28 sps:$4 sm:$0xff]   ;;  %v14433_v30 = vld [vmem:[#allocation11 + $0x380] ss:$28 sps:$4 sm:$0xff]  }
 0x43c   :  { %v14441_v0 = vld [vmem:[#allocation11 + $0x6cc] ss:$28 sps:$4 sm:$0xff]  }
 0x43d   :  { %6817 = vmatpush2.bf16.msra.mxu1 %v14373_v33  ;;  %v14405_v33 = vld [vmem:[#allocation11 + $0x49c] ss:$28 sps:$4 sm:$0xff]  }
 0x43e   :  { %10447 = vmatpush2.bf16.msra.mxu0 %v14376_v43  ;;  %6818 = vmatprep.subr.bf16.mxu1 %v14381_v39  ;;  %v14408_v43 = vld [vmem:[#allocation11 + $0x81c] ss:$28 sps:$4 sm:$0xff]  }
 0x43f   :  { %10448 = vmatprep.subr.bf16.mxu0 %v14384_v63  ;;  %v14406_v63 = vld [vmem:[#allocation11 + $0x818] ss:$28 sps:$4 sm:$0xff]  }
 0x441   :  { %6819 = vmatpush2.bf16.msra.mxu1 %v14379_v10 }
 0x442   :  { %10449 = vmatpush2.bf16.msra.mxu0 %v14382_v18  ;;  %6820 = vmatprep.subr.bf16.mxu1 %v14387_v58  ;;  %v14409_v18 = vld [vmem:[#allocation11 + $0x460] ss:$28 sps:$4 sm:$0xff]  }
 0x443   :  { %10450 = vmatprep.subr.bf16.mxu0 %v14390_v51  ;;  %v14412_v58 = vld [vmem:[#allocation11 + $0x7e0] ss:$28 sps:$4 sm:$0xff]  }
 0x445   :  { %6821 = vmatpush2.bf16.msra.mxu1 %v14385_v53  ;;  %v14426_v53 = vld [vmem:[#allocation11 + $0x774] ss:$28 sps:$4 sm:$0xff]  }
 0x446   :  { %10451 = vmatpush2.bf16.msra.mxu0 %v14388_v35  ;;  %10463 = vmatprep.subr.bf16.mxu1 %v14393_v19  ;;  %v14424_v35 = vld [vmem:[#allocation11 + $0x770] ss:$28 sps:$4 sm:$0xff]   ;;  %v14429_v19 = vld [vmem:[#allocation11 + $0x3bc] ss:$28 sps:$4 sm:$0xff]  }
 0x447   :  { %10506 = vmatprep.subr.bf16.mxu0 %v14396_v12  ;;  %v14427_v12 = vld [vmem:[#allocation11 + $0x3b8] ss:$28 sps:$4 sm:$0xff]  }
 0x448   :  { %v6566_v60 = vpop.f32.mrf.mxu1  ;;  %6823 = vmatmul.mubr.bf16.vlgmr.msra.gmra.mxu1 %v15559_v44 }
 0x449   :  { %v6567_v4 = vadd.f32 %v6566_v60, %v15724_v49  ;;  %v6609_v56 = vpop.f32.mrf.mxu0  ;;  %10453 = vmatmul.mubr.bf16.vlgmr.msra.gmra.mxu0 %v15606_v13  ;;  %10464 = vmatpush1.bf16.msra.mxu1 %v14391_v46  ;;  %v14438_v46 = vld [vmem:[#allocation11 + $0x704] ss:$28 sps:$4 sm:$0xff]  }
 0x44a   :  { %10495 = vmatprep.mubr.bf16.mxu1 %v15761_v1  ;;  %10507 = vmatpush1.bf16.msra.mxu0 %v14394_v5  ;;  %v15769_v32 = vpop.f32.mrf.mxu1  ;;  %v14436_v5 = vld [vmem:[#allocation11 + $0x700] ss:$28 sps:$4 sm:$0xff]   ;;  %v14439_v60 = vld [vmem:[#allocation11 + $0x6c8] ss:$28 sps:$4 sm:$0xff]  }
 0x44b   :  { %v6610_v24 = vadd.f32 %v6609_v56, %v6567_v4  ;;  %10538 = vmatprep.mubr.bf16.mxu0 %v15764_v6  ;;  %v15772_v44 = vpop.f32.mrf.mxu0  ;;  %10465 = vmatprep.subr.bf16.mxu1 %v14399_v50  ;;  %v14444_v50 = vld [vmem:[#allocation11 + $0xa4c] ss:$28 sps:$4 sm:$0xff]   ;;  %v14447_v4 = vld [vmem:[#allocation11 + $0x694] ss:$28 sps:$4 sm:$0xff]  }
 0x44c   :  { %v6570_v49 = vpop.f32.mrf.mxu1  ;;  %10508 = vmatprep.subr.bf16.mxu0 %v14402_v45  ;;  %v14442_v45 = vld [vmem:[#allocation11 + $0xa48] ss:$28 sps:$4 sm:$0xff]   ;;  %v14450_v56 = vld [vmem:[#allocation11 + $0xa14] ss:$28 sps:$4 sm:$0xff]  }
 0x44d   :  { %v6571_v39 = vadd.f32 %v6570_v49, %v15729_v54  ;;  %10466 = vmatpush1.bf16.msra.mxu1 %v14397_v28  ;;  %v6613_v2 = vpop.f32.mrf.mxu0  ;;  %v6839_v10 = vmax.f32 %v6610_v24, 0.0  ;;  %v14420_v54 = vld [vmem:[#allocation11 + $0x7ac] ss:$28 sps:$4 sm:$0xff]   ;;  %v14456_v24 = vld [vmem:[#allocation11 + $0x9dc] ss:$28 sps:$4 sm:$0xff]  }
 0x44e   :  { %10509 = vmatpush1.bf16.msra.mxu0 %v14400_v59  ;;  %10467 = vmatprep.subr.bf16.mxu1 %v14405_v33  ;;  %v14445_v28 = vld [vmem:[#allocation11 + $0x690] ss:$28 sps:$4 sm:$0xff]   ;;  %v14453_v33 = vld [vmem:[#allocation11 + $0x65c] ss:$28 sps:$4 sm:$0xff]  }
 0x44f   :  { %v6614_v11 = vadd.f32 %v6613_v2, %v6571_v39  ;;  %10510 = vmatprep.subr.bf16.mxu0 %v14408_v43  ;;  %v14448_v59 = vld [vmem:[#allocation11 + $0xa10] ss:$28 sps:$4 sm:$0xff]   ;;  %v14451_v43 = vld [vmem:[#allocation11 + $0x658] ss:$28 sps:$4 sm:$0xff]   ;;  %v14459_v39 = vld [vmem:[#allocation11 + $0x624] ss:$28 sps:$4 sm:$0xff]  }
 0x450   :  { %v14454_v49 = vld [vmem:[#allocation11 + $0x9d8] ss:$28 sps:$4 sm:$0xff]   ;;  %v14457_v2 = vld [vmem:[#allocation11 + $0x620] ss:$28 sps:$4 sm:$0xff]  }
 0x451   :  { %v6849_v34 = vmax.f32 %v6614_v11, 0.0  ;;  %10468 = vmatpush1.bf16.msra.mxu1 %v14403_v9  ;;  %v14462_v9 = vld [vmem:[#allocation11 + $0x9a4] ss:$28 sps:$4 sm:$0xff]   ;;  %v14465_v11 = vld [vmem:[#allocation11 + $0x5ec] ss:$28 sps:$4 sm:$0xff]  }
 0x452   :  { %10511 = vmatpush1.bf16.msra.mxu0 %v14406_v63  ;;  %10469 = vmatprep.subr.bf16.mxu1 %v14411_v29  ;;  %v1739_v63 = vrot.slane %v15731_v37, %v233_v15  ;;  %v14460_v29 = vld [vmem:[#allocation11 + $0x9a0] ss:$28 sps:$4 sm:$0xff]   ;;  %v14474_v15 = vld [vmem:[#allocation11 + $0x934] ss:$28 sps:$4 sm:$0xff]  }
 0x453   :  { %v15775_v51 = vpack.c.bf16 %v6849_v34, %v6839_v10  ;;  %10512 = vmatprep.subr.bf16.mxu0 %v14414_v48  ;;  %v14468_v48 = vld [vmem:[#allocation11 + $0x96c] ss:$28 sps:$4 sm:$0xff]  }
 0x454   :  { %v6444_v10 = vadd.f32 %v15715_v41, %v1739_v63  ;;  %v14463_v34 = vld [vmem:[#allocation11 + $0x5e8] ss:$28 sps:$4 sm:$0xff]   ;;  %v14472_v41 = vld [vmem:[#allocation11 + $0x930] ss:$28 sps:$4 sm:$0xff]  }
 0x455   :  { %10470 = vmatpush1.bf16.msra.mxu1 %v14409_v18  ;;  %v6440_v18 = vadd.f32 %v15706_v55, %v1739_v63  ;;  %v14480_v55 = vld [vmem:[#allocation11 + $0x8fc] ss:$28 sps:$4 sm:$0xff]   ;;  %v14573_v63 = vld [vmem:[#allocation11 + $0xeac] ss:$28 sps:$4 sm:$0xff]  }
 0x456   :  { %10513 = vmatpush1.bf16.msra.mxu0 %v14412_v58  ;;  %10471 = vmatprep.subr.bf16.mxu1 %v14417_v8  ;;  %v6487_v58 = vadd.f32 %v15757_v20, %v6444_v10  ;;  %v14466_v8 = vld [vmem:[#allocation11 + $0x968] ss:$28 sps:$4 sm:$0xff]   ;;  %v14579_v10 = vld [vmem:[#allocation11 + $0xe74] ss:$28 sps:$4 sm:$0xff]  }
 0x457   :  { %10514 = vmatprep.subr.bf16.mxu0 %v14420_v54  ;;  %v6483_v37 = vadd.f32 %v15722_v61, %v6440_v18  ;;  %v6572_v54 = vpop.f32.mrf.mxu1  ;;  %v14478_v61 = vld [vmem:[#allocation11 + $0x8f8] ss:$28 sps:$4 sm:$0xff]  }
 0x458   :  { %v14507_v18 = vld [vmem:[#allocation11 + $0xabc] ss:$28 sps:$4 sm:$0xff]  }
 0x459   :  { %10472 = vmatpush1.bf16.msra.mxu1 %v14415_v42  ;;  %v14469_v42 = vld [vmem:[#allocation11 + $0x5b0] ss:$28 sps:$4 sm:$0xff]   ;;  %v6526_v20 = vadd.f32 %v15727_v3, %v6483_v37  ;;  %v14484_v3 = vld [vmem:[#allocation11 + $0x8c0] ss:$28 sps:$4 sm:$0xff]   ;;  %v14583_v37 = vld [vmem:[#allocation11 + $0xe38] ss:$28 sps:$4 sm:$0xff]  }
 0x45a   :  { %10515 = vmatpush1.bf16.msra.mxu0 %v14418_v31  ;;  %10473 = vmatprep.subr.bf16.mxu1 %v14423_v47  ;;  %v6530_v31 = vadd.f32 %v15759_v40, %v6487_v58  ;;  %v14477_v47 = vld [vmem:[#allocation11 + $0x57c] ss:$28 sps:$4 sm:$0xff]   ;;  %v14486_v40 = vld [vmem:[#allocation11 + $0x8c4] ss:$28 sps:$4 sm:$0xff]   ;;  %v14577_v58 = vld [vmem:[#allocation11 + $0xe70] ss:$28 sps:$4 sm:$0xff]  }
 0x45b   :  { %10516 = vmatprep.subr.bf16.mxu0 %v14426_v53 }
 0x45c   :  { %v6573_v53 = vadd.f32 %v6572_v54, %v6530_v31  ;;  %v14591_v54 = vld [vmem:[#allocation11 + $0xe04] ss:$28 sps:$4 sm:$0xff]   ;;  %v14513_v31 = vld [vmem:[#allocation11 + $0xdcc] ss:$28 sps:$4 sm:$0xff]  }
 0x45d   :  { %10474 = vmatpush1.bf16.msra.mxu1 %v14421_v62  ;;  %v14475_v62 = vld [vmem:[#allocation11 + $0x578] ss:$28 sps:$4 sm:$0xff]  }
 0x45e   :  { %10517 = vmatpush1.bf16.msra.mxu0 %v14424_v35  ;;  %10475 = vmatprep.subr.bf16.mxu1 %v14429_v19  ;;  %v6569_v35 = vadd.f32 %v15769_v32, %v6526_v20  ;;  %v14483_v19 = vld [vmem:[#allocation11 + $0x544] ss:$28 sps:$4 sm:$0xff]   ;;  %v14516_v20 = vld [vmem:[#allocation11 + $0xd94] ss:$28 sps:$4 sm:$0xff]  }
 0x45f   :  { %10518 = vmatprep.subr.bf16.mxu0 %v14432_v7  ;;  %v6615_v7 = vpop.f32.mrf.mxu0  ;;  %v14487_v32 = vld [vmem:[#allocation11 + $0xc08] ss:$28 sps:$4 sm:$0xff]  }
 0x461   :  { %10476 = vmatpush1.bf16.msra.mxu1 %v14427_v12  ;;  %v6616_v12 = vadd.f32 %v6615_v7, %v6573_v53  ;;  %v14595_v53 = vld [vmem:[#allocation11 + $0x1148] ss:$28 sps:$4 sm:$0xff]   ;;  %v14609_v7 = vld [vmem:[#allocation11 + $0x10dc] ss:$28 sps:$4 sm:$0xff]  }
 0x462   :  { %10519 = vmatpush1.bf16.msra.mxu0 %v14430_v52  ;;  %10477 = vmatprep.subr.bf16.mxu1 %v14435_v57  ;;  %v14481_v52 = vld [vmem:[#allocation11 + $0x540] ss:$28 sps:$4 sm:$0xff]   ;;  %v6612_v57 = vadd.f32 %v15772_v44, %v6569_v35  ;;  %v14555_v44 = vld [vmem:[#allocation11 + $0xf54] ss:$28 sps:$4 sm:$0xff]  }
 0x463   :  { %10520 = vmatprep.subr.bf16.mxu0 %v14438_v46  ;;  %v14489_v46 = vld [vmem:[#allocation11 + $0xc0c] ss:$28 sps:$4 sm:$0xff]  }
 0x464   :  { %v14514_v35 = vld [vmem:[#allocation11 + $0xd90] ss:$28 sps:$4 sm:$0xff]  }
 0x465   :  { %10478 = vmatpush1.bf16.msra.mxu1 %v14433_v30  ;;  %v14549_v30 = vld [vmem:[#allocation11 + $0xf8c] ss:$28 sps:$4 sm:$0xff]  }
 0x466   :  { %10521 = vmatpush1.bf16.msra.mxu0 %v14436_v5  ;;  %10479 = vmatprep.subr.bf16.mxu1 %v14441_v0  ;;  %v6850_v5 = vmax.f32 %v6616_v12, 0.0  ;;  %v6840_v0 = vmax.f32 %v6612_v57, 0.0  ;;  %v14522_v12 = vld [vmem:[#allocation11 + $0xd24] ss:$28 sps:$4 sm:$0xff]  }
 0x467   :  { %10522 = vmatprep.subr.bf16.mxu0 %v14444_v50  ;;  %v14492_v50 = vld [vmem:[#allocation11 + $0xbd4] ss:$28 sps:$4 sm:$0xff]   ;;  %v14615_v57 = vld [vmem:[#allocation11 + $0x10a4] ss:$28 sps:$4 sm:$0xff]  }
 0x469   :  { %10480 = vmatpush2.bf16.msra.mxu1 %v14439_v60  ;;  %v14547_v60 = vld [vmem:[#allocation11 + $0xf88] ss:$28 sps:$4 sm:$0xff]  }
 0x46a   :  { %10523 = vmatpush2.bf16.msra.mxu0 %v14442_v45  ;;  %10481 = vmatprep.subr.bf16.mxu1 %v14447_v4  ;;  %v15788_v45 = vpack.c.bf16 %v6850_v5, %v6840_v0  ;;  %v14490_v4 = vld [vmem:[#allocation11 + $0xbd0] ss:$28 sps:$4 sm:$0xff]  }
 0x46b   :  { %10524 = vmatprep.subr.bf16.mxu0 %v14450_v56  ;;  %v14495_v56 = vld [vmem:[#allocation11 + $0xb9c] ss:$28 sps:$4 sm:$0xff]   ;;  %v14621_v5 = vld [vmem:[#allocation11 + $0x106c] ss:$28 sps:$4 sm:$0xff]   ;;  %v14528_v0 = vld [vmem:[#allocation11 + $0xcb4] ss:$28 sps:$4 sm:$0xff]  }
 0x46d   :  { %10482 = vmatpush2.bf16.msra.mxu1 %v14445_v28  ;;  %v14553_v28 = vld [vmem:[#allocation11 + $0xf50] ss:$28 sps:$4 sm:$0xff]  }
 0x46e   :  { %10525 = vmatpush2.bf16.msra.mxu0 %v14448_v59  ;;  %10483 = vmatprep.subr.bf16.mxu1 %v14453_v33  ;;  %v14561_v59 = vld [vmem:[#allocation11 + $0xf1c] ss:$28 sps:$4 sm:$0xff]  }
 0x46f   :  { %10526 = vmatprep.subr.bf16.mxu0 %v14456_v24  ;;  %v14493_v33 = vld [vmem:[#allocation11 + $0xb98] ss:$28 sps:$4 sm:$0xff]   ;;  %v14498_v24 = vld [vmem:[#allocation11 + $0xb64] ss:$28 sps:$4 sm:$0xff]  }
 0x471   :  { %10484 = vmatpush2.bf16.msra.mxu1 %v14451_v43  ;;  %v14559_v43 = vld [vmem:[#allocation11 + $0xf18] ss:$28 sps:$4 sm:$0xff]  }
 0x472   :  { %10527 = vmatpush2.bf16.msra.mxu0 %v14454_v49  ;;  %10485 = vmatprep.subr.bf16.mxu1 %v14459_v39  ;;  %v14567_v49 = vld [vmem:[#allocation11 + $0xee4] ss:$28 sps:$4 sm:$0xff]  }
 0x473   :  { %10528 = vmatprep.subr.bf16.mxu0 %v14462_v9  ;;  %v14496_v39 = vld [vmem:[#allocation11 + $0xb60] ss:$28 sps:$4 sm:$0xff]   ;;  %v14501_v9 = vld [vmem:[#allocation11 + $0xb2c] ss:$28 sps:$4 sm:$0xff]  }
 0x475   :  { %10486 = vmatpush2.bf16.msra.mxu1 %v14457_v2  ;;  %v14565_v2 = vld [vmem:[#allocation11 + $0xee0] ss:$28 sps:$4 sm:$0xff]  }
 0x476   :  { %10529 = vmatpush2.bf16.msra.mxu0 %v14460_v29  ;;  %10487 = vmatprep.subr.bf16.mxu1 %v14465_v11  ;;  %v14499_v29 = vld [vmem:[#allocation11 + $0xb28] ss:$28 sps:$4 sm:$0xff]   ;;  %v14504_v11 = vld [vmem:[#allocation11 + $0xaf4] ss:$28 sps:$4 sm:$0xff]  }
 0x477   :  { %10530 = vmatprep.subr.bf16.mxu0 %v14468_v48  ;;  %v14571_v48 = vld [vmem:[#allocation11 + $0xea8] ss:$28 sps:$4 sm:$0xff]  }
 0x479   :  { %10488 = vmatpush2.bf16.msra.mxu1 %v14463_v34  ;;  %v14502_v34 = vld [vmem:[#allocation11 + $0xaf0] ss:$28 sps:$4 sm:$0xff]  }
 0x47a   :  { %10531 = vmatpush2.bf16.msra.mxu0 %v14466_v8  ;;  %10489 = vmatprep.subr.bf16.mxu1 %v14471_v21  ;;  %v14585_v8 = vld [vmem:[#allocation11 + $0xe3c] ss:$28 sps:$4 sm:$0xff]  }
 0x47b   :  { %10532 = vmatprep.subr.bf16.mxu0 %v14474_v15  ;;  %v14505_v21 = vld [vmem:[#allocation11 + $0xab8] ss:$28 sps:$4 sm:$0xff]   ;;  %v14510_v15 = vld [vmem:[#allocation11 + $0xa84] ss:$28 sps:$4 sm:$0xff]  }
 0x47d   :  { %10490 = vmatpush2.bf16.msra.mxu1 %v14469_v42  ;;  %v14508_v42 = vld [vmem:[#allocation11 + $0xa80] ss:$28 sps:$4 sm:$0xff]  }
 0x47e   :  { %10533 = vmatpush2.bf16.msra.mxu0 %v14472_v41  ;;  %10491 = vmatprep.subr.bf16.mxu1 %v14477_v47  ;;  %v14589_v41 = vld [vmem:[#allocation11 + $0xe00] ss:$28 sps:$4 sm:$0xff]   ;;  %v14597_v47 = vld [vmem:[#allocation11 + $0x114c] ss:$28 sps:$4 sm:$0xff]  }
 0x47f   :  { %10534 = vmatprep.subr.bf16.mxu0 %v14480_v55  ;;  %v14511_v55 = vld [vmem:[#allocation11 + $0xdc8] ss:$28 sps:$4 sm:$0xff]  }
 0x481   :  { %10492 = vmatpush2.bf16.msra.mxu1 %v14475_v62  ;;  %v14603_v62 = vld [vmem:[#allocation11 + $0x1114] ss:$28 sps:$4 sm:$0xff]  }
 0x482   :  { %10535 = vmatpush2.bf16.msra.mxu0 %v14478_v61  ;;  %10493 = vmatprep.subr.bf16.mxu1 %v14483_v19  ;;  %v14519_v61 = vld [vmem:[#allocation11 + $0xd5c] ss:$28 sps:$4 sm:$0xff]   ;;  %v14601_v19 = vld [vmem:[#allocation11 + $0x1110] ss:$28 sps:$4 sm:$0xff]  }
 0x483   :  { %10536 = vmatprep.subr.bf16.mxu0 %v14486_v40  ;;  %v14517_v40 = vld [vmem:[#allocation11 + $0xd58] ss:$28 sps:$4 sm:$0xff]  }
 0x485   :  { %10494 = vmatpush2.bf16.msra.mxu1 %v14481_v52  ;;  %v14607_v52 = vld [vmem:[#allocation11 + $0x10d8] ss:$28 sps:$4 sm:$0xff]  }
 0x486   :  { %10537 = vmatpush2.bf16.msra.mxu0 %v14484_v3  ;;  %10549 = vmatprep.subr.bf16.mxu1 %v14489_v46  ;;  %v14520_v3 = vld [vmem:[#allocation11 + $0xd20] ss:$28 sps:$4 sm:$0xff]   ;;  %v14525_v46 = vld [vmem:[#allocation11 + $0xcec] ss:$28 sps:$4 sm:$0xff]  }
 0x487   :  { %10592 = vmatprep.subr.bf16.mxu0 %v14549_v30  ;;  %v14613_v30 = vld [vmem:[#allocation11 + $0x10a0] ss:$28 sps:$4 sm:$0xff]  }
 0x488   :  { %10496 = vmatmul.mubr.bf16.vlgmr.msra.gmra.mxu1 %v15643_v38 }
 0x489   :  { %10539 = vmatmul.mubr.bf16.vlgmr.msra.gmra.mxu0 %v15693_v36  ;;  %10550 = vmatpush1.bf16.msra.mxu1 %v14487_v32  ;;  %v14523_v32 = vld [vmem:[#allocation11 + $0xce8] ss:$28 sps:$4 sm:$0xff]  }
 0x48a   :  { %10581 = vmatprep.mubr.bf16.mxu1 %v15788_v45  ;;  %10551 = vmatprep.subr.bf16.mxu1 %v14492_v50  ;;  %v14619_v50 = vld [vmem:[#allocation11 + $0x1068] ss:$28 sps:$4 sm:$0xff]  }
 0x48b   :  { %10593 = vmatpush1.bf16.msra.mxu0 %v14547_v60  ;;  %v14627_v60 = vld [vmem:[#allocation11 + $0x1034] ss:$28 sps:$4 sm:$0xff]  }
 0x48c   :  { %10594 = vmatprep.subr.bf16.mxu0 %v14555_v44  ;;  %v14526_v44 = vld [vmem:[#allocation11 + $0xcb0] ss:$28 sps:$4 sm:$0xff]  }
 0x48d   :  { %10552 = vmatpush1.bf16.msra.mxu1 %v14490_v4  ;;  %v14531_v4 = vld [vmem:[#allocation11 + $0xc7c] ss:$28 sps:$4 sm:$0xff]  }
 0x48e   :  { %10553 = vmatprep.subr.bf16.mxu1 %v14495_v56  ;;  %v14625_v56 = vld [vmem:[#allocation11 + $0x1030] ss:$28 sps:$4 sm:$0xff]  }
 0x48f   :  { %10595 = vmatpush1.bf16.msra.mxu0 %v14553_v28  ;;  %v14633_v28 = vld [vmem:[#allocation11 + $0xffc] ss:$28 sps:$4 sm:$0xff]  }
 0x490   :  { %10596 = vmatprep.subr.bf16.mxu0 %v14561_v59  ;;  %v14529_v59 = vld [vmem:[#allocation11 + $0xc78] ss:$28 sps:$4 sm:$0xff]  }
 0x491   :  { %10554 = vmatpush1.bf16.msra.mxu1 %v14493_v33  ;;  %v14534_v33 = vld [vmem:[#allocation11 + $0xc44] ss:$28 sps:$4 sm:$0xff]  }
 0x492   :  { %10555 = vmatprep.subr.bf16.mxu1 %v14498_v24  ;;  %v14631_v24 = vld [vmem:[#allocation11 + $0xff8] ss:$28 sps:$4 sm:$0xff]  }
 0x493   :  { %10597 = vmatpush1.bf16.msra.mxu0 %v14559_v43  ;;  %v14639_v43 = vld [vmem:[#allocation11 + $0xfc4] ss:$28 sps:$4 sm:$0xff]  }
 0x494   :  { %10598 = vmatprep.subr.bf16.mxu0 %v14567_v49  ;;  %v14532_v49 = vld [vmem:[#allocation11 + $0xc40] ss:$28 sps:$4 sm:$0xff]  }
 0x495   :  { %10556 = vmatpush1.bf16.msra.mxu1 %v14496_v39  ;;  %v14537_v39 = vld [vmem:[#allocation11 + $0x194] ss:$28 sps:$4 sm:$0xff]  }
 0x496   :  { %10557 = vmatprep.subr.bf16.mxu1 %v14501_v9  ;;  %v14637_v9 = vld [vmem:[#allocation11 + $0xfc0] ss:$28 sps:$4 sm:$0xff]  }
 0x497   :  { %10599 = vmatpush1.bf16.msra.mxu0 %v14565_v2  ;;  %v14645_v2 = vld [vmem:[#allocation11 + $0x514] ss:$28 sps:$4 sm:$0xff]  }
 0x498   :  { %10600 = vmatprep.subr.bf16.mxu0 %v14573_v63  ;;  %v14535_v63 = vld [vmem:[#allocation11 + $0x190] ss:$28 sps:$4 sm:$0xff]  }
 0x499   :  { %10558 = vmatpush1.bf16.msra.mxu1 %v14499_v29  ;;  %v14540_v29 = vld [vmem:[#allocation11 + $0x15c] ss:$28 sps:$4 sm:$0xff]  }
 0x49a   :  { %10559 = vmatprep.subr.bf16.mxu1 %v14504_v11  ;;  %v14538_v11 = vld [vmem:[#allocation11 + $0x158] ss:$28 sps:$4 sm:$0xff]  }
 0x49b   :  { %10601 = vmatpush1.bf16.msra.mxu0 %v14571_v48  ;;  %v14543_v48 = vld [vmem:[#allocation11 + $0x124] ss:$28 sps:$4 sm:$0xff]  }
 0x49c   :  { %10602 = vmatprep.subr.bf16.mxu0 %v14579_v10  ;;  %v14541_v10 = vld [vmem:[#allocation11 + $0x120] ss:$28 sps:$4 sm:$0xff]  }
 0x49d   :  { %10560 = vmatpush1.bf16.msra.mxu1 %v14502_v34  ;;  %v14546_v34 = vld [vmem:[#allocation11 + $0xec] ss:$28 sps:$4 sm:$0xff]  }
 0x49e   :  { %10561 = vmatprep.subr.bf16.mxu1 %v14507_v18  ;;  %v14544_v18 = vld [vmem:[#allocation11 + $0xe8] ss:$28 sps:$4 sm:$0xff]  }
 0x49f   :  { %10603 = vmatpush1.bf16.msra.mxu0 %v14577_v58  ;;  %v14552_v58 = vld [vmem:[#allocation11 + $0xb4] ss:$28 sps:$4 sm:$0xff]  }
 0x4a0   :  { %10604 = vmatprep.subr.bf16.mxu0 %v14585_v8  ;;  %v14550_v8 = vld [vmem:[#allocation11 + $0xb0] ss:$28 sps:$4 sm:$0xff]  }
 0x4a1   :  { %10562 = vmatpush1.bf16.msra.mxu1 %v14505_v21  ;;  %v14558_v21 = vld [vmem:[#allocation11 + $0x7c] ss:$28 sps:$4 sm:$0xff]  }
 0x4a2   :  { %10563 = vmatprep.subr.bf16.mxu1 %v14510_v15  ;;  %v14556_v15 = vld [vmem:[#allocation11 + $0x78] ss:$28 sps:$4 sm:$0xff]  }
 0x4a3   :  { %10605 = vmatpush1.bf16.msra.mxu0 %v14583_v37  ;;  %v14564_v37 = vld [vmem:[#allocation11 + $0x44] ss:$28 sps:$4 sm:$0xff]  }
 0x4a4   :  { %10606 = vmatprep.subr.bf16.mxu0 %v14591_v54  ;;  %v14562_v54 = vld [vmem:[#allocation11 + $0x40] ss:$28 sps:$4 sm:$0xff]  }
 0x4a5   :  { %10564 = vmatpush1.bf16.msra.mxu1 %v14508_v42  ;;  %v14570_v42 = vld [vmem:[#allocation11 + $0xc] ss:$28 sps:$4 sm:$0xff]  }
 0x4a6   :  { %10565 = vmatprep.subr.bf16.mxu1 %v14513_v31  ;;  %v14568_v31 = vld [vmem:[#allocation11 + $0x8] ss:$28 sps:$4 sm:$0xff]  }
 0x4a7   :  { %10607 = vmatpush1.bf16.msra.mxu0 %v14589_v41  ;;  %v14576_v41 = vld [vmem:[#allocation11 + $0x354] ss:$28 sps:$4 sm:$0xff]  }
 0x4a8   :  { %10608 = vmatprep.subr.bf16.mxu0 %v14597_v47  ;;  %v14574_v47 = vld [vmem:[#allocation11 + $0x350] ss:$28 sps:$4 sm:$0xff]  }
 0x4a9   :  { %10566 = vmatpush2.bf16.msra.mxu1 %v14511_v55  ;;  %v14582_v55 = vld [vmem:[#allocation11 + $0x31c] ss:$28 sps:$4 sm:$0xff]  }
 0x4aa   :  { %10567 = vmatprep.subr.bf16.mxu1 %v14516_v20  ;;  %v14580_v20 = vld [vmem:[#allocation11 + $0x318] ss:$28 sps:$4 sm:$0xff]  }
 0x4ab   :  { %10609 = vmatpush2.bf16.msra.mxu0 %v14595_v53  ;;  %v14588_v53 = vld [vmem:[#allocation11 + $0x2e4] ss:$28 sps:$4 sm:$0xff]  }
 0x4ac   :  { %10610 = vmatprep.subr.bf16.mxu0 %v14603_v62  ;;  %v6652_v62 = vpop.f32.mrf.mxu1 }
 0x4ad   :  { %10568 = vmatpush2.bf16.msra.mxu1 %v14514_v35  ;;  %v14586_v35 = vld [vmem:[#allocation11 + $0x2e0] ss:$28 sps:$4 sm:$0xff]  }
 0x4ae   :  { %10569 = vmatprep.subr.bf16.mxu1 %v14519_v61  ;;  %v14594_v61 = vld [vmem:[#allocation11 + $0x2ac] ss:$28 sps:$4 sm:$0xff]  }
 0x4af   :  { %10611 = vmatpush2.bf16.msra.mxu0 %v14601_v19  ;;  %v6654_v19 = vpop.f32.mrf.mxu1 }
 0x4b0   :  { %10612 = vmatprep.subr.bf16.mxu0 %v14609_v7  ;;  %v14592_v7 = vld [vmem:[#allocation11 + $0x2a8] ss:$28 sps:$4 sm:$0xff]  }
 0x4b1   :  { %10570 = vmatpush2.bf16.msra.mxu1 %v14517_v40  ;;  %v6695_v40 = vpop.f32.mrf.mxu0 }
 0x4b2   :  { %10571 = vmatprep.subr.bf16.mxu1 %v14522_v12  ;;  %v14600_v12 = vld [vmem:[#allocation11 + $0x274] ss:$28 sps:$4 sm:$0xff]  }
 0x4b3   :  { %10613 = vmatpush2.bf16.msra.mxu0 %v14607_v52  ;;  %v6656_v52 = vpop.f32.mrf.mxu1 }
 0x4b4   :  { %10614 = vmatprep.subr.bf16.mxu0 %v14615_v57  ;;  %v14598_v57 = vld [vmem:[#allocation11 + $0x270] ss:$28 sps:$4 sm:$0xff]  }
 0x4b5   :  { %10572 = vmatpush2.bf16.msra.mxu1 %v14520_v3  ;;  %v6697_v3 = vpop.f32.mrf.mxu0 }
 0x4b6   :  { %10573 = vmatprep.subr.bf16.mxu1 %v14525_v46  ;;  %v14606_v46 = vld [vmem:[#allocation11 + $0x23c] ss:$28 sps:$4 sm:$0xff]  }
 0x4b7   :  { %10615 = vmatpush2.bf16.msra.mxu0 %v14613_v30  ;;  %v6658_v30 = vpop.f32.mrf.mxu1 }
 0x4b8   :  { %10616 = vmatprep.subr.bf16.mxu0 %v14621_v5  ;;  %v14604_v5 = vld [vmem:[#allocation11 + $0x238] ss:$28 sps:$4 sm:$0xff]  }
 0x4b9   :  { %10574 = vmatpush2.bf16.msra.mxu1 %v14523_v32  ;;  %v6699_v32 = vpop.f32.mrf.mxu0 }
 0x4ba   :  { %10575 = vmatprep.subr.bf16.mxu1 %v14528_v0 }
 0x4bb   :  { %10617 = vmatpush2.bf16.msra.mxu0 %v14619_v50  ;;  %v14612_v50 = vld [vmem:[#allocation11 + $0x204] ss:$28 sps:$4 sm:$0xff]  }
 0x4bc   :  { %10618 = vmatprep.subr.bf16.mxu0 %v14627_v60  ;;  %v1705_v60 = vld [vmem:[#allocation10 + $0x8] sm:$0x3] }
 0x4bd   :  { %10576 = vmatpush2.bf16.msra.mxu1 %v14526_v44  ;;  %v1747_v44 = vrot.slane %v1705_v60, %v15475_v25 }
 0x4be   :  { %10577 = vmatprep.subr.bf16.mxu1 %v14531_v4  ;;  %v14610_v4 = vld [vmem:[#allocation11 + $0x200] ss:$28 sps:$4 sm:$0xff]  }
 0x4bf   :  { %10619 = vmatpush2.bf16.msra.mxu0 %v14625_v56  ;;  %v1743_v56 = vrot.slane %v1705_v60, %v15478_v26 }
 0x4c0   :  { %10620 = vmatprep.subr.bf16.mxu0 %v14633_v28  ;;  %v6701_v28 = vpop.f32.mrf.mxu0 }
 0x4c1   :  { %10578 = vmatpush2.bf16.msra.mxu1 %v14529_v59 }
 0x4c2   :  { %10579 = vmatprep.subr.bf16.mxu1 %v14534_v33  ;;  %v14618_v33 = vld [vmem:[#allocation11 + $0x1cc] ss:$28 sps:$4 sm:$0xff]  }
 0x4c3   :  { %10621 = vmatpush2.bf16.msra.mxu0 %v14631_v24 }
 0x4c4   :  { %10622 = vmatprep.subr.bf16.mxu0 %v14639_v43  ;;  %v6655_v43 = vadd.f32 %v6654_v19, %v1747_v44 }
 0x4c5   :  { %10580 = vmatpush2.bf16.msra.mxu1 %v14532_v49  ;;  %v6657_v49 = vadd.f32 %v6656_v52, %v1743_v56  ;;  %v14634_v52 = vld [vmem:[#allocation11 + $0x820] ss:$28 sps:$4 sm:$0xff]  }
 0x4c6   :  { %10635 = vmatprep.subr.bf16.mxu1 %v14537_v39  ;;  %v14616_v39 = vld [vmem:[#allocation11 + $0x1c8] ss:$28 sps:$4 sm:$0xff]  }
 0x4c7   :  { %10623 = vmatpush2.bf16.msra.mxu0 %v14637_v9  ;;  %v6653_v9 = vadd.f32 %v6652_v62, %v1743_v56  ;;  %v14643_v56 = vld [vmem:[#allocation11 + $0x510] ss:$28 sps:$4 sm:$0xff]  }
 0x4c8   :  { %10582 = vmatmul.mubr.bf16.vlgmr.msra.gmra.mxu1 %v15775_v51  ;;  %10678 = vmatprep.subr.bf16.mxu0 %v14645_v2  ;;  %v6738_v0 = vpop.f32.mrf.mxu1 }
 0x4c9   :  { %10636 = vmatpush1.bf16.msra.mxu1 %v14535_v63  ;;  %10667 = vmatprep.mubr.bf16.mxu1 %v15718_v27  ;;  %v6781_v24 = vpop.f32.mrf.mxu0  ;;  %v14624_v63 = vld [vmem:[#allocation11 + $0x894] ss:$28 sps:$4 sm:$0xff]  }
 0x4ca   :  { %10637 = vmatprep.subr.bf16.mxu1 %v14540_v29  ;;  %v6740_v59 = vpop.f32.mrf.mxu1  ;;  %v6659_v29 = vadd.f32 %v6658_v30, %v1747_v44  ;;  %v14648_v44 = vld [vmem:[#allocation11 + $0x7b4] ss:$28 sps:$4 sm:$0xff]  }
 0x4cc   :  { %v6742_v2 = vpop.f32.mrf.mxu1 }
 0x4cd   :  { %10638 = vmatpush1.bf16.msra.mxu1 %v14538_v11  ;;  %v6783_v11 = vpop.f32.mrf.mxu0 }
 0x4ce   :  { %10639 = vmatprep.subr.bf16.mxu1 %v14543_v48  ;;  %v6698_v48 = vadd.f32 %v6697_v3, %v6655_v43  ;;  %v14649_v43 = vld [vmem:[#allocation11 + $0x4d8] ss:$28 sps:$4 sm:$0xff]  }
 0x4d1   :  { %10640 = vmatpush1.bf16.msra.mxu1 %v14541_v10  ;;  %v6700_v10 = vadd.f32 %v6699_v32, %v6657_v49  ;;  %v14657_v49 = vld [vmem:[#allocation11 + $0x4a4] ss:$28 sps:$4 sm:$0xff]  }
 0x4d2   :  { %10641 = vmatprep.subr.bf16.mxu1 %v14546_v34  ;;  %v14622_v34 = vld [vmem:[#allocation11 + $0x890] ss:$28 sps:$4 sm:$0xff]  }
 0x4d5   :  { %10642 = vmatpush1.bf16.msra.mxu1 %v14544_v18  ;;  %v6696_v18 = vadd.f32 %v6695_v40, %v6653_v9  ;;  %v14660_v9 = vld [vmem:[#allocation11 + $0x744] ss:$28 sps:$4 sm:$0xff]  }
 0x4d6   :  { %10643 = vmatprep.subr.bf16.mxu1 %v14552_v58  ;;  %v6744_v58 = vpop.f32.mrf.mxu1 }
 0x4d9   :  { %10644 = vmatpush1.bf16.msra.mxu1 %v14550_v8  ;;  %v14630_v8 = vld [vmem:[#allocation11 + $0x85c] ss:$28 sps:$4 sm:$0xff]  }
 0x4da   :  { %10645 = vmatprep.subr.bf16.mxu1 %v14558_v21  ;;  %v6702_v21 = vadd.f32 %v6701_v28, %v6659_v29  ;;  %v14658_v29 = vld [vmem:[#allocation11 + $0x740] ss:$28 sps:$4 sm:$0xff]  }
 0x4dd   :  { %10646 = vmatpush1.bf16.msra.mxu1 %v14556_v15  ;;  %v6741_v15 = vadd.f32 %v6740_v59, %v6698_v48  ;;  %v14651_v59 = vld [vmem:[#allocation11 + $0x4dc] ss:$28 sps:$4 sm:$0xff]   ;;  %v14661_v48 = vld [vmem:[#allocation11 + $0x468] ss:$28 sps:$4 sm:$0xff]  }
 0x4de   :  { %10647 = vmatprep.subr.bf16.mxu1 %v14564_v37  ;;  %v6743_v37 = vadd.f32 %v6742_v2, %v6700_v10  ;;  %v14655_v2 = vld [vmem:[#allocation11 + $0x4a0] ss:$28 sps:$4 sm:$0xff]   ;;  %v14669_v10 = vld [vmem:[#allocation11 + $0x434] ss:$28 sps:$4 sm:$0xff]  }
 0x4e1   :  { %10648 = vmatpush1.bf16.msra.mxu1 %v14562_v54  ;;  %v6739_v54 = vadd.f32 %v6738_v0, %v6696_v18  ;;  %v14672_v18 = vld [vmem:[#allocation11 + $0xa54] ss:$28 sps:$4 sm:$0xff]  }
 0x4e2   :  { %10649 = vmatprep.subr.bf16.mxu1 %v14570_v42  ;;  %v6785_v42 = vpop.f32.mrf.mxu0 }
 0x4e3   :  { %v6786_v62 = vadd.f32 %v6785_v42, %v6743_v37  ;;  %v14673_v37 = vld [vmem:[#allocation11 + $0x3f8] ss:$28 sps:$4 sm:$0xff]  }
 0x4e4   :  { %v14676_v42 = vld [vmem:[#allocation11 + $0xa18] ss:$28 sps:$4 sm:$0xff]  }
 0x4e5   :  { %10650 = vmatpush1.bf16.msra.mxu1 %v14568_v31 }
 0x4e6   :  { %10651 = vmatprep.subr.bf16.mxu1 %v14576_v41  ;;  %v6745_v41 = vadd.f32 %v6744_v58, %v6702_v21  ;;  %v14667_v58 = vld [vmem:[#allocation11 + $0x430] ss:$28 sps:$4 sm:$0xff]  }
 0x4e7   :  { %v14670_v21 = vld [vmem:[#allocation11 + $0xa50] ss:$28 sps:$4 sm:$0xff]  }
 0x4e9   :  { %10652 = vmatpush2.bf16.msra.mxu1 %v14574_v47  ;;  %v14628_v47 = vld [vmem:[#allocation11 + $0x858] ss:$28 sps:$4 sm:$0xff]  }
 0x4ea   :  { %10653 = vmatprep.subr.bf16.mxu1 %v14582_v55 }
 0x4ed   :  { %10654 = vmatpush2.bf16.msra.mxu1 %v14580_v20  ;;  %v14636_v20 = vld [vmem:[#allocation11 + $0x824] ss:$28 sps:$4 sm:$0xff]  }
 0x4ee   :  { %10655 = vmatprep.subr.bf16.mxu1 %v14588_v53  ;;  %v6784_v53 = vadd.f32 %v6783_v11, %v6741_v15  ;;  %v14666_v11 = vld [vmem:[#allocation11 + $0x70c] ss:$28 sps:$4 sm:$0xff]   ;;  %v14678_v15 = vld [vmem:[#allocation11 + $0xa1c] ss:$28 sps:$4 sm:$0xff]  }
 0x4f1   :  { %10656 = vmatpush2.bf16.msra.mxu1 %v14586_v35  ;;  %v6782_v35 = vadd.f32 %v6781_v24, %v6739_v54  ;;  %v14654_v24 = vld [vmem:[#allocation11 + $0x77c] ss:$28 sps:$4 sm:$0xff]   ;;  %v14681_v54 = vld [vmem:[#allocation11 + $0x3c4] ss:$28 sps:$4 sm:$0xff]  }
 0x4f2   :  { %10657 = vmatprep.subr.bf16.mxu1 %v14594_v61  ;;  %v6787_v61 = vpop.f32.mrf.mxu0 }
 0x4f5   :  { %10658 = vmatpush2.bf16.msra.mxu1 %v14592_v7  ;;  %v6788_v7 = vadd.f32 %v6787_v61, %v6745_v41  ;;  %v14679_v41 = vld [vmem:[#allocation11 + $0x3c0] ss:$28 sps:$4 sm:$0xff]   ;;  %v14696_v61 = vld [vmem:[#allocation11 + $0x974] ss:$28 sps:$4 sm:$0xff]  }
 0x4f6   :  { %10659 = vmatprep.subr.bf16.mxu1 %v14600_v12 }
 0x4f9   :  { %10660 = vmatpush2.bf16.msra.mxu1 %v14598_v57 }
 0x4fa   :  { %10661 = vmatprep.subr.bf16.mxu1 %v14606_v46  ;;  %v14642_v46 = vld [vmem:[#allocation11 + $0x7ec] ss:$28 sps:$4 sm:$0xff]  }
 0x4fd   :  { %10662 = vmatpush2.bf16.msra.mxu1 %v14604_v5 }
 0x4fe   :  { %10663 = vmatprep.subr.bf16.mxu1 %v14612_v50  ;;  %v14640_v50 = vld [vmem:[#allocation11 + $0x7e8] ss:$28 sps:$4 sm:$0xff]  }
 0x501   :  { %10664 = vmatpush2.bf16.msra.mxu1 %v14610_v4 }
 0x502   :  { %10665 = vmatprep.subr.bf16.mxu1 %v14618_v33  ;;  %v14646_v33 = vld [vmem:[#allocation11 + $0x7b0] ss:$28 sps:$4 sm:$0xff]  }
 0x505   :  { %10666 = vmatpush2.bf16.msra.mxu1 %v14616_v39  ;;  %v14652_v39 = vld [vmem:[#allocation11 + $0x778] ss:$28 sps:$4 sm:$0xff]  }
 0x506   :  { %10721 = vmatprep.subr.bf16.mxu1 %v14624_v63  ;;  %v14663_v63 = vld [vmem:[#allocation11 + $0x46c] ss:$28 sps:$4 sm:$0xff]  }
 0x508   :  { %v6824_v31 = vpop.f32.mrf.mxu1  ;;  %10668 = vmatmul.mubr.bf16.vlgmr.msra.gmra.mxu1 %v15606_v13 }
 0x509   :  { %10722 = vmatpush1.bf16.msra.mxu1 %v14622_v34  ;;  %10753 = vmatprep.mubr.bf16.mxu1 %v15764_v6  ;;  %v6825_v57 = vadd.f32 %v6824_v31, %v6782_v35  ;;  %v14664_v34 = vld [vmem:[#allocation11 + $0x708] ss:$28 sps:$4 sm:$0xff]  }
 0x50a   :  { %v6826_v55 = vpop.f32.mrf.mxu1  ;;  %10723 = vmatprep.subr.bf16.mxu1 %v14630_v8  ;;  %v14675_v8 = vld [vmem:[#allocation11 + $0x3fc] ss:$28 sps:$4 sm:$0xff]   ;;  %v14684_v31 = vld [vmem:[#allocation11 + $0x9e4] ss:$28 sps:$4 sm:$0xff]  }
 0x50b   :  { %v6827_v40 = vadd.f32 %v6826_v55, %v6784_v53  ;;  %v6841_v60 = vmax.f32 %v6825_v57, 0.0  ;;  %v14682_v55 = vld [vmem:[#allocation11 + $0x9e0] ss:$28 sps:$4 sm:$0xff]   ;;  %v14685_v53 = vld [vmem:[#allocation11 + $0x388] ss:$28 sps:$4 sm:$0xff]  }
 0x50c   :  { %v6828_v19 = vpop.f32.mrf.mxu1  ;;  %v14688_v35 = vld [vmem:[#allocation11 + $0x9a8] ss:$28 sps:$4 sm:$0xff]  }
 0x50d   :  { %v6829_v12 = vadd.f32 %v6828_v19, %v6786_v62  ;;  %10724 = vmatpush1.bf16.msra.mxu1 %v14628_v47  ;;  %v6842_v32 = vmax.f32 %v6827_v40, 0.0  ;;  %v14687_v47 = vld [vmem:[#allocation11 + $0x38c] ss:$28 sps:$4 sm:$0xff]   ;;  %v14693_v62 = vld [vmem:[#allocation11 + $0x6d4] ss:$28 sps:$4 sm:$0xff]  }
 0x50e   :  { %v6830_v3 = vpop.f32.mrf.mxu1  ;;  %10725 = vmatprep.subr.bf16.mxu1 %v14636_v20  ;;  %v14690_v20 = vld [vmem:[#allocation11 + $0x9ac] ss:$28 sps:$4 sm:$0xff]   ;;  %v14705_v57 = vld [vmem:[#allocation11 + $0x664] ss:$28 sps:$4 sm:$0xff]  }
 0x50f   :  { %v6831_v30 = vadd.f32 %v6830_v3, %v6788_v7  ;;  %v6851_v5 = vmax.f32 %v6829_v12, 0.0  ;;  %v14691_v19 = vld [vmem:[#allocation11 + $0x6d0] ss:$28 sps:$4 sm:$0xff]   ;;  %v14699_v7 = vld [vmem:[#allocation11 + $0x69c] ss:$28 sps:$4 sm:$0xff]  }
 0x510   :  { %v14694_v40 = vld [vmem:[#allocation11 + $0x970] ss:$28 sps:$4 sm:$0xff]   ;;  %v14702_v12 = vld [vmem:[#allocation11 + $0x93c] ss:$28 sps:$4 sm:$0xff]  }
 0x511   :  { %v6852_v0 = vmax.f32 %v6831_v30, 0.0  ;;  %10726 = vmatpush1.bf16.msra.mxu1 %v14634_v52  ;;  %v15801_v28 = vpack.c.bf16 %v6851_v5, %v6841_v60  ;;  %v14697_v52 = vld [vmem:[#allocation11 + $0x698] ss:$28 sps:$4 sm:$0xff]   ;;  %v14703_v30 = vld [vmem:[#allocation11 + $0x660] ss:$28 sps:$4 sm:$0xff]  }
 0x512   :  { %10727 = vmatprep.subr.bf16.mxu1 %v14642_v46  ;;  %v14700_v3 = vld [vmem:[#allocation11 + $0x938] ss:$28 sps:$4 sm:$0xff]   ;;  %v14708_v46 = vld [vmem:[#allocation11 + $0x904] ss:$28 sps:$4 sm:$0xff]   ;;  %v14711_v5 = vld [vmem:[#allocation11 + $0x62c] ss:$28 sps:$4 sm:$0xff]  }
 0x513   :  { %v15799_v4 = vpack.c.bf16 %v6852_v0, %v6842_v32  ;;  %v14706_v32 = vld [vmem:[#allocation11 + $0x900] ss:$28 sps:$4 sm:$0xff]   ;;  %v14714_v0 = vld [vmem:[#allocation11 + $0x8cc] ss:$28 sps:$4 sm:$0xff]   ;;  %v14717_v60 = vld [vmem:[#allocation11 + $0x5f4] ss:$28 sps:$4 sm:$0xff]  }
 0x515   :  { %10624 = vmatprep.mubr.bf16.mxu0 %v15799_v4  ;;  %10728 = vmatpush1.bf16.msra.mxu1 %v14640_v50  ;;  %v14709_v50 = vld [vmem:[#allocation11 + $0x628] ss:$28 sps:$4 sm:$0xff]  }
 0x516   :  { %10625 = vmatmul.mubr.bf16.vlgmr.msra.gmra.mxu0 %v15801_v28  ;;  %10729 = vmatprep.subr.bf16.mxu1 %v14648_v44  ;;  %v14712_v44 = vld [vmem:[#allocation11 + $0x8c8] ss:$28 sps:$4 sm:$0xff]  }
 0x517   :  { %10679 = vmatpush1.bf16.msra.mxu0 %v14643_v56  ;;  %10710 = vmatprep.mubr.bf16.mxu0 %v15761_v1  ;;  %v14720_v56 = vld [vmem:[#allocation11 + $0xf94] ss:$28 sps:$4 sm:$0xff]  }
 0x518   :  { %10680 = vmatprep.subr.bf16.mxu0 %v14651_v59  ;;  %v14715_v59 = vld [vmem:[#allocation11 + $0x5f0] ss:$28 sps:$4 sm:$0xff]  }
 0x519   :  { %10730 = vmatpush1.bf16.msra.mxu1 %v14646_v33  ;;  %v14723_v33 = vld [vmem:[#allocation11 + $0x5bc] ss:$28 sps:$4 sm:$0xff]  }
 0x51a   :  { %10731 = vmatprep.subr.bf16.mxu1 %v14654_v24  ;;  %v14718_v24 = vld [vmem:[#allocation11 + $0xf90] ss:$28 sps:$4 sm:$0xff]  }
 0x51b   :  { %10681 = vmatpush1.bf16.msra.mxu0 %v14649_v43  ;;  %v14726_v43 = vld [vmem:[#allocation11 + $0xf5c] ss:$28 sps:$4 sm:$0xff]  }
 0x51c   :  { %10682 = vmatprep.subr.bf16.mxu0 %v14657_v49  ;;  %v14721_v49 = vld [vmem:[#allocation11 + $0x5b8] ss:$28 sps:$4 sm:$0xff]  }
 0x51d   :  { %10732 = vmatpush1.bf16.msra.mxu1 %v14652_v39  ;;  %v14729_v39 = vld [vmem:[#allocation11 + $0x584] ss:$28 sps:$4 sm:$0xff]  }
 0x51e   :  { %10733 = vmatprep.subr.bf16.mxu1 %v14660_v9  ;;  %v14724_v9 = vld [vmem:[#allocation11 + $0xf58] ss:$28 sps:$4 sm:$0xff]  }
 0x51f   :  { %10683 = vmatpush1.bf16.msra.mxu0 %v14655_v2  ;;  %v14732_v2 = vld [vmem:[#allocation11 + $0xf24] ss:$28 sps:$4 sm:$0xff]  }
 0x520   :  { %10684 = vmatprep.subr.bf16.mxu0 %v14663_v63  ;;  %v14727_v63 = vld [vmem:[#allocation11 + $0x580] ss:$28 sps:$4 sm:$0xff]  }
 0x521   :  { %10734 = vmatpush1.bf16.msra.mxu1 %v14658_v29  ;;  %v14735_v29 = vld [vmem:[#allocation11 + $0x54c] ss:$28 sps:$4 sm:$0xff]  }
 0x522   :  { %10735 = vmatprep.subr.bf16.mxu1 %v14666_v11  ;;  %v14730_v11 = vld [vmem:[#allocation11 + $0xf20] ss:$28 sps:$4 sm:$0xff]  }
 0x523   :  { %10685 = vmatpush1.bf16.msra.mxu0 %v14661_v48  ;;  %v14738_v48 = vld [vmem:[#allocation11 + $0xeec] ss:$28 sps:$4 sm:$0xff]  }
 0x524   :  { %10686 = vmatprep.subr.bf16.mxu0 %v14669_v10  ;;  %v14733_v10 = vld [vmem:[#allocation11 + $0x548] ss:$28 sps:$4 sm:$0xff]  }
 0x525   :  { %10736 = vmatpush1.bf16.msra.mxu1 %v14664_v34  ;;  %v14741_v34 = vld [vmem:[#allocation11 + $0xc14] ss:$28 sps:$4 sm:$0xff]  }
 0x526   :  { %10737 = vmatprep.subr.bf16.mxu1 %v14672_v18  ;;  %v14736_v18 = vld [vmem:[#allocation11 + $0xee8] ss:$28 sps:$4 sm:$0xff]  }
 0x527   :  { %10687 = vmatpush1.bf16.msra.mxu0 %v14667_v58  ;;  %v14744_v58 = vld [vmem:[#allocation11 + $0xeb4] ss:$28 sps:$4 sm:$0xff]  }
 0x528   :  { %10688 = vmatprep.subr.bf16.mxu0 %v14675_v8  ;;  %v14739_v8 = vld [vmem:[#allocation11 + $0xc10] ss:$28 sps:$4 sm:$0xff]  }
 0x529   :  { %10738 = vmatpush2.bf16.msra.mxu1 %v14670_v21  ;;  %v14747_v21 = vld [vmem:[#allocation11 + $0xbdc] ss:$28 sps:$4 sm:$0xff]  }
 0x52a   :  { %10739 = vmatprep.subr.bf16.mxu1 %v14678_v15  ;;  %v14742_v15 = vld [vmem:[#allocation11 + $0xeb0] ss:$28 sps:$4 sm:$0xff]  }
 0x52b   :  { %10689 = vmatpush1.bf16.msra.mxu0 %v14673_v37  ;;  %v14750_v37 = vld [vmem:[#allocation11 + $0xe7c] ss:$28 sps:$4 sm:$0xff]  }
 0x52c   :  { %10690 = vmatprep.subr.bf16.mxu0 %v14681_v54  ;;  %v14745_v54 = vld [vmem:[#allocation11 + $0xbd8] ss:$28 sps:$4 sm:$0xff]  }
 0x52d   :  { %10740 = vmatpush2.bf16.msra.mxu1 %v14676_v42  ;;  %v14753_v42 = vld [vmem:[#allocation11 + $0xba4] ss:$28 sps:$4 sm:$0xff]  }
 0x52e   :  { %10741 = vmatprep.subr.bf16.mxu1 %v14684_v31  ;;  %v14748_v31 = vld [vmem:[#allocation11 + $0xe78] ss:$28 sps:$4 sm:$0xff]  }
 0x52f   :  { %10691 = vmatpush1.bf16.msra.mxu0 %v14679_v41  ;;  %v14756_v41 = vld [vmem:[#allocation11 + $0xe44] ss:$28 sps:$4 sm:$0xff]  }
 0x530   :  { %10692 = vmatprep.subr.bf16.mxu0 %v14687_v47  ;;  %v14751_v47 = vld [vmem:[#allocation11 + $0xba0] ss:$28 sps:$4 sm:$0xff]  }
 0x531   :  { %10742 = vmatpush2.bf16.msra.mxu1 %v14682_v55  ;;  %v14759_v55 = vld [vmem:[#allocation11 + $0xb6c] ss:$28 sps:$4 sm:$0xff]  }
 0x532   :  { %10743 = vmatprep.subr.bf16.mxu1 %v14690_v20  ;;  %v14754_v20 = vld [vmem:[#allocation11 + $0xe40] ss:$28 sps:$4 sm:$0xff]  }
 0x533   :  { %10693 = vmatpush1.bf16.msra.mxu0 %v14685_v53  ;;  %v14762_v53 = vld [vmem:[#allocation11 + $0xe0c] ss:$28 sps:$4 sm:$0xff]  }
 0x534   :  { %10694 = vmatprep.subr.bf16.mxu0 %v14693_v62  ;;  %v14757_v62 = vld [vmem:[#allocation11 + $0xb68] ss:$28 sps:$4 sm:$0xff]  }
 0x535   :  { %10744 = vmatpush2.bf16.msra.mxu1 %v14688_v35  ;;  %v14765_v35 = vld [vmem:[#allocation11 + $0xb34] ss:$28 sps:$4 sm:$0xff]  }
 0x536   :  { %10745 = vmatprep.subr.bf16.mxu1 %v14696_v61  ;;  %v14760_v61 = vld [vmem:[#allocation11 + $0xe08] ss:$28 sps:$4 sm:$0xff]  }
 0x537   :  { %10695 = vmatpush2.bf16.msra.mxu0 %v14691_v19  ;;  %v14768_v19 = vld [vmem:[#allocation11 + $0x1154] ss:$28 sps:$4 sm:$0xff]  }
 0x538   :  { %10696 = vmatprep.subr.bf16.mxu0 %v14699_v7  ;;  %v14763_v7 = vld [vmem:[#allocation11 + $0xb30] ss:$28 sps:$4 sm:$0xff]  }
 0x539   :  { %10746 = vmatpush2.bf16.msra.mxu1 %v14694_v40  ;;  %v14771_v40 = vld [vmem:[#allocation11 + $0xafc] ss:$28 sps:$4 sm:$0xff]  }
 0x53a   :  { %10747 = vmatprep.subr.bf16.mxu1 %v14702_v12  ;;  %v14766_v12 = vld [vmem:[#allocation11 + $0x1150] ss:$28 sps:$4 sm:$0xff]  }
 0x53b   :  { %10697 = vmatpush2.bf16.msra.mxu0 %v14697_v52  ;;  %v14774_v52 = vld [vmem:[#allocation11 + $0x111c] ss:$28 sps:$4 sm:$0xff]  }
 0x53c   :  { %10698 = vmatprep.subr.bf16.mxu0 %v14705_v57  ;;  %v14769_v57 = vld [vmem:[#allocation11 + $0xaf8] ss:$28 sps:$4 sm:$0xff]  }
 0x53d   :  { %10748 = vmatpush2.bf16.msra.mxu1 %v14700_v3  ;;  %v14777_v3 = vld [vmem:[#allocation11 + $0xac4] ss:$28 sps:$4 sm:$0xff]  }
 0x53e   :  { %10749 = vmatprep.subr.bf16.mxu1 %v14708_v46  ;;  %v14772_v46 = vld [vmem:[#allocation11 + $0x1118] ss:$28 sps:$4 sm:$0xff]  }
 0x53f   :  { %10699 = vmatpush2.bf16.msra.mxu0 %v14703_v30  ;;  %v14780_v30 = vld [vmem:[#allocation11 + $0x10e4] ss:$28 sps:$4 sm:$0xff]  }
 0x540   :  { %10700 = vmatprep.subr.bf16.mxu0 %v14711_v5  ;;  %v14775_v5 = vld [vmem:[#allocation11 + $0xac0] ss:$28 sps:$4 sm:$0xff]  }
 0x541   :  { %10750 = vmatpush2.bf16.msra.mxu1 %v14706_v32  ;;  %v14783_v32 = vld [vmem:[#allocation11 + $0xa8c] ss:$28 sps:$4 sm:$0xff]  }
 0x542   :  { %10751 = vmatprep.subr.bf16.mxu1 %v14714_v0  ;;  %v14778_v0 = vld [vmem:[#allocation11 + $0x10e0] ss:$28 sps:$4 sm:$0xff]  }
 0x543   :  { %10701 = vmatpush2.bf16.msra.mxu0 %v14709_v50  ;;  %v14786_v50 = vld [vmem:[#allocation11 + $0x10ac] ss:$28 sps:$4 sm:$0xff]  }
 0x544   :  { %10702 = vmatprep.subr.bf16.mxu0 %v14717_v60  ;;  %v14781_v60 = vld [vmem:[#allocation11 + $0xa88] ss:$28 sps:$4 sm:$0xff]  }
 0x545   :  { %10752 = vmatpush2.bf16.msra.mxu1 %v14712_v44  ;;  %v14789_v44 = vld [vmem:[#allocation11 + $0xdd4] ss:$28 sps:$4 sm:$0xff]  }
 0x546   :  { %10807 = vmatprep.subr.bf16.mxu1 %v14720_v56  ;;  %v14784_v56 = vld [vmem:[#allocation11 + $0x10a8] ss:$28 sps:$4 sm:$0xff]  }
 0x547   :  { %10703 = vmatpush2.bf16.msra.mxu0 %v14715_v59  ;;  %v14792_v59 = vld [vmem:[#allocation11 + $0x1074] ss:$28 sps:$4 sm:$0xff]  }
 0x548   :  { %10754 = vmatmul.mubr.bf16.vlgmr.msra.gmra.mxu1 %v15693_v36  ;;  %10704 = vmatprep.subr.bf16.mxu0 %v14723_v33  ;;  %v14787_v33 = vld [vmem:[#allocation11 + $0xdd0] ss:$28 sps:$4 sm:$0xff]  }
 0x549   :  { %10808 = vmatpush1.bf16.msra.mxu1 %v14718_v24  ;;  %10839 = vmatprep.mubr.bf16.mxu1 %v15799_v4  ;;  %v14795_v24 = vld [vmem:[#allocation11 + $0xd9c] ss:$28 sps:$4 sm:$0xff]  }
 0x54a   :  { %10809 = vmatprep.subr.bf16.mxu1 %v14726_v43  ;;  %v14790_v43 = vld [vmem:[#allocation11 + $0x1070] ss:$28 sps:$4 sm:$0xff]  }
 0x54b   :  { %10705 = vmatpush2.bf16.msra.mxu0 %v14721_v49  ;;  %v14798_v49 = vld [vmem:[#allocation11 + $0x103c] ss:$28 sps:$4 sm:$0xff]  }
 0x54c   :  { %10706 = vmatprep.subr.bf16.mxu0 %v14729_v39  ;;  %v14793_v39 = vld [vmem:[#allocation11 + $0xd98] ss:$28 sps:$4 sm:$0xff]  }
 0x54d   :  { %10810 = vmatpush1.bf16.msra.mxu1 %v14724_v9  ;;  %v14801_v9 = vld [vmem:[#allocation11 + $0xd64] ss:$28 sps:$4 sm:$0xff]  }
 0x54e   :  { %10811 = vmatprep.subr.bf16.mxu1 %v14732_v2  ;;  %v14796_v2 = vld [vmem:[#allocation11 + $0x1038] ss:$28 sps:$4 sm:$0xff]  }
 0x54f   :  { %10707 = vmatpush2.bf16.msra.mxu0 %v14727_v63  ;;  %v14804_v63 = vld [vmem:[#allocation11 + $0x1004] ss:$28 sps:$4 sm:$0xff]  }
 0x550   :  { %10708 = vmatprep.subr.bf16.mxu0 %v14735_v29  ;;  %v14799_v29 = vld [vmem:[#allocation11 + $0xd60] ss:$28 sps:$4 sm:$0xff]  }
 0x551   :  { %10812 = vmatpush1.bf16.msra.mxu1 %v14730_v11  ;;  %v14807_v11 = vld [vmem:[#allocation11 + $0xd2c] ss:$28 sps:$4 sm:$0xff]  }
 0x552   :  { %10813 = vmatprep.subr.bf16.mxu1 %v14738_v48  ;;  %v14802_v48 = vld [vmem:[#allocation11 + $0x1000] ss:$28 sps:$4 sm:$0xff]  }
 0x553   :  { %10709 = vmatpush2.bf16.msra.mxu0 %v14733_v10  ;;  %v14810_v10 = vld [vmem:[#allocation11 + $0xfcc] ss:$28 sps:$4 sm:$0xff]  }
 0x554   :  { %10764 = vmatprep.subr.bf16.mxu0 %v14741_v34  ;;  %v14805_v34 = vld [vmem:[#allocation11 + $0xd28] ss:$28 sps:$4 sm:$0xff]  }
 0x555   :  { %10814 = vmatpush1.bf16.msra.mxu1 %v14736_v18  ;;  %v14813_v18 = vld [vmem:[#allocation11 + $0xcf4] ss:$28 sps:$4 sm:$0xff]  }
 0x556   :  { %10711 = vmatmul.mubr.bf16.vlgmr.msra.gmra.mxu0 %v15643_v38  ;;  %10815 = vmatprep.subr.bf16.mxu1 %v14744_v58  ;;  %v14808_v58 = vld [vmem:[#allocation11 + $0xfc8] ss:$28 sps:$4 sm:$0xff]  }
 0x557   :  { %10765 = vmatpush1.bf16.msra.mxu0 %v14739_v8  ;;  %10796 = vmatprep.mubr.bf16.mxu0 %v15788_v45  ;;  %v14816_v8 = vld [vmem:[#allocation11 + $0x51c] ss:$28 sps:$4 sm:$0xff]  }
 0x558   :  { %10766 = vmatprep.subr.bf16.mxu0 %v14747_v21  ;;  %v14811_v21 = vld [vmem:[#allocation11 + $0xcf0] ss:$28 sps:$4 sm:$0xff]  }
 0x559   :  { %10816 = vmatpush1.bf16.msra.mxu1 %v14742_v15  ;;  %v14819_v15 = vld [vmem:[#allocation11 + $0xcbc] ss:$28 sps:$4 sm:$0xff]  }
 0x55a   :  { %10817 = vmatprep.subr.bf16.mxu1 %v14750_v37  ;;  %v14814_v37 = vld [vmem:[#allocation11 + $0x518] ss:$28 sps:$4 sm:$0xff]  }
 0x55b   :  { %10767 = vmatpush1.bf16.msra.mxu0 %v14745_v54  ;;  %v14822_v54 = vld [vmem:[#allocation11 + $0x4e4] ss:$28 sps:$4 sm:$0xff]  }
 0x55c   :  { %10768 = vmatprep.subr.bf16.mxu0 %v14753_v42  ;;  %v14817_v42 = vld [vmem:[#allocation11 + $0xcb8] ss:$28 sps:$4 sm:$0xff]  }
 0x55d   :  { %10818 = vmatpush1.bf16.msra.mxu1 %v14748_v31  ;;  %v14825_v31 = vld [vmem:[#allocation11 + $0xc84] ss:$28 sps:$4 sm:$0xff]  }
 0x55e   :  { %10819 = vmatprep.subr.bf16.mxu1 %v14756_v41  ;;  %v14820_v41 = vld [vmem:[#allocation11 + $0x4e0] ss:$28 sps:$4 sm:$0xff]  }
 0x55f   :  { %10769 = vmatpush1.bf16.msra.mxu0 %v14751_v47  ;;  %v14828_v47 = vld [vmem:[#allocation11 + $0x4ac] ss:$28 sps:$4 sm:$0xff]  }
 0x560   :  { %10770 = vmatprep.subr.bf16.mxu0 %v14759_v55  ;;  %v14823_v55 = vld [vmem:[#allocation11 + $0xc80] ss:$28 sps:$4 sm:$0xff]  }
 0x561   :  { %10820 = vmatpush1.bf16.msra.mxu1 %v14754_v20  ;;  %v14831_v20 = vld [vmem:[#allocation11 + $0xc4c] ss:$28 sps:$4 sm:$0xff]  }
 0x562   :  { %10821 = vmatprep.subr.bf16.mxu1 %v14762_v53  ;;  %v14826_v53 = vld [vmem:[#allocation11 + $0x4a8] ss:$28 sps:$4 sm:$0xff]  }
 0x563   :  { %10771 = vmatpush1.bf16.msra.mxu0 %v14757_v62  ;;  %v14834_v62 = vld [vmem:[#allocation11 + $0x474] ss:$28 sps:$4 sm:$0xff]  }
 0x564   :  { %10772 = vmatprep.subr.bf16.mxu0 %v14765_v35  ;;  %v14829_v35 = vld [vmem:[#allocation11 + $0xc48] ss:$28 sps:$4 sm:$0xff]  }
 0x565   :  { %10822 = vmatpush1.bf16.msra.mxu1 %v14760_v61  ;;  %v14837_v61 = vld [vmem:[#allocation11 + $0x19c] ss:$28 sps:$4 sm:$0xff]  }
 0x566   :  { %10823 = vmatprep.subr.bf16.mxu1 %v14768_v19  ;;  %v14832_v19 = vld [vmem:[#allocation11 + $0x470] ss:$28 sps:$4 sm:$0xff]  }
 0x567   :  { %10773 = vmatpush1.bf16.msra.mxu0 %v14763_v7  ;;  %v14840_v7 = vld [vmem:[#allocation11 + $0x43c] ss:$28 sps:$4 sm:$0xff]  }
 0x568   :  { %10774 = vmatprep.subr.bf16.mxu0 %v14771_v40  ;;  %v14835_v40 = vld [vmem:[#allocation11 + $0x198] ss:$28 sps:$4 sm:$0xff]  }
 0x569   :  { %10824 = vmatpush2.bf16.msra.mxu1 %v14766_v12  ;;  %v14843_v12 = vld [vmem:[#allocation11 + $0x164] ss:$28 sps:$4 sm:$0xff]  }
 0x56a   :  { %10825 = vmatprep.subr.bf16.mxu1 %v14774_v52  ;;  %v14838_v52 = vld [vmem:[#allocation11 + $0x438] ss:$28 sps:$4 sm:$0xff]  }
 0x56b   :  { %10775 = vmatpush1.bf16.msra.mxu0 %v14769_v57  ;;  %v14846_v57 = vld [vmem:[#allocation11 + $0x404] ss:$28 sps:$4 sm:$0xff]  }
 0x56c   :  { %10776 = vmatprep.subr.bf16.mxu0 %v14777_v3  ;;  %v14841_v3 = vld [vmem:[#allocation11 + $0x160] ss:$28 sps:$4 sm:$0xff]  }
 0x56d   :  { %10826 = vmatpush2.bf16.msra.mxu1 %v14772_v46  ;;  %v14849_v46 = vld [vmem:[#allocation11 + $0x12c] ss:$28 sps:$4 sm:$0xff]  }
 0x56e   :  { %10827 = vmatprep.subr.bf16.mxu1 %v14780_v30  ;;  %v14844_v30 = vld [vmem:[#allocation11 + $0x400] ss:$28 sps:$4 sm:$0xff]  }
 0x56f   :  { %10777 = vmatpush1.bf16.msra.mxu0 %v14775_v5  ;;  %v14852_v5 = vld [vmem:[#allocation11 + $0x3cc] ss:$28 sps:$4 sm:$0xff]  }
 0x570   :  { %10778 = vmatprep.subr.bf16.mxu0 %v14783_v32  ;;  %v14847_v32 = vld [vmem:[#allocation11 + $0x128] ss:$28 sps:$4 sm:$0xff]  }
 0x571   :  { %10828 = vmatpush2.bf16.msra.mxu1 %v14778_v0  ;;  %v14855_v0 = vld [vmem:[#allocation11 + $0xf4] ss:$28 sps:$4 sm:$0xff]  }
 0x572   :  { %10829 = vmatprep.subr.bf16.mxu1 %v14786_v50  ;;  %v14850_v50 = vld [vmem:[#allocation11 + $0x3c8] ss:$28 sps:$4 sm:$0xff]  }
 0x573   :  { %10779 = vmatpush1.bf16.msra.mxu0 %v14781_v60  ;;  %v14858_v60 = vld [vmem:[#allocation11 + $0x394] ss:$28 sps:$4 sm:$0xff]  }
 0x574   :  { %10780 = vmatprep.subr.bf16.mxu0 %v14789_v44  ;;  %v14853_v44 = vld [vmem:[#allocation11 + $0xf0] ss:$28 sps:$4 sm:$0xff]  }
 0x575   :  { %10830 = vmatpush2.bf16.msra.mxu1 %v14784_v56  ;;  %v14861_v56 = vld [vmem:[#allocation11 + $0xbc] ss:$28 sps:$4 sm:$0xff]  }
 0x576   :  { %10831 = vmatprep.subr.bf16.mxu1 %v14792_v59  ;;  %v14856_v59 = vld [vmem:[#allocation11 + $0x390] ss:$28 sps:$4 sm:$0xff]  }
 0x577   :  { %10781 = vmatpush2.bf16.msra.mxu0 %v14787_v33  ;;  %v14864_v33 = vld [vmem:[#allocation11 + $0x6dc] ss:$28 sps:$4 sm:$0xff]  }
 0x578   :  { %10782 = vmatprep.subr.bf16.mxu0 %v14795_v24  ;;  %v14859_v24 = vld [vmem:[#allocation11 + $0xb8] ss:$28 sps:$4 sm:$0xff]  }
 0x579   :  { %10832 = vmatpush2.bf16.msra.mxu1 %v14790_v43  ;;  %v14867_v43 = vld [vmem:[#allocation11 + $0x84] ss:$28 sps:$4 sm:$0xff]  }
 0x57a   :  { %10833 = vmatprep.subr.bf16.mxu1 %v14798_v49  ;;  %v14862_v49 = vld [vmem:[#allocation11 + $0x6d8] ss:$28 sps:$4 sm:$0xff]  }
 0x57b   :  { %10783 = vmatpush2.bf16.msra.mxu0 %v14793_v39  ;;  %v14870_v39 = vld [vmem:[#allocation11 + $0x6a4] ss:$28 sps:$4 sm:$0xff]  }
 0x57c   :  { %10784 = vmatprep.subr.bf16.mxu0 %v14801_v9  ;;  %v14865_v9 = vld [vmem:[#allocation11 + $0x80] ss:$28 sps:$4 sm:$0xff]  }
 0x57d   :  { %10834 = vmatpush2.bf16.msra.mxu1 %v14796_v2  ;;  %v14873_v2 = vld [vmem:[#allocation11 + $0x4c] ss:$28 sps:$4 sm:$0xff]  }
 0x57e   :  { %10835 = vmatprep.subr.bf16.mxu1 %v14804_v63  ;;  %v14868_v63 = vld [vmem:[#allocation11 + $0x6a0] ss:$28 sps:$4 sm:$0xff]  }
 0x57f   :  { %10785 = vmatpush2.bf16.msra.mxu0 %v14799_v29  ;;  %v14876_v29 = vld [vmem:[#allocation11 + $0x66c] ss:$28 sps:$4 sm:$0xff]  }
 0x580   :  { %10786 = vmatprep.subr.bf16.mxu0 %v14807_v11  ;;  %v14871_v11 = vld [vmem:[#allocation11 + $0x48] ss:$28 sps:$4 sm:$0xff]  }
 0x581   :  { %10836 = vmatpush2.bf16.msra.mxu1 %v14802_v48  ;;  %v14879_v48 = vld [vmem:[#allocation11 + $0x14] ss:$28 sps:$4 sm:$0xff]  }
 0x582   :  { %10837 = vmatprep.subr.bf16.mxu1 %v14810_v10  ;;  %v14874_v10 = vld [vmem:[#allocation11 + $0x668] ss:$28 sps:$4 sm:$0xff]  }
 0x583   :  { %10787 = vmatpush2.bf16.msra.mxu0 %v14805_v34  ;;  %v14882_v34 = vld [vmem:[#allocation11 + $0x634] ss:$28 sps:$4 sm:$0xff]  }
 0x584   :  { %10788 = vmatprep.subr.bf16.mxu0 %v14813_v18  ;;  %v14877_v18 = vld [vmem:[#allocation11 + $0x10] ss:$28 sps:$4 sm:$0xff]  }
 0x585   :  { %10838 = vmatpush2.bf16.msra.mxu1 %v14808_v58  ;;  %v14885_v58 = vld [vmem:[#allocation11 + $0x35c] ss:$28 sps:$4 sm:$0xff]  }
 0x586   :  { %10893 = vmatprep.subr.bf16.mxu1 %v14816_v8  ;;  %v14880_v8 = vld [vmem:[#allocation11 + $0x630] ss:$28 sps:$4 sm:$0xff]  }
 0x587   :  { %10789 = vmatpush2.bf16.msra.mxu0 %v14811_v21  ;;  %v14888_v21 = vld [vmem:[#allocation11 + $0x5fc] ss:$28 sps:$4 sm:$0xff]  }
 0x588   :  { %10840 = vmatmul.mubr.bf16.vlgmr.msra.gmra.mxu1 %v15801_v28  ;;  %10790 = vmatprep.subr.bf16.mxu0 %v14819_v15  ;;  %v14883_v15 = vld [vmem:[#allocation11 + $0x358] ss:$28 sps:$4 sm:$0xff]  }
 0x589   :  { %10894 = vmatpush1.bf16.msra.mxu1 %v14814_v37  ;;  %10925 = vmatprep.mubr.bf16.mxu1 %v15761_v1  ;;  %v14891_v37 = vld [vmem:[#allocation11 + $0x324] ss:$28 sps:$4 sm:$0xff]  }
 0x58a   :  { %10895 = vmatprep.subr.bf16.mxu1 %v14822_v54  ;;  %v14886_v54 = vld [vmem:[#allocation11 + $0x5f8] ss:$28 sps:$4 sm:$0xff]  }
 0x58b   :  { %10791 = vmatpush2.bf16.msra.mxu0 %v14817_v42  ;;  %v14894_v42 = vld [vmem:[#allocation11 + $0x5c4] ss:$28 sps:$4 sm:$0xff]  }
 0x58c   :  { %10792 = vmatprep.subr.bf16.mxu0 %v14825_v31  ;;  %v14889_v31 = vld [vmem:[#allocation11 + $0x320] ss:$28 sps:$4 sm:$0xff]  }
 0x58d   :  { %10896 = vmatpush1.bf16.msra.mxu1 %v14820_v41  ;;  %v14897_v41 = vld [vmem:[#allocation11 + $0x2ec] ss:$28 sps:$4 sm:$0xff]  }
 0x58e   :  { %10897 = vmatprep.subr.bf16.mxu1 %v14828_v47  ;;  %v14892_v47 = vld [vmem:[#allocation11 + $0x5c0] ss:$28 sps:$4 sm:$0xff]  }
 0x58f   :  { %10793 = vmatpush2.bf16.msra.mxu0 %v14823_v55  ;;  %v10454_v55 = vpop.f32.mrf.mxu0 }
 0x590   :  { %10794 = vmatprep.subr.bf16.mxu0 %v14831_v20  ;;  %v14900_v20 = vld [vmem:[#allocation11 + $0x58c] ss:$28 sps:$4 sm:$0xff]  }
 0x591   :  { %10898 = vmatpush1.bf16.msra.mxu1 %v14826_v53  ;;  %v14895_v53 = vld [vmem:[#allocation11 + $0x2e8] ss:$28 sps:$4 sm:$0xff]  }
 0x592   :  { %10899 = vmatprep.subr.bf16.mxu1 %v14834_v62  ;;  %v14903_v62 = vld [vmem:[#allocation11 + $0x2b4] ss:$28 sps:$4 sm:$0xff]  }
 0x593   :  { %10795 = vmatpush2.bf16.msra.mxu0 %v14829_v35  ;;  %v14898_v35 = vld [vmem:[#allocation11 + $0x588] ss:$28 sps:$4 sm:$0xff]  }
 0x594   :  { %10850 = vmatprep.subr.bf16.mxu0 %v14837_v61  ;;  %v10456_v61 = vpop.f32.mrf.mxu0 }
 0x595   :  { %10900 = vmatpush1.bf16.msra.mxu1 %v14832_v19  ;;  %v10497_v19 = vpop.f32.mrf.mxu1 }
 0x596   :  { %10797 = vmatmul.mubr.bf16.vlgmr.msra.gmra.mxu0 %v15775_v51  ;;  %10901 = vmatprep.subr.bf16.mxu1 %v14840_v7  ;;  %v14906_v7 = vld [vmem:[#allocation11 + $0x554] ss:$28 sps:$4 sm:$0xff]  }
 0x597   :  { %10851 = vmatpush1.bf16.msra.mxu0 %v14835_v40  ;;  %10882 = vmatprep.mubr.bf16.mxu0 %v15718_v27  ;;  %v14901_v40 = vld [vmem:[#allocation11 + $0x2b0] ss:$28 sps:$4 sm:$0xff]  }
 0x598   :  { %10852 = vmatprep.subr.bf16.mxu0 %v14843_v12  ;;  %v14909_v12 = vld [vmem:[#allocation11 + $0x27c] ss:$28 sps:$4 sm:$0xff]  }
 0x599   :  { %10902 = vmatpush1.bf16.msra.mxu1 %v14838_v52  ;;  %v14904_v52 = vld [vmem:[#allocation11 + $0x550] ss:$28 sps:$4 sm:$0xff]  }
 0x59a   :  { %10903 = vmatprep.subr.bf16.mxu1 %v14846_v57  ;;  %v10458_v57 = vpop.f32.mrf.mxu0 }
 0x59b   :  { %10853 = vmatpush1.bf16.msra.mxu0 %v14841_v3  ;;  %v10499_v3 = vpop.f32.mrf.mxu1 }
 0x59c   :  { %10854 = vmatprep.subr.bf16.mxu0 %v14849_v46  ;;  %v14912_v46 = vld [vmem:[#allocation11 + $0xc1c] ss:$28 sps:$4 sm:$0xff]  }
 0x59d   :  { %10904 = vmatpush1.bf16.msra.mxu1 %v14844_v30  ;;  %v14907_v30 = vld [vmem:[#allocation11 + $0x278] ss:$28 sps:$4 sm:$0xff]  }
 0x59e   :  { %10905 = vmatprep.subr.bf16.mxu1 %v14852_v5  ;;  %v14915_v5 = vld [vmem:[#allocation11 + $0x244] ss:$28 sps:$4 sm:$0xff]  }
 0x59f   :  { %10855 = vmatpush1.bf16.msra.mxu0 %v14847_v32  ;;  %v14910_v32 = vld [vmem:[#allocation11 + $0xc18] ss:$28 sps:$4 sm:$0xff]  }
 0x5a0   :  { %10856 = vmatprep.subr.bf16.mxu0 %v14855_v0  ;;  %v15814_v0 = vld [vmem:[#allocation13] sm:$0xff] }
 0x5a1   :  { %10906 = vmatpush1.bf16.msra.mxu1 %v14850_v50  ;;  %v10460_v50 = vpop.f32.mrf.mxu0 }
 0x5a2   :  { %10907 = vmatprep.subr.bf16.mxu1 %v14858_v60  ;;  %v10501_v60 = vpop.f32.mrf.mxu1 }
 0x5a3   :  { %10857 = vmatpush1.bf16.msra.mxu0 %v14853_v44  ;;  %v14918_v44 = vld [vmem:[#allocation11 + $0xbe4] ss:$28 sps:$4 sm:$0xff]  }
 0x5a4   :  { %10858 = vmatprep.subr.bf16.mxu0 %v14861_v56  ;;  %v14913_v56 = vld [vmem:[#allocation11 + $0x240] ss:$28 sps:$4 sm:$0xff]  }
 0x5a5   :  { %10908 = vmatpush1.bf16.msra.mxu1 %v14856_v59  ;;  %v10540_v59 = vpop.f32.mrf.mxu0 }
 0x5a6   :  { %10909 = vmatprep.subr.bf16.mxu1 %v14864_v33  ;;  %v14921_v33 = vld [vmem:[#allocation11 + $0x20c] ss:$28 sps:$4 sm:$0xff]  }
 0x5a7   :  { %10859 = vmatpush1.bf16.msra.mxu0 %v14859_v24  ;;  %v7508_v24 = vrot.slane %v15814_v0, %v15478_v26  ;;  %v14930_v26 = vld [vmem:[#allocation11 + $0xb74] ss:$28 sps:$4 sm:$0xff]  }
 0x5a8   :  { %10860 = vmatprep.subr.bf16.mxu0 %v14867_v43  ;;  %v14916_v43 = vld [vmem:[#allocation11 + $0xbe0] ss:$28 sps:$4 sm:$0xff]  }
 0x5a9   :  { %10910 = vmatpush2.bf16.msra.mxu1 %v14862_v49  ;;  %v10503_v49 = vpop.f32.mrf.mxu1 }
 0x5aa   :  { %10911 = vmatprep.subr.bf16.mxu1 %v14870_v39  ;;  %v14924_v39 = vld [vmem:[#allocation11 + $0xbac] ss:$28 sps:$4 sm:$0xff]  }
 0x5ab   :  { %10861 = vmatpush1.bf16.msra.mxu0 %v14865_v9  ;;  %v7512_v9 = vrot.slane %v15814_v0, %v15475_v25  ;;  %v10459_v25 = vadd.f32 %v10458_v57, %v7508_v24 }
 0x5ac   :  { %10862 = vmatprep.subr.bf16.mxu0 %v14873_v2  ;;  %v14919_v2 = vld [vmem:[#allocation11 + $0x208] ss:$28 sps:$4 sm:$0xff]  }
 0x5ad   :  { %10912 = vmatpush2.bf16.msra.mxu1 %v14868_v63  ;;  %v10542_v63 = vpop.f32.mrf.mxu0 }
 0x5ae   :  { %10913 = vmatprep.subr.bf16.mxu1 %v14876_v29  ;;  %v10583_v29 = vpop.f32.mrf.mxu1 }
 0x5af   :  { %10863 = vmatpush1.bf16.msra.mxu0 %v14871_v11  ;;  %v14927_v11 = vld [vmem:[#allocation11 + $0x1d4] ss:$28 sps:$4 sm:$0xff]  }
 0x5b0   :  { %10864 = vmatprep.subr.bf16.mxu0 %v14879_v48  ;;  %v10455_v48 = vadd.f32 %v10454_v55, %v7508_v24  ;;  %v14931_v55 = vld [vmem:[#allocation11 + $0x898] ss:$28 sps:$4 sm:$0xff]   ;;  %v14948_v24 = vld [vmem:[#allocation11 + $0xacc] ss:$28 sps:$4 sm:$0xff]  }
 0x5b1   :  { %10914 = vmatpush2.bf16.msra.mxu1 %v14874_v10  ;;  %v14922_v10 = vld [vmem:[#allocation11 + $0xba8] ss:$28 sps:$4 sm:$0xff]  }
 0x5b2   :  { %10915 = vmatprep.subr.bf16.mxu1 %v14882_v34  ;;  %v10457_v34 = vadd.f32 %v10456_v61, %v7512_v9 }
 0x5b3   :  { %10865 = vmatpush1.bf16.msra.mxu0 %v14877_v18  ;;  %v10498_v18 = vadd.f32 %v10497_v19, %v10455_v48  ;;  %v14946_v48 = vld [vmem:[#allocation11 + $0xac8] ss:$28 sps:$4 sm:$0xff]  }
 0x5b4   :  { %10866 = vmatprep.subr.bf16.mxu0 %v14885_v58  ;;  %v14925_v58 = vld [vmem:[#allocation11 + $0x1d0] ss:$28 sps:$4 sm:$0xff]  }
 0x5b5   :  { %10916 = vmatpush2.bf16.msra.mxu1 %v14880_v8  ;;  %v10544_v8 = vpop.f32.mrf.mxu0 }
 0x5b6   :  { %10917 = vmatprep.subr.bf16.mxu1 %v14888_v21  ;;  %v10585_v21 = vpop.f32.mrf.mxu1 }
 0x5b7   :  { %10867 = vmatpush2.bf16.msra.mxu0 %v14883_v15  ;;  %v14933_v15 = vld [vmem:[#allocation11 + $0x89c] ss:$28 sps:$4 sm:$0xff]  }
 0x5b8   :  { %10868 = vmatprep.subr.bf16.mxu0 %v14891_v37  ;;  %v10500_v37 = vadd.f32 %v10499_v3, %v10457_v34  ;;  %v14949_v34 = vld [vmem:[#allocation11 + $0x7f0] ss:$28 sps:$4 sm:$0xff]  }
 0x5b9   :  { %10918 = vmatpush2.bf16.msra.mxu1 %v14886_v54  ;;  %v14928_v54 = vld [vmem:[#allocation11 + $0xb70] ss:$28 sps:$4 sm:$0xff]  }
 0x5ba   :  { %10919 = vmatprep.subr.bf16.mxu1 %v14894_v42  ;;  %v14936_v42 = vld [vmem:[#allocation11 + $0xb3c] ss:$28 sps:$4 sm:$0xff]  }
 0x5bb   :  { %10869 = vmatpush2.bf16.msra.mxu0 %v14889_v31  ;;  %v10461_v31 = vadd.f32 %v10460_v50, %v7512_v9  ;;  %v14943_v9 = vld [vmem:[#allocation11 + $0x828] ss:$28 sps:$4 sm:$0xff]  }
 0x5bc   :  { %10870 = vmatprep.subr.bf16.mxu0 %v14897_v41  ;;  %v10541_v41 = vadd.f32 %v10540_v59, %v10498_v18  ;;  %v14940_v59 = vld [vmem:[#allocation11 + $0xb00] ss:$28 sps:$4 sm:$0xff]  }
 0x5bd   :  { %10920 = vmatpush2.bf16.msra.mxu1 %v14892_v47  ;;  %v10502_v47 = vadd.f32 %v10501_v60, %v10459_v25  ;;  %v10504_v61 = vadd.f32 %v10503_v49, %v10461_v31  ;;  %v14957_v18 = vld [vmem:[#allocation11 + $0x7bc] ss:$28 sps:$4 sm:$0xff]   ;;  %v14969_v31 = vld [vmem:[#allocation11 + $0x74c] ss:$28 sps:$4 sm:$0xff]  }
 0x5be   :  { %10921 = vmatprep.subr.bf16.mxu1 %v14900_v20  ;;  %v10546_v20 = vpop.f32.mrf.mxu0  ;;  %v10584_v19 = vadd.f32 %v10583_v29, %v10541_v41  ;;  %v14958_v25 = vld [vmem:[#allocation11 + $0xdd8] ss:$28 sps:$4 sm:$0xff]  }
 0x5bf   :  { %10871 = vmatpush2.bf16.msra.mxu0 %v14895_v53  ;;  %v10587_v53 = vpop.f32.mrf.mxu1  ;;  %v10547_v50 = vadd.f32 %v10546_v20, %v10504_v61  ;;  %v14972_v20 = vld [vmem:[#allocation11 + $0xd6c] ss:$28 sps:$4 sm:$0xff]   ;;  %v14975_v61 = vld [vmem:[#allocation11 + $0x714] ss:$28 sps:$4 sm:$0xff]  }
 0x5c0   :  { %10872 = vmatprep.subr.bf16.mxu0 %v14903_v62  ;;  %v14939_v62 = vld [vmem:[#allocation11 + $0x864] ss:$28 sps:$4 sm:$0xff]  }
 0x5c1   :  { %10922 = vmatpush2.bf16.msra.mxu1 %v14898_v35  ;;  %v10543_v35 = vadd.f32 %v10542_v63, %v10500_v37  ;;  %v14951_v63 = vld [vmem:[#allocation11 + $0x7f4] ss:$28 sps:$4 sm:$0xff]   ;;  %v14966_v37 = vld [vmem:[#allocation11 + $0xda4] ss:$28 sps:$4 sm:$0xff]  }
 0x5c2   :  { %10923 = vmatprep.subr.bf16.mxu1 %v14906_v7  ;;  %v14934_v7 = vld [vmem:[#allocation11 + $0xb38] ss:$28 sps:$4 sm:$0xff]  }
 0x5c3   :  { %10873 = vmatpush2.bf16.msra.mxu0 %v14901_v40  ;;  %v10586_v57 = vadd.f32 %v10585_v21, %v10543_v35  ;;  %v14955_v21 = vld [vmem:[#allocation11 + $0x7b8] ss:$28 sps:$4 sm:$0xff]  }
 0x5c4   :  { %10874 = vmatprep.subr.bf16.mxu0 %v14909_v12  ;;  %v14942_v12 = vld [vmem:[#allocation11 + $0xb04] ss:$28 sps:$4 sm:$0xff]  }
 0x5c5   :  { %10924 = vmatpush2.bf16.msra.mxu1 %v14904_v52  ;;  %v10545_v52 = vadd.f32 %v10544_v8, %v10502_v47  ;;  %v14960_v8 = vld [vmem:[#allocation11 + $0xddc] ss:$28 sps:$4 sm:$0xff]  }
 0x5c6   :  { %10979 = vmatprep.subr.bf16.mxu1 %v14912_v46  ;;  %v14937_v46 = vld [vmem:[#allocation11 + $0x860] ss:$28 sps:$4 sm:$0xff]  }
 0x5c7   :  { %10875 = vmatpush2.bf16.msra.mxu0 %v14907_v30  ;;  %v10589_v30 = vpop.f32.mrf.mxu1  ;;  %v10588_v60 = vadd.f32 %v10587_v53, %v10545_v52  ;;  %v14964_v47 = vld [vmem:[#allocation11 + $0xda0] ss:$28 sps:$4 sm:$0xff]  }
 0x5c8   :  { %10926 = vmatmul.mubr.bf16.vlgmr.msra.gmra.mxu1 %v15643_v38  ;;  %10876 = vmatprep.subr.bf16.mxu0 %v14915_v5 }
 0x5c9   :  { %10980 = vmatpush1.bf16.msra.mxu1 %v14910_v32  ;;  %11011 = vmatprep.mubr.bf16.mxu1 %v15788_v45  ;;  %v14945_v32 = vld [vmem:[#allocation11 + $0x82c] ss:$28 sps:$4 sm:$0xff]  }
 0x5ca   :  { %10981 = vmatprep.subr.bf16.mxu1 %v14918_v44 }
 0x5cb   :  { %10877 = vmatpush2.bf16.msra.mxu0 %v14913_v56 }
 0x5cc   :  { %10878 = vmatprep.subr.bf16.mxu0 %v14921_v33 }
 0x5cd   :  { %10982 = vmatpush1.bf16.msra.mxu1 %v14916_v43  ;;  %v10590_v43 = vadd.f32 %v10589_v30, %v10547_v50  ;;  %v14984_v30 = vld [vmem:[#allocation11 + $0xcfc] ss:$28 sps:$4 sm:$0xff]  }
 0x5ce   :  { %10983 = vmatprep.subr.bf16.mxu1 %v14924_v39  ;;  %v14982_v50 = vld [vmem:[#allocation11 + $0xcf8] ss:$28 sps:$4 sm:$0xff]  }
 0x5cf   :  { %10879 = vmatpush2.bf16.msra.mxu0 %v14919_v2 }
 0x5d0   :  { %10880 = vmatprep.subr.bf16.mxu0 %v14927_v11 }
 0x5d1   :  { %10984 = vmatpush1.bf16.msra.mxu1 %v14922_v10  ;;  %v14954_v10 = vld [vmem:[#allocation11 + $0xa94] ss:$28 sps:$4 sm:$0xff]  }
 0x5d2   :  { %10985 = vmatprep.subr.bf16.mxu1 %v14930_v26 }
 0x5d3   :  { %10881 = vmatpush2.bf16.msra.mxu0 %v14925_v58  ;;  %v14952_v58 = vld [vmem:[#allocation11 + $0xa90] ss:$28 sps:$4 sm:$0xff]  }
 0x5d4   :  { %10936 = vmatprep.subr.bf16.mxu0 %v14933_v15  ;;  %v14963_v15 = vld [vmem:[#allocation11 + $0x784] ss:$28 sps:$4 sm:$0xff]  }
 0x5d5   :  { %10986 = vmatpush1.bf16.msra.mxu1 %v14928_v54  ;;  %v14961_v54 = vld [vmem:[#allocation11 + $0x780] ss:$28 sps:$4 sm:$0xff]  }
 0x5d6   :  { %10883 = vmatmul.mubr.bf16.vlgmr.msra.gmra.mxu0 %v15606_v13  ;;  %v10626_v40 = vpop.f32.mrf.mxu0  ;;  %10987 = vmatprep.subr.bf16.mxu1 %v14936_v42 }
 0x5d7   :  { %v10627_v3 = vadd.f32 %v10626_v40, %v10584_v19  ;;  %10937 = vmatpush1.bf16.msra.mxu0 %v14931_v55  ;;  %10968 = vmatprep.mubr.bf16.mxu0 %v15764_v6 }
 0x5d8   :  { %v10628_v5 = vpop.f32.mrf.mxu0  ;;  %10938 = vmatprep.subr.bf16.mxu0 %v14939_v62  ;;  %v14967_v62 = vld [vmem:[#allocation11 + $0x748] ss:$28 sps:$4 sm:$0xff]  }
 0x5d9   :  { %v12867_v44 = vmul.f32 -1.442695, %v10627_v3  ;;  %v10629_v56 = vadd.f32 %v10628_v5, %v10586_v57  ;;  %10988 = vmatpush1.bf16.msra.mxu1 %v14934_v7  ;;  %v14970_v7 = vld [vmem:[#allocation11 + $0xd68] ss:$28 sps:$4 sm:$0xff]   ;;  %v14973_v57 = vld [vmem:[#allocation11 + $0x710] ss:$28 sps:$4 sm:$0xff]  }
 0x5da   :  { %v10630_v33 = vpop.f32.mrf.mxu0  ;;  %10989 = vmatprep.subr.bf16.mxu1 %v14942_v12  ;;  %v14978_v12 = vld [vmem:[#allocation11 + $0xd34] ss:$28 sps:$4 sm:$0xff]   ;;  %v14981_v3 = vld [vmem:[#allocation11 + $0xa5c] ss:$28 sps:$4 sm:$0xff]  }
 0x5db   :  { %15143 = vpow2.f32 %v12867_v44  ;;  %v12868_v49 = vmul.f32 -1.442695, %v10629_v56  ;;  %v10631_v39 = vadd.f32 %v10630_v33, %v10588_v60  ;;  %10939 = vmatpush1.bf16.msra.mxu0 %v14937_v46  ;;  %v14976_v46 = vld [vmem:[#allocation11 + $0xd30] ss:$28 sps:$4 sm:$0xff]   ;;  %v14979_v5 = vld [vmem:[#allocation11 + $0xa58] ss:$28 sps:$4 sm:$0xff]  }
 0x5dc   :  { %v10632_v2 = vpop.f32.mrf.mxu0  ;;  %10940 = vmatprep.subr.bf16.mxu0 %v14945_v32  ;;  %v14987_v32 = vld [vmem:[#allocation11 + $0xa24] ss:$28 sps:$4 sm:$0xff]   ;;  %v14993_v56 = vld [vmem:[#allocation11 + $0x9ec] ss:$28 sps:$4 sm:$0xff]  }
 0x5dd   :  { %15145 = vpow2.f32 %v12868_v49  ;;  %v12874_v29 = vmul.f32 -1.442695, %v10631_v39  ;;  %v10633_v11 = vadd.f32 %v10632_v2, %v10590_v43  ;;  %10990 = vmatpush1.bf16.msra.mxu1 %v14940_v59  ;;  %v14990_v60 = vld [vmem:[#allocation11 + $0xcc4] ss:$28 sps:$4 sm:$0xff]   ;;  %v14996_v43 = vld [vmem:[#allocation11 + $0xc8c] ss:$28 sps:$4 sm:$0xff]  }
 0x5de   :  { %10991 = vmatprep.subr.bf16.mxu1 %v14948_v24  ;;  %v14985_v44 = vld [vmem:[#allocation11 + $0xa20] ss:$28 sps:$4 sm:$0xff]   ;;  %v14991_v39 = vld [vmem:[#allocation11 + $0x9e8] ss:$28 sps:$4 sm:$0xff]  }
 0x5df   :  { %15147 = vpow2.f32 %v12874_v29  ;;  %v12875_v26 = vmul.f32 -1.442695, %v10633_v11  ;;  %10941 = vmatpush1.bf16.msra.mxu0 %v14943_v9  ;;  %v14988_v33 = vld [vmem:[#allocation11 + $0xcc0] ss:$28 sps:$4 sm:$0xff]   ;;  %v14999_v9 = vld [vmem:[#allocation11 + $0x9b4] ss:$28 sps:$4 sm:$0xff]  }
 0x5e0   :  { %10942 = vmatprep.subr.bf16.mxu0 %v14951_v63  ;;  %v14994_v63 = vld [vmem:[#allocation11 + $0xc88] ss:$28 sps:$4 sm:$0xff]   ;;  %v15002_v11 = vld [vmem:[#allocation11 + $0xc54] ss:$28 sps:$4 sm:$0xff]  }
 0x5e1   :  { %15149 = vpow2.f32 %v12875_v26  ;;  %10992 = vmatpush1.bf16.msra.mxu1 %v14946_v48  ;;  %v15005_v26 = vld [vmem:[#allocation11 + $0x97c] ss:$28 sps:$4 sm:$0xff]  }
 0x5e2   :  { %10993 = vmatprep.subr.bf16.mxu1 %v14954_v10  ;;  %v14997_v10 = vld [vmem:[#allocation11 + $0x9b0] ss:$28 sps:$4 sm:$0xff]  }
 0x5e3   :  { %10943 = vmatpush1.bf16.msra.mxu0 %v14949_v34  ;;  %v15000_v34 = vld [vmem:[#allocation11 + $0xc50] ss:$28 sps:$4 sm:$0xff]  }
 0x5e4   :  { %10944 = vmatprep.subr.bf16.mxu0 %v14957_v18  ;;  %v15006_v18 = vld [vmem:[#allocation11 + $0x360] ss:$28 sps:$4 sm:$0xff]  }
 0x5e5   :  { %10994 = vmatpush1.bf16.msra.mxu1 %v14952_v58  ;;  %v15003_v58 = vld [vmem:[#allocation11 + $0x978] ss:$28 sps:$4 sm:$0xff]  }
 0x5e6   :  { %10995 = vmatprep.subr.bf16.mxu1 %v14960_v8  ;;  %v15009_v8 = vld [vmem:[#allocation11 + $0x944] ss:$28 sps:$4 sm:$0xff]  }
 0x5e7   :  { %10945 = vmatpush1.bf16.msra.mxu0 %v14955_v21  ;;  %v15010_v21 = vld [vmem:[#allocation11 + $0x1a0] ss:$28 sps:$4 sm:$0xff]  }
 0x5e8   :  { %v15144_v42 = vpop.eup %15143  ;;  %10946 = vmatprep.subr.bf16.mxu0 %v14963_v15  ;;  %v15011_v15 = vld [vmem:[#allocation11 + $0x328] ss:$28 sps:$4 sm:$0xff]  }
 0x5e9   :  { %v11312_v41 = vadd.f32 1.0, %v15144_v42  ;;  %10996 = vmatpush2.bf16.msra.mxu1 %v14958_v25  ;;  %v15007_v25 = vld [vmem:[#allocation11 + $0x940] ss:$28 sps:$4 sm:$0xff]   ;;  %v15016_v42 = vld [vmem:[#allocation11 + $0x2f0] ss:$28 sps:$4 sm:$0xff]  }
 0x5ea   :  { %v15146_v55 = vpop.eup %15145  ;;  %10997 = vmatprep.subr.bf16.mxu1 %v14966_v37  ;;  %v15014_v37 = vld [vmem:[#allocation11 + $0x90c] ss:$28 sps:$4 sm:$0xff]  }
 0x5eb   :  { %v11313_v53 = vadd.f32 1.0, %v15146_v55  ;;  %10947 = vmatpush1.bf16.msra.mxu0 %v14961_v54  ;;  %15151 = vrcp.f32 %v11312_v41  ;;  %v15015_v54 = vld [vmem:[#allocation11 + $0x168] ss:$28 sps:$4 sm:$0xff]   ;;  %v15019_v41 = vld [vmem:[#allocation11 + $0x8d4] ss:$28 sps:$4 sm:$0xff]  }
 0x5ec   :  { %v15148_v35 = vpop.eup %15147  ;;  %10948 = vmatprep.subr.bf16.mxu0 %v14969_v31  ;;  %v15012_v31 = vld [vmem:[#allocation11 + $0x908] ss:$28 sps:$4 sm:$0xff]   ;;  %v15021_v55 = vld [vmem:[#allocation11 + $0x2b8] ss:$28 sps:$4 sm:$0xff]  }
 0x5ed   :  { %15153 = vrcp.f32 %v11313_v53  ;;  %v11319_v19 = vadd.f32 1.0, %v15148_v35  ;;  %10998 = vmatpush2.bf16.msra.mxu1 %v14964_v47  ;;  %v15020_v47 = vld [vmem:[#allocation11 + $0x130] ss:$28 sps:$4 sm:$0xff]   ;;  %v15024_v53 = vld [vmem:[#allocation11 + $0xf9c] ss:$28 sps:$4 sm:$0xff]  }
 0x5ee   :  { %v15150_v40 = vpop.eup %15149  ;;  %10999 = vmatprep.subr.bf16.mxu1 %v14972_v20  ;;  %v15017_v20 = vld [vmem:[#allocation11 + $0x8d0] ss:$28 sps:$4 sm:$0xff]   ;;  %v15026_v35 = vld [vmem:[#allocation11 + $0x280] ss:$28 sps:$4 sm:$0xff]  }
 0x5ef   :  { %v11320_v52 = vadd.f32 1.0, %v15150_v40  ;;  %10949 = vmatpush1.bf16.msra.mxu0 %v14967_v62  ;;  %15155 = vrcp.f32 %v11319_v19  ;;  %v15025_v62 = vld [vmem:[#allocation11 + $0xf8] ss:$28 sps:$4 sm:$0xff]   ;;  %v15030_v19 = vld [vmem:[#allocation11 + $0xc0] ss:$28 sps:$4 sm:$0xff]  }
 0x5f0   :  { %10950 = vmatprep.subr.bf16.mxu0 %v14975_v61  ;;  %v15029_v61 = vld [vmem:[#allocation11 + $0xf64] ss:$28 sps:$4 sm:$0xff]  }
 0x5f1   :  { %15157 = vrcp.f32 %v11320_v52  ;;  %11000 = vmatpush2.bf16.msra.mxu1 %v14970_v7  ;;  %v15031_v7 = vld [vmem:[#allocation11 + $0x248] ss:$28 sps:$4 sm:$0xff]   ;;  %v15027_v40 = vld [vmem:[#allocation11 + $0xf60] ss:$28 sps:$4 sm:$0xff]  }
 0x5f2   :  { %11001 = vmatprep.subr.bf16.mxu1 %v14978_v12  ;;  %v15034_v12 = vld [vmem:[#allocation11 + $0xf2c] ss:$28 sps:$4 sm:$0xff]  }
 0x5f3   :  { %10951 = vmatpush1.bf16.msra.mxu0 %v14973_v57  ;;  %v15035_v52 = vld [vmem:[#allocation11 + $0x88] ss:$28 sps:$4 sm:$0xff]   ;;  %v15036_v57 = vld [vmem:[#allocation11 + $0x210] ss:$28 sps:$4 sm:$0xff]  }
 0x5f4   :  { %10952 = vmatprep.subr.bf16.mxu0 %v14981_v3  ;;  %v15032_v3 = vld [vmem:[#allocation11 + $0xf28] ss:$28 sps:$4 sm:$0xff]  }
 0x5f5   :  { %11002 = vmatpush2.bf16.msra.mxu1 %v14976_v46  ;;  %v15039_v46 = vld [vmem:[#allocation11 + $0xef4] ss:$28 sps:$4 sm:$0xff]  }
 0x5f6   :  { %11003 = vmatprep.subr.bf16.mxu1 %v14984_v30  ;;  %v15040_v30 = vld [vmem:[#allocation11 + $0x50] ss:$28 sps:$4 sm:$0xff]  }
 0x5f7   :  { %10953 = vmatpush2.bf16.msra.mxu0 %v14979_v5  ;;  %v15041_v5 = vld [vmem:[#allocation11 + $0x1d8] ss:$28 sps:$4 sm:$0xff]  }
 0x5f8   :  { %10954 = vmatprep.subr.bf16.mxu0 %v14987_v32  ;;  %v15152_v59 = vpop.eup %15151  ;;  %v15037_v32 = vld [vmem:[#allocation11 + $0xef0] ss:$28 sps:$4 sm:$0xff]  }
 0x5f9   :  { %11004 = vmatpush2.bf16.msra.mxu1 %v14982_v50  ;;  %v15044_v50 = vld [vmem:[#allocation11 + $0xebc] ss:$28 sps:$4 sm:$0xff]  }
 0x5fa   :  { %v15154_v24 = vpop.eup %15153  ;;  %11005 = vmatprep.subr.bf16.mxu1 %v14990_v60  ;;  %v15045_v60 = vld [vmem:[#allocation11 + $0x18] ss:$28 sps:$4 sm:$0xff]  }
 0x5fb   :  { %v12889_v49 = vpack.c.bf16 %v15154_v24, %v15152_v59  ;;  %10955 = vmatpush2.bf16.msra.mxu0 %v14985_v44  ;;  %v15046_v44 = vld [vmem:[#allocation11 + $0xa60] ss:$28 sps:$4 sm:$0xff]   ;;  %v15051_v24 = vld [vmem:[#allocation11 + $0xa28] ss:$28 sps:$4 sm:$0xff]  }
 0x5fc   :  { %10956 = vmatprep.subr.bf16.mxu0 %v14993_v56  ;;  %v15156_v2 = vpop.eup %15155  ;;  %v15042_v56 = vld [vmem:[#allocation11 + $0xeb8] ss:$28 sps:$4 sm:$0xff]   ;;  %v15049_v59 = vld [vmem:[#allocation11 + $0xe84] ss:$28 sps:$4 sm:$0xff]  }
 0x5fd   :  { %11398 = vst [vmem:[#allocation14] sm:$0xff] %v12889_v49  ;;  %11006 = vmatpush2.bf16.msra.mxu1 %v14988_v33  ;;  %v15050_v33 = vld [vmem:[#allocation11 + $0x8a0] ss:$28 sps:$4 sm:$0xff]   ;;  %v15054_v49 = vld [vmem:[#allocation11 + $0xe4c] ss:$28 sps:$4 sm:$0xff]  }
 0x5fe   :  { %v15158_v29 = vpop.eup %15157  ;;  %11007 = vmatprep.subr.bf16.mxu1 %v14996_v43  ;;  %v15047_v43 = vld [vmem:[#allocation11 + $0xe80] ss:$28 sps:$4 sm:$0xff]  }
 0x5ff   :  { %v12893_v48 = vpack.c.bf16 %v15158_v29, %v15156_v2  ;;  %10957 = vmatpush2.bf16.msra.mxu0 %v14991_v39  ;;  %v15055_v39 = vld [vmem:[#allocation11 + $0x868] ss:$28 sps:$4 sm:$0xff]   ;;  %v15060_v29 = vld [vmem:[#allocation11 + $0x830] ss:$28 sps:$4 sm:$0xff]  }
 0x600   :  { %10958 = vmatprep.subr.bf16.mxu0 %v14999_v9  ;;  %v15056_v9 = vld [vmem:[#allocation11 + $0x9f0] ss:$28 sps:$4 sm:$0xff]   ;;  %v15052_v2 = vld [vmem:[#allocation11 + $0xe48] ss:$28 sps:$4 sm:$0xff]  }
 0x601   :  { %11402 = vst [vmem:[#allocation14 + $0x1c] sm:$0xff] %v12893_v48  ;;  %11008 = vmatpush2.bf16.msra.mxu1 %v14994_v63  ;;  %v15059_v63 = vld [vmem:[#allocation11 + $0xe14] ss:$28 sps:$4 sm:$0xff]  }
 0x602   :  { %11009 = vmatprep.subr.bf16.mxu1 %v15002_v11  ;;  %v15061_v11 = vld [vmem:[#allocation11 + $0x9b8] ss:$28 sps:$4 sm:$0xff]   ;;  %v15057_v48 = vld [vmem:[#allocation11 + $0xe10] ss:$28 sps:$4 sm:$0xff]  }
 0x603   :  { %10959 = vmatpush2.bf16.msra.mxu0 %v14997_v10  ;;  %v15065_v10 = vld [vmem:[#allocation11 + $0x7f8] ss:$28 sps:$4 sm:$0xff]  }
 0x604   :  { %10960 = vmatprep.subr.bf16.mxu0 %v15005_v26  ;;  %v15066_v26 = vld [vmem:[#allocation11 + $0x980] ss:$28 sps:$4 sm:$0xff]  }
 0x605   :  { %11010 = vmatpush2.bf16.msra.mxu1 %v15000_v34  ;;  %v15069_v34 = vld [vmem:[#allocation11 + $0x1124] ss:$28 sps:$4 sm:$0xff]  }
 0x606   :  { %12897 = vmatprep.subr.bf16.mxu1 %v15006_v18  ;;  %v15070_v18 = vld [vmem:[#allocation11 + $0x7c0] ss:$28 sps:$4 sm:$0xff]  }
 0x607   :  { %10961 = vmatpush2.bf16.msra.mxu0 %v15003_v58  ;;  %v15830_v58 = vpop.f32.mrf.mxu1 }
 0x608   :  { %11012 = vmatmul.mubr.bf16.vlgmr.msra.gmra.mxu1 %v15775_v51  ;;  %10962 = vmatprep.subr.bf16.mxu0 %v15009_v8  ;;  %v15071_v8 = vld [vmem:[#allocation11 + $0x948] ss:$28 sps:$4 sm:$0xff]  }
 0x609   :  { %12898 = vmatpush3.bf16.msra.mxu1 %v15010_v21  ;;  %11097 = vmatprep.mubr.bf16.mxu1 %v15718_v27  ;;  %v15022_v27 = vld [vmem:[#allocation11 + $0xf98] ss:$28 sps:$4 sm:$0xff]   ;;  %v15067_v21 = vld [vmem:[#allocation11 + $0x1120] ss:$28 sps:$4 sm:$0xff]  }
 0x60a   :  { %12899 = vmatprep.subr.bf16.mxu1 %v15011_v15  ;;  %v15074_v15 = vld [vmem:[#allocation11 + $0x10ec] ss:$28 sps:$4 sm:$0xff]  }
 0x60b   :  { %10963 = vmatpush2.bf16.msra.mxu0 %v15007_v25  ;;  %v15075_v25 = vld [vmem:[#allocation11 + $0x788] ss:$28 sps:$4 sm:$0xff]  }
 0x60c   :  { %10964 = vmatprep.subr.bf16.mxu0 %v15014_v37  ;;  %v10671_v37 = vpop.f32.mrf.mxu1 }
 0x60d   :  { %12900 = vmatpush3.bf16.msra.mxu1 %v15015_v54  ;;  %v15076_v54 = vld [vmem:[#allocation11 + $0x910] ss:$28 sps:$4 sm:$0xff]  }
 0x60e   :  { %12901 = vmatprep.subr.bf16.mxu1 %v15016_v42  ;;  %v15072_v42 = vld [vmem:[#allocation11 + $0x10e8] ss:$28 sps:$4 sm:$0xff]  }
 0x60f   :  { %10965 = vmatpush2.bf16.msra.mxu0 %v15012_v31  ;;  %v15079_v31 = vld [vmem:[#allocation11 + $0x10b4] ss:$28 sps:$4 sm:$0xff]  }
 0x610   :  { %10966 = vmatprep.subr.bf16.mxu0 %v15019_v41  ;;  %v15080_v41 = vld [vmem:[#allocation11 + $0x750] ss:$28 sps:$4 sm:$0xff]  }
 0x611   :  { %12902 = vmatpush3.bf16.msra.mxu1 %v15020_v47  ;;  %v10673_v47 = vpop.f32.mrf.mxu1 }
 0x612   :  { %12903 = vmatprep.subr.bf16.mxu1 %v15021_v55  ;;  %v15081_v55 = vld [vmem:[#allocation11 + $0x8d8] ss:$28 sps:$4 sm:$0xff]  }
 0x613   :  { %10967 = vmatpush2.bf16.msra.mxu0 %v15017_v20  ;;  %v15077_v20 = vld [vmem:[#allocation11 + $0x10b0] ss:$28 sps:$4 sm:$0xff]  }
 0x614   :  { %11022 = vmatprep.subr.bf16.mxu0 %v15024_v53  ;;  %v15084_v53 = vld [vmem:[#allocation11 + $0x107c] ss:$28 sps:$4 sm:$0xff]  }
 0x615   :  { %12904 = vmatpush3.bf16.msra.mxu1 %v15025_v62  ;;  %v15085_v62 = vld [vmem:[#allocation11 + $0x718] ss:$28 sps:$4 sm:$0xff]  }
 0x616   :  { %10969 = vmatmul.mubr.bf16.vlgmr.msra.gmra.mxu0 %v15693_v36  ;;  %12905 = vmatprep.subr.bf16.mxu1 %v15026_v35  ;;  %v10675_v35 = vpop.f32.mrf.mxu1 }
 0x617   :  { %11023 = vmatpush1.bf16.msra.mxu0 %v15022_v27  ;;  %11054 = vmatprep.mubr.bf16.mxu0 %v15799_v4  ;;  %v15086_v27 = vld [vmem:[#allocation11 + $0x1160] ss:$28 sps:$4 sm:$0xff]  }
 0x618   :  { %11024 = vmatprep.subr.bf16.mxu0 %v15029_v61  ;;  %v15082_v61 = vld [vmem:[#allocation11 + $0x1078] ss:$28 sps:$4 sm:$0xff]  }
 0x619   :  { %12906 = vmatpush3.bf16.msra.mxu1 %v15030_v19  ;;  %v10755_v19 = vpop.f32.mrf.mxu1 }
 0x61a   :  { %12907 = vmatprep.subr.bf16.mxu1 %v15031_v7  ;;  %v15089_v7 = vld [vmem:[#allocation11 + $0x1044] ss:$28 sps:$4 sm:$0xff]  }
 0x61b   :  { %11025 = vmatpush1.bf16.msra.mxu0 %v15027_v40  ;;  %v15090_v40 = vld [vmem:[#allocation11 + $0xfa0] ss:$28 sps:$4 sm:$0xff]  }
 0x61c   :  { %11026 = vmatprep.subr.bf16.mxu0 %v15034_v12  ;;  %v15091_v12 = vld [vmem:[#allocation11 + $0x1128] ss:$28 sps:$4 sm:$0xff]  }
 0x61d   :  { %12908 = vmatpush3.bf16.msra.mxu1 %v15035_v52  ;;  %v15087_v52 = vld [vmem:[#allocation11 + $0x1040] ss:$28 sps:$4 sm:$0xff]  }
 0x61e   :  { %12909 = vmatprep.subr.bf16.mxu1 %v15036_v57  ;;  %v10757_v57 = vpop.f32.mrf.mxu1 }
 0x61f   :  { %11027 = vmatpush1.bf16.msra.mxu0 %v15032_v3  ;;  %v10712_v3 = vpop.f32.mrf.mxu0 }
 0x620   :  { %11028 = vmatprep.subr.bf16.mxu0 %v15039_v46  ;;  %v15094_v46 = vld [vmem:[#allocation11 + $0x100c] ss:$28 sps:$4 sm:$0xff]  }
 0x621   :  { %12910 = vmatpush3.bf16.msra.mxu1 %v15040_v30  ;;  %v15095_v30 = vld [vmem:[#allocation11 + $0xf68] ss:$28 sps:$4 sm:$0xff]  }
 0x622   :  { %12911 = vmatprep.subr.bf16.mxu1 %v15041_v5  ;;  %v15096_v5 = vld [vmem:[#allocation11 + $0x10f0] ss:$28 sps:$4 sm:$0xff]  }
 0x623   :  { %11029 = vmatpush1.bf16.msra.mxu0 %v15037_v32  ;;  %v7516_v32 = vrot.slane %v15814_v0, %v15467_v22  ;;  %v15102_v22 = vld [vmem:[#allocation11 + $0x6e0] ss:$28 sps:$4 sm:$0xff]  }
 0x624   :  { %11030 = vmatprep.subr.bf16.mxu0 %v15044_v50  ;;  %v15092_v50 = vld [vmem:[#allocation11 + $0x1008] ss:$28 sps:$4 sm:$0xff]  }
 0x625   :  { %12912 = vmatpush3.bf16.msra.mxu1 %v15045_v60  ;;  %v10759_v60 = vpop.f32.mrf.mxu1 }
 0x626   :  { %12941 = vmatprep.subr.bf16.mxu1 %v15046_v44  ;;  %v10714_v44 = vpop.f32.mrf.mxu0 }
 0x627   :  { %11031 = vmatpush1.bf16.msra.mxu0 %v15042_v56  ;;  %v15099_v56 = vld [vmem:[#allocation11 + $0xfd4] ss:$28 sps:$4 sm:$0xff]  }
 0x628   :  { %11098 = vmatmul.mubr.bf16.vlgmr.msra.gmra.mxu1 %v15606_v13  ;;  %11032 = vmatprep.subr.bf16.mxu0 %v15049_v59  ;;  %v15064_v13 = vld [vmem:[#allocation11 + $0x115c] ss:$28 sps:$4 sm:$0xff]   ;;  %v15100_v59 = vld [vmem:[#allocation11 + $0xf30] ss:$28 sps:$4 sm:$0xff]  }
 0x629   :  { %12942 = vmatpush3.bf16.msra.mxu1 %v15050_v33  ;;  %11179 = vmatprep.mubr.bf16.mxu1 %v15764_v6  ;;  %v15062_v6 = vld [vmem:[#allocation11 + $0x1158] ss:$28 sps:$4 sm:$0xff]  }
 0x62a   :  { %12943 = vmatprep.subr.bf16.mxu1 %v15051_v24  ;;  %v15101_v33 = vld [vmem:[#allocation11 + $0x10b8] ss:$28 sps:$4 sm:$0xff]   ;;  %v15097_v24 = vld [vmem:[#allocation11 + $0xfd0] ss:$28 sps:$4 sm:$0xff]  }
 0x62b   :  { %11033 = vmatpush1.bf16.msra.mxu0 %v15047_v43  ;;  %v10761_v43 = vpop.f32.mrf.mxu1 }
 0x62c   :  { %11034 = vmatprep.subr.bf16.mxu0 %v15054_v49  ;;  %v10716_v49 = vpop.f32.mrf.mxu0 }
 0x62d   :  { %12944 = vmatpush3.bf16.msra.mxu1 %v15055_v39 }
 0x62e   :  { %12945 = vmatprep.subr.bf16.mxu1 %v15056_v9 }
 0x62f   :  { %11035 = vmatpush1.bf16.msra.mxu0 %v15052_v2  ;;  %v15103_v2 = vld [vmem:[#allocation11 + $0xef8] ss:$28 sps:$4 sm:$0xff]  }
 0x630   :  { %11036 = vmatprep.subr.bf16.mxu0 %v15059_v63 }
 0x631   :  { %12946 = vmatpush3.bf16.msra.mxu1 %v15060_v29  ;;  %v15105_v29 = vld [vmem:[#allocation11 + $0x1080] ss:$28 sps:$4 sm:$0xff]  }
 0x632   :  { %12947 = vmatprep.subr.bf16.mxu1 %v15061_v11  ;;  %v15104_v11 = vld [vmem:[#allocation11 + $0x520] ss:$28 sps:$4 sm:$0xff]  }
 0x633   :  { %11037 = vmatpush1.bf16.msra.mxu0 %v15057_v48  ;;  %v10718_v48 = vpop.f32.mrf.mxu0 }
 0x634   :  { %11038 = vmatprep.subr.bf16.mxu0 %v15064_v13  ;;  %v15106_v13 = vld [vmem:[#allocation11 + $0x6a8] ss:$28 sps:$4 sm:$0xff]  }
 0x635   :  { %12948 = vmatpush3.bf16.msra.mxu1 %v15065_v10 }
 0x636   :  { %12949 = vmatprep.subr.bf16.mxu1 %v15066_v26 }
 0x637   :  { %11039 = vmatpush2.bf16.msra.mxu0 %v15062_v6 }
 0x638   :  { %11040 = vmatprep.subr.bf16.mxu0 %v15069_v34  ;;  %v15107_v34 = vld [vmem:[#allocation11 + $0xec0] ss:$28 sps:$4 sm:$0xff]  }
 0x639   :  { %12950 = vmatpush3.bf16.msra.mxu1 %v15070_v18 }
 0x63a   :  { %12951 = vmatprep.subr.bf16.mxu1 %v15071_v8  ;;  %v15109_v8 = vld [vmem:[#allocation11 + $0x1048] ss:$28 sps:$4 sm:$0xff]  }
 0x63b   :  { %11041 = vmatpush2.bf16.msra.mxu0 %v15067_v21 }
 0x63c   :  { %11042 = vmatprep.subr.bf16.mxu0 %v15074_v15 }
 0x63d   :  { %12952 = vmatpush3.bf16.msra.mxu1 %v15075_v25 }
 0x63e   :  { %12953 = vmatprep.subr.bf16.mxu1 %v15076_v54 }
 0x63f   :  { %11043 = vmatpush2.bf16.msra.mxu0 %v15072_v42  ;;  %v15110_v42 = vld [vmem:[#allocation11 + $0x670] ss:$28 sps:$4 sm:$0xff]  }
 0x640   :  { %11044 = vmatprep.subr.bf16.mxu0 %v15079_v31 }
 0x641   :  { %12954 = vmatpush3.bf16.msra.mxu1 %v15080_v41 }
 0x642   :  { %12955 = vmatprep.subr.bf16.mxu1 %v15081_v55  ;;  %v15111_v55 = vld [vmem:[#allocation11 + $0xe88] ss:$28 sps:$4 sm:$0xff]  }
 0x643   :  { %11045 = vmatpush2.bf16.msra.mxu0 %v15077_v20 }
 0x644   :  { %11046 = vmatprep.subr.bf16.mxu0 %v15084_v53 }
 0x645   :  { %12956 = vmatpush3.bf16.msra.mxu1 %v15085_v62  ;;  %v15113_v62 = vld [vmem:[#allocation11 + $0x1010] ss:$28 sps:$4 sm:$0xff]  }
 0x646   :  { %12985 = vmatprep.subr.bf16.mxu1 %v15086_v27 }
 0x647   :  { %11047 = vmatpush2.bf16.msra.mxu0 %v15082_v61 }
 0x648   :  { %11180 = vmatmul.mubr.bf16.vlgmr.msra.gmra.mxu1 %v15693_v36  ;;  %11048 = vmatprep.subr.bf16.mxu0 %v15089_v7  ;;  %v7520_v36 = vrot.slane %v15814_v0, %v15470_v23  ;;  %v10841_v63 = vpop.f32.mrf.mxu1  ;;  %v10674_v23 = vadd.f32 %v10673_v47, %v7516_v32 }
 0x649   :  { %12986 = vmatpush3.bf16.msra.mxu1 %v15090_v40  ;;  %11261 = vmatprep.mubr.bf16.mxu1 %v15799_v4  ;;  %v10670_v4 = vadd.f32 %v15830_v58, %v7516_v32  ;;  %v15114_v40 = vld [vmem:[#allocation11 + $0x638] ss:$28 sps:$4 sm:$0xff]  }
 0x64a   :  { %12987 = vmatprep.subr.bf16.mxu1 %v15091_v12  ;;  %v10672_v39 = vadd.f32 %v10671_v37, %v7520_v36  ;;  %v10676_v10 = vadd.f32 %v10675_v35, %v7520_v36  ;;  %v10717_v26 = vadd.f32 %v10716_v49, %v10674_v23  ;;  %v10843_v18 = vpop.f32.mrf.mxu1  ;;  %v15108_v37 = vld [vmem:[#allocation11 + $0x4e8] ss:$28 sps:$4 sm:$0xff]   ;;  %v15120_v36 = vld [vmem:[#allocation11 + $0x440] ss:$28 sps:$4 sm:$0xff]   ;;  %v15124_v49 = vld [vmem:[#allocation11 + $0x3d0] ss:$28 sps:$4 sm:$0xff]  }
 0x64b   :  { %11049 = vmatpush2.bf16.msra.mxu0 %v15087_v52  ;;  %v10713_v9 = vadd.f32 %v10712_v3, %v10670_v4  ;;  %v15115_v3 = vld [vmem:[#allocation11 + $0xe50] ss:$28 sps:$4 sm:$0xff]  }
 0x64c   :  { %11050 = vmatprep.subr.bf16.mxu0 %v15094_v46  ;;  %v10715_v0 = vadd.f32 %v10714_v44, %v10672_v39  ;;  %v10719_v21 = vadd.f32 %v10718_v48, %v10676_v10  ;;  %v10760_v47 = vadd.f32 %v10759_v60, %v10717_v26  ;;  %v10845_v20 = vpop.f32.mrf.mxu1  ;;  %v15118_v60 = vld [vmem:[#allocation11 + $0x600] ss:$28 sps:$4 sm:$0xff]   ;;  %v15123_v4 = vld [vmem:[#allocation11 + $0x590] ss:$28 sps:$4 sm:$0xff]   ;;  %v15125_v39 = vld [vmem:[#allocation11 + $0x558] ss:$28 sps:$4 sm:$0xff]  }
 0x64d   :  { %12988 = vmatpush3.bf16.msra.mxu1 %v15095_v30  ;;  %v10756_v6 = vadd.f32 %v10755_v19, %v10713_v9  ;;  %v15117_v30 = vld [vmem:[#allocation11 + $0xfd8] ss:$28 sps:$4 sm:$0xff]   ;;  %v15129_v48 = vld [vmem:[#allocation11 + $0xda8] ss:$28 sps:$4 sm:$0xff]   ;;  %v15131_v10 = vld [vmem:[#allocation11 + $0xd70] ss:$28 sps:$4 sm:$0xff]  }
 0x64e   :  { %12989 = vmatprep.subr.bf16.mxu1 %v15096_v5  ;;  %v10758_v25 = vadd.f32 %v10757_v57, %v10715_v0  ;;  %v10762_v19 = vadd.f32 %v10761_v43, %v10719_v21  ;;  %v10847_v46 = vpop.f32.mrf.mxu1  ;;  %v15127_v0 = vld [vmem:[#allocation11 + $0xde0] ss:$28 sps:$4 sm:$0xff]   ;;  %v15134_v21 = vld [vmem:[#allocation11 + $0xb78] ss:$28 sps:$4 sm:$0xff]  }
 0x64f   :  { %11051 = vmatpush2.bf16.msra.mxu0 %v15092_v50  ;;  %v15116_v50 = vld [vmem:[#allocation11 + $0x478] ss:$28 sps:$4 sm:$0xff]  }
 0x650   :  { %11052 = vmatprep.subr.bf16.mxu0 %v15099_v56  ;;  %v15119_v56 = vld [vmem:[#allocation11 + $0xe18] ss:$28 sps:$4 sm:$0xff]  }
 0x651   :  { %12990 = vmatpush3.bf16.msra.mxu1 %v15100_v59  ;;  %v15121_v59 = vld [vmem:[#allocation11 + $0x5c8] ss:$28 sps:$4 sm:$0xff]  }
 0x652   :  { %12991 = vmatprep.subr.bf16.mxu1 %v15101_v33  ;;  %v15122_v33 = vld [vmem:[#allocation11 + $0x408] ss:$28 sps:$4 sm:$0xff]  }
 0x653   :  { %11053 = vmatpush2.bf16.msra.mxu0 %v15097_v24 }
 0x654   :  { %12919 = vmatprep.subr.bf16.mxu0 %v15102_v22 }
 0x655   :  { %12992 = vmatpush3.bf16.msra.mxu1 %v15103_v2 }
 0x656   :  { %v10798_v58 = vpop.f32.mrf.mxu0  ;;  %11055 = vmatmul.mubr.bf16.vlgmr.msra.gmra.mxu0 %v15801_v28  ;;  %12993 = vmatprep.subr.bf16.mxu1 %v15105_v29  ;;  %v15126_v29 = vld [vmem:[#allocation11 + $0x398] ss:$28 sps:$4 sm:$0xff]  }
 0x657   :  { %v10799_v15 = vadd.f32 %v10798_v58, %v10756_v6  ;;  %12920 = vmatpush3.bf16.msra.mxu0 %v15104_v11  ;;  %11138 = vmatprep.mubr.bf16.mxu0 %v15761_v1  ;;  %v15112_v1 = vld [vmem:[#allocation11 + $0x4b0] ss:$28 sps:$4 sm:$0xff]   ;;  %v15128_v11 = vld [vmem:[#allocation11 + $0xc20] ss:$28 sps:$4 sm:$0xff]  }
 0x658   :  { %v10800_v54 = vpop.f32.mrf.mxu0  ;;  %12921 = vmatprep.subr.bf16.mxu0 %v15106_v13  ;;  %v15130_v13 = vld [vmem:[#allocation11 + $0xbe8] ss:$28 sps:$4 sm:$0xff]   ;;  %v15132_v6 = vld [vmem:[#allocation11 + $0xbb0] ss:$28 sps:$4 sm:$0xff]  }
 0x659   :  { %v10842_v31 = vadd.f32 %v10841_v63, %v10799_v15  ;;  %v10801_v41 = vadd.f32 %v10800_v54, %v10758_v25  ;;  %12994 = vmatpush3.bf16.msra.mxu1 %v15107_v34  ;;  %v15138_v54 = vld [vmem:[#allocation11 + $0xb08] ss:$28 sps:$4 sm:$0xff]  }
 0x65a   :  { %v10802_v53 = vpop.f32.mrf.mxu0  ;;  %12995 = vmatprep.subr.bf16.mxu1 %v15109_v8 }
 0x65b   :  { %v12869_v35 = vmul.f32 -1.442695, %v10842_v31  ;;  %v10844_v27 = vadd.f32 %v10843_v18, %v10801_v41  ;;  %v10803_v61 = vadd.f32 %v10802_v53, %v10760_v47  ;;  %12922 = vmatpush3.bf16.msra.mxu0 %v15108_v37  ;;  %v15133_v18 = vld [vmem:[#allocation11 + $0xd38] ss:$28 sps:$4 sm:$0xff]   ;;  %v15137_v37 = vld [vmem:[#allocation11 + $0xcc8] ss:$28 sps:$4 sm:$0xff]  }
 0x65c   :  { %v10804_v7 = vpop.f32.mrf.mxu0  ;;  %12923 = vmatprep.subr.bf16.mxu0 %v15110_v42  ;;  %v15139_v42 = vld [vmem:[#allocation11 + $0xc90] ss:$28 sps:$4 sm:$0xff]   ;;  %v15141_v41 = vld [vmem:[#allocation11 + $0xc58] ss:$28 sps:$4 sm:$0xff]  }
 0x65d   :  { %15159 = vpow2.f32 %v12869_v35  ;;  %v12870_v12 = vmul.f32 -1.442695, %v10844_v27  ;;  %v10846_v52 = vadd.f32 %v10845_v20, %v10803_v61  ;;  %v10805_v57 = vadd.f32 %v10804_v7, %v10762_v19  ;;  %12996 = vmatpush3.bf16.msra.mxu1 %v15111_v55  ;;  %v15140_v31 = vld [vmem:[#allocation11 + $0xad0] ss:$28 sps:$4 sm:$0xff]   ;;  %v15142_v47 = vld [vmem:[#allocation11 + $0xa98] ss:$28 sps:$4 sm:$0xff]  }
 0x65e   :  { %12997 = vmatprep.subr.bf16.mxu1 %v15113_v62  ;;  %v15845_v61 = vld [vmem:[#allocation13] sm:$0xff] }
 0x65f   :  { %15161 = vpow2.f32 %v12870_v12  ;;  %v12876_v5 = vmul.f32 -1.442695, %v10846_v52  ;;  %v10848_v32 = vadd.f32 %v10847_v46, %v10805_v57  ;;  %12924 = vmatpush3.bf16.msra.mxu0 %v15112_v1  ;;  %v7524_v19 = vrot.slane %v15845_v61, %v15527_v17 }
 0x660   :  { %12925 = vmatprep.subr.bf16.mxu0 %v15114_v40  ;;  %v7528_v40 = vrot.slane %v15845_v61, %v15501_v14 }
 0x661   :  { %15163 = vpow2.f32 %v12876_v5  ;;  %v12877_v44 = vmul.f32 -1.442695, %v10848_v32  ;;  %12998 = vmatpush3.bf16.msra.mxu1 %v15115_v3 }
 0x662   :  { %12999 = vmatprep.subr.bf16.mxu1 %v15117_v30 }
 0x663   :  { %15165 = vpow2.f32 %v12877_v44  ;;  %12926 = vmatpush3.bf16.msra.mxu0 %v15116_v50 }
 0x664   :  { %12927 = vmatprep.subr.bf16.mxu0 %v15118_v60 }
 0x665   :  { %13000 = vmatpush3.bf16.msra.mxu1 %v15119_v56 }
 0x667   :  { %12928 = vmatpush3.bf16.msra.mxu0 %v15120_v36 }
 0x668   :  { %11262 = vmatmul.mubr.bf16.vlgmr.msra.gmra.mxu1 %v15801_v28  ;;  %12929 = vmatprep.subr.bf16.mxu0 %v15121_v59 }
 0x66a   :  { %v15160_v24 = vpop.eup %15159 }
 0x66b   :  { %v11314_v43 = vadd.f32 1.0, %v15160_v24  ;;  %12930 = vmatpush3.bf16.msra.mxu0 %v15122_v33 }
 0x66c   :  { %v15162_v22 = vpop.eup %15161  ;;  %12931 = vmatprep.subr.bf16.mxu0 %v15123_v4 }
 0x66d   :  { %v11315_v9 = vadd.f32 1.0, %v15162_v22  ;;  %15167 = vrcp.f32 %v11314_v43 }
 0x66e   :  { %v15164_v2 = vpop.eup %15163 }
 0x66f   :  { %15169 = vrcp.f32 %v11315_v9  ;;  %v11321_v63 = vadd.f32 1.0, %v15164_v2  ;;  %12932 = vmatpush3.bf16.msra.mxu0 %v15124_v49 }
 0x670   :  { %v15166_v23 = vpop.eup %15165  ;;  %12933 = vmatprep.subr.bf16.mxu0 %v15125_v39 }
 0x671   :  { %v11322_v28 = vadd.f32 1.0, %v15166_v23  ;;  %15171 = vrcp.f32 %v11321_v63 }
 0x673   :  { %15173 = vrcp.f32 %v11322_v28  ;;  %12934 = vmatpush3.bf16.msra.mxu0 %v15126_v29 }
 0x674   :  { %12963 = vmatprep.subr.bf16.mxu0 %v15127_v0 }
 0x676   :  { %11139 = vmatmul.mubr.bf16.vlgmr.msra.gmra.mxu0 %v15643_v38  ;;  %v15135_v38 = vld [vmem:[#allocation11 + $0xd00] ss:$28 sps:$4 sm:$0xff]  }
 0x677   :  { %12964 = vmatpush3.bf16.msra.mxu0 %v15128_v11  ;;  %11220 = vmatprep.mubr.bf16.mxu0 %v15788_v45  ;;  %v15136_v45 = vld [vmem:[#allocation11 + $0xb40] ss:$28 sps:$4 sm:$0xff]  }
 0x678   :  { %12965 = vmatprep.subr.bf16.mxu0 %v15129_v48 }
 0x67a   :  { %v15168_v26 = vpop.eup %15167 }
 0x67b   :  { %12966 = vmatpush3.bf16.msra.mxu0 %v15130_v13 }
 0x67c   :  { %v15170_v34 = vpop.eup %15169  ;;  %12967 = vmatprep.subr.bf16.mxu0 %v15131_v10 }
 0x67d   :  { %v12890_v58 = vpack.c.bf16 %v15170_v34, %v15168_v26 }
 0x67e   :  { %v15172_v8 = vpop.eup %15171 }
 0x67f   :  { %11399 = vst [vmem:[#allocation14 + $0x8] sm:$0xff] %v12890_v58  ;;  %12968 = vmatpush3.bf16.msra.mxu0 %v15132_v6 }
 0x680   :  { %v15174_v15 = vpop.eup %15173  ;;  %12969 = vmatprep.subr.bf16.mxu0 %v15133_v18 }
 0x681   :  { %v12894_v25 = vpack.c.bf16 %v15174_v15, %v15172_v8 }
 0x683   :  { %11403 = vst [vmem:[#allocation14 + $0x24] sm:$0xff] %v12894_v25  ;;  %12970 = vmatpush3.bf16.msra.mxu0 %v15134_v21 }
 0x684   :  { %12971 = vmatprep.subr.bf16.mxu0 %v15135_v38 }
 0x687   :  { %12972 = vmatpush3.bf16.msra.mxu0 %v15136_v45 }
 0x688   :  { %12973 = vmatprep.subr.bf16.mxu0 %v15137_v37  ;;  %v10927_v53 = vpop.f32.mrf.mxu1 }
 0x68a   :  { %v10929_v35 = vpop.f32.mrf.mxu1 }
 0x68b   :  { %12974 = vmatpush3.bf16.msra.mxu0 %v15138_v54 }
 0x68c   :  { %12975 = vmatprep.subr.bf16.mxu0 %v15139_v42  ;;  %v10931_v1 = vpop.f32.mrf.mxu1 }
 0x68e   :  { %v10933_v52 = vpop.f32.mrf.mxu1 }
 0x68f   :  { %12976 = vmatpush3.bf16.msra.mxu0 %v15140_v31 }
 0x690   :  { %12977 = vmatprep.subr.bf16.mxu0 %v15141_v41 }
 0x693   :  { %12978 = vmatpush3.bf16.msra.mxu0 %v15142_v47 }
 0x696   :  { %11221 = vmatmul.mubr.bf16.vlgmr.msra.gmra.mxu0 %v15775_v51  ;;  %v10884_v55 = vpop.f32.mrf.mxu0 }
 0x697   :  { %v10885_v12 = vadd.f32 %v10884_v55, %v7524_v19 }
 0x698   :  { %v10886_v20 = vpop.f32.mrf.mxu0 }
 0x699   :  { %v10887_v51 = vadd.f32 %v10886_v20, %v7528_v40  ;;  %v10928_v30 = vadd.f32 %v10927_v53, %v10885_v12 }
 0x69a   :  { %v10888_v62 = vpop.f32.mrf.mxu0 }
 0x69b   :  { %v10889_v46 = vadd.f32 %v10888_v62, %v7524_v19  ;;  %v10930_v60 = vadd.f32 %v10929_v35, %v10887_v51 }
 0x69c   :  { %v10890_v27 = vpop.f32.mrf.mxu0 }
 0x69d   :  { %v10891_v32 = vadd.f32 %v10890_v27, %v7528_v40  ;;  %v10932_v36 = vadd.f32 %v10931_v1, %v10889_v46  ;;  %v7532_v40 = vrot.slane %v15845_v61, %v15524_v16 }
 0x69f   :  { %v10934_v33 = vadd.f32 %v10933_v52, %v10891_v32 }
 0x6c8   :  { %v11013_v3 = vpop.f32.mrf.mxu1 }
 0x6ca   :  { %v11015_v44 = vpop.f32.mrf.mxu1 }
 0x6cc   :  { %v11017_v24 = vpop.f32.mrf.mxu1 }
 0x6ce   :  { %v11019_v29 = vpop.f32.mrf.mxu1 }
 0x6d6   :  { %v10970_v7 = vpop.f32.mrf.mxu0 }
 0x6d7   :  { %v10971_v50 = vadd.f32 %v10970_v7, %v10928_v30 }
 0x6d8   :  { %v10972_v57 = vpop.f32.mrf.mxu0 }
 0x6d9   :  { %v10973_v56 = vadd.f32 %v10972_v57, %v10930_v60  ;;  %v11014_v4 = vadd.f32 %v11013_v3, %v10971_v50 }
 0x6da   :  { %v10974_v5 = vpop.f32.mrf.mxu0 }
 0x6db   :  { %v10975_v59 = vadd.f32 %v10974_v5, %v10932_v36  ;;  %v11016_v22 = vadd.f32 %v11015_v44, %v10973_v56 }
 0x6dc   :  { %v10976_v17 = vpop.f32.mrf.mxu0 }
 0x6dd   :  { %v10977_v43 = vadd.f32 %v10976_v17, %v10934_v33  ;;  %v11018_v63 = vadd.f32 %v11017_v24, %v10975_v59 }
 0x6df   :  { %v11020_v11 = vadd.f32 %v11019_v29, %v10977_v43 }
 0x6e8   :  { %v12913_v25 = vpop.f32.mrf.mxu1 }
 0x6ea   :  { %v12914_v45 = vpop.f32.mrf.mxu1 }
 0x6eb   :  { %v12915_v12 = vadd.f32 %v12914_v45, %v12913_v25 }
 0x6ec   :  { %v12916_v31 = vpop.f32.mrf.mxu1 }
 0x6ed   :  { %v11100_v3 = vadd.f32 %v12915_v12, %v7532_v40 }
 0x6ee   :  { %v12917_v20 = vpop.f32.mrf.mxu1 }
 0x6ef   :  { %v12918_v46 = vadd.f32 %v12917_v20, %v12916_v31 }
 0x6f1   :  { %v11103_v60 = vadd.f32 %v12918_v46, %v7532_v40 }
 0x708   :  { %v12957_v53 = vpop.f32.mrf.mxu1 }
 0x70a   :  { %v12958_v62 = vpop.f32.mrf.mxu1 }
 0x70b   :  { %v12959_v44 = vadd.f32 %v12958_v62, %v12957_v53 }
 0x70c   :  { %v12960_v27 = vpop.f32.mrf.mxu1 }
 0x70e   :  { %v12961_v1 = vpop.f32.mrf.mxu1 }
 0x70f   :  { %v12962_v24 = vadd.f32 %v12961_v1, %v12960_v27 }
 0x716   :  { %v11056_v14 = vpop.f32.mrf.mxu0 }
 0x717   :  { %v11057_v49 = vadd.f32 %v11056_v14, %v11014_v4 }
 0x718   :  { %v11058_v39 = vpop.f32.mrf.mxu0 }
 0x719   :  { %v12871_v9 = vmul.f32 -1.442695, %v11057_v49  ;;  %v11059_v2 = vadd.f32 %v11058_v39, %v11016_v22 }
 0x71a   :  { %v11060_v23 = vpop.f32.mrf.mxu0 }
 0x71b   :  { %15175 = vpow2.f32 %v12871_v9  ;;  %v12872_v0 = vmul.f32 -1.442695, %v11059_v2  ;;  %v11061_v28 = vadd.f32 %v11060_v23, %v11018_v63 }
 0x71c   :  { %v11062_v48 = vpop.f32.mrf.mxu0 }
 0x71d   :  { %15177 = vpow2.f32 %v12872_v0  ;;  %v12878_v13 = vmul.f32 -1.442695, %v11061_v28  ;;  %v11063_v10 = vadd.f32 %v11062_v48, %v11020_v11 }
 0x71f   :  { %15179 = vpow2.f32 %v12878_v13  ;;  %v12879_v26 = vmul.f32 -1.442695, %v11063_v10 }
 0x721   :  { %15181 = vpow2.f32 %v12879_v26 }
 0x728   :  { %v15176_v6 = vpop.eup %15175  ;;  %v13001_v52 = vpop.f32.mrf.mxu1 }
 0x729   :  { %v11316_v34 = vadd.f32 1.0, %v15176_v6 }
 0x72a   :  { %v15178_v18 = vpop.eup %15177  ;;  %v13002_v30 = vpop.f32.mrf.mxu1 }
 0x72b   :  { %v11317_v58 = vadd.f32 1.0, %v15178_v18  ;;  %15183 = vrcp.f32 %v11316_v34  ;;  %v13003_v16 = vadd.f32 %v13002_v30, %v13001_v52 }
 0x72c   :  { %v15180_v8 = vpop.eup %15179  ;;  %v13004_v56 = vpop.f32.mrf.mxu1 }
 0x72d   :  { %15185 = vrcp.f32 %v11317_v58  ;;  %v11323_v21 = vadd.f32 1.0, %v15180_v8 }
 0x72e   :  { %v15182_v15 = vpop.eup %15181  ;;  %v13005_v14 = vpop.f32.mrf.mxu1 }
 0x72f   :  { %v11324_v38 = vadd.f32 1.0, %v15182_v15  ;;  %15187 = vrcp.f32 %v11323_v21  ;;  %v13006_v9 = vadd.f32 %v13005_v14, %v13004_v56 }
 0x731   :  { %15189 = vrcp.f32 %v11324_v38 }
 0x736   :  { %v12935_v35 = vpop.f32.mrf.mxu0 }
 0x738   :  { %v15184_v37 = vpop.eup %15183  ;;  %v12936_v19 = vpop.f32.mrf.mxu0 }
 0x739   :  { %v12937_v57 = vadd.f32 %v12936_v19, %v12935_v35 }
 0x73a   :  { %v15186_v54 = vpop.eup %15185  ;;  %v12938_v7 = vpop.f32.mrf.mxu0 }
 0x73b   :  { %v12891_v42 = vpack.c.bf16 %v15186_v54, %v15184_v37  ;;  %v11141_v5 = vadd.f32 %v12937_v57, %v11100_v3 }
 0x73c   :  { %v15188_v41 = vpop.eup %15187  ;;  %v12939_v51 = vpop.f32.mrf.mxu0 }
 0x73d   :  { %11400 = vst [vmem:[#allocation14 + $0x10] sm:$0xff] %v12891_v42  ;;  %v12940_v32 = vadd.f32 %v12939_v51, %v12938_v7  ;;  %v11182_v59 = vadd.f32 %v12959_v44, %v11141_v5 }
 0x73e   :  { %v15190_v47 = vpop.eup %15189 }
 0x73f   :  { %v12895_v55 = vpack.c.bf16 %v15190_v47, %v15188_v41  ;;  %v11144_v17 = vadd.f32 %v12940_v32, %v11103_v60 }
 0x741   :  { %11404 = vst [vmem:[#allocation14 + $0x2c] sm:$0xff] %v12895_v55  ;;  %v11185_v22 = vadd.f32 %v12962_v24, %v11144_v17 }
 0x756   :  { %v12979_v50 = vpop.f32.mrf.mxu0 }
 0x758   :  { %v12980_v36 = vpop.f32.mrf.mxu0 }
 0x759   :  { %v12981_v33 = vadd.f32 %v12980_v36, %v12979_v50 }
 0x75a   :  { %v12982_v4 = vpop.f32.mrf.mxu0 }
 0x75b   :  { %v11223_v61 = vadd.f32 %v12981_v33, %v11182_v59 }
 0x75c   :  { %v12983_v43 = vpop.f32.mrf.mxu0 }
 0x75d   :  { %v11264_v49 = vadd.f32 %v13003_v16, %v11223_v61  ;;  %v12984_v39 = vadd.f32 %v12983_v43, %v12982_v4 }
 0x75f   :  { %v12873_v2 = vmul.f32 -1.442695, %v11264_v49  ;;  %v11226_v63 = vadd.f32 %v12984_v39, %v11185_v22 }
 0x761   :  { %15191 = vpow2.f32 %v12873_v2  ;;  %v11267_v29 = vadd.f32 %v13006_v9, %v11226_v63 }
 0x763   :  { %v12880_v23 = vmul.f32 -1.442695, %v11267_v29 }
 0x765   :  { %15193 = vpow2.f32 %v12880_v23 }
 0x76e   :  { %v15192_v0 = vpop.eup %15191 }
 0x76f   :  { %v11318_v28 = vadd.f32 1.0, %v15192_v0 }
 0x771   :  { %15195 = vrcp.f32 %v11318_v28 }
 0x772   :  { %v15194_v11 = vpop.eup %15193 }
 0x773   :  { %v11325_v48 = vadd.f32 1.0, %v15194_v11 }
 0x775   :  { %15197 = vrcp.f32 %v11325_v48 }
 0x77e   :  { %v15196_v13 = vpop.eup %15195 }
 0x77f   :  { %v12892_v10 = vpack.c.bf16 %v15196_v13, %v15196_v13 }
 0x781   :  { %11401 = vst [vmem:[#allocation14 + $0x18] sm:$0xf] %v12892_v10 }
 0x782   :  { %v15198_v26 = vpop.eup %15197 }
 0x783   :  { %v12896_v6 = vpack.c.bf16 %v15198_v26, %v15198_v26 }
 0x785   :  { %11405 = vst [vmem:[#allocation14 + $0x34] sm:$0xf] %v12896_v6 }
 0x786   :  { %15354 = shalt.err (!%p15351_p11)
}
 0x787   :  { %11417 = dma.vmem_to_hbm [thread:$0]  %s11412_s6, 896, %s15866_s7, [#allocation4], %s15378_s1, %s15378_s1, %s15379_s16  }
 0x788   :  { %15371 = dma.done.wait [#allocation4], 896  }
 0x789   :  { %15372 = vsyncadd [#allocation4], 4294966400 }
 0x78a   :  { %11421 = vsyncpa [#allocation3], 1 }
 0x78b   :  { %11422 = vsyncpa [#allocation6], 1 }
 0x78c   :  { %11423 = vsyncpa [#allocation9], 1 }
 0x78d   :  { %11424 = vsyncpa [#allocation12], 1 }
 0x78e   :  { %11425 = vsyncpa [#allocation4], 1 }

</bundles_post_ra>
